<compile_context>
chip_gen: v5e
topology: v5e:2x2
jax: 0.10.0
libtpu: 0.0.40
codegen_flags: <defaults>
</compile_context>

<pallas_src>
import functools

import numpy as np
import jax
import jax.numpy as jnp
from jax import lax
from jax.experimental import pallas as pl
from jax.experimental.pallas import tpu as pltpu

BN_EPS = 1e-5
PY_KERNELS = [3, 5, 7, 9]
PY_GROUPS = [1, 4, 8, 16]
MAX_PAD = PY_KERNELS[-1] // 2   # 4: spatial padding of the merged 9x9 footprint
XOFF = 8                        # left x over-pad -> interior starts sublane-aligned


# ----------------------------------------------------------------------------
# Tiled matmul kernel (stage 1: adaptive average pooling)
# ----------------------------------------------------------------------------
def _tiled_matmul_kernel(x_ref, w_ref, o_ref):
    o_ref[...] = jnp.dot(x_ref[...], w_ref[...],
                         preferred_element_type=jnp.float32).astype(o_ref.dtype)


def tiled_matmul(x, w, *, max_tile_m=512, tile_bytes=4 << 20):
    """x:(M,K) @ w:(K,N) -> (M,N) f32.  M-tiled; weight stays VMEM-resident;
    tile capped so one input block stays ~<= 4 MiB (safe on v7x's 64 MiB VMEM,
    near the mem-bound roofline knee on v5e/v6e).  Awkward M is padded to keep
    pipelining instead of falling back to one giant block."""
    M, K = x.shape
    K2, N = w.shape
    assert K == K2
    cap = min(max_tile_m, max(8, (tile_bytes // (K * 4)) // 8 * 8))
    tm = None
    for cand in (512, 256, 128, 64, 32, 16, 8):
        if cand <= cap and cand <= M and M % cand == 0:
            tm = cand
            break
    x_in, Mp = x, M
    if tm is None:                       # non-divisible M: pad rows (cheap, keeps pipeline)
        tm = min(cap, 128)
        Mp = tm * pl.cdiv(M, tm)
        x_in = jnp.pad(x, ((0, Mp - M), (0, 0)))
    need = (4 * tm * K + 2 * K * N + 4 * tm * N) * 4 + (4 << 20)
    vmem_limit = int(min(max(need, 32 << 20), 64 << 20))
    out = pl.pallas_call(
        _tiled_matmul_kernel,
        out_shape=jax.ShapeDtypeStruct((Mp, N), jnp.float32),
        grid=(Mp // tm,),
        in_specs=[pl.BlockSpec((tm, K), lambda i: (i, 0)),
                  pl.BlockSpec((K, N), lambda i: (0, 0))],
        out_specs=pl.BlockSpec((tm, N), lambda i: (i, 0)),
        compiler_params=pltpu.CompilerParams(
            dimension_semantics=("parallel",),
            vmem_limit_bytes=vmem_limit),
    )(x_in, w)
    return out if Mp == M else out[:M]


# ----------------------------------------------------------------------------
# Fused middle+upsample kernel:
#   1x1+BN+ReLU -> merged PyConv4 -> BN+ReLU -> 1x1+BN+ReLU -> bilinear up
# ----------------------------------------------------------------------------
def _middle_kernel(pooled_ref, w1_ref, s1_ref, b1_ref, wt_ref,
                   s2_ref, b2_ref, w3_ref, s3_ref, b3_ref, up_ref,
                   out_ref, pad_ref, *, bins, r, side_x):
    P = bins * bins
    K9 = PY_KERNELS[-1]
    side_y = bins + 2 * MAX_PAD

    # ---- zero ONLY the halo of the padded scratch (interior overwritten next)
    pad_ref[0:MAX_PAD] = jnp.zeros((MAX_PAD, side_x, r), jnp.float32)
    pad_ref[MAX_PAD + bins:side_y] = jnp.zeros((side_y - MAX_PAD - bins, side_x, r),
                                               jnp.float32)
    pad_ref[MAX_PAD:MAX_PAD + bins, 0:XOFF, :] = jnp.zeros((bins, XOFF, r),
                                                           jnp.float32)
    pad_ref[MAX_PAD:MAX_PAD + bins, XOFF + bins:side_x, :] = jnp.zeros(
        (bins, side_x - XOFF - bins, r), jnp.float32)

    # ---- 1x1 conv + BN + ReLU: transposed-LHS contraction (no XLU transpose),
    # written straight into the padded interior --------------------------------
    z = pooled_ref[0]                                            # (Cin, P)
    y1 = lax.dot_general(z, w1_ref[...], (((0,), (0,)), ((), ())),
                         preferred_element_type=jnp.float32)     # (P, R)
    y1 = jnp.maximum(y1 * s1_ref[...] + b1_ref[...], 0.0)
    pad_ref[MAX_PAD:MAX_PAD + bins, XOFF:XOFF + bins, :] = y1.reshape(bins, bins, r)

    # ---- merged PyConv4: 81 lane-dense (P,R)@(R,R) tap matmuls ----------------
    # One aligned band load per dy; dx offsets realised with sublane rolls of
    # the flattened band (XLU slot) relying on the zero halo -- no per-tap VMEM
    # window copies.  Wrap safety: |shift| <= MAX_PAD and side_x >= XOFF + bins
    # + MAX_PAD, so wrapped elements never land in the extracted window.
    acc0 = jnp.zeros((P, r), jnp.float32)
    acc1 = jnp.zeros((P, r), jnp.float32)
    Lb = bins * side_x
    t = 0
    for dy in range(K9):
        band = pad_ref[dy:dy + bins].reshape(Lb, r)              # (bins*side_x, R)
        for dx in range(K9):
            shift = (MAX_PAD - dx) % Lb
            rolled = band if shift == 0 else pltpu.roll(band, shift=shift, axis=0)
            win = rolled.reshape(bins, side_x, r)[:, XOFF:XOFF + bins, :]
            win = win.reshape(P, r)
            contrib = jnp.dot(win, wt_ref[t], preferred_element_type=jnp.float32)
            if t % 2 == 0:                                       # break serial acc chain
                acc0 = acc0 + contrib
            else:
                acc1 = acc1 + contrib
            t += 1

    # ---- BN + ReLU, final 1x1 conv + BN + ReLU --------------------------------
    y2 = jnp.maximum((acc0 + acc1) * s2_ref[...] + b2_ref[...], 0.0)     # (P, R)
    y3 = jnp.dot(y2, w3_ref[...], preferred_element_type=jnp.float32)
    y3 = jnp.maximum(y3 * s3_ref[...] + b3_ref[...], 0.0)                # (P, R)

    # ---- fused bilinear upsample (align_corners=True): lane-dense (R, H*W) ----
    up = lax.dot_general(y3, up_ref[...], (((0,), (0,)), ((), ())),
                         preferred_element_type=jnp.float32)             # (R, H*W)
    out_ref[0] = up.astype(out_ref.dtype)


def fused_middle_upsample(pooled, prep, *, bins, hw):
    """pooled: (N, Cin, bins*bins) channels-major -> (N, R, H*W)."""
    n, cin, P = pooled.shape
    r = prep["w3"].shape[0]
    side_y = bins + 2 * MAX_PAD
    side_x = ((XOFF + bins + MAX_PAD + 7) // 8) * 8
    # roll/zero-halo safety (see correctness note in the kernel)
    assert XOFF % 8 == 0 and XOFF >= MAX_PAD
    assert side_x >= XOFF + bins + MAX_PAD

    w_args = (prep["w1"], prep["s1"], prep["b1"], prep["w_taps"],
              prep["s2"], prep["b2"], prep["w3"], prep["s3"], prep["b3"],
              prep["up_T"])
    in_specs = [pl.BlockSpec((1, cin, P), lambda i: (i, 0, 0))]
    for a in w_args:  # grid-invariant weights: stay VMEM-resident across steps
        in_specs.append(pl.BlockSpec(a.shape, lambda i, nd=a.ndim: (0,) * nd))

    kern = functools.partial(_middle_kernel, bins=bins, r=r, side_x=side_x)
    return pl.pallas_call(
        kern,
        out_shape=jax.ShapeDtypeStruct((n, r, hw), jnp.float32),
        grid=(n,),
        in_specs=in_specs,
        out_specs=pl.BlockSpec((1, r, hw), lambda i: (i, 0, 0)),
        scratch_shapes=[pltpu.VMEM((side_y, side_x, r), jnp.float32)],
        compiler_params=pltpu.CompilerParams(
            dimension_semantics=("parallel",)),
    )(pooled, *w_args)


# ----------------------------------------------------------------------------
# Hoisted preprocessing (done ONCE per shape, outside the hot forward path)
# ----------------------------------------------------------------------------
def adaptive_pool_matrix(in_size, out_size):
    """Row-stochastic matrix implementing 1D adaptive average pooling."""
    P = np.zeros((out_size, in_size), np.float32)
    for i in range(out_size):
        s = (i * in_size) // out_size
        e = -(-((i + 1) * in_size) // out_size)  # ceil
        P[i, s:e] = 1.0 / (e - s)
    return P


def bilinear_matrix(out_size, in_size):
    """1D bilinear interpolation matrix with align_corners=True."""
    A = np.zeros((out_size, in_size), np.float32)
    for i in range(out_size):
        s = i * (in_size - 1) / (out_size - 1) if out_size > 1 else 0.0
        i0 = int(np.floor(s))
        if i0 >= in_size - 1:
            i0, f = in_size - 1, 0.0
        else:
            f = s - i0
        A[i, i0] += 1.0 - f
        if f > 0.0:
            A[i, i0 + 1] += f
    return A


def fold_bn(bn):
    gamma, beta, mean, var = bn
    scale = gamma / jnp.sqrt(var + BN_EPS)
    shift = beta - mean * scale
    return scale, shift


def build_merged_tap_weights(params, r):
    """Merge the 4 PyConv branches per spatial offset: one dense (R, R) weight
    per (dy, dx) of the shared 9x9 footprint (zero where a branch's kernel does
    not cover that offset), packed as (81, R, R)."""
    K9 = PY_KERNELS[-1]
    cpb = r // 4
    W = np.zeros((K9 * K9, r, r), np.float32)
    for br, (k, g) in enumerate(zip(PY_KERNELS, PY_GROUPS)):
        w = np.asarray(params[f"wpy{br}"])          # (cpb, r//g, k, k)
        cing = r // g
        coutg = cpb // g
        p = k // 2
        for ky in range(k):
            for kx in range(k):
                t = (ky + MAX_PAD - p) * K9 + (kx + MAX_PAD - p)
                for j in range(g):
                    blk = w[j * coutg:(j + 1) * coutg, :, ky, kx]   # (coutg, cing)
                    W[t, j * cing:(j + 1) * cing,
                      br * cpb + j * coutg: br * cpb + (j + 1) * coutg] = blk.T
    return jnp.asarray(W)


def prepare_forward(params, in_dim, H, W, bins):
    """One-time weight / matrix preparation (kept out of the hot path)."""
    r = params["w1"].shape[0]
    prep = {}
    prep["pool_T"] = jnp.asarray(
        np.kron(adaptive_pool_matrix(H, bins),
                adaptive_pool_matrix(W, bins)).T)                 # (H*W, bins^2)
    prep["up_T"] = jnp.asarray(
        np.kron(bilinear_matrix(H, bins),
                bilinear_matrix(W, bins)).T)                      # (bins^2, H*W)
    prep["w1"] = jnp.asarray(params["w1"][:, :, 0, 0].T)          # (Cin, R)
    prep["w3"] = jnp.asarray(params["w3"][:, :, 0, 0].T)          # (R, R)
    for i in (1, 2, 3):
        s, b = fold_bn(params[f"bn{i}"])
        prep[f"s{i}"] = s.reshape(1, r).astype(jnp.float32)
        prep[f"b{i}"] = b.reshape(1, r).astype(jnp.float32)
    prep["w_taps"] = build_merged_tap_weights(params, r)          # (81, R, R)
    return prep


# ----------------------------------------------------------------------------
# Parameters (deterministic synthetic init, shapes per module __init__)
# ----------------------------------------------------------------------------
def init_params(key, in_dim, reduction_dim):
    R = reduction_dim
    ks = jax.random.split(key, 16)
    p = {}
    p["w1"] = 0.1 * jax.random.normal(ks[0], (R, in_dim, 1, 1), jnp.float32)
    for br, (k, g) in enumerate(zip(PY_KERNELS, PY_GROUPS)):
        p[f"wpy{br}"] = 0.05 * jax.random.normal(
            ks[1 + br], (R // 4, R // g, k, k), jnp.float32)
    p["w3"] = 0.1 * jax.random.normal(ks[5], (R, R, 1, 1), jnp.float32)

    def bn(kk, c):
        k1, k2, k3, k4 = jax.random.split(kk, 4)
        gamma = 1.0 + 0.1 * jax.random.normal(k1, (c,), jnp.float32)
        beta = 0.1 * jax.random.normal(k2, (c,), jnp.float32)
        mean = 0.1 * jax.random.normal(k3, (c,), jnp.float32)
        var = jax.random.uniform(k4, (c,), jnp.float32, 0.5, 1.5)
        return gamma, beta, mean, var

    p["bn1"] = bn(ks[6], R)
    p["bn2"] = bn(ks[7], R)
    p["bn3"] = bn(ks[8], R)
    return p


# ----------------------------------------------------------------------------
# GlobalPyConvBlock forward (Pallas): 2 pallas_calls total
# ----------------------------------------------------------------------------
def global_pyconv_block_forward(x, prep, *, bins):
    N, Cin, H, W = x.shape
    r = prep["w3"].shape[0]
    P = bins * bins
    # AdaptiveAvgPool2d(bins): tiled matmul over the (only) big HBM operand.
    pooled = tiled_matmul(x.reshape(N * Cin, H * W), prep["pool_T"])    # (N*Cin, P)
    # Fused middle + bilinear upsample, VMEM-resident, lane-dense (H*W) output.
    out = fused_middle_upsample(pooled.reshape(N, Cin, P), prep,
                                bins=bins, hw=H * W)                    # (N, R, H*W)
    return out.reshape(N, r, H, W)


# ----------------------------------------------------------------------------
# Pure-JAX reference (independent path) for correctness check
# ----------------------------------------------------------------------------
def _bn_eval_ref(y, prm):
    g, b, m, v = prm
    return (y - m[None, :, None, None]) / jnp.sqrt(v[None, :, None, None] + BN_EPS) \
        * g[None, :, None, None] + b[None, :, None, None]


def _bilinear_ref(x, out_h, out_w):
    n, c, h, w = x.shape
    ys = jnp.arange(out_h, dtype=jnp.float32) * (h - 1) / (out_h - 1)
    xs = jnp.arange(out_w, dtype=jnp.float32) * (w - 1) / (out_w - 1)
    y0 = jnp.floor(ys).astype(jnp.int32)
    y1 = jnp.minimum(y0 + 1, h - 1)
    fy = ys - y0
    x0 = jnp.floor(xs).astype(jnp.int32)
    x1 = jnp.minimum(x0 + 1, w - 1)
    fx = xs - x0
    rows = x[:, :, y0, :] * (1 - fy)[None, None, :, None] \
        + x[:, :, y1, :] * fy[None, None, :, None]
    return rows[:, :, :, x0] * (1 - fx) + rows[:, :, :, x1] * fx


def reference_forward(x, params, bins):
    N, Cin, H, W = x.shape
    p = x.reshape(N, Cin, bins, H // bins, bins, W // bins).mean(axis=(3, 5))
    y = lax.conv_general_dilated(p, params["w1"], (1, 1), "VALID",
                                 dimension_numbers=("NCHW", "OIHW", "NCHW"))
    y = jax.nn.relu(_bn_eval_ref(y, params["bn1"]))
    branches = []
    for br, (k, g) in enumerate(zip(PY_KERNELS, PY_GROUPS)):
        branches.append(lax.conv_general_dilated(
            y, params[f"wpy{br}"], (1, 1),
            [(k // 2, k // 2), (k // 2, k // 2)],
            dimension_numbers=("NCHW", "OIHW", "NCHW"),
            feature_group_count=g))
    y = jnp.concatenate(branches, axis=1)
    y = jax.nn.relu(_bn_eval_ref(y, params["bn2"]))
    y = lax.conv_general_dilated(y, params["w3"], (1, 1), "VALID",
                                 dimension_numbers=("NCHW", "OIHW", "NCHW"))
    y = jax.nn.relu(_bn_eval_ref(y, params["bn3"]))
    return _bilinear_ref(y, H, W)


# ----------------------------------------------------------------------------
if __name__ == "__main__":
    # reduction_dim must be a multiple of 64 (groups=16 branch of PyConv4)
    N, in_dim, H, W = 2, 32, 16, 16
    reduction_dim, bins = 64, 8

    key = jax.random.PRNGKey(0)
    kx, kp = jax.random.split(key)
    x = jax.random.normal(kx, (N, in_dim, H, W), jnp.float32)
    params = init_params(kp, in_dim, reduction_dim)

    # all weight / matrix preprocessing hoisted out of the forward path
    prep = prepare_forward(params, in_dim, H, W, bins)

    fwd = jax.jit(functools.partial(global_pyconv_block_forward, bins=bins))
    out = jax.block_until_ready(fwd(x, prep))
    assert out.shape == (N, reduction_dim, H, W)

    ref = reference_forward(x, params, bins)
    np.testing.assert_allclose(np.asarray(out), np.asarray(ref),
                               rtol=1e-3, atol=1e-3)
    print("KERNEL_OK")
</pallas_src>

<mosaic_0001>
module attributes {stable_mosaic.version = 11 : i64} {
  func.func @_tiled_matmul_kernel(%arg0: i32, %arg1: memref<64x256xf32, #tpu.memory_space<vmem>>, %arg2: memref<256x64xf32, #tpu.memory_space<vmem>>, %arg3: memref<64x64xf32, #tpu.memory_space<vmem>>) attributes {dimension_semantics = [#tpu.dimension_semantics<parallel>], iteration_bounds = array<i64: 1>, scalar_prefetch = 0 : i64, scratch_operands = 0 : i64, tpu.core_type = #tpu.core_type<tc>, window_params = [{transform_indices = @transform_0, window_bounds = array<i64: 64, 256>}, {pipeline_mode = #tpu.pipeline_mode<synchronous>, transform_indices = @transform_1, window_bounds = array<i64: 256, 64>}, {transform_indices = @transform_2, window_bounds = array<i64: 64, 64>}]} {
    %c0 = arith.constant 0 : index
    %c0_0 = arith.constant 0 : index
    %0 = vector.load %arg1[%c0, %c0_0] : memref<64x256xf32, #tpu.memory_space<vmem>>, vector<64x256xf32>
    %c0_1 = arith.constant 0 : index
    %c0_2 = arith.constant 0 : index
    %1 = vector.load %arg2[%c0_1, %c0_2] : memref<256x64xf32, #tpu.memory_space<vmem>>, vector<256x64xf32>
    %cst = arith.constant dense<0.000000e+00> : vector<64x64xf32>
    %2 = tpu.matmul %0, %1, %cst {dimension_numbers = #tpu.dot_dimension_numbers<[1], [0], [0], [1], [0, 0, 1, 1], [], []>} : vector<64x256xf32>, vector<256x64xf32>, vector<64x64xf32> -> vector<64x64xf32>
    %c0_3 = arith.constant 0 : index
    %c0_4 = arith.constant 0 : index
    %3 = vector.load %arg3[%c0_3, %c0_4] : memref<64x64xf32, #tpu.memory_space<vmem>>, vector<64x64xf32>
    tpu.vector_store %arg3[%c0_3, %c0_4], %2 {strides = array<i32>} : memref<64x64xf32, #tpu.memory_space<vmem>>, vector<64x64xf32>,
    return
  }
  func.func @transform_0(%arg0: i32) -> (i32, i32) {
    %c0_i32 = arith.constant 0 : i32
    %c0_i32_0 = arith.constant 0 : i32
    return %arg0, %c0_i32 : i32, i32
  }
  func.func @transform_1(%arg0: i32) -> (i32, i32) {
    %c0_i32 = arith.constant 0 : i32
    %c0_i32_0 = arith.constant 0 : i32
    %c0_i32_1 = arith.constant 0 : i32
    return %c0_i32, %c0_i32_0 : i32, i32
  }
  func.func @transform_2(%arg0: i32) -> (i32, i32) {
    %c0_i32 = arith.constant 0 : i32
    %c0_i32_0 = arith.constant 0 : i32
    return %arg0, %c0_i32 : i32, i32
  }
}

module attributes {stable_mosaic.version = 11 : i64} {
  func.func @_middle_kernel(%arg0: i32, %arg1: memref<1x32x64xf32, #tpu.memory_space<vmem>>, %arg2: memref<32x64xf32, #tpu.memory_space<vmem>>, %arg3: memref<1x64xf32, #tpu.memory_space<vmem>>, %arg4: memref<1x64xf32, #tpu.memory_space<vmem>>, %arg5: memref<81x64x64xf32, #tpu.memory_space<vmem>>, %arg6: memref<1x64xf32, #tpu.memory_space<vmem>>, %arg7: memref<1x64xf32, #tpu.memory_space<vmem>>, %arg8: memref<64x64xf32, #tpu.memory_space<vmem>>, %arg9: memref<1x64xf32, #tpu.memory_space<vmem>>, %arg10: memref<1x64xf32, #tpu.memory_space<vmem>>, %arg11: memref<64x256xf32, #tpu.memory_space<vmem>>, %arg12: memref<1x64x256xf32, #tpu.memory_space<vmem>>, %arg13: memref<16x24x64xf32, #tpu.memory_space<vmem>>) attributes {dimension_semantics = [#tpu.dimension_semantics<parallel>], iteration_bounds = array<i64: 2>, scalar_prefetch = 0 : i64, scratch_operands = 1 : i64, tpu.core_type = #tpu.core_type<tc>, window_params = [{transform_indices = @transform_0, window_bounds = array<i64: 1, 32, 64>}, {pipeline_mode = #tpu.pipeline_mode<synchronous>, transform_indices = @transform_1, window_bounds = array<i64: 32, 64>}, {pipeline_mode = #tpu.pipeline_mode<synchronous>, transform_indices = @transform_2, window_bounds = array<i64: 1, 64>}, {pipeline_mode = #tpu.pipeline_mode<synchronous>, transform_indices = @transform_3, window_bounds = array<i64: 1, 64>}, {pipeline_mode = #tpu.pipeline_mode<synchronous>, transform_indices = @transform_4, window_bounds = array<i64: 81, 64, 64>}, {pipeline_mode = #tpu.pipeline_mode<synchronous>, transform_indices = @transform_5, window_bounds = array<i64: 1, 64>}, {pipeline_mode = #tpu.pipeline_mode<synchronous>, transform_indices = @transform_6, window_bounds = array<i64: 1, 64>}, {pipeline_mode = #tpu.pipeline_mode<synchronous>, transform_indices = @transform_7, window_bounds = array<i64: 64, 64>}, {pipeline_mode = #tpu.pipeline_mode<synchronous>, transform_indices = @transform_8, window_bounds = array<i64: 1, 64>}, {pipeline_mode = #tpu.pipeline_mode<synchronous>, transform_indices = @transform_9, window_bounds = array<i64: 1, 64>}, {pipeline_mode = #tpu.pipeline_mode<synchronous>, transform_indices = @transform_10, window_bounds = array<i64: 64, 256>}, {transform_indices = @transform_11, window_bounds = array<i64: 1, 64, 256>}]} {
    %cst = arith.constant 0.000000e+00 : f32
    %0 = vector.broadcast %cst : f32 to vector<4x24x64xf32>
    %c0 = arith.constant 0 : index
    %c0_0 = arith.constant 0 : index
    %c0_1 = arith.constant 0 : index
    %1 = vector.load %arg13[%c0, %c0_0, %c0_1] : memref<16x24x64xf32, #tpu.memory_space<vmem>>, vector<4x24x64xf32>
    tpu.vector_store %arg13[%c0, %c0_0, %c0_1], %0 {strides = array<i32>} : memref<16x24x64xf32, #tpu.memory_space<vmem>>, vector<4x24x64xf32>,
    %cst_2 = arith.constant 0.000000e+00 : f32
    %2 = vector.broadcast %cst_2 : f32 to vector<4x24x64xf32>
    %c12 = arith.constant 12 : index
    %c0_3 = arith.constant 0 : index
    %c0_4 = arith.constant 0 : index
    %3 = vector.load %arg13[%c12, %c0_3, %c0_4] : memref<16x24x64xf32, #tpu.memory_space<vmem>>, vector<4x24x64xf32>
    tpu.vector_store %arg13[%c12, %c0_3, %c0_4], %2 {strides = array<i32>} : memref<16x24x64xf32, #tpu.memory_space<vmem>>, vector<4x24x64xf32>,
    %cst_5 = arith.constant 0.000000e+00 : f32
    %4 = vector.broadcast %cst_5 : f32 to vector<8x8x64xf32>
    %c4 = arith.constant 4 : index
    %c0_6 = arith.constant 0 : index
    %c0_7 = arith.constant 0 : index
    %5 = vector.load %arg13[%c4, %c0_6, %c0_7] : memref<16x24x64xf32, #tpu.memory_space<vmem>>, vector<8x8x64xf32>
    tpu.vector_store %arg13[%c4, %c0_6, %c0_7], %4 {strides = array<i32>} : memref<16x24x64xf32, #tpu.memory_space<vmem>>, vector<8x8x64xf32>,
    %cst_8 = arith.constant 0.000000e+00 : f32
    %6 = vector.broadcast %cst_8 : f32 to vector<8x8x64xf32>
    %c4_9 = arith.constant 4 : index
    %c16 = arith.constant 16 : index
    %c0_10 = arith.constant 0 : index
    %7 = vector.load %arg13[%c4_9, %c16, %c0_10] : memref<16x24x64xf32, #tpu.memory_space<vmem>>, vector<8x8x64xf32>
    tpu.vector_store %arg13[%c4_9, %c16, %c0_10], %6 {strides = array<i32>} : memref<16x24x64xf32, #tpu.memory_space<vmem>>, vector<8x8x64xf32>,
    %c0_11 = arith.constant 0 : index
    %c0_12 = arith.constant 0 : index
    %c0_13 = arith.constant 0 : index
    %8 = vector.load %arg1[%c0_11, %c0_12, %c0_13] : memref<1x32x64xf32, #tpu.memory_space<vmem>>, vector<1x32x64xf32>
    %9 = vector.shape_cast %8 : vector<1x32x64xf32> to vector<32x64xf32>
    %c0_14 = arith.constant 0 : index
    %c0_15 = arith.constant 0 : index
    %10 = vector.load %arg2[%c0_14, %c0_15] : memref<32x64xf32, #tpu.memory_space<vmem>>, vector<32x64xf32>
    %cst_16 = arith.constant dense<0.000000e+00> : vector<64x64xf32>
    %11 = tpu.matmul %9, %10, %cst_16 {dimension_numbers = #tpu.dot_dimension_numbers<[0], [0], [1], [1], [0, 1, 1, 1], [], []>} : vector<32x64xf32>, vector<32x64xf32>, vector<64x64xf32> -> vector<64x64xf32>
    %c0_17 = arith.constant 0 : index
    %c0_18 = arith.constant 0 : index
    %12 = vector.load %arg3[%c0_17, %c0_18] : memref<1x64xf32, #tpu.memory_space<vmem>>, vector<1x64xf32>
    %13 = vector.broadcast %12 : vector<1x64xf32> to vector<64x64xf32>
    %14 = arith.mulf %11, %13 : vector<64x64xf32>
    %c0_19 = arith.constant 0 : index
    %c0_20 = arith.constant 0 : index
    %15 = vector.load %arg4[%c0_19, %c0_20] : memref<1x64xf32, #tpu.memory_space<vmem>>, vector<1x64xf32>
    %16 = vector.broadcast %15 : vector<1x64xf32> to vector<64x64xf32>
    %17 = arith.addf %14, %16 : vector<64x64xf32>
    %cst_21 = arith.constant 0.000000e+00 : f32
    %18 = vector.broadcast %cst_21 : f32 to vector<64x64xf32>
    %19 = arith.maximumf %17, %18 : vector<64x64xf32>
    %20 = vector.shape_cast %19 : vector<64x64xf32> to vector<8x8x64xf32>
    %c4_22 = arith.constant 4 : index
    %c8 = arith.constant 8 : index
    %c0_23 = arith.constant 0 : index
    %21 = vector.load %arg13[%c4_22, %c8, %c0_23] : memref<16x24x64xf32, #tpu.memory_space<vmem>>, vector<8x8x64xf32>
    tpu.vector_store %arg13[%c4_22, %c8, %c0_23], %20 {strides = array<i32>} : memref<16x24x64xf32, #tpu.memory_space<vmem>>, vector<8x8x64xf32>,
    %cst_24 = arith.constant 0.000000e+00 : f32
    %22 = vector.broadcast %cst_24 : f32 to vector<64x64xf32>
    %cst_25 = arith.constant 0.000000e+00 : f32
    %23 = vector.broadcast %cst_25 : f32 to vector<64x64xf32>
    %c0_26 = arith.constant 0 : index
    %c0_27 = arith.constant 0 : index
    %c0_28 = arith.constant 0 : index
    %24 = vector.load %arg13[%c0_26, %c0_27, %c0_28] : memref<16x24x64xf32, #tpu.memory_space<vmem>>, vector<8x24x64xf32>
    %25 = vector.shape_cast %24 : vector<8x24x64xf32> to vector<192x64xf32>
    %c4_i32 = arith.constant 4 : i32
    %26 = tpu.dynamic_rotate %25 by %c4_i32 dim 0 : vector<192x64xf32>, i32 -> vector<192x64xf32>
    %27 = vector.shape_cast %26 : vector<192x64xf32> to vector<8x24x64xf32>
    %28 = vector.extract_strided_slice %27 {offsets = [0, 8, 0], sizes = [8, 8, 64], strides = [1, 1, 1]} : vector<8x24x64xf32> to vector<8x8x64xf32>
    %29 = vector.shape_cast %28 : vector<8x8x64xf32> to vector<64x64xf32>
    %c0_29 = arith.constant 0 : index
    %c0_30 = arith.constant 0 : index
    %c0_31 = arith.constant 0 : index
    %30 = vector.load %arg5[%c0_29, %c0_30, %c0_31] : memref<81x64x64xf32, #tpu.memory_space<vmem>>, vector<1x64x64xf32>
    %31 = vector.shape_cast %30 : vector<1x64x64xf32> to vector<64x64xf32>
    %cst_32 = arith.constant dense<0.000000e+00> : vector<64x64xf32>
    %32 = tpu.matmul %29, %31, %cst_32 {dimension_numbers = #tpu.dot_dimension_numbers<[1], [0], [0], [1], [0, 0, 1, 1], [], []>} : vector<64x64xf32>, vector<64x64xf32>, vector<64x64xf32> -> vector<64x64xf32>
    %33 = arith.addf %22, %32 : vector<64x64xf32>
    %c3_i32 = arith.constant 3 : i32
    %34 = tpu.dynamic_rotate %25 by %c3_i32 dim 0 : vector<192x64xf32>, i32 -> vector<192x64xf32>
    %35 = vector.shape_cast %34 : vector<192x64xf32> to vector<8x24x64xf32>
    %36 = vector.extract_strided_slice %35 {offsets = [0, 8, 0], sizes = [8, 8, 64], strides = [1, 1, 1]} : vector<8x24x64xf32> to vector<8x8x64xf32>
    %37 = vector.shape_cast %36 : vector<8x8x64xf32> to vector<64x64xf32>
    %c1 = arith.constant 1 : index
    %c0_33 = arith.constant 0 : index
    %c0_34 = arith.constant 0 : index
    %38 = vector.load %arg5[%c1, %c0_33, %c0_34] : memref<81x64x64xf32, #tpu.memory_space<vmem>>, vector<1x64x64xf32>
    %39 = vector.shape_cast %38 : vector<1x64x64xf32> to vector<64x64xf32>
    %cst_35 = arith.constant dense<0.000000e+00> : vector<64x64xf32>
    %40 = tpu.matmul %37, %39, %cst_35 {dimension_numbers = #tpu.dot_dimension_numbers<[1], [0], [0], [1], [0, 0, 1, 1], [], []>} : vector<64x64xf32>, vector<64x64xf32>, vector<64x64xf32> -> vector<64x64xf32>
    %41 = arith.addf %23, %40 : vector<64x64xf32>
    %c2_i32 = arith.constant 2 : i32
    %42 = tpu.dynamic_rotate %25 by %c2_i32 dim 0 : vector<192x64xf32>, i32 -> vector<192x64xf32>
    %43 = vector.shape_cast %42 : vector<192x64xf32> to vector<8x24x64xf32>
    %44 = vector.extract_strided_slice %43 {offsets = [0, 8, 0], sizes = [8, 8, 64], strides = [1, 1, 1]} : vector<8x24x64xf32> to vector<8x8x64xf32>
    %45 = vector.shape_cast %44 : vector<8x8x64xf32> to vector<64x64xf32>
    %c2 = arith.constant 2 : index
    %c0_36 = arith.constant 0 : index
    %c0_37 = arith.constant 0 : index
    %46 = vector.load %arg5[%c2, %c0_36, %c0_37] : memref<81x64x64xf32, #tpu.memory_space<vmem>>, vector<1x64x64xf32>
    %47 = vector.shape_cast %46 : vector<1x64x64xf32> to vector<64x64xf32>
    %cst_38 = arith.constant dense<0.000000e+00> : vector<64x64xf32>
    %48 = tpu.matmul %45, %47, %cst_38 {dimension_numbers = #tpu.dot_dimension_numbers<[1], [0], [0], [1], [0, 0, 1, 1], [], []>} : vector<64x64xf32>, vector<64x64xf32>, vector<64x64xf32> -> vector<64x64xf32>
    %49 = arith.addf %33, %48 : vector<64x64xf32>
    %c1_i32 = arith.constant 1 : i32
    %50 = tpu.dynamic_rotate %25 by %c1_i32 dim 0 : vector<192x64xf32>, i32 -> vector<192x64xf32>
    %51 = vector.shape_cast %50 : vector<192x64xf32> to vector<8x24x64xf32>
    %52 = vector.extract_strided_slice %51 {offsets = [0, 8, 0], sizes = [8, 8, 64], strides = [1, 1, 1]} : vector<8x24x64xf32> to vector<8x8x64xf32>
    %53 = vector.shape_cast %52 : vector<8x8x64xf32> to vector<64x64xf32>
    %c3 = arith.constant 3 : index
    %c0_39 = arith.constant 0 : index
    %c0_40 = arith.constant 0 : index
    %54 = vector.load %arg5[%c3, %c0_39, %c0_40] : memref<81x64x64xf32, #tpu.memory_space<vmem>>, vector<1x64x64xf32>
    %55 = vector.shape_cast %54 : vector<1x64x64xf32> to vector<64x64xf32>
    %cst_41 = arith.constant dense<0.000000e+00> : vector<64x64xf32>
    %56 = tpu.matmul %53, %55, %cst_41 {dimension_numbers = #tpu.dot_dimension_numbers<[1], [0], [0], [1], [0, 0, 1, 1], [], []>} : vector<64x64xf32>, vector<64x64xf32>, vector<64x64xf32> -> vector<64x64xf32>
    %57 = arith.addf %41, %56 : vector<64x64xf32>
    %58 = vector.shape_cast %25 : vector<192x64xf32> to vector<8x24x64xf32>
    %59 = vector.extract_strided_slice %58 {offsets = [0, 8, 0], sizes = [8, 8, 64], strides = [1, 1, 1]} : vector<8x24x64xf32> to vector<8x8x64xf32>
    %60 = vector.shape_cast %59 : vector<8x8x64xf32> to vector<64x64xf32>
    %c4_42 = arith.constant 4 : index
    %c0_43 = arith.constant 0 : index
    %c0_44 = arith.constant 0 : index
    %61 = vector.load %arg5[%c4_42, %c0_43, %c0_44] : memref<81x64x64xf32, #tpu.memory_space<vmem>>, vector<1x64x64xf32>
    %62 = vector.shape_cast %61 : vector<1x64x64xf32> to vector<64x64xf32>
    %cst_45 = arith.constant dense<0.000000e+00> : vector<64x64xf32>
    %63 = tpu.matmul %60, %62, %cst_45 {dimension_numbers = #tpu.dot_dimension_numbers<[1], [0], [0], [1], [0, 0, 1, 1], [], []>} : vector<64x64xf32>, vector<64x64xf32>, vector<64x64xf32> -> vector<64x64xf32>
    %64 = arith.addf %49, %63 : vector<64x64xf32>
    %c191_i32 = arith.constant 191 : i32
    %65 = tpu.dynamic_rotate %25 by %c191_i32 dim 0 : vector<192x64xf32>, i32 -> vector<192x64xf32>
    %66 = vector.shape_cast %65 : vector<192x64xf32> to vector<8x24x64xf32>
    %67 = vector.extract_strided_slice %66 {offsets = [0, 8, 0], sizes = [8, 8, 64], strides = [1, 1, 1]} : vector<8x24x64xf32> to vector<8x8x64xf32>
    %68 = vector.shape_cast %67 : vector<8x8x64xf32> to vector<64x64xf32>
    %c5 = arith.constant 5 : index
    %c0_46 = arith.constant 0 : index
    %c0_47 = arith.constant 0 : index
    %69 = vector.load %arg5[%c5, %c0_46, %c0_47] : memref<81x64x64xf32, #tpu.memory_space<vmem>>, vector<1x64x64xf32>
    %70 = vector.shape_cast %69 : vector<1x64x64xf32> to vector<64x64xf32>
    %cst_48 = arith.constant dense<0.000000e+00> : vector<64x64xf32>
    %71 = tpu.matmul %68, %70, %cst_48 {dimension_numbers = #tpu.dot_dimension_numbers<[1], [0], [0], [1], [0, 0, 1, 1], [], []>} : vector<64x64xf32>, vector<64x64xf32>, vector<64x64xf32> -> vector<64x64xf32>
    %72 = arith.addf %57, %71 : vector<64x64xf32>
    %c190_i32 = arith.constant 190 : i32
    %73 = tpu.dynamic_rotate %25 by %c190_i32 dim 0 : vector<192x64xf32>, i32 -> vector<192x64xf32>
    %74 = vector.shape_cast %73 : vector<192x64xf32> to vector<8x24x64xf32>
    %75 = vector.extract_strided_slice %74 {offsets = [0, 8, 0], sizes = [8, 8, 64], strides = [1, 1, 1]} : vector<8x24x64xf32> to vector<8x8x64xf32>
    %76 = vector.shape_cast %75 : vector<8x8x64xf32> to vector<64x64xf32>
    %c6 = arith.constant 6 : index
    %c0_49 = arith.constant 0 : index
    %c0_50 = arith.constant 0 : index
    %77 = vector.load %arg5[%c6, %c0_49, %c0_50] : memref<81x64x64xf32, #tpu.memory_space<vmem>>, vector<1x64x64xf32>
    %78 = vector.shape_cast %77 : vector<1x64x64xf32> to vector<64x64xf32>
    %cst_51 = arith.constant dense<0.000000e+00> : vector<64x64xf32>
    %79 = tpu.matmul %76, %78, %cst_51 {dimension_numbers = #tpu.dot_dimension_numbers<[1], [0], [0], [1], [0, 0, 1, 1], [], []>} : vector<64x64xf32>, vector<64x64xf32>, vector<64x64xf32> -> vector<64x64xf32>
    %80 = arith.addf %64, %79 : vector<64x64xf32>
    %c189_i32 = arith.constant 189 : i32
    %81 = tpu.dynamic_rotate %25 by %c189_i32 dim 0 : vector<192x64xf32>, i32 -> vector<192x64xf32>
    %82 = vector.shape_cast %81 : vector<192x64xf32> to vector<8x24x64xf32>
    %83 = vector.extract_strided_slice %82 {offsets = [0, 8, 0], sizes = [8, 8, 64], strides = [1, 1, 1]} : vector<8x24x64xf32> to vector<8x8x64xf32>
    %84 = vector.shape_cast %83 : vector<8x8x64xf32> to vector<64x64xf32>
    %c7 = arith.constant 7 : index
    %c0_52 = arith.constant 0 : index
    %c0_53 = arith.constant 0 : index
    %85 = vector.load %arg5[%c7, %c0_52, %c0_53] : memref<81x64x64xf32, #tpu.memory_space<vmem>>, vector<1x64x64xf32>
    %86 = vector.shape_cast %85 : vector<1x64x64xf32> to vector<64x64xf32>
    %cst_54 = arith.constant dense<0.000000e+00> : vector<64x64xf32>
    %87 = tpu.matmul %84, %86, %cst_54 {dimension_numbers = #tpu.dot_dimension_numbers<[1], [0], [0], [1], [0, 0, 1, 1], [], []>} : vector<64x64xf32>, vector<64x64xf32>, vector<64x64xf32> -> vector<64x64xf32>
    %88 = arith.addf %72, %87 : vector<64x64xf32>
    %c188_i32 = arith.constant 188 : i32
    %89 = tpu.dynamic_rotate %25 by %c188_i32 dim 0 : vector<192x64xf32>, i32 -> vector<192x64xf32>
    %90 = vector.shape_cast %89 : vector<192x64xf32> to vector<8x24x64xf32>
    %91 = vector.extract_strided_slice %90 {offsets = [0, 8, 0], sizes = [8, 8, 64], strides = [1, 1, 1]} : vector<8x24x64xf32> to vector<8x8x64xf32>
    %92 = vector.shape_cast %91 : vector<8x8x64xf32> to vector<64x64xf32>
    %c8_55 = arith.constant 8 : index
    %c0_56 = arith.constant 0 : index
    %c0_57 = arith.constant 0 : index
    %93 = vector.load %arg5[%c8_55, %c0_56, %c0_57] : memref<81x64x64xf32, #tpu.memory_space<vmem>>, vector<1x64x64xf32>
    %94 = vector.shape_cast %93 : vector<1x64x64xf32> to vector<64x64xf32>
    %cst_58 = arith.constant dense<0.000000e+00> : vector<64x64xf32>
    %95 = tpu.matmul %92, %94, %cst_58 {dimension_numbers = #tpu.dot_dimension_numbers<[1], [0], [0], [1], [0, 0, 1, 1], [], []>} : vector<64x64xf32>, vector<64x64xf32>, vector<64x64xf32> -> vector<64x64xf32>
    %96 = arith.addf %80, %95 : vector<64x64xf32>
    %c1_59 = arith.constant 1 : index
    %c0_60 = arith.constant 0 : index
    %c0_61 = arith.constant 0 : index
    %97 = vector.load %arg13[%c1_59, %c0_60, %c0_61] : memref<16x24x64xf32, #tpu.memory_space<vmem>>, vector<8x24x64xf32>
    %98 = vector.shape_cast %97 : vector<8x24x64xf32> to vector<192x64xf32>
    %c4_i32_62 = arith.constant 4 : i32
    %99 = tpu.dynamic_rotate %98 by %c4_i32_62 dim 0 : vector<192x64xf32>, i32 -> vector<192x64xf32>
    %100 = vector.shape_cast %99 : vector<192x64xf32> to vector<8x24x64xf32>
    %101 = vector.extract_strided_slice %100 {offsets = [0, 8, 0], sizes = [8, 8, 64], strides = [1, 1, 1]} : vector<8x24x64xf32> to vector<8x8x64xf32>
    %102 = vector.shape_cast %101 : vector<8x8x64xf32> to vector<64x64xf32>
    %c9 = arith.constant 9 : index
    %c0_63 = arith.constant 0 : index
    %c0_64 = arith.constant 0 : index
    %103 = vector.load %arg5[%c9, %c0_63, %c0_64] : memref<81x64x64xf32, #tpu.memory_space<vmem>>, vector<1x64x64xf32>
    %104 = vector.shape_cast %103 : vector<1x64x64xf32> to vector<64x64xf32>
    %cst_65 = arith.constant dense<0.000000e+00> : vector<64x64xf32>
    %105 = tpu.matmul %102, %104, %cst_65 {dimension_numbers = #tpu.dot_dimension_numbers<[1], [0], [0], [1], [0, 0, 1, 1], [], []>} : vector<64x64xf32>, vector<64x64xf32>, vector<64x64xf32> -> vector<64x64xf32>
    %106 = arith.addf %88, %105 : vector<64x64xf32>
    %c3_i32_66 = arith.constant 3 : i32
    %107 = tpu.dynamic_rotate %98 by %c3_i32_66 dim 0 : vector<192x64xf32>, i32 -> vector<192x64xf32>
    %108 = vector.shape_cast %107 : vector<192x64xf32> to vector<8x24x64xf32>
    %109 = vector.extract_strided_slice %108 {offsets = [0, 8, 0], sizes = [8, 8, 64], strides = [1, 1, 1]} : vector<8x24x64xf32> to vector<8x8x64xf32>
    %110 = vector.shape_cast %109 : vector<8x8x64xf32> to vector<64x64xf32>
    %c10 = arith.constant 10 : index
    %c0_67 = arith.constant 0 : index
    %c0_68 = arith.constant 0 : index
    %111 = vector.load %arg5[%c10, %c0_67, %c0_68] : memref<81x64x64xf32, #tpu.memory_space<vmem>>, vector<1x64x64xf32>
    %112 = vector.shape_cast %111 : vector<1x64x64xf32> to vector<64x64xf32>
    %cst_69 = arith.constant dense<0.000000e+00> : vector<64x64xf32>
    %113 = tpu.matmul %110, %112, %cst_69 {dimension_numbers = #tpu.dot_dimension_numbers<[1], [0], [0], [1], [0, 0, 1, 1], [], []>} : vector<64x64xf32>, vector<64x64xf32>, vector<64x64xf32> -> vector<64x64xf32>
    %114 = arith.addf %96, %113 : vector<64x64xf32>
    %c2_i32_70 = arith.constant 2 : i32
    %115 = tpu.dynamic_rotate %98 by %c2_i32_70 dim 0 : vector<192x64xf32>, i32 -> vector<192x64xf32>
    %116 = vector.shape_cast %115 : vector<192x64xf32> to vector<8x24x64xf32>
    %117 = vector.extract_strided_slice %116 {offsets = [0, 8, 0], sizes = [8, 8, 64], strides = [1, 1, 1]} : vector<8x24x64xf32> to vector<8x8x64xf32>
    %118 = vector.shape_cast %117 : vector<8x8x64xf32> to vector<64x64xf32>
    %c11 = arith.constant 11 : index
    %c0_71 = arith.constant 0 : index
    %c0_72 = arith.constant 0 : index
    %119 = vector.load %arg5[%c11, %c0_71, %c0_72] : memref<81x64x64xf32, #tpu.memory_space<vmem>>, vector<1x64x64xf32>
    %120 = vector.shape_cast %119 : vector<1x64x64xf32> to vector<64x64xf32>
    %cst_73 = arith.constant dense<0.000000e+00> : vector<64x64xf32>
    %121 = tpu.matmul %118, %120, %cst_73 {dimension_numbers = #tpu.dot_dimension_numbers<[1], [0], [0], [1], [0, 0, 1, 1], [], []>} : vector<64x64xf32>, vector<64x64xf32>, vector<64x64xf32> -> vector<64x64xf32>
    %122 = arith.addf %106, %121 : vector<64x64xf32>
    %c1_i32_74 = arith.constant 1 : i32
    %123 = tpu.dynamic_rotate %98 by %c1_i32_74 dim 0 : vector<192x64xf32>, i32 -> vector<192x64xf32>
    %124 = vector.shape_cast %123 : vector<192x64xf32> to vector<8x24x64xf32>
    %125 = vector.extract_strided_slice %124 {offsets = [0, 8, 0], sizes = [8, 8, 64], strides = [1, 1, 1]} : vector<8x24x64xf32> to vector<8x8x64xf32>
    %126 = vector.shape_cast %125 : vector<8x8x64xf32> to vector<64x64xf32>
    %c12_75 = arith.constant 12 : index
    %c0_76 = arith.constant 0 : index
    %c0_77 = arith.constant 0 : index
    %127 = vector.load %arg5[%c12_75, %c0_76, %c0_77] : memref<81x64x64xf32, #tpu.memory_space<vmem>>, vector<1x64x64xf32>
    %128 = vector.shape_cast %127 : vector<1x64x64xf32> to vector<64x64xf32>
    %cst_78 = arith.constant dense<0.000000e+00> : vector<64x64xf32>
    %129 = tpu.matmul %126, %128, %cst_78 {dimension_numbers = #tpu.dot_dimension_numbers<[1], [0], [0], [1], [0, 0, 1, 1], [], []>} : vector<64x64xf32>, vector<64x64xf32>, vector<64x64xf32> -> vector<64x64xf32>
    %130 = arith.addf %114, %129 : vector<64x64xf32>
    %131 = vector.shape_cast %98 : vector<192x64xf32> to vector<8x24x64xf32>
    %132 = vector.extract_strided_slice %131 {offsets = [0, 8, 0], sizes = [8, 8, 64], strides = [1, 1, 1]} : vector<8x24x64xf32> to vector<8x8x64xf32>
    %133 = vector.shape_cast %132 : vector<8x8x64xf32> to vector<64x64xf32>
    %c13 = arith.constant 13 : index
    %c0_79 = arith.constant 0 : index
    %c0_80 = arith.constant 0 : index
    %134 = vector.load %arg5[%c13, %c0_79, %c0_80] : memref<81x64x64xf32, #tpu.memory_space<vmem>>, vector<1x64x64xf32>
    %135 = vector.shape_cast %134 : vector<1x64x64xf32> to vector<64x64xf32>
    %cst_81 = arith.constant dense<0.000000e+00> : vector<64x64xf32>
    %136 = tpu.matmul %133, %135, %cst_81 {dimension_numbers = #tpu.dot_dimension_numbers<[1], [0], [0], [1], [0, 0, 1, 1], [], []>} : vector<64x64xf32>, vector<64x64xf32>, vector<64x64xf32> -> vector<64x64xf32>
    %137 = arith.addf %122, %136 : vector<64x64xf32>
    %c191_i32_82 = arith.constant 191 : i32
    %138 = tpu.dynamic_rotate %98 by %c191_i32_82 dim 0 : vector<192x64xf32>, i32 -> vector<192x64xf32>
    %139 = vector.shape_cast %138 : vector<192x64xf32> to vector<8x24x64xf32>
    %140 = vector.extract_strided_slice %139 {offsets = [0, 8, 0], sizes = [8, 8, 64], strides = [1, 1, 1]} : vector<8x24x64xf32> to vector<8x8x64xf32>
    %141 = vector.shape_cast %140 : vector<8x8x64xf32> to vector<64x64xf32>
    %c14 = arith.constant 14 : index
    %c0_83 = arith.constant 0 : index
    %c0_84 = arith.constant 0 : index
    %142 = vector.load %arg5[%c14, %c0_83, %c0_84] : memref<81x64x64xf32, #tpu.memory_space<vmem>>, vector<1x64x64xf32>
    %143 = vector.shape_cast %142 : vector<1x64x64xf32> to vector<64x64xf32>
    %cst_85 = arith.constant dense<0.000000e+00> : vector<64x64xf32>
    %144 = tpu.matmul %141, %143, %cst_85 {dimension_numbers = #tpu.dot_dimension_numbers<[1], [0], [0], [1], [0, 0, 1, 1], [], []>} : vector<64x64xf32>, vector<64x64xf32>, vector<64x64xf32> -> vector<64x64xf32>
    %145 = arith.addf %130, %144 : vector<64x64xf32>
    %c190_i32_86 = arith.constant 190 : i32
    %146 = tpu.dynamic_rotate %98 by %c190_i32_86 dim 0 : vector<192x64xf32>, i32 -> vector<192x64xf32>
    %147 = vector.shape_cast %146 : vector<192x64xf32> to vector<8x24x64xf32>
    %148 = vector.extract_strided_slice %147 {offsets = [0, 8, 0], sizes = [8, 8, 64], strides = [1, 1, 1]} : vector<8x24x64xf32> to vector<8x8x64xf32>
    %149 = vector.shape_cast %148 : vector<8x8x64xf32> to vector<64x64xf32>
    %c15 = arith.constant 15 : index
    %c0_87 = arith.constant 0 : index
    %c0_88 = arith.constant 0 : index
    %150 = vector.load %arg5[%c15, %c0_87, %c0_88] : memref<81x64x64xf32, #tpu.memory_space<vmem>>, vector<1x64x64xf32>
    %151 = vector.shape_cast %150 : vector<1x64x64xf32> to vector<64x64xf32>
    %cst_89 = arith.constant dense<0.000000e+00> : vector<64x64xf32>
    %152 = tpu.matmul %149, %151, %cst_89 {dimension_numbers = #tpu.dot_dimension_numbers<[1], [0], [0], [1], [0, 0, 1, 1], [], []>} : vector<64x64xf32>, vector<64x64xf32>, vector<64x64xf32> -> vector<64x64xf32>
    %153 = arith.addf %137, %152 : vector<64x64xf32>
    %c189_i32_90 = arith.constant 189 : i32
    %154 = tpu.dynamic_rotate %98 by %c189_i32_90 dim 0 : vector<192x64xf32>, i32 -> vector<192x64xf32>
    %155 = vector.shape_cast %154 : vector<192x64xf32> to vector<8x24x64xf32>
    %156 = vector.extract_strided_slice %155 {offsets = [0, 8, 0], sizes = [8, 8, 64], strides = [1, 1, 1]} : vector<8x24x64xf32> to vector<8x8x64xf32>
    %157 = vector.shape_cast %156 : vector<8x8x64xf32> to vector<64x64xf32>
    %c16_91 = arith.constant 16 : index
    %c0_92 = arith.constant 0 : index
    %c0_93 = arith.constant 0 : index
    %158 = vector.load %arg5[%c16_91, %c0_92, %c0_93] : memref<81x64x64xf32, #tpu.memory_space<vmem>>, vector<1x64x64xf32>
    %159 = vector.shape_cast %158 : vector<1x64x64xf32> to vector<64x64xf32>
    %cst_94 = arith.constant dense<0.000000e+00> : vector<64x64xf32>
    %160 = tpu.matmul %157, %159, %cst_94 {dimension_numbers = #tpu.dot_dimension_numbers<[1], [0], [0], [1], [0, 0, 1, 1], [], []>} : vector<64x64xf32>, vector<64x64xf32>, vector<64x64xf32> -> vector<64x64xf32>
    %161 = arith.addf %145, %160 : vector<64x64xf32>
    %c188_i32_95 = arith.constant 188 : i32
    %162 = tpu.dynamic_rotate %98 by %c188_i32_95 dim 0 : vector<192x64xf32>, i32 -> vector<192x64xf32>
    %163 = vector.shape_cast %162 : vector<192x64xf32> to vector<8x24x64xf32>
    %164 = vector.extract_strided_slice %163 {offsets = [0, 8, 0], sizes = [8, 8, 64], strides = [1, 1, 1]} : vector<8x24x64xf32> to vector<8x8x64xf32>
    %165 = vector.shape_cast %164 : vector<8x8x64xf32> to vector<64x64xf32>
    %c17 = arith.constant 17 : index
    %c0_96 = arith.constant 0 : index
    %c0_97 = arith.constant 0 : index
    %166 = vector.load %arg5[%c17, %c0_96, %c0_97] : memref<81x64x64xf32, #tpu.memory_space<vmem>>, vector<1x64x64xf32>
    %167 = vector.shape_cast %166 : vector<1x64x64xf32> to vector<64x64xf32>
    %cst_98 = arith.constant dense<0.000000e+00> : vector<64x64xf32>
    %168 = tpu.matmul %165, %167, %cst_98 {dimension_numbers = #tpu.dot_dimension_numbers<[1], [0], [0], [1], [0, 0, 1, 1], [], []>} : vector<64x64xf32>, vector<64x64xf32>, vector<64x64xf32> -> vector<64x64xf32>
    %169 = arith.addf %153, %168 : vector<64x64xf32>
    %c2_99 = arith.constant 2 : index
    %c0_100 = arith.constant 0 : index
    %c0_101 = arith.constant 0 : index
    %170 = vector.load %arg13[%c2_99, %c0_100, %c0_101] : memref<16x24x64xf32, #tpu.memory_space<vmem>>, vector<8x24x64xf32>
    %171 = vector.shape_cast %170 : vector<8x24x64xf32> to vector<192x64xf32>
    %c4_i32_102 = arith.constant 4 : i32
    %172 = tpu.dynamic_rotate %171 by %c4_i32_102 dim 0 : vector<192x64xf32>, i32 -> vector<192x64xf32>
    %173 = vector.shape_cast %172 : vector<192x64xf32> to vector<8x24x64xf32>
    %174 = vector.extract_strided_slice %173 {offsets = [0, 8, 0], sizes = [8, 8, 64], strides = [1, 1, 1]} : vector<8x24x64xf32> to vector<8x8x64xf32>
    %175 = vector.shape_cast %174 : vector<8x8x64xf32> to vector<64x64xf32>
    %c18 = arith.constant 18 : index
    %c0_103 = arith.constant 0 : index
    %c0_104 = arith.constant 0 : index
    %176 = vector.load %arg5[%c18, %c0_103, %c0_104] : memref<81x64x64xf32, #tpu.memory_space<vmem>>, vector<1x64x64xf32>
    %177 = vector.shape_cast %176 : vector<1x64x64xf32> to vector<64x64xf32>
    %cst_105 = arith.constant dense<0.000000e+00> : vector<64x64xf32>
    %178 = tpu.matmul %175, %177, %cst_105 {dimension_numbers = #tpu.dot_dimension_numbers<[1], [0], [0], [1], [0, 0, 1, 1], [], []>} : vector<64x64xf32>, vector<64x64xf32>, vector<64x64xf32> -> vector<64x64xf32>
    %179 = arith.addf %161, %178 : vector<64x64xf32>
    %c3_i32_106 = arith.constant 3 : i32
    %180 = tpu.dynamic_rotate %171 by %c3_i32_106 dim 0 : vector<192x64xf32>, i32 -> vector<192x64xf32>
    %181 = vector.shape_cast %180 : vector<192x64xf32> to vector<8x24x64xf32>
    %182 = vector.extract_strided_slice %181 {offsets = [0, 8, 0], sizes = [8, 8, 64], strides = [1, 1, 1]} : vector<8x24x64xf32> to vector<8x8x64xf32>
    %183 = vector.shape_cast %182 : vector<8x8x64xf32> to vector<64x64xf32>
    %c19 = arith.constant 19 : index
    %c0_107 = arith.constant 0 : index
    %c0_108 = arith.constant 0 : index
    %184 = vector.load %arg5[%c19, %c0_107, %c0_108] : memref<81x64x64xf32, #tpu.memory_space<vmem>>, vector<1x64x64xf32>
    %185 = vector.shape_cast %184 : vector<1x64x64xf32> to vector<64x64xf32>
    %cst_109 = arith.constant dense<0.000000e+00> : vector<64x64xf32>
    %186 = tpu.matmul %183, %185, %cst_109 {dimension_numbers = #tpu.dot_dimension_numbers<[1], [0], [0], [1], [0, 0, 1, 1], [], []>} : vector<64x64xf32>, vector<64x64xf32>, vector<64x64xf32> -> vector<64x64xf32>
    %187 = arith.addf %169, %186 : vector<64x64xf32>
    %c2_i32_110 = arith.constant 2 : i32
    %188 = tpu.dynamic_rotate %171 by %c2_i32_110 dim 0 : vector<192x64xf32>, i32 -> vector<192x64xf32>
    %189 = vector.shape_cast %188 : vector<192x64xf32> to vector<8x24x64xf32>
    %190 = vector.extract_strided_slice %189 {offsets = [0, 8, 0], sizes = [8, 8, 64], strides = [1, 1, 1]} : vector<8x24x64xf32> to vector<8x8x64xf32>
    %191 = vector.shape_cast %190 : vector<8x8x64xf32> to vector<64x64xf32>
    %c20 = arith.constant 20 : index
    %c0_111 = arith.constant 0 : index
    %c0_112 = arith.constant 0 : index
    %192 = vector.load %arg5[%c20, %c0_111, %c0_112] : memref<81x64x64xf32, #tpu.memory_space<vmem>>, vector<1x64x64xf32>
    %193 = vector.shape_cast %192 : vector<1x64x64xf32> to vector<64x64xf32>
    %cst_113 = arith.constant dense<0.000000e+00> : vector<64x64xf32>
    %194 = tpu.matmul %191, %193, %cst_113 {dimension_numbers = #tpu.dot_dimension_numbers<[1], [0], [0], [1], [0, 0, 1, 1], [], []>} : vector<64x64xf32>, vector<64x64xf32>, vector<64x64xf32> -> vector<64x64xf32>
    %195 = arith.addf %179, %194 : vector<64x64xf32>
    %c1_i32_114 = arith.constant 1 : i32
    %196 = tpu.dynamic_rotate %171 by %c1_i32_114 dim 0 : vector<192x64xf32>, i32 -> vector<192x64xf32>
    %197 = vector.shape_cast %196 : vector<192x64xf32> to vector<8x24x64xf32>
    %198 = vector.extract_strided_slice %197 {offsets = [0, 8, 0], sizes = [8, 8, 64], strides = [1, 1, 1]} : vector<8x24x64xf32> to vector<8x8x64xf32>
    %199 = vector.shape_cast %198 : vector<8x8x64xf32> to vector<64x64xf32>
    %c21 = arith.constant 21 : index
    %c0_115 = arith.constant 0 : index
    %c0_116 = arith.constant 0 : index
    %200 = vector.load %arg5[%c21, %c0_115, %c0_116] : memref<81x64x64xf32, #tpu.memory_space<vmem>>, vector<1x64x64xf32>
    %201 = vector.shape_cast %200 : vector<1x64x64xf32> to vector<64x64xf32>
    %cst_117 = arith.constant dense<0.000000e+00> : vector<64x64xf32>
    %202 = tpu.matmul %199, %201, %cst_117 {dimension_numbers = #tpu.dot_dimension_numbers<[1], [0], [0], [1], [0, 0, 1, 1], [], []>} : vector<64x64xf32>, vector<64x64xf32>, vector<64x64xf32> -> vector<64x64xf32>
    %203 = arith.addf %187, %202 : vector<64x64xf32>
    %204 = vector.shape_cast %171 : vector<192x64xf32> to vector<8x24x64xf32>
    %205 = vector.extract_strided_slice %204 {offsets = [0, 8, 0], sizes = [8, 8, 64], strides = [1, 1, 1]} : vector<8x24x64xf32> to vector<8x8x64xf32>
    %206 = vector.shape_cast %205 : vector<8x8x64xf32> to vector<64x64xf32>
    %c22 = arith.constant 22 : index
    %c0_118 = arith.constant 0 : index
    %c0_119 = arith.constant 0 : index
    %207 = vector.load %arg5[%c22, %c0_118, %c0_119] : memref<81x64x64xf32, #tpu.memory_space<vmem>>, vector<1x64x64xf32>
    %208 = vector.shape_cast %207 : vector<1x64x64xf32> to vector<64x64xf32>
    %cst_120 = arith.constant dense<0.000000e+00> : vector<64x64xf32>
    %209 = tpu.matmul %206, %208, %cst_120 {dimension_numbers = #tpu.dot_dimension_numbers<[1], [0], [0], [1], [0, 0, 1, 1], [], []>} : vector<64x64xf32>, vector<64x64xf32>, vector<64x64xf32> -> vector<64x64xf32>
    %210 = arith.addf %195, %209 : vector<64x64xf32>
    %c191_i32_121 = arith.constant 191 : i32
    %211 = tpu.dynamic_rotate %171 by %c191_i32_121 dim 0 : vector<192x64xf32>, i32 -> vector<192x64xf32>
    %212 = vector.shape_cast %211 : vector<192x64xf32> to vector<8x24x64xf32>
    %213 = vector.extract_strided_slice %212 {offsets = [0, 8, 0], sizes = [8, 8, 64], strides = [1, 1, 1]} : vector<8x24x64xf32> to vector<8x8x64xf32>
    %214 = vector.shape_cast %213 : vector<8x8x64xf32> to vector<64x64xf32>
    %c23 = arith.constant 23 : index
    %c0_122 = arith.constant 0 : index
    %c0_123 = arith.constant 0 : index
    %215 = vector.load %arg5[%c23, %c0_122, %c0_123] : memref<81x64x64xf32, #tpu.memory_space<vmem>>, vector<1x64x64xf32>
    %216 = vector.shape_cast %215 : vector<1x64x64xf32> to vector<64x64xf32>
    %cst_124 = arith.constant dense<0.000000e+00> : vector<64x64xf32>
    %217 = tpu.matmul %214, %216, %cst_124 {dimension_numbers = #tpu.dot_dimension_numbers<[1], [0], [0], [1], [0, 0, 1, 1], [], []>} : vector<64x64xf32>, vector<64x64xf32>, vector<64x64xf32> -> vector<64x64xf32>
    %218 = arith.addf %203, %217 : vector<64x64xf32>
    %c190_i32_125 = arith.constant 190 : i32
    %219 = tpu.dynamic_rotate %171 by %c190_i32_125 dim 0 : vector<192x64xf32>, i32 -> vector<192x64xf32>
    %220 = vector.shape_cast %219 : vector<192x64xf32> to vector<8x24x64xf32>
    %221 = vector.extract_strided_slice %220 {offsets = [0, 8, 0], sizes = [8, 8, 64], strides = [1, 1, 1]} : vector<8x24x64xf32> to vector<8x8x64xf32>
    %222 = vector.shape_cast %221 : vector<8x8x64xf32> to vector<64x64xf32>
    %c24 = arith.constant 24 : index
    %c0_126 = arith.constant 0 : index
    %c0_127 = arith.constant 0 : index
    %223 = vector.load %arg5[%c24, %c0_126, %c0_127] : memref<81x64x64xf32, #tpu.memory_space<vmem>>, vector<1x64x64xf32>
    %224 = vector.shape_cast %223 : vector<1x64x64xf32> to vector<64x64xf32>
    %cst_128 = arith.constant dense<0.000000e+00> : vector<64x64xf32>
    %225 = tpu.matmul %222, %224, %cst_128 {dimension_numbers = #tpu.dot_dimension_numbers<[1], [0], [0], [1], [0, 0, 1, 1], [], []>} : vector<64x64xf32>, vector<64x64xf32>, vector<64x64xf32> -> vector<64x64xf32>
    %226 = arith.addf %210, %225 : vector<64x64xf32>
    %c189_i32_129 = arith.constant 189 : i32
    %227 = tpu.dynamic_rotate %171 by %c189_i32_129 dim 0 : vector<192x64xf32>, i32 -> vector<192x64xf32>
    %228 = vector.shape_cast %227 : vector<192x64xf32> to vector<8x24x64xf32>
    %229 = vector.extract_strided_slice %228 {offsets = [0, 8, 0], sizes = [8, 8, 64], strides = [1, 1, 1]} : vector<8x24x64xf32> to vector<8x8x64xf32>
    %230 = vector.shape_cast %229 : vector<8x8x64xf32> to vector<64x64xf32>
    %c25 = arith.constant 25 : index
    %c0_130 = arith.constant 0 : index
    %c0_131 = arith.constant 0 : index
    %231 = vector.load %arg5[%c25, %c0_130, %c0_131] : memref<81x64x64xf32, #tpu.memory_space<vmem>>, vector<1x64x64xf32>
    %232 = vector.shape_cast %231 : vector<1x64x64xf32> to vector<64x64xf32>
    %cst_132 = arith.constant dense<0.000000e+00> : vector<64x64xf32>
    %233 = tpu.matmul %230, %232, %cst_132 {dimension_numbers = #tpu.dot_dimension_numbers<[1], [0], [0], [1], [0, 0, 1, 1], [], []>} : vector<64x64xf32>, vector<64x64xf32>, vector<64x64xf32> -> vector<64x64xf32>
    %234 = arith.addf %218, %233 : vector<64x64xf32>
    %c188_i32_133 = arith.constant 188 : i32
    %235 = tpu.dynamic_rotate %171 by %c188_i32_133 dim 0 : vector<192x64xf32>, i32 -> vector<192x64xf32>
    %236 = vector.shape_cast %235 : vector<192x64xf32> to vector<8x24x64xf32>
    %237 = vector.extract_strided_slice %236 {offsets = [0, 8, 0], sizes = [8, 8, 64], strides = [1, 1, 1]} : vector<8x24x64xf32> to vector<8x8x64xf32>
    %238 = vector.shape_cast %237 : vector<8x8x64xf32> to vector<64x64xf32>
    %c26 = arith.constant 26 : index
    %c0_134 = arith.constant 0 : index
    %c0_135 = arith.constant 0 : index
    %239 = vector.load %arg5[%c26, %c0_134, %c0_135] : memref<81x64x64xf32, #tpu.memory_space<vmem>>, vector<1x64x64xf32>
    %240 = vector.shape_cast %239 : vector<1x64x64xf32> to vector<64x64xf32>
    %cst_136 = arith.constant dense<0.000000e+00> : vector<64x64xf32>
    %241 = tpu.matmul %238, %240, %cst_136 {dimension_numbers = #tpu.dot_dimension_numbers<[1], [0], [0], [1], [0, 0, 1, 1], [], []>} : vector<64x64xf32>, vector<64x64xf32>, vector<64x64xf32> -> vector<64x64xf32>
    %242 = arith.addf %226, %241 : vector<64x64xf32>
    %c3_137 = arith.constant 3 : index
    %c0_138 = arith.constant 0 : index
    %c0_139 = arith.constant 0 : index
    %243 = vector.load %arg13[%c3_137, %c0_138, %c0_139] : memref<16x24x64xf32, #tpu.memory_space<vmem>>, vector<8x24x64xf32>
    %244 = vector.shape_cast %243 : vector<8x24x64xf32> to vector<192x64xf32>
    %c4_i32_140 = arith.constant 4 : i32
    %245 = tpu.dynamic_rotate %244 by %c4_i32_140 dim 0 : vector<192x64xf32>, i32 -> vector<192x64xf32>
    %246 = vector.shape_cast %245 : vector<192x64xf32> to vector<8x24x64xf32>
    %247 = vector.extract_strided_slice %246 {offsets = [0, 8, 0], sizes = [8, 8, 64], strides = [1, 1, 1]} : vector<8x24x64xf32> to vector<8x8x64xf32>
    %248 = vector.shape_cast %247 : vector<8x8x64xf32> to vector<64x64xf32>
    %c27 = arith.constant 27 : index
    %c0_141 = arith.constant 0 : index
    %c0_142 = arith.constant 0 : index
    %249 = vector.load %arg5[%c27, %c0_141, %c0_142] : memref<81x64x64xf32, #tpu.memory_space<vmem>>, vector<1x64x64xf32>
    %250 = vector.shape_cast %249 : vector<1x64x64xf32> to vector<64x64xf32>
    %cst_143 = arith.constant dense<0.000000e+00> : vector<64x64xf32>
    %251 = tpu.matmul %248, %250, %cst_143 {dimension_numbers = #tpu.dot_dimension_numbers<[1], [0], [0], [1], [0, 0, 1, 1], [], []>} : vector<64x64xf32>, vector<64x64xf32>, vector<64x64xf32> -> vector<64x64xf32>
    %252 = arith.addf %234, %251 : vector<64x64xf32>
    %c3_i32_144 = arith.constant 3 : i32
    %253 = tpu.dynamic_rotate %244 by %c3_i32_144 dim 0 : vector<192x64xf32>, i32 -> vector<192x64xf32>
    %254 = vector.shape_cast %253 : vector<192x64xf32> to vector<8x24x64xf32>
    %255 = vector.extract_strided_slice %254 {offsets = [0, 8, 0], sizes = [8, 8, 64], strides = [1, 1, 1]} : vector<8x24x64xf32> to vector<8x8x64xf32>
    %256 = vector.shape_cast %255 : vector<8x8x64xf32> to vector<64x64xf32>
    %c28 = arith.constant 28 : index
    %c0_145 = arith.constant 0 : index
    %c0_146 = arith.constant 0 : index
    %257 = vector.load %arg5[%c28, %c0_145, %c0_146] : memref<81x64x64xf32, #tpu.memory_space<vmem>>, vector<1x64x64xf32>
    %258 = vector.shape_cast %257 : vector<1x64x64xf32> to vector<64x64xf32>
    %cst_147 = arith.constant dense<0.000000e+00> : vector<64x64xf32>
    %259 = tpu.matmul %256, %258, %cst_147 {dimension_numbers = #tpu.dot_dimension_numbers<[1], [0], [0], [1], [0, 0, 1, 1], [], []>} : vector<64x64xf32>, vector<64x64xf32>, vector<64x64xf32> -> vector<64x64xf32>
    %260 = arith.addf %242, %259 : vector<64x64xf32>
    %c2_i32_148 = arith.constant 2 : i32
    %261 = tpu.dynamic_rotate %244 by %c2_i32_148 dim 0 : vector<192x64xf32>, i32 -> vector<192x64xf32>
    %262 = vector.shape_cast %261 : vector<192x64xf32> to vector<8x24x64xf32>
    %263 = vector.extract_strided_slice %262 {offsets = [0, 8, 0], sizes = [8, 8, 64], strides = [1, 1, 1]} : vector<8x24x64xf32> to vector<8x8x64xf32>
    %264 = vector.shape_cast %263 : vector<8x8x64xf32> to vector<64x64xf32>
    %c29 = arith.constant 29 : index
    %c0_149 = arith.constant 0 : index
    %c0_150 = arith.constant 0 : index
    %265 = vector.load %arg5[%c29, %c0_149, %c0_150] : memref<81x64x64xf32, #tpu.memory_space<vmem>>, vector<1x64x64xf32>
    %266 = vector.shape_cast %265 : vector<1x64x64xf32> to vector<64x64xf32>
    %cst_151 = arith.constant dense<0.000000e+00> : vector<64x64xf32>
    %267 = tpu.matmul %264, %266, %cst_151 {dimension_numbers = #tpu.dot_dimension_numbers<[1], [0], [0], [1], [0, 0, 1, 1], [], []>} : vector<64x64xf32>, vector<64x64xf32>, vector<64x64xf32> -> vector<64x64xf32>
    %268 = arith.addf %252, %267 : vector<64x64xf32>
    %c1_i32_152 = arith.constant 1 : i32
    %269 = tpu.dynamic_rotate %244 by %c1_i32_152 dim 0 : vector<192x64xf32>, i32 -> vector<192x64xf32>
    %270 = vector.shape_cast %269 : vector<192x64xf32> to vector<8x24x64xf32>
    %271 = vector.extract_strided_slice %270 {offsets = [0, 8, 0], sizes = [8, 8, 64], strides = [1, 1, 1]} : vector<8x24x64xf32> to vector<8x8x64xf32>
    %272 = vector.shape_cast %271 : vector<8x8x64xf32> to vector<64x64xf32>
    %c30 = arith.constant 30 : index
    %c0_153 = arith.constant 0 : index
    %c0_154 = arith.constant 0 : index
    %273 = vector.load %arg5[%c30, %c0_153, %c0_154] : memref<81x64x64xf32, #tpu.memory_space<vmem>>, vector<1x64x64xf32>
    %274 = vector.shape_cast %273 : vector<1x64x64xf32> to vector<64x64xf32>
    %cst_155 = arith.constant dense<0.000000e+00> : vector<64x64xf32>
    %275 = tpu.matmul %272, %274, %cst_155 {dimension_numbers = #tpu.dot_dimension_numbers<[1], [0], [0], [1], [0, 0, 1, 1], [], []>} : vector<64x64xf32>, vector<64x64xf32>, vector<64x64xf32> -> vector<64x64xf32>
    %276 = arith.addf %260, %275 : vector<64x64xf32>
    %277 = vector.shape_cast %244 : vector<192x64xf32> to vector<8x24x64xf32>
    %278 = vector.extract_strided_slice %277 {offsets = [0, 8, 0], sizes = [8, 8, 64], strides = [1, 1, 1]} : vector<8x24x64xf32> to vector<8x8x64xf32>
    %279 = vector.shape_cast %278 : vector<8x8x64xf32> to vector<64x64xf32>
    %c31 = arith.constant 31 : index
    %c0_156 = arith.constant 0 : index
    %c0_157 = arith.constant 0 : index
    %280 = vector.load %arg5[%c31, %c0_156, %c0_157] : memref<81x64x64xf32, #tpu.memory_space<vmem>>, vector<1x64x64xf32>
    %281 = vector.shape_cast %280 : vector<1x64x64xf32> to vector<64x64xf32>
    %cst_158 = arith.constant dense<0.000000e+00> : vector<64x64xf32>
    %282 = tpu.matmul %279, %281, %cst_158 {dimension_numbers = #tpu.dot_dimension_numbers<[1], [0], [0], [1], [0, 0, 1, 1], [], []>} : vector<64x64xf32>, vector<64x64xf32>, vector<64x64xf32> -> vector<64x64xf32>
    %283 = arith.addf %268, %282 : vector<64x64xf32>
    %c191_i32_159 = arith.constant 191 : i32
    %284 = tpu.dynamic_rotate %244 by %c191_i32_159 dim 0 : vector<192x64xf32>, i32 -> vector<192x64xf32>
    %285 = vector.shape_cast %284 : vector<192x64xf32> to vector<8x24x64xf32>
    %286 = vector.extract_strided_slice %285 {offsets = [0, 8, 0], sizes = [8, 8, 64], strides = [1, 1, 1]} : vector<8x24x64xf32> to vector<8x8x64xf32>
    %287 = vector.shape_cast %286 : vector<8x8x64xf32> to vector<64x64xf32>
    %c32 = arith.constant 32 : index
    %c0_160 = arith.constant 0 : index
    %c0_161 = arith.constant 0 : index
    %288 = vector.load %arg5[%c32, %c0_160, %c0_161] : memref<81x64x64xf32, #tpu.memory_space<vmem>>, vector<1x64x64xf32>
    %289 = vector.shape_cast %288 : vector<1x64x64xf32> to vector<64x64xf32>
    %cst_162 = arith.constant dense<0.000000e+00> : vector<64x64xf32>
    %290 = tpu.matmul %287, %289, %cst_162 {dimension_numbers = #tpu.dot_dimension_numbers<[1], [0], [0], [1], [0, 0, 1, 1], [], []>} : vector<64x64xf32>, vector<64x64xf32>, vector<64x64xf32> -> vector<64x64xf32>
    %291 = arith.addf %276, %290 : vector<64x64xf32>
    %c190_i32_163 = arith.constant 190 : i32
    %292 = tpu.dynamic_rotate %244 by %c190_i32_163 dim 0 : vector<192x64xf32>, i32 -> vector<192x64xf32>
    %293 = vector.shape_cast %292 : vector<192x64xf32> to vector<8x24x64xf32>
    %294 = vector.extract_strided_slice %293 {offsets = [0, 8, 0], sizes = [8, 8, 64], strides = [1, 1, 1]} : vector<8x24x64xf32> to vector<8x8x64xf32>
    %295 = vector.shape_cast %294 : vector<8x8x64xf32> to vector<64x64xf32>
    %c33 = arith.constant 33 : index
    %c0_164 = arith.constant 0 : index
    %c0_165 = arith.constant 0 : index
    %296 = vector.load %arg5[%c33, %c0_164, %c0_165] : memref<81x64x64xf32, #tpu.memory_space<vmem>>, vector<1x64x64xf32>
    %297 = vector.shape_cast %296 : vector<1x64x64xf32> to vector<64x64xf32>
    %cst_166 = arith.constant dense<0.000000e+00> : vector<64x64xf32>
    %298 = tpu.matmul %295, %297, %cst_166 {dimension_numbers = #tpu.dot_dimension_numbers<[1], [0], [0], [1], [0, 0, 1, 1], [], []>} : vector<64x64xf32>, vector<64x64xf32>, vector<64x64xf32> -> vector<64x64xf32>
    %299 = arith.addf %283, %298 : vector<64x64xf32>
    %c189_i32_167 = arith.constant 189 : i32
    %300 = tpu.dynamic_rotate %244 by %c189_i32_167 dim 0 : vector<192x64xf32>, i32 -> vector<192x64xf32>
    %301 = vector.shape_cast %300 : vector<192x64xf32> to vector<8x24x64xf32>
    %302 = vector.extract_strided_slice %301 {offsets = [0, 8, 0], sizes = [8, 8, 64], strides = [1, 1, 1]} : vector<8x24x64xf32> to vector<8x8x64xf32>
    %303 = vector.shape_cast %302 : vector<8x8x64xf32> to vector<64x64xf32>
    %c34 = arith.constant 34 : index
    %c0_168 = arith.constant 0 : index
    %c0_169 = arith.constant 0 : index
    %304 = vector.load %arg5[%c34, %c0_168, %c0_169] : memref<81x64x64xf32, #tpu.memory_space<vmem>>, vector<1x64x64xf32>
    %305 = vector.shape_cast %304 : vector<1x64x64xf32> to vector<64x64xf32>
    %cst_170 = arith.constant dense<0.000000e+00> : vector<64x64xf32>
    %306 = tpu.matmul %303, %305, %cst_170 {dimension_numbers = #tpu.dot_dimension_numbers<[1], [0], [0], [1], [0, 0, 1, 1], [], []>} : vector<64x64xf32>, vector<64x64xf32>, vector<64x64xf32> -> vector<64x64xf32>
    %307 = arith.addf %291, %306 : vector<64x64xf32>
    %c188_i32_171 = arith.constant 188 : i32
    %308 = tpu.dynamic_rotate %244 by %c188_i32_171 dim 0 : vector<192x64xf32>, i32 -> vector<192x64xf32>
    %309 = vector.shape_cast %308 : vector<192x64xf32> to vector<8x24x64xf32>
    %310 = vector.extract_strided_slice %309 {offsets = [0, 8, 0], sizes = [8, 8, 64], strides = [1, 1, 1]} : vector<8x24x64xf32> to vector<8x8x64xf32>
    %311 = vector.shape_cast %310 : vector<8x8x64xf32> to vector<64x64xf32>
    %c35 = arith.constant 35 : index
    %c0_172 = arith.constant 0 : index
    %c0_173 = arith.constant 0 : index
    %312 = vector.load %arg5[%c35, %c0_172, %c0_173] : memref<81x64x64xf32, #tpu.memory_space<vmem>>, vector<1x64x64xf32>
    %313 = vector.shape_cast %312 : vector<1x64x64xf32> to vector<64x64xf32>
    %cst_174 = arith.constant dense<0.000000e+00> : vector<64x64xf32>
    %314 = tpu.matmul %311, %313, %cst_174 {dimension_numbers = #tpu.dot_dimension_numbers<[1], [0], [0], [1], [0, 0, 1, 1], [], []>} : vector<64x64xf32>, vector<64x64xf32>, vector<64x64xf32> -> vector<64x64xf32>
    %315 = arith.addf %299, %314 : vector<64x64xf32>
    %c4_175 = arith.constant 4 : index
    %c0_176 = arith.constant 0 : index
    %c0_177 = arith.constant 0 : index
    %316 = vector.load %arg13[%c4_175, %c0_176, %c0_177] : memref<16x24x64xf32, #tpu.memory_space<vmem>>, vector<8x24x64xf32>
    %317 = vector.shape_cast %316 : vector<8x24x64xf32> to vector<192x64xf32>
    %c4_i32_178 = arith.constant 4 : i32
    %318 = tpu.dynamic_rotate %317 by %c4_i32_178 dim 0 : vector<192x64xf32>, i32 -> vector<192x64xf32>
    %319 = vector.shape_cast %318 : vector<192x64xf32> to vector<8x24x64xf32>
    %320 = vector.extract_strided_slice %319 {offsets = [0, 8, 0], sizes = [8, 8, 64], strides = [1, 1, 1]} : vector<8x24x64xf32> to vector<8x8x64xf32>
    %321 = vector.shape_cast %320 : vector<8x8x64xf32> to vector<64x64xf32>
    %c36 = arith.constant 36 : index
    %c0_179 = arith.constant 0 : index
    %c0_180 = arith.constant 0 : index
    %322 = vector.load %arg5[%c36, %c0_179, %c0_180] : memref<81x64x64xf32, #tpu.memory_space<vmem>>, vector<1x64x64xf32>
    %323 = vector.shape_cast %322 : vector<1x64x64xf32> to vector<64x64xf32>
    %cst_181 = arith.constant dense<0.000000e+00> : vector<64x64xf32>
    %324 = tpu.matmul %321, %323, %cst_181 {dimension_numbers = #tpu.dot_dimension_numbers<[1], [0], [0], [1], [0, 0, 1, 1], [], []>} : vector<64x64xf32>, vector<64x64xf32>, vector<64x64xf32> -> vector<64x64xf32>
    %325 = arith.addf %307, %324 : vector<64x64xf32>
    %c3_i32_182 = arith.constant 3 : i32
    %326 = tpu.dynamic_rotate %317 by %c3_i32_182 dim 0 : vector<192x64xf32>, i32 -> vector<192x64xf32>
    %327 = vector.shape_cast %326 : vector<192x64xf32> to vector<8x24x64xf32>
    %328 = vector.extract_strided_slice %327 {offsets = [0, 8, 0], sizes = [8, 8, 64], strides = [1, 1, 1]} : vector<8x24x64xf32> to vector<8x8x64xf32>
    %329 = vector.shape_cast %328 : vector<8x8x64xf32> to vector<64x64xf32>
    %c37 = arith.constant 37 : index
    %c0_183 = arith.constant 0 : index
    %c0_184 = arith.constant 0 : index
    %330 = vector.load %arg5[%c37, %c0_183, %c0_184] : memref<81x64x64xf32, #tpu.memory_space<vmem>>, vector<1x64x64xf32>
    %331 = vector.shape_cast %330 : vector<1x64x64xf32> to vector<64x64xf32>
    %cst_185 = arith.constant dense<0.000000e+00> : vector<64x64xf32>
    %332 = tpu.matmul %329, %331, %cst_185 {dimension_numbers = #tpu.dot_dimension_numbers<[1], [0], [0], [1], [0, 0, 1, 1], [], []>} : vector<64x64xf32>, vector<64x64xf32>, vector<64x64xf32> -> vector<64x64xf32>
    %333 = arith.addf %315, %332 : vector<64x64xf32>
    %c2_i32_186 = arith.constant 2 : i32
    %334 = tpu.dynamic_rotate %317 by %c2_i32_186 dim 0 : vector<192x64xf32>, i32 -> vector<192x64xf32>
    %335 = vector.shape_cast %334 : vector<192x64xf32> to vector<8x24x64xf32>
    %336 = vector.extract_strided_slice %335 {offsets = [0, 8, 0], sizes = [8, 8, 64], strides = [1, 1, 1]} : vector<8x24x64xf32> to vector<8x8x64xf32>
    %337 = vector.shape_cast %336 : vector<8x8x64xf32> to vector<64x64xf32>
    %c38 = arith.constant 38 : index
    %c0_187 = arith.constant 0 : index
    %c0_188 = arith.constant 0 : index
    %338 = vector.load %arg5[%c38, %c0_187, %c0_188] : memref<81x64x64xf32, #tpu.memory_space<vmem>>, vector<1x64x64xf32>
    %339 = vector.shape_cast %338 : vector<1x64x64xf32> to vector<64x64xf32>
    %cst_189 = arith.constant dense<0.000000e+00> : vector<64x64xf32>
    %340 = tpu.matmul %337, %339, %cst_189 {dimension_numbers = #tpu.dot_dimension_numbers<[1], [0], [0], [1], [0, 0, 1, 1], [], []>} : vector<64x64xf32>, vector<64x64xf32>, vector<64x64xf32> -> vector<64x64xf32>
    %341 = arith.addf %325, %340 : vector<64x64xf32>
    %c1_i32_190 = arith.constant 1 : i32
    %342 = tpu.dynamic_rotate %317 by %c1_i32_190 dim 0 : vector<192x64xf32>, i32 -> vector<192x64xf32>
    %343 = vector.shape_cast %342 : vector<192x64xf32> to vector<8x24x64xf32>
    %344 = vector.extract_strided_slice %343 {offsets = [0, 8, 0], sizes = [8, 8, 64], strides = [1, 1, 1]} : vector<8x24x64xf32> to vector<8x8x64xf32>
    %345 = vector.shape_cast %344 : vector<8x8x64xf32> to vector<64x64xf32>
    %c39 = arith.constant 39 : index
    %c0_191 = arith.constant 0 : index
    %c0_192 = arith.constant 0 : index
    %346 = vector.load %arg5[%c39, %c0_191, %c0_192] : memref<81x64x64xf32, #tpu.memory_space<vmem>>, vector<1x64x64xf32>
    %347 = vector.shape_cast %346 : vector<1x64x64xf32> to vector<64x64xf32>
    %cst_193 = arith.constant dense<0.000000e+00> : vector<64x64xf32>
    %348 = tpu.matmul %345, %347, %cst_193 {dimension_numbers = #tpu.dot_dimension_numbers<[1], [0], [0], [1], [0, 0, 1, 1], [], []>} : vector<64x64xf32>, vector<64x64xf32>, vector<64x64xf32> -> vector<64x64xf32>
    %349 = arith.addf %333, %348 : vector<64x64xf32>
    %350 = vector.shape_cast %317 : vector<192x64xf32> to vector<8x24x64xf32>
    %351 = vector.extract_strided_slice %350 {offsets = [0, 8, 0], sizes = [8, 8, 64], strides = [1, 1, 1]} : vector<8x24x64xf32> to vector<8x8x64xf32>
    %352 = vector.shape_cast %351 : vector<8x8x64xf32> to vector<64x64xf32>
    %c40 = arith.constant 40 : index
    %c0_194 = arith.constant 0 : index
    %c0_195 = arith.constant 0 : index
    %353 = vector.load %arg5[%c40, %c0_194, %c0_195] : memref<81x64x64xf32, #tpu.memory_space<vmem>>, vector<1x64x64xf32>
    %354 = vector.shape_cast %353 : vector<1x64x64xf32> to vector<64x64xf32>
    %cst_196 = arith.constant dense<0.000000e+00> : vector<64x64xf32>
    %355 = tpu.matmul %352, %354, %cst_196 {dimension_numbers = #tpu.dot_dimension_numbers<[1], [0], [0], [1], [0, 0, 1, 1], [], []>} : vector<64x64xf32>, vector<64x64xf32>, vector<64x64xf32> -> vector<64x64xf32>
    %356 = arith.addf %341, %355 : vector<64x64xf32>
    %c191_i32_197 = arith.constant 191 : i32
    %357 = tpu.dynamic_rotate %317 by %c191_i32_197 dim 0 : vector<192x64xf32>, i32 -> vector<192x64xf32>
    %358 = vector.shape_cast %357 : vector<192x64xf32> to vector<8x24x64xf32>
    %359 = vector.extract_strided_slice %358 {offsets = [0, 8, 0], sizes = [8, 8, 64], strides = [1, 1, 1]} : vector<8x24x64xf32> to vector<8x8x64xf32>
    %360 = vector.shape_cast %359 : vector<8x8x64xf32> to vector<64x64xf32>
    %c41 = arith.constant 41 : index
    %c0_198 = arith.constant 0 : index
    %c0_199 = arith.constant 0 : index
    %361 = vector.load %arg5[%c41, %c0_198, %c0_199] : memref<81x64x64xf32, #tpu.memory_space<vmem>>, vector<1x64x64xf32>
    %362 = vector.shape_cast %361 : vector<1x64x64xf32> to vector<64x64xf32>
    %cst_200 = arith.constant dense<0.000000e+00> : vector<64x64xf32>
    %363 = tpu.matmul %360, %362, %cst_200 {dimension_numbers = #tpu.dot_dimension_numbers<[1], [0], [0], [1], [0, 0, 1, 1], [], []>} : vector<64x64xf32>, vector<64x64xf32>, vector<64x64xf32> -> vector<64x64xf32>
    %364 = arith.addf %349, %363 : vector<64x64xf32>
    %c190_i32_201 = arith.constant 190 : i32
    %365 = tpu.dynamic_rotate %317 by %c190_i32_201 dim 0 : vector<192x64xf32>, i32 -> vector<192x64xf32>
    %366 = vector.shape_cast %365 : vector<192x64xf32> to vector<8x24x64xf32>
    %367 = vector.extract_strided_slice %366 {offsets = [0, 8, 0], sizes = [8, 8, 64], strides = [1, 1, 1]} : vector<8x24x64xf32> to vector<8x8x64xf32>
    %368 = vector.shape_cast %367 : vector<8x8x64xf32> to vector<64x64xf32>
    %c42 = arith.constant 42 : index
    %c0_202 = arith.constant 0 : index
    %c0_203 = arith.constant 0 : index
    %369 = vector.load %arg5[%c42, %c0_202, %c0_203] : memref<81x64x64xf32, #tpu.memory_space<vmem>>, vector<1x64x64xf32>
    %370 = vector.shape_cast %369 : vector<1x64x64xf32> to vector<64x64xf32>
    %cst_204 = arith.constant dense<0.000000e+00> : vector<64x64xf32>
    %371 = tpu.matmul %368, %370, %cst_204 {dimension_numbers = #tpu.dot_dimension_numbers<[1], [0], [0], [1], [0, 0, 1, 1], [], []>} : vector<64x64xf32>, vector<64x64xf32>, vector<64x64xf32> -> vector<64x64xf32>
    %372 = arith.addf %356, %371 : vector<64x64xf32>
    %c189_i32_205 = arith.constant 189 : i32
    %373 = tpu.dynamic_rotate %317 by %c189_i32_205 dim 0 : vector<192x64xf32>, i32 -> vector<192x64xf32>
    %374 = vector.shape_cast %373 : vector<192x64xf32> to vector<8x24x64xf32>
    %375 = vector.extract_strided_slice %374 {offsets = [0, 8, 0], sizes = [8, 8, 64], strides = [1, 1, 1]} : vector<8x24x64xf32> to vector<8x8x64xf32>
    %376 = vector.shape_cast %375 : vector<8x8x64xf32> to vector<64x64xf32>
    %c43 = arith.constant 43 : index
    %c0_206 = arith.constant 0 : index
    %c0_207 = arith.constant 0 : index
    %377 = vector.load %arg5[%c43, %c0_206, %c0_207] : memref<81x64x64xf32, #tpu.memory_space<vmem>>, vector<1x64x64xf32>
    %378 = vector.shape_cast %377 : vector<1x64x64xf32> to vector<64x64xf32>
    %cst_208 = arith.constant dense<0.000000e+00> : vector<64x64xf32>
    %379 = tpu.matmul %376, %378, %cst_208 {dimension_numbers = #tpu.dot_dimension_numbers<[1], [0], [0], [1], [0, 0, 1, 1], [], []>} : vector<64x64xf32>, vector<64x64xf32>, vector<64x64xf32> -> vector<64x64xf32>
    %380 = arith.addf %364, %379 : vector<64x64xf32>
    %c188_i32_209 = arith.constant 188 : i32
    %381 = tpu.dynamic_rotate %317 by %c188_i32_209 dim 0 : vector<192x64xf32>, i32 -> vector<192x64xf32>
    %382 = vector.shape_cast %381 : vector<192x64xf32> to vector<8x24x64xf32>
    %383 = vector.extract_strided_slice %382 {offsets = [0, 8, 0], sizes = [8, 8, 64], strides = [1, 1, 1]} : vector<8x24x64xf32> to vector<8x8x64xf32>
    %384 = vector.shape_cast %383 : vector<8x8x64xf32> to vector<64x64xf32>
    %c44 = arith.constant 44 : index
    %c0_210 = arith.constant 0 : index
    %c0_211 = arith.constant 0 : index
    %385 = vector.load %arg5[%c44, %c0_210, %c0_211] : memref<81x64x64xf32, #tpu.memory_space<vmem>>, vector<1x64x64xf32>
    %386 = vector.shape_cast %385 : vector<1x64x64xf32> to vector<64x64xf32>
    %cst_212 = arith.constant dense<0.000000e+00> : vector<64x64xf32>
    %387 = tpu.matmul %384, %386, %cst_212 {dimension_numbers = #tpu.dot_dimension_numbers<[1], [0], [0], [1], [0, 0, 1, 1], [], []>} : vector<64x64xf32>, vector<64x64xf32>, vector<64x64xf32> -> vector<64x64xf32>
    %388 = arith.addf %372, %387 : vector<64x64xf32>
    %c5_213 = arith.constant 5 : index
    %c0_214 = arith.constant 0 : index
    %c0_215 = arith.constant 0 : index
    %389 = vector.load %arg13[%c5_213, %c0_214, %c0_215] : memref<16x24x64xf32, #tpu.memory_space<vmem>>, vector<8x24x64xf32>
    %390 = vector.shape_cast %389 : vector<8x24x64xf32> to vector<192x64xf32>
    %c4_i32_216 = arith.constant 4 : i32
    %391 = tpu.dynamic_rotate %390 by %c4_i32_216 dim 0 : vector<192x64xf32>, i32 -> vector<192x64xf32>
    %392 = vector.shape_cast %391 : vector<192x64xf32> to vector<8x24x64xf32>
    %393 = vector.extract_strided_slice %392 {offsets = [0, 8, 0], sizes = [8, 8, 64], strides = [1, 1, 1]} : vector<8x24x64xf32> to vector<8x8x64xf32>
    %394 = vector.shape_cast %393 : vector<8x8x64xf32> to vector<64x64xf32>
    %c45 = arith.constant 45 : index
    %c0_217 = arith.constant 0 : index
    %c0_218 = arith.constant 0 : index
    %395 = vector.load %arg5[%c45, %c0_217, %c0_218] : memref<81x64x64xf32, #tpu.memory_space<vmem>>, vector<1x64x64xf32>
    %396 = vector.shape_cast %395 : vector<1x64x64xf32> to vector<64x64xf32>
    %cst_219 = arith.constant dense<0.000000e+00> : vector<64x64xf32>
    %397 = tpu.matmul %394, %396, %cst_219 {dimension_numbers = #tpu.dot_dimension_numbers<[1], [0], [0], [1], [0, 0, 1, 1], [], []>} : vector<64x64xf32>, vector<64x64xf32>, vector<64x64xf32> -> vector<64x64xf32>
    %398 = arith.addf %380, %397 : vector<64x64xf32>
    %c3_i32_220 = arith.constant 3 : i32
    %399 = tpu.dynamic_rotate %390 by %c3_i32_220 dim 0 : vector<192x64xf32>, i32 -> vector<192x64xf32>
    %400 = vector.shape_cast %399 : vector<192x64xf32> to vector<8x24x64xf32>
    %401 = vector.extract_strided_slice %400 {offsets = [0, 8, 0], sizes = [8, 8, 64], strides = [1, 1, 1]} : vector<8x24x64xf32> to vector<8x8x64xf32>
    %402 = vector.shape_cast %401 : vector<8x8x64xf32> to vector<64x64xf32>
    %c46 = arith.constant 46 : index
    %c0_221 = arith.constant 0 : index
    %c0_222 = arith.constant 0 : index
    %403 = vector.load %arg5[%c46, %c0_221, %c0_222] : memref<81x64x64xf32, #tpu.memory_space<vmem>>, vector<1x64x64xf32>
    %404 = vector.shape_cast %403 : vector<1x64x64xf32> to vector<64x64xf32>
    %cst_223 = arith.constant dense<0.000000e+00> : vector<64x64xf32>
    %405 = tpu.matmul %402, %404, %cst_223 {dimension_numbers = #tpu.dot_dimension_numbers<[1], [0], [0], [1], [0, 0, 1, 1], [], []>} : vector<64x64xf32>, vector<64x64xf32>, vector<64x64xf32> -> vector<64x64xf32>
    %406 = arith.addf %388, %405 : vector<64x64xf32>
    %c2_i32_224 = arith.constant 2 : i32
    %407 = tpu.dynamic_rotate %390 by %c2_i32_224 dim 0 : vector<192x64xf32>, i32 -> vector<192x64xf32>
    %408 = vector.shape_cast %407 : vector<192x64xf32> to vector<8x24x64xf32>
    %409 = vector.extract_strided_slice %408 {offsets = [0, 8, 0], sizes = [8, 8, 64], strides = [1, 1, 1]} : vector<8x24x64xf32> to vector<8x8x64xf32>
    %410 = vector.shape_cast %409 : vector<8x8x64xf32> to vector<64x64xf32>
    %c47 = arith.constant 47 : index
    %c0_225 = arith.constant 0 : index
    %c0_226 = arith.constant 0 : index
    %411 = vector.load %arg5[%c47, %c0_225, %c0_226] : memref<81x64x64xf32, #tpu.memory_space<vmem>>, vector<1x64x64xf32>
    %412 = vector.shape_cast %411 : vector<1x64x64xf32> to vector<64x64xf32>
    %cst_227 = arith.constant dense<0.000000e+00> : vector<64x64xf32>
    %413 = tpu.matmul %410, %412, %cst_227 {dimension_numbers = #tpu.dot_dimension_numbers<[1], [0], [0], [1], [0, 0, 1, 1], [], []>} : vector<64x64xf32>, vector<64x64xf32>, vector<64x64xf32> -> vector<64x64xf32>
    %414 = arith.addf %398, %413 : vector<64x64xf32>
    %c1_i32_228 = arith.constant 1 : i32
    %415 = tpu.dynamic_rotate %390 by %c1_i32_228 dim 0 : vector<192x64xf32>, i32 -> vector<192x64xf32>
    %416 = vector.shape_cast %415 : vector<192x64xf32> to vector<8x24x64xf32>
    %417 = vector.extract_strided_slice %416 {offsets = [0, 8, 0], sizes = [8, 8, 64], strides = [1, 1, 1]} : vector<8x24x64xf32> to vector<8x8x64xf32>
    %418 = vector.shape_cast %417 : vector<8x8x64xf32> to vector<64x64xf32>
    %c48 = arith.constant 48 : index
    %c0_229 = arith.constant 0 : index
    %c0_230 = arith.constant 0 : index
    %419 = vector.load %arg5[%c48, %c0_229, %c0_230] : memref<81x64x64xf32, #tpu.memory_space<vmem>>, vector<1x64x64xf32>
    %420 = vector.shape_cast %419 : vector<1x64x64xf32> to vector<64x64xf32>
    %cst_231 = arith.constant dense<0.000000e+00> : vector<64x64xf32>
    %421 = tpu.matmul %418, %420, %cst_231 {dimension_numbers = #tpu.dot_dimension_numbers<[1], [0], [0], [1], [0, 0, 1, 1], [], []>} : vector<64x64xf32>, vector<64x64xf32>, vector<64x64xf32> -> vector<64x64xf32>
    %422 = arith.addf %406, %421 : vector<64x64xf32>
    %423 = vector.shape_cast %390 : vector<192x64xf32> to vector<8x24x64xf32>
    %424 = vector.extract_strided_slice %423 {offsets = [0, 8, 0], sizes = [8, 8, 64], strides = [1, 1, 1]} : vector<8x24x64xf32> to vector<8x8x64xf32>
    %425 = vector.shape_cast %424 : vector<8x8x64xf32> to vector<64x64xf32>
    %c49 = arith.constant 49 : index
    %c0_232 = arith.constant 0 : index
    %c0_233 = arith.constant 0 : index
    %426 = vector.load %arg5[%c49, %c0_232, %c0_233] : memref<81x64x64xf32, #tpu.memory_space<vmem>>, vector<1x64x64xf32>
    %427 = vector.shape_cast %426 : vector<1x64x64xf32> to vector<64x64xf32>
    %cst_234 = arith.constant dense<0.000000e+00> : vector<64x64xf32>
    %428 = tpu.matmul %425, %427, %cst_234 {dimension_numbers = #tpu.dot_dimension_numbers<[1], [0], [0], [1], [0, 0, 1, 1], [], []>} : vector<64x64xf32>, vector<64x64xf32>, vector<64x64xf32> -> vector<64x64xf32>
    %429 = arith.addf %414, %428 : vector<64x64xf32>
    %c191_i32_235 = arith.constant 191 : i32
    %430 = tpu.dynamic_rotate %390 by %c191_i32_235 dim 0 : vector<192x64xf32>, i32 -> vector<192x64xf32>
    %431 = vector.shape_cast %430 : vector<192x64xf32> to vector<8x24x64xf32>
    %432 = vector.extract_strided_slice %431 {offsets = [0, 8, 0], sizes = [8, 8, 64], strides = [1, 1, 1]} : vector<8x24x64xf32> to vector<8x8x64xf32>
    %433 = vector.shape_cast %432 : vector<8x8x64xf32> to vector<64x64xf32>
    %c50 = arith.constant 50 : index
    %c0_236 = arith.constant 0 : index
    %c0_237 = arith.constant 0 : index
    %434 = vector.load %arg5[%c50, %c0_236, %c0_237] : memref<81x64x64xf32, #tpu.memory_space<vmem>>, vector<1x64x64xf32>
    %435 = vector.shape_cast %434 : vector<1x64x64xf32> to vector<64x64xf32>
    %cst_238 = arith.constant dense<0.000000e+00> : vector<64x64xf32>
    %436 = tpu.matmul %433, %435, %cst_238 {dimension_numbers = #tpu.dot_dimension_numbers<[1], [0], [0], [1], [0, 0, 1, 1], [], []>} : vector<64x64xf32>, vector<64x64xf32>, vector<64x64xf32> -> vector<64x64xf32>
    %437 = arith.addf %422, %436 : vector<64x64xf32>
    %c190_i32_239 = arith.constant 190 : i32
    %438 = tpu.dynamic_rotate %390 by %c190_i32_239 dim 0 : vector<192x64xf32>, i32 -> vector<192x64xf32>
    %439 = vector.shape_cast %438 : vector<192x64xf32> to vector<8x24x64xf32>
    %440 = vector.extract_strided_slice %439 {offsets = [0, 8, 0], sizes = [8, 8, 64], strides = [1, 1, 1]} : vector<8x24x64xf32> to vector<8x8x64xf32>
    %441 = vector.shape_cast %440 : vector<8x8x64xf32> to vector<64x64xf32>
    %c51 = arith.constant 51 : index
    %c0_240 = arith.constant 0 : index
    %c0_241 = arith.constant 0 : index
    %442 = vector.load %arg5[%c51, %c0_240, %c0_241] : memref<81x64x64xf32, #tpu.memory_space<vmem>>, vector<1x64x64xf32>
    %443 = vector.shape_cast %442 : vector<1x64x64xf32> to vector<64x64xf32>
    %cst_242 = arith.constant dense<0.000000e+00> : vector<64x64xf32>
    %444 = tpu.matmul %441, %443, %cst_242 {dimension_numbers = #tpu.dot_dimension_numbers<[1], [0], [0], [1], [0, 0, 1, 1], [], []>} : vector<64x64xf32>, vector<64x64xf32>, vector<64x64xf32> -> vector<64x64xf32>
    %445 = arith.addf %429, %444 : vector<64x64xf32>
    %c189_i32_243 = arith.constant 189 : i32
    %446 = tpu.dynamic_rotate %390 by %c189_i32_243 dim 0 : vector<192x64xf32>, i32 -> vector<192x64xf32>
    %447 = vector.shape_cast %446 : vector<192x64xf32> to vector<8x24x64xf32>
    %448 = vector.extract_strided_slice %447 {offsets = [0, 8, 0], sizes = [8, 8, 64], strides = [1, 1, 1]} : vector<8x24x64xf32> to vector<8x8x64xf32>
    %449 = vector.shape_cast %448 : vector<8x8x64xf32> to vector<64x64xf32>
    %c52 = arith.constant 52 : index
    %c0_244 = arith.constant 0 : index
    %c0_245 = arith.constant 0 : index
    %450 = vector.load %arg5[%c52, %c0_244, %c0_245] : memref<81x64x64xf32, #tpu.memory_space<vmem>>, vector<1x64x64xf32>
    %451 = vector.shape_cast %450 : vector<1x64x64xf32> to vector<64x64xf32>
    %cst_246 = arith.constant dense<0.000000e+00> : vector<64x64xf32>
    %452 = tpu.matmul %449, %451, %cst_246 {dimension_numbers = #tpu.dot_dimension_numbers<[1], [0], [0], [1], [0, 0, 1, 1], [], []>} : vector<64x64xf32>, vector<64x64xf32>, vector<64x64xf32> -> vector<64x64xf32>
    %453 = arith.addf %437, %452 : vector<64x64xf32>
    %c188_i32_247 = arith.constant 188 : i32
    %454 = tpu.dynamic_rotate %390 by %c188_i32_247 dim 0 : vector<192x64xf32>, i32 -> vector<192x64xf32>
    %455 = vector.shape_cast %454 : vector<192x64xf32> to vector<8x24x64xf32>
    %456 = vector.extract_strided_slice %455 {offsets = [0, 8, 0], sizes = [8, 8, 64], strides = [1, 1, 1]} : vector<8x24x64xf32> to vector<8x8x64xf32>
    %457 = vector.shape_cast %456 : vector<8x8x64xf32> to vector<64x64xf32>
    %c53 = arith.constant 53 : index
    %c0_248 = arith.constant 0 : index
    %c0_249 = arith.constant 0 : index
    %458 = vector.load %arg5[%c53, %c0_248, %c0_249] : memref<81x64x64xf32, #tpu.memory_space<vmem>>, vector<1x64x64xf32>
    %459 = vector.shape_cast %458 : vector<1x64x64xf32> to vector<64x64xf32>
    %cst_250 = arith.constant dense<0.000000e+00> : vector<64x64xf32>
    %460 = tpu.matmul %457, %459, %cst_250 {dimension_numbers = #tpu.dot_dimension_numbers<[1], [0], [0], [1], [0, 0, 1, 1], [], []>} : vector<64x64xf32>, vector<64x64xf32>, vector<64x64xf32> -> vector<64x64xf32>
    %461 = arith.addf %445, %460 : vector<64x64xf32>
    %c6_251 = arith.constant 6 : index
    %c0_252 = arith.constant 0 : index
    %c0_253 = arith.constant 0 : index
    %462 = vector.load %arg13[%c6_251, %c0_252, %c0_253] : memref<16x24x64xf32, #tpu.memory_space<vmem>>, vector<8x24x64xf32>
    %463 = vector.shape_cast %462 : vector<8x24x64xf32> to vector<192x64xf32>
    %c4_i32_254 = arith.constant 4 : i32
    %464 = tpu.dynamic_rotate %463 by %c4_i32_254 dim 0 : vector<192x64xf32>, i32 -> vector<192x64xf32>
    %465 = vector.shape_cast %464 : vector<192x64xf32> to vector<8x24x64xf32>
    %466 = vector.extract_strided_slice %465 {offsets = [0, 8, 0], sizes = [8, 8, 64], strides = [1, 1, 1]} : vector<8x24x64xf32> to vector<8x8x64xf32>
    %467 = vector.shape_cast %466 : vector<8x8x64xf32> to vector<64x64xf32>
    %c54 = arith.constant 54 : index
    %c0_255 = arith.constant 0 : index
    %c0_256 = arith.constant 0 : index
    %468 = vector.load %arg5[%c54, %c0_255, %c0_256] : memref<81x64x64xf32, #tpu.memory_space<vmem>>, vector<1x64x64xf32>
    %469 = vector.shape_cast %468 : vector<1x64x64xf32> to vector<64x64xf32>
    %cst_257 = arith.constant dense<0.000000e+00> : vector<64x64xf32>
    %470 = tpu.matmul %467, %469, %cst_257 {dimension_numbers = #tpu.dot_dimension_numbers<[1], [0], [0], [1], [0, 0, 1, 1], [], []>} : vector<64x64xf32>, vector<64x64xf32>, vector<64x64xf32> -> vector<64x64xf32>
    %471 = arith.addf %453, %470 : vector<64x64xf32>
    %c3_i32_258 = arith.constant 3 : i32
    %472 = tpu.dynamic_rotate %463 by %c3_i32_258 dim 0 : vector<192x64xf32>, i32 -> vector<192x64xf32>
    %473 = vector.shape_cast %472 : vector<192x64xf32> to vector<8x24x64xf32>
    %474 = vector.extract_strided_slice %473 {offsets = [0, 8, 0], sizes = [8, 8, 64], strides = [1, 1, 1]} : vector<8x24x64xf32> to vector<8x8x64xf32>
    %475 = vector.shape_cast %474 : vector<8x8x64xf32> to vector<64x64xf32>
    %c55 = arith.constant 55 : index
    %c0_259 = arith.constant 0 : index
    %c0_260 = arith.constant 0 : index
    %476 = vector.load %arg5[%c55, %c0_259, %c0_260] : memref<81x64x64xf32, #tpu.memory_space<vmem>>, vector<1x64x64xf32>
    %477 = vector.shape_cast %476 : vector<1x64x64xf32> to vector<64x64xf32>
    %cst_261 = arith.constant dense<0.000000e+00> : vector<64x64xf32>
    %478 = tpu.matmul %475, %477, %cst_261 {dimension_numbers = #tpu.dot_dimension_numbers<[1], [0], [0], [1], [0, 0, 1, 1], [], []>} : vector<64x64xf32>, vector<64x64xf32>, vector<64x64xf32> -> vector<64x64xf32>
    %479 = arith.addf %461, %478 : vector<64x64xf32>
    %c2_i32_262 = arith.constant 2 : i32
    %480 = tpu.dynamic_rotate %463 by %c2_i32_262 dim 0 : vector<192x64xf32>, i32 -> vector<192x64xf32>
    %481 = vector.shape_cast %480 : vector<192x64xf32> to vector<8x24x64xf32>
    %482 = vector.extract_strided_slice %481 {offsets = [0, 8, 0], sizes = [8, 8, 64], strides = [1, 1, 1]} : vector<8x24x64xf32> to vector<8x8x64xf32>
    %483 = vector.shape_cast %482 : vector<8x8x64xf32> to vector<64x64xf32>
    %c56 = arith.constant 56 : index
    %c0_263 = arith.constant 0 : index
    %c0_264 = arith.constant 0 : index
    %484 = vector.load %arg5[%c56, %c0_263, %c0_264] : memref<81x64x64xf32, #tpu.memory_space<vmem>>, vector<1x64x64xf32>
    %485 = vector.shape_cast %484 : vector<1x64x64xf32> to vector<64x64xf32>
    %cst_265 = arith.constant dense<0.000000e+00> : vector<64x64xf32>
    %486 = tpu.matmul %483, %485, %cst_265 {dimension_numbers = #tpu.dot_dimension_numbers<[1], [0], [0], [1], [0, 0, 1, 1], [], []>} : vector<64x64xf32>, vector<64x64xf32>, vector<64x64xf32> -> vector<64x64xf32>
    %487 = arith.addf %471, %486 : vector<64x64xf32>
    %c1_i32_266 = arith.constant 1 : i32
    %488 = tpu.dynamic_rotate %463 by %c1_i32_266 dim 0 : vector<192x64xf32>, i32 -> vector<192x64xf32>
    %489 = vector.shape_cast %488 : vector<192x64xf32> to vector<8x24x64xf32>
    %490 = vector.extract_strided_slice %489 {offsets = [0, 8, 0], sizes = [8, 8, 64], strides = [1, 1, 1]} : vector<8x24x64xf32> to vector<8x8x64xf32>
    %491 = vector.shape_cast %490 : vector<8x8x64xf32> to vector<64x64xf32>
    %c57 = arith.constant 57 : index
    %c0_267 = arith.constant 0 : index
    %c0_268 = arith.constant 0 : index
    %492 = vector.load %arg5[%c57, %c0_267, %c0_268] : memref<81x64x64xf32, #tpu.memory_space<vmem>>, vector<1x64x64xf32>
    %493 = vector.shape_cast %492 : vector<1x64x64xf32> to vector<64x64xf32>
    %cst_269 = arith.constant dense<0.000000e+00> : vector<64x64xf32>
    %494 = tpu.matmul %491, %493, %cst_269 {dimension_numbers = #tpu.dot_dimension_numbers<[1], [0], [0], [1], [0, 0, 1, 1], [], []>} : vector<64x64xf32>, vector<64x64xf32>, vector<64x64xf32> -> vector<64x64xf32>
    %495 = arith.addf %479, %494 : vector<64x64xf32>
    %496 = vector.shape_cast %463 : vector<192x64xf32> to vector<8x24x64xf32>
    %497 = vector.extract_strided_slice %496 {offsets = [0, 8, 0], sizes = [8, 8, 64], strides = [1, 1, 1]} : vector<8x24x64xf32> to vector<8x8x64xf32>
    %498 = vector.shape_cast %497 : vector<8x8x64xf32> to vector<64x64xf32>
    %c58 = arith.constant 58 : index
    %c0_270 = arith.constant 0 : index
    %c0_271 = arith.constant 0 : index
    %499 = vector.load %arg5[%c58, %c0_270, %c0_271] : memref<81x64x64xf32, #tpu.memory_space<vmem>>, vector<1x64x64xf32>
    %500 = vector.shape_cast %499 : vector<1x64x64xf32> to vector<64x64xf32>
    %cst_272 = arith.constant dense<0.000000e+00> : vector<64x64xf32>
    %501 = tpu.matmul %498, %500, %cst_272 {dimension_numbers = #tpu.dot_dimension_numbers<[1], [0], [0], [1], [0, 0, 1, 1], [], []>} : vector<64x64xf32>, vector<64x64xf32>, vector<64x64xf32> -> vector<64x64xf32>
    %502 = arith.addf %487, %501 : vector<64x64xf32>
    %c191_i32_273 = arith.constant 191 : i32
    %503 = tpu.dynamic_rotate %463 by %c191_i32_273 dim 0 : vector<192x64xf32>, i32 -> vector<192x64xf32>
    %504 = vector.shape_cast %503 : vector<192x64xf32> to vector<8x24x64xf32>
    %505 = vector.extract_strided_slice %504 {offsets = [0, 8, 0], sizes = [8, 8, 64], strides = [1, 1, 1]} : vector<8x24x64xf32> to vector<8x8x64xf32>
    %506 = vector.shape_cast %505 : vector<8x8x64xf32> to vector<64x64xf32>
    %c59 = arith.constant 59 : index
    %c0_274 = arith.constant 0 : index
    %c0_275 = arith.constant 0 : index
    %507 = vector.load %arg5[%c59, %c0_274, %c0_275] : memref<81x64x64xf32, #tpu.memory_space<vmem>>, vector<1x64x64xf32>
    %508 = vector.shape_cast %507 : vector<1x64x64xf32> to vector<64x64xf32>
    %cst_276 = arith.constant dense<0.000000e+00> : vector<64x64xf32>
    %509 = tpu.matmul %506, %508, %cst_276 {dimension_numbers = #tpu.dot_dimension_numbers<[1], [0], [0], [1], [0, 0, 1, 1], [], []>} : vector<64x64xf32>, vector<64x64xf32>, vector<64x64xf32> -> vector<64x64xf32>
    %510 = arith.addf %495, %509 : vector<64x64xf32>
    %c190_i32_277 = arith.constant 190 : i32
    %511 = tpu.dynamic_rotate %463 by %c190_i32_277 dim 0 : vector<192x64xf32>, i32 -> vector<192x64xf32>
    %512 = vector.shape_cast %511 : vector<192x64xf32> to vector<8x24x64xf32>
    %513 = vector.extract_strided_slice %512 {offsets = [0, 8, 0], sizes = [8, 8, 64], strides = [1, 1, 1]} : vector<8x24x64xf32> to vector<8x8x64xf32>
    %514 = vector.shape_cast %513 : vector<8x8x64xf32> to vector<64x64xf32>
    %c60 = arith.constant 60 : index
    %c0_278 = arith.constant 0 : index
    %c0_279 = arith.constant 0 : index
    %515 = vector.load %arg5[%c60, %c0_278, %c0_279] : memref<81x64x64xf32, #tpu.memory_space<vmem>>, vector<1x64x64xf32>
    %516 = vector.shape_cast %515 : vector<1x64x64xf32> to vector<64x64xf32>
    %cst_280 = arith.constant dense<0.000000e+00> : vector<64x64xf32>
    %517 = tpu.matmul %514, %516, %cst_280 {dimension_numbers = #tpu.dot_dimension_numbers<[1], [0], [0], [1], [0, 0, 1, 1], [], []>} : vector<64x64xf32>, vector<64x64xf32>, vector<64x64xf32> -> vector<64x64xf32>
    %518 = arith.addf %502, %517 : vector<64x64xf32>
    %c189_i32_281 = arith.constant 189 : i32
    %519 = tpu.dynamic_rotate %463 by %c189_i32_281 dim 0 : vector<192x64xf32>, i32 -> vector<192x64xf32>
    %520 = vector.shape_cast %519 : vector<192x64xf32> to vector<8x24x64xf32>
    %521 = vector.extract_strided_slice %520 {offsets = [0, 8, 0], sizes = [8, 8, 64], strides = [1, 1, 1]} : vector<8x24x64xf32> to vector<8x8x64xf32>
    %522 = vector.shape_cast %521 : vector<8x8x64xf32> to vector<64x64xf32>
    %c61 = arith.constant 61 : index
    %c0_282 = arith.constant 0 : index
    %c0_283 = arith.constant 0 : index
    %523 = vector.load %arg5[%c61, %c0_282, %c0_283] : memref<81x64x64xf32, #tpu.memory_space<vmem>>, vector<1x64x64xf32>
    %524 = vector.shape_cast %523 : vector<1x64x64xf32> to vector<64x64xf32>
    %cst_284 = arith.constant dense<0.000000e+00> : vector<64x64xf32>
    %525 = tpu.matmul %522, %524, %cst_284 {dimension_numbers = #tpu.dot_dimension_numbers<[1], [0], [0], [1], [0, 0, 1, 1], [], []>} : vector<64x64xf32>, vector<64x64xf32>, vector<64x64xf32> -> vector<64x64xf32>
    %526 = arith.addf %510, %525 : vector<64x64xf32>
    %c188_i32_285 = arith.constant 188 : i32
    %527 = tpu.dynamic_rotate %463 by %c188_i32_285 dim 0 : vector<192x64xf32>, i32 -> vector<192x64xf32>
    %528 = vector.shape_cast %527 : vector<192x64xf32> to vector<8x24x64xf32>
    %529 = vector.extract_strided_slice %528 {offsets = [0, 8, 0], sizes = [8, 8, 64], strides = [1, 1, 1]} : vector<8x24x64xf32> to vector<8x8x64xf32>
    %530 = vector.shape_cast %529 : vector<8x8x64xf32> to vector<64x64xf32>
    %c62 = arith.constant 62 : index
    %c0_286 = arith.constant 0 : index
    %c0_287 = arith.constant 0 : index
    %531 = vector.load %arg5[%c62, %c0_286, %c0_287] : memref<81x64x64xf32, #tpu.memory_space<vmem>>, vector<1x64x64xf32>
    %532 = vector.shape_cast %531 : vector<1x64x64xf32> to vector<64x64xf32>
    %cst_288 = arith.constant dense<0.000000e+00> : vector<64x64xf32>
    %533 = tpu.matmul %530, %532, %cst_288 {dimension_numbers = #tpu.dot_dimension_numbers<[1], [0], [0], [1], [0, 0, 1, 1], [], []>} : vector<64x64xf32>, vector<64x64xf32>, vector<64x64xf32> -> vector<64x64xf32>
    %534 = arith.addf %518, %533 : vector<64x64xf32>
    %c7_289 = arith.constant 7 : index
    %c0_290 = arith.constant 0 : index
    %c0_291 = arith.constant 0 : index
    %535 = vector.load %arg13[%c7_289, %c0_290, %c0_291] : memref<16x24x64xf32, #tpu.memory_space<vmem>>, vector<8x24x64xf32>
    %536 = vector.shape_cast %535 : vector<8x24x64xf32> to vector<192x64xf32>
    %c4_i32_292 = arith.constant 4 : i32
    %537 = tpu.dynamic_rotate %536 by %c4_i32_292 dim 0 : vector<192x64xf32>, i32 -> vector<192x64xf32>
    %538 = vector.shape_cast %537 : vector<192x64xf32> to vector<8x24x64xf32>
    %539 = vector.extract_strided_slice %538 {offsets = [0, 8, 0], sizes = [8, 8, 64], strides = [1, 1, 1]} : vector<8x24x64xf32> to vector<8x8x64xf32>
    %540 = vector.shape_cast %539 : vector<8x8x64xf32> to vector<64x64xf32>
    %c63 = arith.constant 63 : index
    %c0_293 = arith.constant 0 : index
    %c0_294 = arith.constant 0 : index
    %541 = vector.load %arg5[%c63, %c0_293, %c0_294] : memref<81x64x64xf32, #tpu.memory_space<vmem>>, vector<1x64x64xf32>
    %542 = vector.shape_cast %541 : vector<1x64x64xf32> to vector<64x64xf32>
    %cst_295 = arith.constant dense<0.000000e+00> : vector<64x64xf32>
    %543 = tpu.matmul %540, %542, %cst_295 {dimension_numbers = #tpu.dot_dimension_numbers<[1], [0], [0], [1], [0, 0, 1, 1], [], []>} : vector<64x64xf32>, vector<64x64xf32>, vector<64x64xf32> -> vector<64x64xf32>
    %544 = arith.addf %526, %543 : vector<64x64xf32>
    %c3_i32_296 = arith.constant 3 : i32
    %545 = tpu.dynamic_rotate %536 by %c3_i32_296 dim 0 : vector<192x64xf32>, i32 -> vector<192x64xf32>
    %546 = vector.shape_cast %545 : vector<192x64xf32> to vector<8x24x64xf32>
    %547 = vector.extract_strided_slice %546 {offsets = [0, 8, 0], sizes = [8, 8, 64], strides = [1, 1, 1]} : vector<8x24x64xf32> to vector<8x8x64xf32>
    %548 = vector.shape_cast %547 : vector<8x8x64xf32> to vector<64x64xf32>
    %c64 = arith.constant 64 : index
    %c0_297 = arith.constant 0 : index
    %c0_298 = arith.constant 0 : index
    %549 = vector.load %arg5[%c64, %c0_297, %c0_298] : memref<81x64x64xf32, #tpu.memory_space<vmem>>, vector<1x64x64xf32>
    %550 = vector.shape_cast %549 : vector<1x64x64xf32> to vector<64x64xf32>
    %cst_299 = arith.constant dense<0.000000e+00> : vector<64x64xf32>
    %551 = tpu.matmul %548, %550, %cst_299 {dimension_numbers = #tpu.dot_dimension_numbers<[1], [0], [0], [1], [0, 0, 1, 1], [], []>} : vector<64x64xf32>, vector<64x64xf32>, vector<64x64xf32> -> vector<64x64xf32>
    %552 = arith.addf %534, %551 : vector<64x64xf32>
    %c2_i32_300 = arith.constant 2 : i32
    %553 = tpu.dynamic_rotate %536 by %c2_i32_300 dim 0 : vector<192x64xf32>, i32 -> vector<192x64xf32>
    %554 = vector.shape_cast %553 : vector<192x64xf32> to vector<8x24x64xf32>
    %555 = vector.extract_strided_slice %554 {offsets = [0, 8, 0], sizes = [8, 8, 64], strides = [1, 1, 1]} : vector<8x24x64xf32> to vector<8x8x64xf32>
    %556 = vector.shape_cast %555 : vector<8x8x64xf32> to vector<64x64xf32>
    %c65 = arith.constant 65 : index
    %c0_301 = arith.constant 0 : index
    %c0_302 = arith.constant 0 : index
    %557 = vector.load %arg5[%c65, %c0_301, %c0_302] : memref<81x64x64xf32, #tpu.memory_space<vmem>>, vector<1x64x64xf32>
    %558 = vector.shape_cast %557 : vector<1x64x64xf32> to vector<64x64xf32>
    %cst_303 = arith.constant dense<0.000000e+00> : vector<64x64xf32>
    %559 = tpu.matmul %556, %558, %cst_303 {dimension_numbers = #tpu.dot_dimension_numbers<[1], [0], [0], [1], [0, 0, 1, 1], [], []>} : vector<64x64xf32>, vector<64x64xf32>, vector<64x64xf32> -> vector<64x64xf32>
    %560 = arith.addf %544, %559 : vector<64x64xf32>
    %c1_i32_304 = arith.constant 1 : i32
    %561 = tpu.dynamic_rotate %536 by %c1_i32_304 dim 0 : vector<192x64xf32>, i32 -> vector<192x64xf32>
    %562 = vector.shape_cast %561 : vector<192x64xf32> to vector<8x24x64xf32>
    %563 = vector.extract_strided_slice %562 {offsets = [0, 8, 0], sizes = [8, 8, 64], strides = [1, 1, 1]} : vector<8x24x64xf32> to vector<8x8x64xf32>
    %564 = vector.shape_cast %563 : vector<8x8x64xf32> to vector<64x64xf32>
    %c66 = arith.constant 66 : index
    %c0_305 = arith.constant 0 : index
    %c0_306 = arith.constant 0 : index
    %565 = vector.load %arg5[%c66, %c0_305, %c0_306] : memref<81x64x64xf32, #tpu.memory_space<vmem>>, vector<1x64x64xf32>
    %566 = vector.shape_cast %565 : vector<1x64x64xf32> to vector<64x64xf32>
    %cst_307 = arith.constant dense<0.000000e+00> : vector<64x64xf32>
    %567 = tpu.matmul %564, %566, %cst_307 {dimension_numbers = #tpu.dot_dimension_numbers<[1], [0], [0], [1], [0, 0, 1, 1], [], []>} : vector<64x64xf32>, vector<64x64xf32>, vector<64x64xf32> -> vector<64x64xf32>
    %568 = arith.addf %552, %567 : vector<64x64xf32>
    %569 = vector.shape_cast %536 : vector<192x64xf32> to vector<8x24x64xf32>
    %570 = vector.extract_strided_slice %569 {offsets = [0, 8, 0], sizes = [8, 8, 64], strides = [1, 1, 1]} : vector<8x24x64xf32> to vector<8x8x64xf32>
    %571 = vector.shape_cast %570 : vector<8x8x64xf32> to vector<64x64xf32>
    %c67 = arith.constant 67 : index
    %c0_308 = arith.constant 0 : index
    %c0_309 = arith.constant 0 : index
    %572 = vector.load %arg5[%c67, %c0_308, %c0_309] : memref<81x64x64xf32, #tpu.memory_space<vmem>>, vector<1x64x64xf32>
    %573 = vector.shape_cast %572 : vector<1x64x64xf32> to vector<64x64xf32>
    %cst_310 = arith.constant dense<0.000000e+00> : vector<64x64xf32>
    %574 = tpu.matmul %571, %573, %cst_310 {dimension_numbers = #tpu.dot_dimension_numbers<[1], [0], [0], [1], [0, 0, 1, 1], [], []>} : vector<64x64xf32>, vector<64x64xf32>, vector<64x64xf32> -> vector<64x64xf32>
    %575 = arith.addf %560, %574 : vector<64x64xf32>
    %c191_i32_311 = arith.constant 191 : i32
    %576 = tpu.dynamic_rotate %536 by %c191_i32_311 dim 0 : vector<192x64xf32>, i32 -> vector<192x64xf32>
    %577 = vector.shape_cast %576 : vector<192x64xf32> to vector<8x24x64xf32>
    %578 = vector.extract_strided_slice %577 {offsets = [0, 8, 0], sizes = [8, 8, 64], strides = [1, 1, 1]} : vector<8x24x64xf32> to vector<8x8x64xf32>
    %579 = vector.shape_cast %578 : vector<8x8x64xf32> to vector<64x64xf32>
    %c68 = arith.constant 68 : index
    %c0_312 = arith.constant 0 : index
    %c0_313 = arith.constant 0 : index
    %580 = vector.load %arg5[%c68, %c0_312, %c0_313] : memref<81x64x64xf32, #tpu.memory_space<vmem>>, vector<1x64x64xf32>
    %581 = vector.shape_cast %580 : vector<1x64x64xf32> to vector<64x64xf32>
    %cst_314 = arith.constant dense<0.000000e+00> : vector<64x64xf32>
    %582 = tpu.matmul %579, %581, %cst_314 {dimension_numbers = #tpu.dot_dimension_numbers<[1], [0], [0], [1], [0, 0, 1, 1], [], []>} : vector<64x64xf32>, vector<64x64xf32>, vector<64x64xf32> -> vector<64x64xf32>
    %583 = arith.addf %568, %582 : vector<64x64xf32>
    %c190_i32_315 = arith.constant 190 : i32
    %584 = tpu.dynamic_rotate %536 by %c190_i32_315 dim 0 : vector<192x64xf32>, i32 -> vector<192x64xf32>
    %585 = vector.shape_cast %584 : vector<192x64xf32> to vector<8x24x64xf32>
    %586 = vector.extract_strided_slice %585 {offsets = [0, 8, 0], sizes = [8, 8, 64], strides = [1, 1, 1]} : vector<8x24x64xf32> to vector<8x8x64xf32>
    %587 = vector.shape_cast %586 : vector<8x8x64xf32> to vector<64x64xf32>
    %c69 = arith.constant 69 : index
    %c0_316 = arith.constant 0 : index
    %c0_317 = arith.constant 0 : index
    %588 = vector.load %arg5[%c69, %c0_316, %c0_317] : memref<81x64x64xf32, #tpu.memory_space<vmem>>, vector<1x64x64xf32>
    %589 = vector.shape_cast %588 : vector<1x64x64xf32> to vector<64x64xf32>
    %cst_318 = arith.constant dense<0.000000e+00> : vector<64x64xf32>
    %590 = tpu.matmul %587, %589, %cst_318 {dimension_numbers = #tpu.dot_dimension_numbers<[1], [0], [0], [1], [0, 0, 1, 1], [], []>} : vector<64x64xf32>, vector<64x64xf32>, vector<64x64xf32> -> vector<64x64xf32>
    %591 = arith.addf %575, %590 : vector<64x64xf32>
    %c189_i32_319 = arith.constant 189 : i32
    %592 = tpu.dynamic_rotate %536 by %c189_i32_319 dim 0 : vector<192x64xf32>, i32 -> vector<192x64xf32>
    %593 = vector.shape_cast %592 : vector<192x64xf32> to vector<8x24x64xf32>
    %594 = vector.extract_strided_slice %593 {offsets = [0, 8, 0], sizes = [8, 8, 64], strides = [1, 1, 1]} : vector<8x24x64xf32> to vector<8x8x64xf32>
    %595 = vector.shape_cast %594 : vector<8x8x64xf32> to vector<64x64xf32>
    %c70 = arith.constant 70 : index
    %c0_320 = arith.constant 0 : index
    %c0_321 = arith.constant 0 : index
    %596 = vector.load %arg5[%c70, %c0_320, %c0_321] : memref<81x64x64xf32, #tpu.memory_space<vmem>>, vector<1x64x64xf32>
    %597 = vector.shape_cast %596 : vector<1x64x64xf32> to vector<64x64xf32>
    %cst_322 = arith.constant dense<0.000000e+00> : vector<64x64xf32>
    %598 = tpu.matmul %595, %597, %cst_322 {dimension_numbers = #tpu.dot_dimension_numbers<[1], [0], [0], [1], [0, 0, 1, 1], [], []>} : vector<64x64xf32>, vector<64x64xf32>, vector<64x64xf32> -> vector<64x64xf32>
    %599 = arith.addf %583, %598 : vector<64x64xf32>
    %c188_i32_323 = arith.constant 188 : i32
    %600 = tpu.dynamic_rotate %536 by %c188_i32_323 dim 0 : vector<192x64xf32>, i32 -> vector<192x64xf32>
    %601 = vector.shape_cast %600 : vector<192x64xf32> to vector<8x24x64xf32>
    %602 = vector.extract_strided_slice %601 {offsets = [0, 8, 0], sizes = [8, 8, 64], strides = [1, 1, 1]} : vector<8x24x64xf32> to vector<8x8x64xf32>
    %603 = vector.shape_cast %602 : vector<8x8x64xf32> to vector<64x64xf32>
    %c71 = arith.constant 71 : index
    %c0_324 = arith.constant 0 : index
    %c0_325 = arith.constant 0 : index
    %604 = vector.load %arg5[%c71, %c0_324, %c0_325] : memref<81x64x64xf32, #tpu.memory_space<vmem>>, vector<1x64x64xf32>
    %605 = vector.shape_cast %604 : vector<1x64x64xf32> to vector<64x64xf32>
    %cst_326 = arith.constant dense<0.000000e+00> : vector<64x64xf32>
    %606 = tpu.matmul %603, %605, %cst_326 {dimension_numbers = #tpu.dot_dimension_numbers<[1], [0], [0], [1], [0, 0, 1, 1], [], []>} : vector<64x64xf32>, vector<64x64xf32>, vector<64x64xf32> -> vector<64x64xf32>
    %607 = arith.addf %591, %606 : vector<64x64xf32>
    %c8_327 = arith.constant 8 : index
    %c0_328 = arith.constant 0 : index
    %c0_329 = arith.constant 0 : index
    %608 = vector.load %arg13[%c8_327, %c0_328, %c0_329] : memref<16x24x64xf32, #tpu.memory_space<vmem>>, vector<8x24x64xf32>
    %609 = vector.shape_cast %608 : vector<8x24x64xf32> to vector<192x64xf32>
    %c4_i32_330 = arith.constant 4 : i32
    %610 = tpu.dynamic_rotate %609 by %c4_i32_330 dim 0 : vector<192x64xf32>, i32 -> vector<192x64xf32>
    %611 = vector.shape_cast %610 : vector<192x64xf32> to vector<8x24x64xf32>
    %612 = vector.extract_strided_slice %611 {offsets = [0, 8, 0], sizes = [8, 8, 64], strides = [1, 1, 1]} : vector<8x24x64xf32> to vector<8x8x64xf32>
    %613 = vector.shape_cast %612 : vector<8x8x64xf32> to vector<64x64xf32>
    %c72 = arith.constant 72 : index
    %c0_331 = arith.constant 0 : index
    %c0_332 = arith.constant 0 : index
    %614 = vector.load %arg5[%c72, %c0_331, %c0_332] : memref<81x64x64xf32, #tpu.memory_space<vmem>>, vector<1x64x64xf32>
    %615 = vector.shape_cast %614 : vector<1x64x64xf32> to vector<64x64xf32>
    %cst_333 = arith.constant dense<0.000000e+00> : vector<64x64xf32>
    %616 = tpu.matmul %613, %615, %cst_333 {dimension_numbers = #tpu.dot_dimension_numbers<[1], [0], [0], [1], [0, 0, 1, 1], [], []>} : vector<64x64xf32>, vector<64x64xf32>, vector<64x64xf32> -> vector<64x64xf32>
    %617 = arith.addf %599, %616 : vector<64x64xf32>
    %c3_i32_334 = arith.constant 3 : i32
    %618 = tpu.dynamic_rotate %609 by %c3_i32_334 dim 0 : vector<192x64xf32>, i32 -> vector<192x64xf32>
    %619 = vector.shape_cast %618 : vector<192x64xf32> to vector<8x24x64xf32>
    %620 = vector.extract_strided_slice %619 {offsets = [0, 8, 0], sizes = [8, 8, 64], strides = [1, 1, 1]} : vector<8x24x64xf32> to vector<8x8x64xf32>
    %621 = vector.shape_cast %620 : vector<8x8x64xf32> to vector<64x64xf32>
    %c73 = arith.constant 73 : index
    %c0_335 = arith.constant 0 : index
    %c0_336 = arith.constant 0 : index
    %622 = vector.load %arg5[%c73, %c0_335, %c0_336] : memref<81x64x64xf32, #tpu.memory_space<vmem>>, vector<1x64x64xf32>
    %623 = vector.shape_cast %622 : vector<1x64x64xf32> to vector<64x64xf32>
    %cst_337 = arith.constant dense<0.000000e+00> : vector<64x64xf32>
    %624 = tpu.matmul %621, %623, %cst_337 {dimension_numbers = #tpu.dot_dimension_numbers<[1], [0], [0], [1], [0, 0, 1, 1], [], []>} : vector<64x64xf32>, vector<64x64xf32>, vector<64x64xf32> -> vector<64x64xf32>
    %625 = arith.addf %607, %624 : vector<64x64xf32>
    %c2_i32_338 = arith.constant 2 : i32
    %626 = tpu.dynamic_rotate %609 by %c2_i32_338 dim 0 : vector<192x64xf32>, i32 -> vector<192x64xf32>
    %627 = vector.shape_cast %626 : vector<192x64xf32> to vector<8x24x64xf32>
    %628 = vector.extract_strided_slice %627 {offsets = [0, 8, 0], sizes = [8, 8, 64], strides = [1, 1, 1]} : vector<8x24x64xf32> to vector<8x8x64xf32>
    %629 = vector.shape_cast %628 : vector<8x8x64xf32> to vector<64x64xf32>
    %c74 = arith.constant 74 : index
    %c0_339 = arith.constant 0 : index
    %c0_340 = arith.constant 0 : index
    %630 = vector.load %arg5[%c74, %c0_339, %c0_340] : memref<81x64x64xf32, #tpu.memory_space<vmem>>, vector<1x64x64xf32>
    %631 = vector.shape_cast %630 : vector<1x64x64xf32> to vector<64x64xf32>
    %cst_341 = arith.constant dense<0.000000e+00> : vector<64x64xf32>
    %632 = tpu.matmul %629, %631, %cst_341 {dimension_numbers = #tpu.dot_dimension_numbers<[1], [0], [0], [1], [0, 0, 1, 1], [], []>} : vector<64x64xf32>, vector<64x64xf32>, vector<64x64xf32> -> vector<64x64xf32>
    %633 = arith.addf %617, %632 : vector<64x64xf32>
    %c1_i32_342 = arith.constant 1 : i32
    %634 = tpu.dynamic_rotate %609 by %c1_i32_342 dim 0 : vector<192x64xf32>, i32 -> vector<192x64xf32>
    %635 = vector.shape_cast %634 : vector<192x64xf32> to vector<8x24x64xf32>
    %636 = vector.extract_strided_slice %635 {offsets = [0, 8, 0], sizes = [8, 8, 64], strides = [1, 1, 1]} : vector<8x24x64xf32> to vector<8x8x64xf32>
    %637 = vector.shape_cast %636 : vector<8x8x64xf32> to vector<64x64xf32>
    %c75 = arith.constant 75 : index
    %c0_343 = arith.constant 0 : index
    %c0_344 = arith.constant 0 : index
    %638 = vector.load %arg5[%c75, %c0_343, %c0_344] : memref<81x64x64xf32, #tpu.memory_space<vmem>>, vector<1x64x64xf32>
    %639 = vector.shape_cast %638 : vector<1x64x64xf32> to vector<64x64xf32>
    %cst_345 = arith.constant dense<0.000000e+00> : vector<64x64xf32>
    %640 = tpu.matmul %637, %639, %cst_345 {dimension_numbers = #tpu.dot_dimension_numbers<[1], [0], [0], [1], [0, 0, 1, 1], [], []>} : vector<64x64xf32>, vector<64x64xf32>, vector<64x64xf32> -> vector<64x64xf32>
    %641 = arith.addf %625, %640 : vector<64x64xf32>
    %642 = vector.shape_cast %609 : vector<192x64xf32> to vector<8x24x64xf32>
    %643 = vector.extract_strided_slice %642 {offsets = [0, 8, 0], sizes = [8, 8, 64], strides = [1, 1, 1]} : vector<8x24x64xf32> to vector<8x8x64xf32>
    %644 = vector.shape_cast %643 : vector<8x8x64xf32> to vector<64x64xf32>
    %c76 = arith.constant 76 : index
    %c0_346 = arith.constant 0 : index
    %c0_347 = arith.constant 0 : index
    %645 = vector.load %arg5[%c76, %c0_346, %c0_347] : memref<81x64x64xf32, #tpu.memory_space<vmem>>, vector<1x64x64xf32>
    %646 = vector.shape_cast %645 : vector<1x64x64xf32> to vector<64x64xf32>
    %cst_348 = arith.constant dense<0.000000e+00> : vector<64x64xf32>
    %647 = tpu.matmul %644, %646, %cst_348 {dimension_numbers = #tpu.dot_dimension_numbers<[1], [0], [0], [1], [0, 0, 1, 1], [], []>} : vector<64x64xf32>, vector<64x64xf32>, vector<64x64xf32> -> vector<64x64xf32>
    %648 = arith.addf %633, %647 : vector<64x64xf32>
    %c191_i32_349 = arith.constant 191 : i32
    %649 = tpu.dynamic_rotate %609 by %c191_i32_349 dim 0 : vector<192x64xf32>, i32 -> vector<192x64xf32>
    %650 = vector.shape_cast %649 : vector<192x64xf32> to vector<8x24x64xf32>
    %651 = vector.extract_strided_slice %650 {offsets = [0, 8, 0], sizes = [8, 8, 64], strides = [1, 1, 1]} : vector<8x24x64xf32> to vector<8x8x64xf32>
    %652 = vector.shape_cast %651 : vector<8x8x64xf32> to vector<64x64xf32>
    %c77 = arith.constant 77 : index
    %c0_350 = arith.constant 0 : index
    %c0_351 = arith.constant 0 : index
    %653 = vector.load %arg5[%c77, %c0_350, %c0_351] : memref<81x64x64xf32, #tpu.memory_space<vmem>>, vector<1x64x64xf32>
    %654 = vector.shape_cast %653 : vector<1x64x64xf32> to vector<64x64xf32>
    %cst_352 = arith.constant dense<0.000000e+00> : vector<64x64xf32>
    %655 = tpu.matmul %652, %654, %cst_352 {dimension_numbers = #tpu.dot_dimension_numbers<[1], [0], [0], [1], [0, 0, 1, 1], [], []>} : vector<64x64xf32>, vector<64x64xf32>, vector<64x64xf32> -> vector<64x64xf32>
    %656 = arith.addf %641, %655 : vector<64x64xf32>
    %c190_i32_353 = arith.constant 190 : i32
    %657 = tpu.dynamic_rotate %609 by %c190_i32_353 dim 0 : vector<192x64xf32>, i32 -> vector<192x64xf32>
    %658 = vector.shape_cast %657 : vector<192x64xf32> to vector<8x24x64xf32>
    %659 = vector.extract_strided_slice %658 {offsets = [0, 8, 0], sizes = [8, 8, 64], strides = [1, 1, 1]} : vector<8x24x64xf32> to vector<8x8x64xf32>
    %660 = vector.shape_cast %659 : vector<8x8x64xf32> to vector<64x64xf32>
    %c78 = arith.constant 78 : index
    %c0_354 = arith.constant 0 : index
    %c0_355 = arith.constant 0 : index
    %661 = vector.load %arg5[%c78, %c0_354, %c0_355] : memref<81x64x64xf32, #tpu.memory_space<vmem>>, vector<1x64x64xf32>
    %662 = vector.shape_cast %661 : vector<1x64x64xf32> to vector<64x64xf32>
    %cst_356 = arith.constant dense<0.000000e+00> : vector<64x64xf32>
    %663 = tpu.matmul %660, %662, %cst_356 {dimension_numbers = #tpu.dot_dimension_numbers<[1], [0], [0], [1], [0, 0, 1, 1], [], []>} : vector<64x64xf32>, vector<64x64xf32>, vector<64x64xf32> -> vector<64x64xf32>
    %664 = arith.addf %648, %663 : vector<64x64xf32>
    %c189_i32_357 = arith.constant 189 : i32
    %665 = tpu.dynamic_rotate %609 by %c189_i32_357 dim 0 : vector<192x64xf32>, i32 -> vector<192x64xf32>
    %666 = vector.shape_cast %665 : vector<192x64xf32> to vector<8x24x64xf32>
    %667 = vector.extract_strided_slice %666 {offsets = [0, 8, 0], sizes = [8, 8, 64], strides = [1, 1, 1]} : vector<8x24x64xf32> to vector<8x8x64xf32>
    %668 = vector.shape_cast %667 : vector<8x8x64xf32> to vector<64x64xf32>
    %c79 = arith.constant 79 : index
    %c0_358 = arith.constant 0 : index
    %c0_359 = arith.constant 0 : index
    %669 = vector.load %arg5[%c79, %c0_358, %c0_359] : memref<81x64x64xf32, #tpu.memory_space<vmem>>, vector<1x64x64xf32>
    %670 = vector.shape_cast %669 : vector<1x64x64xf32> to vector<64x64xf32>
    %cst_360 = arith.constant dense<0.000000e+00> : vector<64x64xf32>
    %671 = tpu.matmul %668, %670, %cst_360 {dimension_numbers = #tpu.dot_dimension_numbers<[1], [0], [0], [1], [0, 0, 1, 1], [], []>} : vector<64x64xf32>, vector<64x64xf32>, vector<64x64xf32> -> vector<64x64xf32>
    %672 = arith.addf %656, %671 : vector<64x64xf32>
    %c188_i32_361 = arith.constant 188 : i32
    %673 = tpu.dynamic_rotate %609 by %c188_i32_361 dim 0 : vector<192x64xf32>, i32 -> vector<192x64xf32>
    %674 = vector.shape_cast %673 : vector<192x64xf32> to vector<8x24x64xf32>
    %675 = vector.extract_strided_slice %674 {offsets = [0, 8, 0], sizes = [8, 8, 64], strides = [1, 1, 1]} : vector<8x24x64xf32> to vector<8x8x64xf32>
    %676 = vector.shape_cast %675 : vector<8x8x64xf32> to vector<64x64xf32>
    %c80 = arith.constant 80 : index
    %c0_362 = arith.constant 0 : index
    %c0_363 = arith.constant 0 : index
    %677 = vector.load %arg5[%c80, %c0_362, %c0_363] : memref<81x64x64xf32, #tpu.memory_space<vmem>>, vector<1x64x64xf32>
    %678 = vector.shape_cast %677 : vector<1x64x64xf32> to vector<64x64xf32>
    %cst_364 = arith.constant dense<0.000000e+00> : vector<64x64xf32>
    %679 = tpu.matmul %676, %678, %cst_364 {dimension_numbers = #tpu.dot_dimension_numbers<[1], [0], [0], [1], [0, 0, 1, 1], [], []>} : vector<64x64xf32>, vector<64x64xf32>, vector<64x64xf32> -> vector<64x64xf32>
    %680 = arith.addf %664, %679 : vector<64x64xf32>
    %681 = arith.addf %680, %672 : vector<64x64xf32>
    %c0_365 = arith.constant 0 : index
    %c0_366 = arith.constant 0 : index
    %682 = vector.load %arg6[%c0_365, %c0_366] : memref<1x64xf32, #tpu.memory_space<vmem>>, vector<1x64xf32>
    %683 = vector.broadcast %682 : vector<1x64xf32> to vector<64x64xf32>
    %684 = arith.mulf %681, %683 : vector<64x64xf32>
    %c0_367 = arith.constant 0 : index
    %c0_368 = arith.constant 0 : index
    %685 = vector.load %arg7[%c0_367, %c0_368] : memref<1x64xf32, #tpu.memory_space<vmem>>, vector<1x64xf32>
    %686 = vector.broadcast %685 : vector<1x64xf32> to vector<64x64xf32>
    %687 = arith.addf %684, %686 : vector<64x64xf32>
    %cst_369 = arith.constant 0.000000e+00 : f32
    %688 = vector.broadcast %cst_369 : f32 to vector<64x64xf32>
    %689 = arith.maximumf %687, %688 : vector<64x64xf32>
    %c0_370 = arith.constant 0 : index
    %c0_371 = arith.constant 0 : index
    %690 = vector.load %arg8[%c0_370, %c0_371] : memref<64x64xf32, #tpu.memory_space<vmem>>, vector<64x64xf32>
    %cst_372 = arith.constant dense<0.000000e+00> : vector<64x64xf32>
    %691 = tpu.matmul %689, %690, %cst_372 {dimension_numbers = #tpu.dot_dimension_numbers<[1], [0], [0], [1], [0, 0, 1, 1], [], []>} : vector<64x64xf32>, vector<64x64xf32>, vector<64x64xf32> -> vector<64x64xf32>
    %c0_373 = arith.constant 0 : index
    %c0_374 = arith.constant 0 : index
    %692 = vector.load %arg9[%c0_373, %c0_374] : memref<1x64xf32, #tpu.memory_space<vmem>>, vector<1x64xf32>
    %693 = vector.broadcast %692 : vector<1x64xf32> to vector<64x64xf32>
    %694 = arith.mulf %691, %693 : vector<64x64xf32>
    %c0_375 = arith.constant 0 : index
    %c0_376 = arith.constant 0 : index
    %695 = vector.load %arg10[%c0_375, %c0_376] : memref<1x64xf32, #tpu.memory_space<vmem>>, vector<1x64xf32>
    %696 = vector.broadcast %695 : vector<1x64xf32> to vector<64x64xf32>
    %697 = arith.addf %694, %696 : vector<64x64xf32>
    %cst_377 = arith.constant 0.000000e+00 : f32
    %698 = vector.broadcast %cst_377 : f32 to vector<64x64xf32>
    %699 = arith.maximumf %697, %698 : vector<64x64xf32>
    %c0_378 = arith.constant 0 : index
    %c0_379 = arith.constant 0 : index
    %700 = vector.load %arg11[%c0_378, %c0_379] : memref<64x256xf32, #tpu.memory_space<vmem>>, vector<64x256xf32>
    %cst_380 = arith.constant dense<0.000000e+00> : vector<64x256xf32>
    %701 = tpu.matmul %699, %700, %cst_380 {dimension_numbers = #tpu.dot_dimension_numbers<[0], [0], [1], [1], [0, 1, 1, 1], [], []>} : vector<64x64xf32>, vector<64x256xf32>, vector<64x256xf32> -> vector<64x256xf32>
    %c0_381 = arith.constant 0 : index
    %c0_382 = arith.constant 0 : index
    %c0_383 = arith.constant 0 : index
    %702 = vector.load %arg12[%c0_381, %c0_382, %c0_383] : memref<1x64x256xf32, #tpu.memory_space<vmem>>, vector<1x64x256xf32>
    %703 = vector.shape_cast %702 : vector<1x64x256xf32> to vector<64x256xf32>
    %704 = vector.shape_cast %701 : vector<64x256xf32> to vector<1x64x256xf32>
    tpu.vector_store %arg12[%c0_381, %c0_382, %c0_383], %704 {strides = array<i32>} : memref<1x64x256xf32, #tpu.memory_space<vmem>>, vector<1x64x256xf32>,
    return
  }
  func.func @transform_0(%arg0: i32) -> (i32, i32, i32) {
    %c0_i32 = arith.constant 0 : i32
    %c0_i32_0 = arith.constant 0 : i32
    %c0_i32_1 = arith.constant 0 : i32
    return %arg0, %c0_i32, %c0_i32_0 : i32, i32, i32
  }
  func.func @transform_1(%arg0: i32) -> (i32, i32) {
    %c0_i32 = arith.constant 0 : i32
    %c0_i32_0 = arith.constant 0 : i32
    %c0_i32_1 = arith.constant 0 : i32
    return %c0_i32, %c0_i32_0 : i32, i32
  }
  func.func @transform_2(%arg0: i32) -> (i32, i32) {
    %c0_i32 = arith.constant 0 : i32
    %c0_i32_0 = arith.constant 0 : i32
    %c0_i32_1 = arith.constant 0 : i32
    return %c0_i32, %c0_i32_0 : i32, i32
  }
  func.func @transform_3(%arg0: i32) -> (i32, i32) {
    %c0_i32 = arith.constant 0 : i32
    %c0_i32_0 = arith.constant 0 : i32
    %c0_i32_1 = arith.constant 0 : i32
    return %c0_i32, %c0_i32_0 : i32, i32
  }
  func.func @transform_4(%arg0: i32) -> (i32, i32, i32) {
    %c0_i32 = arith.constant 0 : i32
    %c0_i32_0 = arith.constant 0 : i32
    %c0_i32_1 = arith.constant 0 : i32
    %c0_i32_2 = arith.constant 0 : i32
    return %c0_i32, %c0_i32_0, %c0_i32_1 : i32, i32, i32
  }
  func.func @transform_5(%arg0: i32) -> (i32, i32) {
    %c0_i32 = arith.constant 0 : i32
    %c0_i32_0 = arith.constant 0 : i32
    %c0_i32_1 = arith.constant 0 : i32
    return %c0_i32, %c0_i32_0 : i32, i32
  }
  func.func @transform_6(%arg0: i32) -> (i32, i32) {
    %c0_i32 = arith.constant 0 : i32
    %c0_i32_0 = arith.constant 0 : i32
    %c0_i32_1 = arith.constant 0 : i32
    return %c0_i32, %c0_i32_0 : i32, i32
  }
  func.func @transform_7(%arg0: i32) -> (i32, i32) {
    %c0_i32 = arith.constant 0 : i32
    %c0_i32_0 = arith.constant 0 : i32
    %c0_i32_1 = arith.constant 0 : i32
    return %c0_i32, %c0_i32_0 : i32, i32
  }
  func.func @transform_8(%arg0: i32) -> (i32, i32) {
    %c0_i32 = arith.constant 0 : i32
    %c0_i32_0 = arith.constant 0 : i32
    %c0_i32_1 = arith.constant 0 : i32
    return %c0_i32, %c0_i32_0 : i32, i32
  }
  func.func @transform_9(%arg0: i32) -> (i32, i32) {
    %c0_i32 = arith.constant 0 : i32
    %c0_i32_0 = arith.constant 0 : i32
    %c0_i32_1 = arith.constant 0 : i32
    return %c0_i32, %c0_i32_0 : i32, i32
  }
  func.func @transform_10(%arg0: i32) -> (i32, i32) {
    %c0_i32 = arith.constant 0 : i32
    %c0_i32_0 = arith.constant 0 : i32
    %c0_i32_1 = arith.constant 0 : i32
    return %c0_i32, %c0_i32_0 : i32, i32
  }
  func.func @transform_11(%arg0: i32) -> (i32, i32, i32) {
    %c0_i32 = arith.constant 0 : i32
    %c0_i32_0 = arith.constant 0 : i32
    %c0_i32_1 = arith.constant 0 : i32
    return %arg0, %c0_i32, %c0_i32_0 : i32, i32, i32
  }
}

</mosaic_0001>

<bundles_post_ra>
// kernel: global_pyconv_block_forward.2
= control target key start
LH: loop header
LB: loop body
LE: loop exit
PB: predicated region body
PF: predicated region fallthrough
CT: control target
= control target key end

     0   :  { %vm141_vm0 = vcmask 523264   ;;  %s377_s1 = inlined_call_operand.vmem [shape: f32[256,64], index: 1, kind: input, shape index: {}]   ;;  %s378_s0 = inlined_call_operand.vmem [shape: f32[64,256], index: 0, kind: input, shape index: {}]   ;;  %s379_s2 = inlined_call_operand.vmem [shape: f32[64,64], index: 2, kind: output, shape index: {}]  }
   0x1   :  { %v42_v0 = vld [vmem:[%s377_s1 + $0x78] sm:$0xff]  ;;  %v41_v2 = vld [vmem:[%s377_s1 + $0x70] sm:$0xff]  ;;  %v40_v4 = vld [vmem:[%s377_s1 + $0x68] sm:$0xff] }
   0x2   :  { %v58_v1 = vld [vmem:[%s377_s1 + $0xf8] sm:$0xff]  ;;  %154 = vmatpush.msra.mxu2 %v42_v0  ;;  %v57_v3 = vld [vmem:[%s377_s1 + $0xf0] sm:$0xff]  ;;  %v56_v5 = vld [vmem:[%s377_s1 + $0xe8] sm:$0xff]  ;;  %59 = vmatpush.msra.mxu0 %v42_v0 }
   0x3   :  { %170 = vmatpush.msra.mxu3 %v58_v1  ;;  %100 = vmatpush.msra.mxu1 %v58_v1  ;;  %v39_v6 = vld [vmem:[%s377_s1 + $0x60] sm:$0xff]  ;;  %v38_v8 = vld [vmem:[%s377_s1 + $0x58] sm:$0xff]  ;;  %v37_v10 = vld [vmem:[%s377_s1 + $0x50] sm:$0xff] }
   0x4   :  { %155 = vmatpush.msra.mxu2 %v41_v2  ;;  %v55_v7 = vld [vmem:[%s377_s1 + $0xe0] sm:$0xff]  ;;  %60 = vmatpush.msra.mxu0 %v41_v2  ;;  %v54_v9 = vld [vmem:[%s377_s1 + $0xd8] sm:$0xff]  ;;  %v53_v11 = vld [vmem:[%s377_s1 + $0xd0] sm:$0xff] }
   0x5   :  { %171 = vmatpush.msra.mxu3 %v57_v3  ;;  %101 = vmatpush.msra.mxu1 %v57_v3  ;;  %v36_v12 = vld [vmem:[%s377_s1 + $0x48] sm:$0xff]  ;;  %v35_v14 = vld [vmem:[%s377_s1 + $0x40] sm:$0xff]  ;;  %v34_v16 = vld [vmem:[%s377_s1 + $0x38] sm:$0xff] }
   0x6   :  { %156 = vmatpush.msra.mxu2 %v40_v4  ;;  %61 = vmatpush.msra.mxu0 %v40_v4  ;;  %v52_v13 = vld [vmem:[%s377_s1 + $0xc8] sm:$0xff]  ;;  %v51_v15 = vld [vmem:[%s377_s1 + $0xc0] sm:$0xff]  ;;  %v50_v17 = vld [vmem:[%s377_s1 + $0xb8] sm:$0xff] }
   0x7   :  { %172 = vmatpush.msra.mxu3 %v56_v5  ;;  %102 = vmatpush.msra.mxu1 %v56_v5  ;;  %v33_v18 = vld [vmem:[%s377_s1 + $0x30] sm:$0xff]  ;;  %v32_v20 = vld [vmem:[%s377_s1 + $0x28] sm:$0xff]  ;;  %v31_v22 = vld [vmem:[%s377_s1 + $0x20] sm:$0xff] }
   0x8   :  { %157 = vmatpush.msra.mxu2 %v39_v6  ;;  %62 = vmatpush.msra.mxu0 %v39_v6  ;;  %v49_v19 = vld [vmem:[%s377_s1 + $0xb0] sm:$0xff]  ;;  %v48_v21 = vld [vmem:[%s377_s1 + $0xa8] sm:$0xff]  ;;  %v47_v23 = vld [vmem:[%s377_s1 + $0xa0] sm:$0xff] }
   0x9   :  { %173 = vmatpush.msra.mxu3 %v55_v7  ;;  %103 = vmatpush.msra.mxu1 %v55_v7  ;;  %v30_v24 = vld [vmem:[%s377_s1 + $0x18] sm:$0xff]  ;;  %v29_v26 = vld [vmem:[%s377_s1 + $0x10] sm:$0xff]  ;;  %v28_v28 = vld [vmem:[%s377_s1 + $0x8] sm:$0xff] }
   0xa   :  { %158 = vmatpush.msra.mxu2 %v38_v8  ;;  %63 = vmatpush.msra.mxu0 %v38_v8  ;;  %v46_v25 = vld [vmem:[%s377_s1 + $0x98] sm:$0xff]  ;;  %v45_v27 = vld [vmem:[%s377_s1 + $0x90] sm:$0xff]  ;;  %v44_v29 = vld [vmem:[%s377_s1 + $0x88] sm:$0xff] }
   0xb   :  { %174 = vmatpush.msra.mxu3 %v54_v9  ;;  %104 = vmatpush.msra.mxu1 %v54_v9  ;;  %v27_v30 = vld [vmem:[%s377_s1] sm:$0xff]  ;;  %v20_v33 = vld [vmem:[%s378_s0 + $0x48] sm:$0xff]  ;;  %v21_v36 = vld [vmem:[%s378_s0 + $0x50] sm:$0xff] }
   0xc   :  { %159 = vmatpush.msra.mxu2 %v37_v10  ;;  %64 = vmatpush.msra.mxu0 %v37_v10  ;;  %v43_v31 = vld [vmem:[%s377_s1 + $0x80] sm:$0xff]  ;;  %v12_v35 = vld [vmem:[%s378_s0 + $0x8] sm:$0xff]  ;;  %v22_v37 = vld [vmem:[%s378_s0 + $0x58] sm:$0xff] }
   0xd   :  { %175 = vmatpush.msra.mxu3 %v53_v11  ;;  %105 = vmatpush.msra.mxu1 %v53_v11  ;;  %v19_v32 = vld [vmem:[%s378_s0 + $0x40] sm:$0xff]  ;;  %v13_v38 = vld [vmem:[%s378_s0 + $0x10] sm:$0xff]  ;;  %v14_v39 = vld [vmem:[%s378_s0 + $0x18] sm:$0xff] }
   0xe   :  { %160 = vmatpush.msra.mxu2 %v36_v12  ;;  %65 = vmatpush.msra.mxu0 %v36_v12  ;;  %v11_v34 = vld [vmem:[%s378_s0] sm:$0xff]  ;;  %v24_v41 = vld [vmem:[%s378_s0 + $0x68] sm:$0xff]  ;;  %v25_v44 = vld [vmem:[%s378_s0 + $0x70] sm:$0xff] }
   0xf   :  { %176 = vmatpush.msra.mxu3 %v52_v13  ;;  %106 = vmatpush.msra.mxu1 %v52_v13  ;;  %v23_v40 = vld [vmem:[%s378_s0 + $0x60] sm:$0xff]  ;;  %v16_v43 = vld [vmem:[%s378_s0 + $0x28] sm:$0xff]  ;;  %v26_v45 = vld [vmem:[%s378_s0 + $0x78] sm:$0xff] }
  0x10   :  { %161 = vmatpush.msra.mxu2 %v35_v14  ;;  %66 = vmatpush.msra.mxu0 %v35_v14  ;;  %v15_v42 = vld [vmem:[%s378_s0 + $0x20] sm:$0xff]  ;;  %v17_v46 = vld [vmem:[%s378_s0 + $0x30] sm:$0xff]  ;;  %v18_v47 = vld [vmem:[%s378_s0 + $0x38] sm:$0xff] }
  0x11   :  { %177 = vmatpush.msra.mxu3 %v51_v15  ;;  %107 = vmatpush.msra.mxu1 %v51_v15 }
  0x12   :  { %162 = vmatpush.msra.mxu2 %v34_v16  ;;  %67 = vmatpush.msra.mxu0 %v34_v16 }
  0x13   :  { %178 = vmatpush.msra.mxu3 %v50_v17  ;;  %108 = vmatpush.msra.mxu1 %v50_v17 }
  0x14   :  { %163 = vmatpush.msra.mxu2 %v33_v18  ;;  %68 = vmatpush.msra.mxu0 %v33_v18 }
  0x15   :  { %179 = vmatpush.msra.mxu3 %v49_v19  ;;  %109 = vmatpush.msra.mxu1 %v49_v19 }
  0x16   :  { %164 = vmatpush.msra.mxu2 %v32_v20  ;;  %69 = vmatpush.msra.mxu0 %v32_v20 }
  0x17   :  { %180 = vmatpush.msra.mxu3 %v48_v21  ;;  %110 = vmatpush.msra.mxu1 %v48_v21 }
  0x18   :  { %165 = vmatpush.msra.mxu2 %v31_v22  ;;  %70 = vmatpush.msra.mxu0 %v31_v22 }
  0x19   :  { %181 = vmatpush.msra.mxu3 %v47_v23  ;;  %111 = vmatpush.msra.mxu1 %v47_v23 }
  0x1a   :  { %166 = vmatpush.msra.mxu2 %v30_v24  ;;  %71 = vmatpush.msra.mxu0 %v30_v24 }
  0x1b   :  { %182 = vmatpush.msra.mxu3 %v46_v25  ;;  %112 = vmatpush.msra.mxu1 %v46_v25 }
  0x1c   :  { %167 = vmatpush.msra.mxu2 %v29_v26  ;;  %72 = vmatpush.msra.mxu0 %v29_v26 }
  0x1d   :  { %183 = vmatpush.msra.mxu3 %v45_v27  ;;  %113 = vmatpush.msra.mxu1 %v45_v27 }
  0x1e   :  { %168 = vmatpush.msra.mxu2 %v28_v28  ;;  %73 = vmatpush.msra.mxu0 %v28_v28 }
  0x1f   :  { %184 = vmatpush.msra.mxu3 %v44_v29  ;;  %114 = vmatpush.msra.mxu1 %v44_v29 }
  0x20   :  { %169 = vmatpush.msra.mxu2 %v27_v30  ;;  %74 = vmatpush.msra.mxu0 %v27_v30 }
  0x21   :  { %185 = vmatpush.msra.mxu3 %v43_v31  ;;  %87 = vmatmul.f32.vlgmr.msra.gmra.mxu2 %v19_v32 }
  0x22   :  { %128 = vmatmul.f32.vlgmr.msra.gmra.mxu3 %v20_v33  ;;  %115 = vmatpush.msra.mxu1 %v43_v31 }
  0x23   :  { %75 = vmatmul.f32.vlgmr.msra.gmra.mxu0 %v11_v34  ;;  %116 = vmatmul.f32.vlgmr.msra.gmra.mxu1 %v12_v35 }
  0x29   :  { %90 = vmatmul.f32.gmra.mxu2 %v21_v36 }
  0x2a   :  { %131 = vmatmul.f32.gmra.mxu3 %v22_v37 }
  0x2b   :  { %78 = vmatmul.f32.gmra.mxu0 %v13_v38  ;;  %119 = vmatmul.f32.gmra.mxu1 %v14_v39 }
  0x31   :  { %93 = vmatmul.f32.gmra.mxu2 %v23_v40 }
  0x32   :  { %134 = vmatmul.f32.gmra.mxu3 %v24_v41 }
  0x33   :  { %81 = vmatmul.f32.gmra.mxu0 %v15_v42  ;;  %122 = vmatmul.f32.gmra.mxu1 %v16_v43 }
  0x39   :  { %96 = vmatmul.f32.gmra.mxu2 %v25_v44 }
  0x3a   :  { %137 = vmatmul.f32.gmra.mxu3 %v26_v45 }
  0x3b   :  { %84 = vmatmul.f32.gmra.mxu0 %v17_v46  ;;  %125 = vmatmul.f32.gmra.mxu1 %v18_v47 }
  0xa0   :  { %v76_v48 = vpop.f32.mrf.mxu0  ;;  %v117_v49 = vpop.f32.mrf.mxu1 }
  0xa1   :  { %v118_v50 = vadd.f32 %v117_v49, %v76_v48 }
  0xa3   :  { %142 = vst.msk [vmem:[%s379_s2] sm:$0xff] %vm141_vm0, %v118_v50 }
  0xa4   :  { %v88_v51 = vpop.f32.mrf.mxu2 }
  0xa5   :  { %v129_v52 = vpop.f32.mrf.mxu3 }
  0xa6   :  { %v130_v53 = vadd.f32 %v129_v52, %v88_v51 }
  0xa8   :  { %146 = vst.msk [vmem:[%s379_s2 + $0x20] sm:$0xff] %vm141_vm0, %v130_v53  ;;  %v79_v54 = vpop.f32.mrf.mxu0  ;;  %v120_v55 = vpop.f32.mrf.mxu1 }
  0xa9   :  { %v121_v56 = vadd.f32 %v120_v55, %v79_v54 }
  0xab   :  { %143 = vst.msk [vmem:[%s379_s2 + $0x8] sm:$0xff] %vm141_vm0, %v121_v56 }
  0xac   :  { %v91_v57 = vpop.f32.mrf.mxu2 }
  0xad   :  { %v132_v58 = vpop.f32.mrf.mxu3 }
  0xae   :  { %v133_v59 = vadd.f32 %v132_v58, %v91_v57 }
  0xb0   :  { %147 = vst.msk [vmem:[%s379_s2 + $0x28] sm:$0xff] %vm141_vm0, %v133_v59  ;;  %v82_v60 = vpop.f32.mrf.mxu0  ;;  %v123_v61 = vpop.f32.mrf.mxu1 }
  0xb1   :  { %v124_v62 = vadd.f32 %v123_v61, %v82_v60 }
  0xb3   :  { %144 = vst.msk [vmem:[%s379_s2 + $0x10] sm:$0xff] %vm141_vm0, %v124_v62 }
  0xb4   :  { %v94_v63 = vpop.f32.mrf.mxu2 }
  0xb5   :  { %v135_v0 = vpop.f32.mrf.mxu3 }
  0xb6   :  { %v136_v1 = vadd.f32 %v135_v0, %v94_v63 }
  0xb8   :  { %148 = vst.msk [vmem:[%s379_s2 + $0x30] sm:$0xff] %vm141_vm0, %v136_v1  ;;  %v85_v2 = vpop.f32.mrf.mxu0  ;;  %v126_v3 = vpop.f32.mrf.mxu1 }
  0xb9   :  { %v127_v4 = vadd.f32 %v126_v3, %v85_v2 }
  0xbb   :  { %145 = vst.msk [vmem:[%s379_s2 + $0x18] sm:$0xff] %vm141_vm0, %v127_v4 }
  0xbc   :  { %v97_v5 = vpop.f32.mrf.mxu2 }
  0xbd   :  { %v138_v6 = vpop.f32.mrf.mxu3 }
  0xbe   :  { %v139_v7 = vadd.f32 %v138_v6, %v97_v5 }
  0xc0   :  { %149 = vst.msk [vmem:[%s379_s2 + $0x38] sm:$0xff] %vm141_vm0, %v139_v7 }

// kernel: global_pyconv_block_forward.3
= control target key start
LH: loop header
LB: loop body
LE: loop exit
PB: predicated region body
PF: predicated region fallthrough
CT: control target
= control target key end

     0   :  { %s10991_s17 = smov 0   ;;  %s18564_s0 = inlined_call_operand.vmem [shape: f32[2,32,64], index: 0, kind: input, shape index: {}]   ;;  %s18565_s1 = inlined_call_operand.vmem [shape: f32[32,64], index: 1, kind: input, shape index: {}]   ;;  %s18566_s2 = inlined_call_operand.vmem [shape: f32[1,64], index: 2, kind: input, shape index: {}]   ;;  %s18567_s3 = inlined_call_operand.vmem [shape: f32[1,64], index: 3, kind: input, shape index: {}]   ;;  %s18568_s4 = inlined_call_operand.vmem [shape: f32[81,64,64], index: 4, kind: input, shape index: {}]   ;;  %s18569_s5 = inlined_call_operand.vmem [shape: f32[1,64], index: 5, kind: input, shape index: {}]   ;;  %s18570_s6 = inlined_call_operand.vmem [shape: f32[1,64], index: 6, kind: input, shape index: {}]   ;;  %s18571_s7 = inlined_call_operand.vmem [shape: f32[64,64], index: 7, kind: input, shape index: {}]   ;;  %s18572_s8 = inlined_call_operand.vmem [shape: f32[1,64], index: 8, kind: input, shape index: {}]   ;;  %s18573_s9 = inlined_call_operand.vmem [shape: f32[1,64], index: 9, kind: input, shape index: {}]   ;;  %s18574_s10 = inlined_call_operand.vmem [shape: f32[64,256], index: 10, kind: input, shape index: {}]   ;;  %s18575_s11 = inlined_call_operand.vmem [shape: f32[2,64,256], index: 11, kind: output, shape index: {}]  }
   0x1 LB: > { %s9443_s18 = sadd.s32 4294967295, %s10928_s17   ;;  %p9447_p0 = scmp.ge.s32.totalorder %s10928_s17, 1  ;;  %s10928_s17 = sphi %s10991_s17, %s21_s17  }
   0x2   : > { %p337_p1 = scmp.lt.s32.totalorder %s10928_s17, 3 }
   0x4   : > { %p338_p2 = pnand %p9447_p0, %p337_p1 }
   0x6   : > { %341 = sbr.rel (%p338_p2) target bundleno = 2202 (0x89a), region = 64 }
   0xb   : > { %p377_p3 = scmp.lt.s32.totalorder %s9443_s18, 1  ;;  %v437_v0 = vld [vmem:[%s18565_s1 + $0x18] sm:$0xff]  ;;  %v436_v1 = vld [vmem:[%s18565_s1 + $0x10] sm:$0xff]  ;;  %v435_v2 = vld [vmem:[%s18565_s1 + $0x8] sm:$0xff]  ;;  %vm470_vm0 = vcmask 261120   ;;  %vm387_vm1 = vcmask 523264   ;;  %v616_v37 = vlaneseq }
   0xc   : > { %507 = vmatpush.msra.mxu0 %v437_v0  ;;  %10776 = vmatpush.msra.mxu1 %v437_v0  ;;  %v434_v3 = vld [vmem:[%s18565_s1] sm:$0xff]  ;;  %v634_v10 = vld [vmem:[%s18568_s4 + $0x38] sm:$0xff]  ;;  %v633_v11 = vld [vmem:[%s18568_s4 + $0x30] sm:$0xff]  ;;  %v10930_v36 = vmov 0.0  }
   0xd   : > { %s19047_s18 = smov (!%p377_p3, %s9443_s18), 1  ;;  %10777 = vmatpush.msra.mxu2 %v437_v0  ;;  %10778 = vmatpush.msra.mxu3 %v437_v0  ;;  %v632_v12 = vld [vmem:[%s18568_s4 + $0x28] sm:$0xff]  ;;  %v9475_v14 = vld [vmem:[%s18568_s4 + $0xb8] sm:$0xff]  ;;  %v631_v15 = vld [vmem:[%s18568_s4 + $0x20] sm:$0xff]  ;;  %388 = vst.msk [vmem:[#allocation2] sm:$0xff] %vm387_vm1, %v10930_v36  ;;  %v11105_v39 = vshrl.u32 %v616_v37, 7 }
   0xe   : > { %508 = vmatpush.msra.mxu0 %v436_v1  ;;  %10779 = vmatpush.msra.mxu1 %v436_v1  ;;  %s10774_s25 = sshll.u32 %s19047_s18, 5  ;;  %v9499_v16 = vld [vmem:[%s18568_s4 + $0xf8] sm:$0xff]  ;;  %v9474_v18 = vld [vmem:[%s18568_s4 + $0xb0] sm:$0xff]  ;;  %v9473_v22 = vld [vmem:[%s18568_s4 + $0xa8] sm:$0xff]  ;;  %389 = vst.msk [vmem:[#allocation2 + $0x8] sm:$0xff] %vm387_vm1, %v10930_v36  ;;  %s10775_s27 = sshll.u32 %s19047_s18, 7 }
   0xf   : > { %10780 = vmatpush.msra.mxu2 %v436_v1  ;;  %10781 = vmatpush.msra.mxu3 %v436_v1  ;;  %s381_s30 = scalar_lea.vmem %s18564_s0, %s10774_s25  ;;  %v9467_v17 = vld [vmem:[%s18568_s4 + $0x78] sm:$0xff]  ;;  %v9498_v20 = vld [vmem:[%s18568_s4 + $0xf0] sm:$0xff]  ;;  %v9497_v24 = vld [vmem:[%s18568_s4 + $0xe8] sm:$0xff]  ;;  %390 = vst.msk [vmem:[#allocation2 + $0x10] sm:$0xff] %vm387_vm1, %v10930_v36  ;;  %vm685_vm2 = vcmp.lt.s32.totalorder %v11105_v39, 2  ;;  %vm651_vm3 = vcmp.lt.s32.totalorder %v11105_v39, 3 }
  0x10   : > { %509 = vmatpush.msra.mxu0 %v435_v2  ;;  %10782 = vmatpush.msra.mxu1 %v435_v2  ;;  %v430_v4 = vld [vmem:[%s381_s30] sm:$0xff]  ;;  %v431_v5 = vld [vmem:[%s381_s30 + $0x8] sm:$0xff]  ;;  %v432_v6 = vld [vmem:[%s381_s30 + $0x10] sm:$0xff]  ;;  %391 = vst.msk [vmem:[#allocation2 + $0x18] sm:$0xff] %vm387_vm1, %v10930_v36  ;;  %vm618_vm4 = vcmp.lt.s32.totalorder %v11105_v39, 4  ;;  %vm849_vm5 = vcmp.lt.s32.totalorder %v11105_v39, 1 }
  0x11   : > { %10783 = vmatpush.msra.mxu2 %v435_v2  ;;  %10784 = vmatpush.msra.mxu3 %v435_v2  ;;  %v433_v7 = vld [vmem:[%s381_s30 + $0x18] sm:$0xff]  ;;  %v9466_v21 = vld [vmem:[%s18568_s4 + $0x70] sm:$0xff]  ;;  %v9465_v25 = vld [vmem:[%s18568_s4 + $0x68] sm:$0xff]  ;;  %392 = vst.msk [vmem:[#allocation2 + $0x20] sm:$0xff] %vm387_vm1, %v10930_v36  ;;  %vm1095_vm6 = vcmp.lt.s32.totalorder %v11105_v39, 7  ;;  %vm1202_vm7 = vcmp.lt.s32.totalorder %v11105_v39, 6  ;;  %s18543_s30 = scalar_lea.vmem %s18575_s11, %s10775_s27 }
  0x12   : > { %438 = vxpose.xlu0.b32.start [1/4] (short) (narrow) %v430_v4, 64  ;;  %510 = vmatpush.msra.mxu0 %v434_v3  ;;  %v630_v19 = vld [vmem:[%s18568_s4 + $0x18] sm:$0xff]  ;;  %v629_v23 = vld [vmem:[%s18568_s4 + $0x10] sm:$0xff]  ;;  %v628_v26 = vld [vmem:[%s18568_s4 + $0x8] sm:$0xff]  ;;  %393 = vst.msk [vmem:[#allocation2 + $0x28] sm:$0xff] %vm387_vm1, %v10930_v36  ;;  %vm1309_vm8 = vcmp.lt.s32.totalorder %v11105_v39, 5 }
  0x13   : > { %10785 = vmatpush.msra.mxu1 %v434_v3  ;;  %10786 = vmatpush.msra.mxu2 %v434_v3  ;;  %v9472_v27 = vld [vmem:[%s18568_s4 + $0xa0] sm:$0xff]  ;;  %v9471_v31 = vld [vmem:[%s18568_s4 + $0x98] sm:$0xff]  ;;  %v9470_v35 = vld [vmem:[%s18568_s4 + $0x90] sm:$0xff]  ;;  %394 = vst.msk [vmem:[#allocation2 + $0x30] sm:$0xff] %vm387_vm1, %v10930_v36 }
  0x14   : > { %10787 = vmatpush.msra.mxu3 %v434_v3  ;;  %964 = vmatpush.msrb.mxu0 %v9467_v17  ;;  %v9496_v28 = vld [vmem:[%s18568_s4 + $0xe0] sm:$0xff]  ;;  %v9495_v33 = vld [vmem:[%s18568_s4 + $0xd8] sm:$0xff]  ;;  %395 = vst.msk [vmem:[#allocation2 + $0x38] sm:$0xff] %vm387_vm1, %v10930_v36  ;;  %v9494_v41 = vld [vmem:[%s18568_s4 + $0xd0] sm:$0xff] }
  0x15   : > { %800 = vmatpush.msrb.mxu2 %v634_v10  ;;  %735 = vmatpush.msrb.mxu1 %v9475_v14  ;;  %v9464_v29 = vld [vmem:[%s18568_s4 + $0x60] sm:$0xff]  ;;  %v9463_v34 = vld [vmem:[%s18568_s4 + $0x58] sm:$0xff]  ;;  %v9462_v42 = vld [vmem:[%s18568_s4 + $0x50] sm:$0xff]  ;;  %396 = vst.msk [vmem:[#allocation2 + $0x40] sm:$0xff] %vm387_vm1, %v10930_v36 }
  0x16   : > { %899 = vmatpush.msrb.mxu3 %v9499_v16  ;;  %965 = vmatpush.msrb.mxu0 %v9466_v21  ;;  %v627_v32 = vld [vmem:[%s18568_s4] sm:$0xff]  ;;  %v11120_v43 = vld [vmem:[#allocation2 + $0x8] sm:$0xff]  ;;  %397 = vst.msk [vmem:[#allocation2 + $0x48] sm:$0xff] %vm387_vm1, %v10930_v36  ;;  %v9523_v55 = vld [vmem:[%s18568_s4 + $0x138] sm:$0xff] }
  0x17   : > { %801 = vmatpush.msrb.mxu2 %v633_v11  ;;  %736 = vmatpush.msrb.mxu1 %v9474_v18  ;;  %v11110_v40 = vld [vmem:[#allocation2] sm:$0xff]  ;;  %v9469_v44 = vld [vmem:[%s18568_s4 + $0x88] sm:$0xff]  ;;  %v670_v50 = vrot.slane %v11120_v43, 6  ;;  %398 = vst.msk [vmem:[#allocation2 + $0x50] sm:$0xff] %vm387_vm1, %v10930_v36  ;;  %v636_v53 = vrot.slane %v11120_v43, 5  ;;  %v11167_v57 = vld [vmem:[#allocation2 + $0x18] sm:$0xff] }
  0x18   : > { %900 = vmatpush.msrb.mxu3 %v9498_v20  ;;  %966 = vmatpush.msrb.mxu0 %v9465_v25  ;;  %v9493_v45 = vld [vmem:[%s18568_s4 + $0xc8] sm:$0xff]  ;;  %v669_v46 = vrot.slane %v11110_v40, 6  ;;  %v9468_v48 = vld [vmem:[%s18568_s4 + $0x80] sm:$0xff]  ;;  %v635_v52 = vrot.slane %v11110_v40, 5  ;;  %399 = vst.msk [vmem:[#allocation2 + $0x58] sm:$0xff] %vm387_vm1, %v10930_v36  ;;  %v671_v60 = vrot.slane %v11167_v57, 6 }
  0x19   : > { %802 = vmatpush.msrb.mxu2 %v632_v12  ;;  %737 = vmatpush.msrb.mxu1 %v9473_v22  ;;  %v9461_v47 = vld [vmem:[%s18568_s4 + $0x48] sm:$0xff]  ;;  %v9492_v49 = vld [vmem:[%s18568_s4 + $0xc0] sm:$0xff]  ;;  %401 = vst.msk [vmem:[#allocation2 + $0x120] sm:$0xff] %vm387_vm1, %v10930_v36  ;;  %v637_v62 = vrot.slane %v11167_v57, 5  ;;  %v9522_v0 = vld [vmem:[%s18568_s4 + $0x130] sm:$0xff]  ;;  %v600_v4 = vrot.slane %v11110_v40, 4 }
  0x1a   : > { %439 = vxpose.xlu0.b32.cont [2/4] (short) (narrow) %v431_v5, 64  ;;  %901 = vmatpush.msrb.mxu3 %v9497_v24  ;;  %v9460_v51 = vld [vmem:[%s18568_s4 + $0x40] sm:$0xff]  ;;  %v693_v54 = vsel %vm685_vm2, %v669_v46, %v670_v50  ;;  %v659_v56 = vsel %vm651_vm3, %v635_v52, %v636_v53  ;;  %402 = vst.msk [vmem:[#allocation2 + $0x128] sm:$0xff] %vm387_vm1, %v10930_v36  ;;  %v18579_v5 = vrot.slane %v11120_v43, 4  ;;  %v602_v10 = vrot.slane %v11167_v57, 4  ;;  %v582_v14 = vld [vmem:[#allocation2 + $0x30] sm:$0xff] }
  0x1b   : > { %803 = vmatpush.msrb.mxu2 %v631_v15  ;;  %738 = vmatpush.msrb.mxu1 %v9472_v27  ;;  %v11169_v58 = vld [vmem:[#allocation2 + $0x20] sm:$0xff]  ;;  %403 = vst.msk [vmem:[#allocation2 + $0x130] sm:$0xff] %vm387_vm1, %v10930_v36  ;;  %v11262_v15 = vld [vmem:[#allocation2 + $0x38] sm:$0xff]  ;;  %v835_v16 = vrot.slane %v11167_v57, 7  ;;  %v604_v18 = vrot.slane %v582_v14, 4  ;;  %v673_v22 = vrot.slane %v582_v14, 6 }
  0x1c   : > { %902 = vmatpush.msrb.mxu3 %v9496_v28  ;;  %967 = vmatpush.msrb.mxu0 %v9464_v29  ;;  %v672_v61 = vrot.slane %v11169_v58, 6  ;;  %404 = vst.msk [vmem:[#allocation2 + $0x138] sm:$0xff] %vm387_vm1, %v10930_v36  ;;  %v638_v63 = vrot.slane %v11169_v58, 5  ;;  %v18578_v11 = vrot.slane %v11169_v58, 4  ;;  %v836_v17 = vrot.slane %v11169_v58, 7  ;;  %v9518_v52 = vld [vmem:[%s18568_s4 + $0x110] sm:$0xff] }
  0x1d   : > { %804 = vmatpush.msrb.mxu2 %v630_v19  ;;  %739 = vmatpush.msrb.mxu1 %v9471_v31  ;;  %405 = vst.msk [vmem:[#allocation2 + $0x140] sm:$0xff] %vm387_vm1, %v10930_v36  ;;  %v18577_v19 = vrot.slane %v11262_v15, 4  ;;  %v837_v24 = vrot.slane %v582_v14, 7  ;;  %v838_v25 = vrot.slane %v11262_v15, 7  ;;  %v640_v27 = vrot.slane %v11262_v15, 5  ;;  %v585_v28 = vld [vmem:[#allocation2 + $0x48] sm:$0xff] }
  0x1e   : > { %903 = vmatpush.msrb.mxu3 %v9495_v33  ;;  %968 = vmatpush.msrb.mxu0 %v9463_v34  ;;  %406 = vst.msk [vmem:[#allocation2 + $0x148] sm:$0xff] %vm387_vm1, %v10930_v36  ;;  %v11191_v1 = vsel %vm685_vm2, %v671_v60, %v672_v61  ;;  %v11195_v2 = vsel %vm651_vm3, %v637_v62, %v638_v63  ;;  %v11288_v29 = vld [vmem:[#allocation2 + $0x50] sm:$0xff]  ;;  %v675_v37 = vrot.slane %v585_v28, 6  ;;  %v11344_v50 = vld [vmem:[%s18566_s2] ss:$0 sm:$0xff]  ;;  %v9539_v57 = vld [vmem:[%s18568_s4 + $0x178] sm:$0xff] }
  0x1f   : > { %805 = vmatpush.msrb.mxu2 %v629_v23  ;;  %740 = vmatpush.msrb.mxu1 %v9470_v35  ;;  %407 = vst.msk [vmem:[#allocation2 + $0x150] sm:$0xff] %vm387_vm1, %v10930_v36  ;;  %v856_v20 = vsel %vm849_vm5, %v835_v16, %v836_v17  ;;  %v11280_v21 = vsel %vm618_vm4, %v604_v18, %v18577_v19  ;;  %v674_v23 = vrot.slane %v11262_v15, 6  ;;  %v18576_v33 = vrot.slane %v11288_v29, 4  ;;  %v9571_v60 = vld [vmem:[%s18568_s4 + $0x1f8] sm:$0xff]  ;;  %v9538_v61 = vld [vmem:[%s18568_s4 + $0x170] sm:$0xff]  ;;  %v9516_v17 = vld [vmem:[%s18568_s4 + $0x100] sm:$0xff] }
  0x20   : > { %904 = vmatpush.msrb.mxu3 %v9494_v41  ;;  %969 = vmatpush.msrb.mxu0 %v9462_v42  ;;  %408 = vst.msk [vmem:[#allocation2 + $0x158] sm:$0xff] %vm387_vm1, %v10930_v36  ;;  %v855_v31 = vsel %vm849_vm5, %v837_v24, %v838_v25  ;;  %v840_v41 = vrot.slane %v11288_v29, 7  ;;  %v641_v42 = vrot.slane %v585_v28, 5  ;;  %v9554_v62 = vld [vmem:[%s18568_s4 + $0x1b0] sm:$0xff]  ;;  %v9535_v18 = vld [vmem:[%s18568_s4 + $0x158] sm:$0xff]  ;;  %v9117_v39 = vld [vmem:[%s18571_s7 + $0x20] sm:$0xff] }
  0x21   : > { %806 = vmatpush.msrb.mxu2 %v628_v26  ;;  %741 = vmatpush.msrb.mxu1 %v9469_v44  ;;  %409 = vst.msk [vmem:[#allocation2 + $0x160] sm:$0xff] %vm387_vm1, %v10930_v36  ;;  %v639_v26 = vrot.slane %v582_v14, 5  ;;  %v642_v44 = vrot.slane %v11288_v29, 5  ;;  %v9550_v24 = vld [vmem:[%s18568_s4 + $0x190] sm:$0xff] }
  0x22   : > { %440 = vxpose.xlu0.b32.cont [3/4] (short) (narrow) %v432_v6, 64  ;;  %905 = vmatpush.msrb.mxu3 %v9493_v45  ;;  %410 = vst.msk [vmem:[#allocation2 + $0x168] sm:$0xff] %vm387_vm1, %v10930_v36  ;;  %v626_v6 = vsel %vm618_vm4, %v600_v4, %v18579_v5  ;;  %v9553_v4 = vld [vmem:[%s18568_s4 + $0x1a8] sm:$0xff] }
  0x23   : > { %807 = vmatpush.msrb.mxu2 %v627_v32  ;;  %970 = vmatpush.msrb.mxu0 %v9461_v47  ;;  %411 = vst.msk [vmem:[#allocation2 + $0x170] sm:$0xff] %vm387_vm1, %v10930_v36  ;;  %v606_v32 = vrot.slane %v585_v28, 4  ;;  %v11302_v34 = vsel %vm651_vm3, %v639_v26, %v640_v27  ;;  %v11331_v47 = vsel %vm651_vm3, %v641_v42, %v642_v44 }
  0x24   : > { %742 = vmatpush.msrb.mxu1 %v9468_v48  ;;  %906 = vmatpush.msrb.mxu3 %v9492_v49  ;;  %412 = vst.msk [vmem:[#allocation2 + $0x178] sm:$0xff] %vm387_vm1, %v10930_v36  ;;  %v9520_v48 = vld [vmem:[%s18568_s4 + $0x120] sm:$0xff]  ;;  %v9519_v49 = vld [vmem:[%s18568_s4 + $0x118] sm:$0xff] }
  0x25   : > { %971 = vmatpush.msrb.mxu0 %v9460_v51  ;;  %414 = vst.msk [vmem:[#allocation2 + $0x60] sm:$0xff] %vm387_vm1, %v10930_v36  ;;  %v11310_v35 = vsel %vm618_vm4, %v606_v32, %v18576_v33  ;;  %v11349_v51 = vld [vmem:[%s18567_s3] ss:$0 sm:$0xff]  ;;  %v9533_v32 = vld [vmem:[%s18568_s4 + $0x148] sm:$0xff] }
  0x26   : > { %415 = vst.msk [vmem:[#allocation2 + $0x78] sm:$0xff] %vm387_vm1, %v10930_v36 }
  0x27   : > { %416 = vst.msk [vmem:[#allocation2 + $0x90] sm:$0xff] %vm387_vm1, %v10930_v36 }
  0x28   : > { %417 = vst.msk [vmem:[#allocation2 + $0xa8] sm:$0xff] %vm387_vm1, %v10930_v36 }
  0x29   : > { %418 = vst.msk [vmem:[#allocation2 + $0xc0] sm:$0xff] %vm387_vm1, %v10930_v36 }
  0x2a   : > { %441 = vxpose.xlu0.b32.end [4/4] (short) (narrow) %v433_v7, 64  ;;  %419 = vst.msk [vmem:[#allocation2 + $0xd8] sm:$0xff] %vm387_vm1, %v10930_v36 }
  0x2b   : > { %420 = vst.msk [vmem:[#allocation2 + $0xf0] sm:$0xff] %vm387_vm1, %v10930_v36 }
  0x2c   : > { %421 = vst.msk [vmem:[#allocation2 + $0x108] sm:$0xff] %vm387_vm1, %v10930_v36  ;;  %v588_v14 = vld [vmem:[#allocation2 + $0x60] sm:$0xff] }
  0x2d   : > { %422 = vst.msk [vmem:[#allocation2 + $0x70] sm:$0xff] %vm387_vm1, %v10930_v36  ;;  %v677_v26 = vrot.slane %v588_v14, 6  ;;  %v608_v27 = vrot.slane %v588_v14, 4 }
  0x2e   : > { %423 = vst.msk [vmem:[#allocation2 + $0x88] sm:$0xff] %vm387_vm1, %v10930_v36 }
  0x2f   : > { %424 = vst.msk [vmem:[#allocation2 + $0xa0] sm:$0xff] %vm387_vm1, %v10930_v36 }
  0x30   : > { %425 = vst.msk [vmem:[#allocation2 + $0xb8] sm:$0xff] %vm387_vm1, %v10930_v36 }
  0x31   : > { %426 = vst.msk [vmem:[#allocation2 + $0xd0] sm:$0xff] %vm387_vm1, %v10930_v36 }
  0x32   : > { %427 = vst.msk [vmem:[#allocation2 + $0xe8] sm:$0xff] %vm387_vm1, %v10930_v36 }
  0x33   : > { %428 = vst.msk [vmem:[#allocation2 + $0x100] sm:$0xff] %vm387_vm1, %v10930_v36 }
  0x34   : > { %429 = vst.msk [vmem:[#allocation2 + $0x118] sm:$0xff] %vm387_vm1, %v10930_v36  ;;  %v9521_v36 = vld [vmem:[%s18568_s4 + $0x128] sm:$0xff] }
  0x35   : > { %v2457_v33 = vld [vmem:[#allocation2 + $0x88] sm:$0xff] }
  0xb6   : > { %v454_v8 = vpop.trf.xlu0 }
  0xb7   : > { %9452 = vmatmul.msk.f32.vlgmr.msra.gmra.mxu0 %vm470_vm0, %v454_v8  ;;  %v833_v8 = vrot.slane %v11110_v40, 7  ;;  %v839_v40 = vrot.slane %v585_v28, 7  ;;  %v841_v28 = vrot.slane %v588_v14, 7 }
  0xb8   : > { %1359 = vmatpush.msra.mxu0 %v9571_v60  ;;  %v9548_v60 = vld [vmem:[%s18568_s4 + $0x180] sm:$0xff] }
  0xb9   : > { %v854_v46 = vsel %vm849_vm5, %v839_v40, %v840_v41 }
  0xbe   : > { %v455_v9 = vpop.trf.xlu0 }
  0xbf   : > { %9453 = vmatmul.msk.f32.gmra.mxu0 %vm470_vm0, %v455_v9  ;;  %v834_v9 = vrot.slane %v11120_v43, 7 }
  0xc1   : > { %v857_v12 = vsel %vm849_vm5, %v833_v8, %v834_v9  ;;  %v9552_v9 = vld [vmem:[%s18568_s4 + $0x1a0] sm:$0xff] }
  0xc6   : > { %v456_v13 = vpop.trf.xlu0 }
  0xc7   : > { %9454 = vmatmul.msk.f32.vlgmr.msra.gmra.mxu1 %vm470_vm0, %v456_v13  ;;  %9508 = vmatmul.msk.f32.vlgmr.msrb.gmra.mxu0 %vm387_vm1, %v659_v56  ;;  %v11258_v13 = vsel %vm618_vm4, %v602_v10, %v18578_v11  ;;  %v9517_v56 = vld [vmem:[%s18568_s4 + $0x108] sm:$0xff]  ;;  %v9568_v10 = vld [vmem:[%s18568_s4 + $0x1e0] sm:$0xff]  ;;  %v11664_v11 = vld [vmem:[#allocation2 + $0x58] sm:$0xff] }
  0xc8   : > { %1038 = vmatpush.msra.mxu1 %v9523_v55 }
  0xca   : > { %1039 = vmatpush.msra.mxu1 %v9522_v0  ;;  %v9570_v0 = vld [vmem:[%s18568_s4 + $0x1f0] sm:$0xff] }
  0xcb   : > { %1360 = vmatpush.msra.mxu0 %v9570_v0  ;;  %v9587_v0 = vld [vmem:[%s18568_s4 + $0x238] sm:$0xff] }
  0xcc   : > { %1040 = vmatpush.msra.mxu1 %v9521_v36 }
  0xce   : > { %v457_v30 = vpop.trf.xlu0  ;;  %1041 = vmatpush.msra.mxu1 %v9520_v48 }
  0xcf   : > { %9455 = vmatmul.msk.f32.gmra.mxu1 %vm470_vm0, %v457_v30  ;;  %9509 = vmatmul.msk.f32.gmra.mxu0 %vm387_vm1, %v11195_v2  ;;  %v11292_v30 = vsel %vm685_vm2, %v673_v22, %v674_v23  ;;  %v9567_v22 = vld [vmem:[%s18568_s4 + $0x1d8] sm:$0xff]  ;;  %v9534_v23 = vld [vmem:[%s18568_s4 + $0x150] sm:$0xff] }
  0xd0   : > { %1042 = vmatpush.msra.mxu1 %v9519_v49 }
  0xd2   : > { %1043 = vmatpush.msra.mxu1 %v9518_v52 }
  0xd4   : > { %1044 = vmatpush.msra.mxu1 %v9517_v56  ;;  %v9532_v56 = vld [vmem:[%s18568_s4 + $0x140] sm:$0xff] }
  0xd6   : > { %v458_v38 = vpop.trf.xlu0  ;;  %1045 = vmatpush.msra.mxu1 %v9516_v17 }
  0xd7   : > { %9456 = vmatmul.msk.f32.vlgmr.msra.gmra.mxu2 %vm470_vm0, %v458_v38  ;;  %9476 = vmatmul.msk.f32.vlgmr.msrb.gmra.mxu1 %vm387_vm1, %v693_v54  ;;  %v676_v38 = vrot.slane %v11288_v29, 6 }
  0xd8   : > { %9510 = vmatmul.msk.f32.gmra.mxu0 %vm387_vm1, %v11302_v34  ;;  %1145 = vmatpush.msra.mxu2 %v9539_v57 }
  0xd9   : > { %v11322_v45 = vsel %vm685_vm2, %v675_v37, %v676_v38  ;;  %v643_v37 = vrot.slane %v588_v14, 5  ;;  %v9549_v38 = vld [vmem:[%s18568_s4 + $0x188] sm:$0xff]  ;;  %1457 = vmatpush.msrb.mxu1 %v9587_v0 }
  0xda   : > { %1146 = vmatpush.msra.mxu2 %v9538_v61 }
  0xde   : > { %v459_v59 = vpop.trf.xlu0 }
  0xdf   : > { %9457 = vmatmul.msk.f32.gmra.mxu2 %vm470_vm0, %v459_v59  ;;  %9477 = vmatmul.msk.f32.gmra.mxu1 %vm387_vm1, %v11191_v1  ;;  %v9555_v59 = vld [vmem:[%s18568_s4 + $0x1b8] sm:$0xff] }
  0xe0   : > { %9511 = vmatmul.msk.f32.gmra.mxu0 %vm387_vm1, %v11331_v47 }
  0xe6   : > { %v460_v3 = vpop.trf.xlu0 }
  0xe7   : > { %9458 = vmatmul.msk.f32.gmra.mxu2 %vm470_vm0, %v460_v3  ;;  %9478 = vmatmul.msk.f32.gmra.mxu1 %vm387_vm1, %v11292_v30  ;;  %v9537_v3 = vld [vmem:[%s18568_s4 + $0x168] sm:$0xff] }
  0xe8   : > { %1147 = vmatpush.msra.mxu2 %v9537_v3 }
  0xee   : > { %v461_v7 = vpop.trf.xlu0 }
  0xef   : > { %9459 = vmatmul.msk.f32.vlgmr.msra.gmra.mxu3 %vm470_vm0, %v461_v7  ;;  %9484 = vmatmul.msk.f32.vlgmr.msrb.gmra.mxu2 %vm387_vm1, %v626_v6  ;;  %v9569_v6 = vld [vmem:[%s18568_s4 + $0x1e8] sm:$0xff]  ;;  %v9536_v7 = vld [vmem:[%s18568_s4 + $0x160] sm:$0xff] }
  0xf0   : > { %9479 = vmatmul.msk.f32.gmra.mxu1 %vm387_vm1, %v11322_v45  ;;  %1252 = vmatpush.msra.mxu3 %v9555_v59  ;;  %v591_v59 = vld [vmem:[#allocation2 + $0x78] sm:$0xff] }
  0xf1   : > { %1361 = vmatpush.msra.mxu0 %v9569_v6  ;;  %1148 = vmatpush.msra.mxu2 %v9536_v7  ;;  %v610_v6 = vrot.slane %v591_v59, 4  ;;  %v843_v7 = vrot.slane %v591_v59, 7 }
  0xf2   : > { %1253 = vmatpush.msra.mxu3 %v9554_v62 }
  0xf3   : > { %1362 = vmatpush.msra.mxu0 %v9568_v10  ;;  %1149 = vmatpush.msra.mxu2 %v9535_v18  ;;  %v645_v10 = vrot.slane %v591_v59, 5 }
  0xf4   : > { %1254 = vmatpush.msra.mxu3 %v9553_v4  ;;  %v679_v4 = vrot.slane %v591_v59, 6 }
  0xf5   : > { %1363 = vmatpush.msra.mxu0 %v9567_v22  ;;  %1150 = vmatpush.msra.mxu2 %v9534_v23 }
  0xf6   : > { %1255 = vmatpush.msra.mxu3 %v9552_v9 }
  0xf7   : > { %9500 = vmatmul.msk.f32.vlgmr.msrb.gmra.mxu3 %vm387_vm1, %v857_v12  ;;  %9485 = vmatmul.msk.f32.gmra.mxu2 %vm387_vm1, %v11258_v13 }
  0xf8   : > { %1151 = vmatpush.msra.mxu2 %v9533_v32  ;;  %v9586_v32 = vld [vmem:[%s18568_s4 + $0x230] sm:$0xff] }
  0xf9   : > { %1458 = vmatpush.msrb.mxu1 %v9586_v32 }
  0xfa   : > { %1152 = vmatpush.msra.mxu2 %v9532_v56 }
  0xff   : > { %9501 = vmatmul.msk.f32.gmra.mxu3 %vm387_vm1, %v856_v20  ;;  %9486 = vmatmul.msk.f32.gmra.mxu2 %vm387_vm1, %v11280_v21  ;;  %v9551_v20 = vld [vmem:[%s18568_s4 + $0x198] sm:$0xff] }
 0x100   : > { %1256 = vmatpush.msra.mxu3 %v9551_v20 }
 0x102   : > { %1257 = vmatpush.msra.mxu3 %v9550_v24 }
 0x104   : > { %1258 = vmatpush.msra.mxu3 %v9549_v38 }
 0x106   : > { %1259 = vmatpush.msra.mxu3 %v9548_v60 }
 0x107   : > { %9502 = vmatmul.msk.f32.gmra.mxu3 %vm387_vm1, %v855_v31  ;;  %9487 = vmatmul.msk.f32.gmra.mxu2 %vm387_vm1, %v11310_v35  ;;  %v9566_v31 = vld [vmem:[%s18568_s4 + $0x1d0] sm:$0xff] }
 0x108   : > { %1364 = vmatpush.msra.mxu0 %v9566_v31 }
 0x10f   : > { %9503 = vmatmul.msk.f32.gmra.mxu3 %vm387_vm1, %v854_v46  ;;  %v11432_v46 = vld [vmem:[#allocation2 + $0x70] sm:$0xff] }
 0x110   : > { %v1404_v61 = vrot.slane %v11432_v46, 4 }
 0x134   : > { %v512_v53 = vpop.f32.mrf.mxu0 }
 0x135   : > { %v540_v54 = vmul.f32 %v11344_v50, %v512_v53 }
 0x137   : > { %v552_v55 = vadd.f32 %v11349_v51, %v540_v54 }
 0x139   : > { %v560_v63 = vmax.f32 %v552_v55, 0.0  ;;  %v9565_v55 = vld [vmem:[%s18568_s4 + $0x1c8] sm:$0xff] }
 0x13a   : > { %1365 = vmatpush.msra.mxu0 %v9565_v55 }
 0x13b   : > { %568 = vst.msk [vmem:[#allocation2 + $0x68] sm:$0xff] %vm387_vm1, %v560_v63  ;;  %v9564_v63 = vld [vmem:[%s18568_s4 + $0x1c0] sm:$0xff] }
 0x13c   : > { %v515_v8 = vpop.f32.mrf.mxu0  ;;  %1366 = vmatpush.msra.mxu0 %v9564_v63 }
 0x13d   : > { %v541_v12 = vmul.f32 %v11344_v50, %v515_v8  ;;  %v11473_v8 = vld [vmem:[#allocation2 + $0x88] sm:$0xff] }
 0x13e   : > { %v1405_v22 = vrot.slane %v11473_v8, 4 }
 0x13f   : > { %v553_v16 = vadd.f32 %v11349_v51, %v541_v12 }
 0x141   : > { %v561_v25 = vmax.f32 %v553_v16, 0.0 }
 0x142   : > { %v11422_v36 = vld [vmem:[#allocation2 + $0x68] sm:$0xff] }
 0x143   : > { %569 = vst.msk [vmem:[#allocation2 + $0x80] sm:$0xff] %vm387_vm1, %v561_v25  ;;  %v678_v40 = vrot.slane %v11422_v36, 6  ;;  %v609_v41 = vrot.slane %v11422_v36, 4  ;;  %v842_v42 = vrot.slane %v11422_v36, 7  ;;  %v644_v44 = vrot.slane %v11422_v36, 5 }
 0x144   : > { %v518_v48 = vpop.f32.mrf.mxu1 }
 0x145   : > { %v542_v49 = vmul.f32 %v11344_v50, %v518_v48  ;;  %v11437_v52 = vsel %vm685_vm2, %v677_v26, %v678_v40  ;;  %v11441_v53 = vsel %vm618_vm4, %v608_v27, %v609_v41  ;;  %v853_v54 = vsel %vm849_vm5, %v841_v28, %v842_v42  ;;  %v594_v27 = vld [vmem:[#allocation2 + $0x90] sm:$0xff] }
 0x146   : > { %9480 = vmatmul.msk.f32.gmra.mxu1 %vm387_vm1, %v11437_v52  ;;  %9488 = vmatmul.msk.f32.gmra.mxu2 %vm387_vm1, %v11441_v53  ;;  %v11457_v57 = vsel %vm651_vm3, %v643_v37, %v644_v44  ;;  %v11479_v12 = vsel %vm618_vm4, %v609_v41, %v1404_v61  ;;  %v11513_v37 = vld [vmem:[#allocation2 + $0xa0] sm:$0xff]  ;;  %v681_v38 = vrot.slane %v594_v27, 6  ;;  %v612_v42 = vrot.slane %v594_v27, 4 }
 0x147   : > { %v554_v62 = vadd.f32 %v11349_v51, %v542_v49  ;;  %9504 = vmatmul.msk.f32.gmra.mxu3 %vm387_vm1, %v853_v54  ;;  %9512 = vmatmul.msk.f32.gmra.mxu0 %vm387_vm1, %v11457_v57  ;;  %v845_v44 = vrot.slane %v594_v27, 7  ;;  %v647_v48 = vrot.slane %v594_v27, 5  ;;  %v1406_v54 = vrot.slane %v11513_v37, 4 }
 0x149   : > { %v562_v3 = vmax.f32 %v554_v62, 0.0 }
 0x14a   : > { %v11475_v9 = vld [vmem:[#allocation2 + $0x80] sm:$0xff] }
 0x14b   : > { %570 = vst.msk [vmem:[#allocation2 + $0x98] sm:$0xff] %vm387_vm1, %v562_v3  ;;  %v680_v14 = vrot.slane %v11475_v9, 6  ;;  %v611_v16 = vrot.slane %v11475_v9, 4  ;;  %v844_v17 = vrot.slane %v11475_v9, 7  ;;  %v646_v18 = vrot.slane %v11475_v9, 5  ;;  %v597_v3 = vld [vmem:[#allocation2 + $0xa8] sm:$0xff] }
 0x14c   : > { %v521_v20 = vpop.f32.mrf.mxu1 }
 0x14d   : > { %v543_v23 = vmul.f32 %v11344_v50, %v521_v20  ;;  %v11490_v24 = vsel %vm685_vm2, %v679_v4, %v680_v14  ;;  %v11494_v25 = vsel %vm618_vm4, %v610_v6, %v611_v16  ;;  %v852_v26 = vsel %vm849_vm5, %v843_v7, %v844_v17  ;;  %v9585_v4 = vld [vmem:[%s18568_s4 + $0x228] sm:$0xff]  ;;  %v11551_v6 = vld [vmem:[#allocation2 + $0xb8] sm:$0xff] }
 0x14e   : > { %9481 = vmatmul.msk.f32.gmra.mxu1 %vm387_vm1, %v11490_v24  ;;  %9489 = vmatmul.msk.f32.gmra.mxu2 %vm387_vm1, %v11494_v25  ;;  %v11504_v28 = vsel %vm651_vm3, %v645_v10, %v646_v18  ;;  %v11517_v40 = vsel %vm618_vm4, %v611_v16, %v1405_v22  ;;  %v683_v10 = vrot.slane %v597_v3, 6  ;;  %v614_v14 = vrot.slane %v597_v3, 4 }
 0x14f   : > { %v555_v31 = vadd.f32 %v11349_v51, %v543_v23  ;;  %9505 = vmatmul.msk.f32.gmra.mxu3 %vm387_vm1, %v852_v26  ;;  %9513 = vmatmul.msk.f32.gmra.mxu0 %vm387_vm1, %v11504_v28  ;;  %v847_v16 = vrot.slane %v597_v3, 7  ;;  %v649_v17 = vrot.slane %v597_v3, 5  ;;  %v1407_v20 = vrot.slane %v11551_v6, 4 }
 0x150   : > { %1459 = vmatpush.msrb.mxu1 %v9585_v4 }
 0x151   : > { %v563_v41 = vmax.f32 %v555_v31, 0.0  ;;  %v11564_v31 = vld [vmem:[#allocation2 + $0x10] sm:$0xff] }
 0x152   : > { %v11519_v49 = vld [vmem:[#allocation2 + $0x98] sm:$0xff] }
 0x153   : > { %571 = vst.msk [vmem:[#allocation2 + $0xb0] sm:$0xff] %vm387_vm1, %v563_v41  ;;  %v682_v55 = vrot.slane %v11519_v49, 6  ;;  %v613_v56 = vrot.slane %v11519_v49, 4  ;;  %v846_v59 = vrot.slane %v11519_v49, 7  ;;  %v648_v60 = vrot.slane %v11519_v49, 5 }
 0x155   : > { %v11529_v61 = vsel %vm685_vm2, %v681_v38, %v682_v55  ;;  %v11533_v62 = vsel %vm618_vm4, %v612_v42, %v613_v56  ;;  %v851_v63 = vsel %vm849_vm5, %v845_v44, %v846_v59  ;;  %v11539_v0 = vsel %vm651_vm3, %v647_v48, %v648_v60 }
 0x156   : > { %9482 = vmatmul.msk.f32.gmra.mxu1 %vm387_vm1, %v11529_v61  ;;  %9490 = vmatmul.msk.f32.gmra.mxu2 %vm387_vm1, %v11533_v62  ;;  %v11555_v7 = vsel %vm618_vm4, %v613_v56, %v1406_v54  ;;  %v1079_v44 = vrot.slane %v11120_v43, 1  ;;  %v1080_v48 = vrot.slane %v11564_v31, 1  ;;  %v9584_v54 = vld [vmem:[%s18568_s4 + $0x220] sm:$0xff]  ;;  %v1186_v56 = vrot.slane %v11120_v43, 2 }
 0x157   : > { %9506 = vmatmul.msk.f32.gmra.mxu3 %vm387_vm1, %v851_v63  ;;  %9514 = vmatmul.msk.f32.gmra.mxu0 %vm387_vm1, %v11539_v0  ;;  %v1187_v59 = vrot.slane %v11564_v31, 2  ;;  %v1293_v60 = vrot.slane %v11120_v43, 3  ;;  %v1294_v63 = vrot.slane %v11564_v31, 3 }
 0x158   : > { %1460 = vmatpush.msrb.mxu1 %v9584_v54  ;;  %v1103_v3 = vsel %vm1095_vm6, %v1079_v44, %v1080_v48 }
 0x159   : > { %v1210_v4 = vsel %vm1202_vm7, %v1186_v56, %v1187_v59 }
 0x15a   : > { %v11557_v18 = vld [vmem:[#allocation2 + $0xb0] sm:$0xff] }
 0x15b   : > { %v684_v22 = vrot.slane %v11557_v18, 6  ;;  %v615_v23 = vrot.slane %v11557_v18, 4  ;;  %v848_v26 = vrot.slane %v11557_v18, 7  ;;  %v650_v27 = vrot.slane %v11557_v18, 5 }
 0x15d   : > { %v11568_v32 = vsel %vm685_vm2, %v683_v10, %v684_v22  ;;  %v11572_v38 = vsel %vm618_vm4, %v614_v14, %v615_v23  ;;  %v850_v41 = vsel %vm849_vm5, %v847_v16, %v848_v26  ;;  %v11578_v42 = vsel %vm651_vm3, %v649_v17, %v650_v27  ;;  %v11609_v14 = vld [vmem:[#allocation2 + $0x28] sm:$0xff]  ;;  %v9583_v22 = vld [vmem:[%s18568_s4 + $0x218] sm:$0xff] }
 0x15e   : > { %9483 = vmatmul.msk.f32.gmra.mxu1 %vm387_vm1, %v11568_v32  ;;  %9491 = vmatmul.msk.f32.gmra.mxu2 %vm387_vm1, %v11572_v38  ;;  %v11594_v55 = vsel %vm618_vm4, %v615_v23, %v1407_v20  ;;  %v1317_v10 = vsel %vm1309_vm8, %v1293_v60, %v1294_v63  ;;  %v1081_v16 = vrot.slane %v11169_v58, 1  ;;  %v1082_v17 = vrot.slane %v11609_v14, 1  ;;  %v524_v23 = vpop.f32.mrf.mxu2  ;;  %v11637_v60 = vld [vmem:[#allocation2 + $0x40] sm:$0xff] }
 0x15f   : > { %9507 = vmatmul.msk.f32.gmra.mxu3 %vm387_vm1, %v850_v41  ;;  %9515 = vmatmul.msk.f32.gmra.mxu0 %vm387_vm1, %v11578_v42  ;;  %18731 = vst [vmem:[#allocation3_spill] sm:$0xff] %v11594_v55  ;;  %v1188_v20 = vrot.slane %v11169_v58, 2  ;;  %v1189_v26 = vrot.slane %v11609_v14, 2  ;;  %v1295_v27 = vrot.slane %v11169_v58, 3  ;;  %v1296_v41 = vrot.slane %v11609_v14, 3 }
 0x160   : > { %1461 = vmatpush.msrb.mxu1 %v9583_v22  ;;  %v544_v44 = vmul.f32 %v11344_v50, %v524_v23  ;;  %v11629_v54 = vsel %vm1095_vm6, %v1081_v16, %v1082_v17  ;;  %v1190_v16 = vrot.slane %v11262_v15, 2  ;;  %v9582_v17 = vld [vmem:[%s18568_s4 + $0x210] sm:$0xff]  ;;  %v1191_v22 = vrot.slane %v11637_v60, 2 }
 0x161   : > { %18732 = vst [vmem:[#allocation4_spill] sm:$0xff] %v11629_v54  ;;  %v11633_v56 = vsel %vm1202_vm7, %v1188_v20, %v1189_v26  ;;  %v1316_v59 = vsel %vm1309_vm8, %v1295_v27, %v1296_v41  ;;  %v1297_v23 = vrot.slane %v11262_v15, 3  ;;  %v1298_v26 = vrot.slane %v11637_v60, 3  ;;  %v2456_v41 = vld [vmem:[#allocation2 + $0x80] sm:$0xff] }
 0x162   : > { %v556_v48 = vadd.f32 %v11349_v51, %v544_v44  ;;  %18733 = vst [vmem:[#allocation5_spill] sm:$0xff] %v11633_v56  ;;  %1462 = vmatpush.msrb.mxu1 %v9582_v17  ;;  %v2454_v44 = vld [vmem:[#allocation2 + $0x70] sm:$0xff]  ;;  %v11666_v5 = vrot.slane %v2456_v41, 4  ;;  %v11670_v17 = vsel %vm1202_vm7, %v1190_v16, %v1191_v22  ;;  %v1085_v16 = vrot.slane %v11288_v29, 1  ;;  %v9619_v41 = vld [vmem:[%s18568_s4 + $0x2b8] sm:$0xff] }
 0x163   : > { %18737 = vst [vmem:[#allocation9_spill] sm:$0xff] %v11670_v17  ;;  %v1086_v22 = vrot.slane %v11664_v11, 1  ;;  %1694 = vmatpush.msrb.mxu3 %v9619_v41  ;;  %v9633_v41 = vld [vmem:[%s18568_s4 + $0x2e8] sm:$0xff] }
 0x164   : > { %v564_v63 = vmax.f32 %v556_v48, 0.0  ;;  %18736 = vst [vmem:[#allocation8_spill] sm:$0xff] %v11666_v5 }
 0x166   : > { %9524 = vmatmul.msk.f32.vlgmr.msra.gmra.mxu1 %vm387_vm1, %v11120_v43  ;;  %9540 = vmatmul.msk.f32.vlgmr.msra.gmra.mxu2 %vm387_vm1, %v1103_v3  ;;  %572 = vst.msk [vmem:[#allocation2 + $0xc8] sm:$0xff] %vm387_vm1, %v564_v63  ;;  %v2453_v3 = vld [vmem:[#allocation2 + $0x68] sm:$0xff]  ;;  %v527_v20 = vpop.f32.mrf.mxu2  ;;  %v2459_v63 = vld [vmem:[#allocation2 + $0x98] sm:$0xff] }
 0x167   : > { %9556 = vmatmul.msk.f32.vlgmr.msra.gmra.mxu3 %vm387_vm1, %v1210_v4  ;;  %9572 = vmatmul.msk.f32.vlgmr.msra.gmra.mxu0 %vm387_vm1, %v1317_v10  ;;  %v1083_v4 = vrot.slane %v11262_v15, 1  ;;  %v1084_v10 = vrot.slane %v11637_v60, 1  ;;  %v545_v27 = vmul.f32 %v11344_v50, %v527_v20  ;;  %v11657_v48 = vrot.slane %v2453_v3, 4 }
 0x168   : > { %v1315_v3 = vsel %vm1309_vm8, %v1297_v23, %v1298_v26  ;;  %v11674_v55 = vrot.slane %v2459_v63, 4  ;;  %v2463_v23 = vld [vmem:[#allocation2 + $0xb8] sm:$0xff] }
 0x169   : > { %18734 = vst [vmem:[#allocation6_spill] sm:$0xff] %v11657_v48  ;;  %v11662_v19 = vsel %vm1095_vm6, %v1083_v4, %v1084_v10  ;;  %v3297_v10 = vrot.slane %v2457_v33, 4  ;;  %v1192_v33 = vrot.slane %v11288_v29, 2  ;;  %v9603_v26 = vld [vmem:[%s18568_s4 + $0x278] sm:$0xff] }
 0x16a   : > { %18735 = vst [vmem:[#allocation7_spill] sm:$0xff] %v11662_v19  ;;  %1588 = vmatpush.msrb.mxu2 %v9603_v26  ;;  %v9601_v26 = vld [vmem:[%s18568_s4 + $0x268] sm:$0xff] }
 0x16b   : > { %18738 = vst [vmem:[#allocation10_spill] sm:$0xff] %v11674_v55  ;;  %v11706_v63 = vsel %vm618_vm4, %v11666_v5, %v3297_v10  ;;  %v3299_v5 = vrot.slane %v2463_v23, 4 }
 0x16c   : > { %18741 = vst [vmem:[#allocation13_spill] sm:$0xff] %v11706_v63 }
 0x16e   : > { %9525 = vmatmul.msk.f32.gmra.mxu1 %vm387_vm1, %v11169_v58  ;;  %9541 = vmatmul.msk.f32.gmra.mxu2 %vm387_vm1, %v11629_v54  ;;  %v2460_v54 = vld [vmem:[#allocation2 + $0xa0] sm:$0xff] }
 0x16f   : > { %9557 = vmatmul.msk.f32.gmra.mxu3 %vm387_vm1, %v11633_v56  ;;  %9573 = vmatmul.msk.f32.gmra.mxu0 %vm387_vm1, %v1316_v59  ;;  %v557_v59 = vadd.f32 %v11349_v51, %v545_v27  ;;  %v3296_v56 = vrot.slane %v2454_v44, 4  ;;  %v2462_v27 = vld [vmem:[#allocation2 + $0xb0] sm:$0xff]  ;;  %v530_v44 = vpop.f32.mrf.mxu2 }
 0x170   : > { %v546_v10 = vmul.f32 %v11344_v50, %v530_v44  ;;  %v11741_v44 = vsel %vm1095_vm6, %v1085_v16, %v1086_v22  ;;  %v9600_v16 = vld [vmem:[%s18568_s4 + $0x260] sm:$0xff]  ;;  %v9615_v22 = vld [vmem:[%s18568_s4 + $0x298] sm:$0xff] }
 0x171   : > { %v565_v20 = vmax.f32 %v557_v59, 0.0  ;;  %v11679_v4 = vsel %vm618_vm4, %v11657_v48, %v3296_v56  ;;  %v9581_v56 = vld [vmem:[%s18568_s4 + $0x208] sm:$0xff]  ;;  %v11701_v59 = vrot.slane %v2462_v27, 4  ;;  %v1300_v48 = vrot.slane %v11664_v11, 3  ;;  %v9602_v27 = vld [vmem:[%s18568_s4 + $0x270] sm:$0xff] }
 0x172   : > { %18739 = vst [vmem:[#allocation11_spill] sm:$0xff] %v11679_v4  ;;  %v1299_v4 = vrot.slane %v11288_v29, 3  ;;  %1463 = vmatpush.msrb.mxu1 %v9581_v56  ;;  %v9634_v56 = vld [vmem:[%s18568_s4 + $0x2f0] sm:$0xff]  ;;  %1589 = vmatpush.msrb.mxu2 %v9602_v27 }
 0x173   : > { %573 = vst.msk [vmem:[#allocation2 + $0xe0] sm:$0xff] %vm387_vm1, %v565_v20  ;;  %v1193_v20 = vrot.slane %v11664_v11, 2  ;;  %v11746_v23 = vsel %vm618_vm4, %v11701_v59, %v3299_v5  ;;  %v9616_v5 = vld [vmem:[%s18568_s4 + $0x2a0] sm:$0xff] }
 0x174   : > { %18740 = vst [vmem:[#allocation12_spill] sm:$0xff] %v11701_v59  ;;  %v1314_v27 = vsel %vm1309_vm8, %v1299_v4, %v1300_v48  ;;  %1590 = vmatpush.msrb.mxu2 %v9601_v26  ;;  %v9580_v48 = vld [vmem:[%s18568_s4 + $0x200] sm:$0xff]  ;;  %v9599_v4 = vld [vmem:[%s18568_s4 + $0x258] sm:$0xff]  ;;  %v1088_v26 = vrot.slane %v11432_v46, 1 }
 0x175   : > { %18743 = vst [vmem:[#allocation15_spill] sm:$0xff] %v11746_v23  ;;  %1464 = vmatpush.msrb.mxu1 %v9580_v48  ;;  %v11904_v23 = vpop.f32.mrf.mxu0 }
 0x176   : > { %9526 = vmatmul.msk.f32.gmra.mxu1 %vm387_vm1, %v11262_v15  ;;  %9542 = vmatmul.msk.f32.gmra.mxu2 %vm387_vm1, %v11662_v19  ;;  %v558_v19 = vadd.f32 %v11349_v51, %v546_v10 }
 0x177   : > { %9558 = vmatmul.msk.f32.gmra.mxu3 %vm387_vm1, %v11670_v17  ;;  %9574 = vmatmul.msk.f32.gmra.mxu0 %vm387_vm1, %v1315_v3  ;;  %v3298_v3 = vrot.slane %v2460_v54, 4  ;;  %v9635_v17 = vld [vmem:[%s18568_s4 + $0x2f8] sm:$0xff]  ;;  %v9618_v54 = vld [vmem:[%s18568_s4 + $0x2b0] sm:$0xff] }
 0x178   : > { %1800 = vmatpush.msrb.mxu0 %v9635_v17  ;;  %v9617_v17 = vld [vmem:[%s18568_s4 + $0x2a8] sm:$0xff]  ;;  %1695 = vmatpush.msrb.mxu3 %v9618_v54  ;;  %v566_v10 = vmax.f32 %v558_v19, 0.0  ;;  %v9632_v19 = vld [vmem:[%s18568_s4 + $0x2e0] sm:$0xff] }
 0x179   : > { %v11730_v63 = vsel %vm618_vm4, %v11674_v55, %v3298_v3  ;;  %v11750_v3 = vsel %vm1202_vm7, %v1192_v33, %v1193_v20  ;;  %v533_v33 = vpop.f32.mrf.mxu3  ;;  %1591 = vmatpush.msrb.mxu2 %v9600_v16  ;;  %v9631_v20 = vld [vmem:[%s18568_s4 + $0x2d8] sm:$0xff]  ;;  %v1302_v16 = vrot.slane %v11432_v46, 3 }
 0x17a   : > { %18742 = vst [vmem:[#allocation14_spill] sm:$0xff] %v11730_v63  ;;  %1801 = vmatpush.msrb.mxu0 %v9634_v56  ;;  %1696 = vmatpush.msrb.mxu3 %v9617_v17  ;;  %v547_v54 = vmul.f32 %v11344_v50, %v533_v33  ;;  %v1087_v56 = vrot.slane %v11422_v36, 1  ;;  %v1195_v17 = vrot.slane %v11432_v46, 2  ;;  %v1301_v50 = vrot.slane %v11422_v36, 3  ;;  %v9597_v46 = vld [vmem:[%s18568_s4 + $0x248] sm:$0xff] }
 0x17b   : > { %574 = vst.msk [vmem:[#allocation2 + $0xf8] sm:$0xff] %vm387_vm1, %v566_v10  ;;  %v1194_v10 = vrot.slane %v11422_v36, 2  ;;  %1592 = vmatpush.msrb.mxu2 %v9599_v4 }
 0x17c   : > { %1802 = vmatpush.msrb.mxu0 %v9633_v41  ;;  %1697 = vmatpush.msrb.mxu3 %v9616_v5  ;;  %v9598_v41 = vld [vmem:[%s18568_s4 + $0x250] sm:$0xff]  ;;  %v559_v5 = vadd.f32 %v11349_v51, %v547_v54  ;;  %v11802_v33 = vsel %vm1095_vm6, %v1087_v56, %v1088_v26  ;;  %v9613_v51 = vld [vmem:[%s18568_s4 + $0x288] sm:$0xff]  ;;  %v9612_v54 = vld [vmem:[%s18568_s4 + $0x280] sm:$0xff] }
 0x17d   : > { %1593 = vmatpush.msrb.mxu2 %v9598_v41  ;;  %v11816_v4 = vsel %vm1202_vm7, %v1194_v10, %v1195_v17  ;;  %v9651_v56 = vld [vmem:[%s18568_s4 + $0x338] sm:$0xff]  ;;  %v9628_v26 = vld [vmem:[%s18568_s4 + $0x2c0] sm:$0xff]  ;;  %v1089_v17 = vrot.slane %v11475_v9, 1  ;;  %v1090_v41 = vrot.slane %v11473_v8, 1  ;;  %v1197_v10 = vrot.slane %v11473_v8, 2 }
 0x17e   : > { %9527 = vmatmul.msk.f32.gmra.mxu1 %vm387_vm1, %v11288_v29  ;;  %9543 = vmatmul.msk.f32.gmra.mxu2 %vm387_vm1, %v11741_v44  ;;  %v567_v48 = vmax.f32 %v559_v5, 0.0 }
 0x17f   : > { %9559 = vmatmul.msk.f32.gmra.mxu3 %vm387_vm1, %v11750_v3  ;;  %9575 = vmatmul.msk.f32.gmra.mxu0 %vm387_vm1, %v1314_v27  ;;  %v9614_v27 = vld [vmem:[%s18568_s4 + $0x290] sm:$0xff]  ;;  %v11847_v5 = vsel %vm1095_vm6, %v1089_v17, %v1090_v41  ;;  %v1094_v17 = vrot.slane %v11551_v6, 1  ;;  %v4343_v41 = vld [vmem:[#allocation2 + $0x80] sm:$0xff] }
 0x180   : > { %1803 = vmatpush.msrb.mxu0 %v9632_v19  ;;  %1698 = vmatpush.msrb.mxu3 %v9615_v22  ;;  %v9630_v19 = vld [vmem:[%s18568_s4 + $0x2d0] sm:$0xff]  ;;  %v1313_v22 = vsel %vm1309_vm8, %v1301_v50, %v1302_v16  ;;  %575 = vst.msk [vmem:[#allocation2 + $0x110] sm:$0xff] %vm387_vm1, %v567_v48  ;;  %v1303_v50 = vrot.slane %v11475_v9, 3  ;;  %v1304_v16 = vrot.slane %v11473_v8, 3 }
 0x181   : > { %1594 = vmatpush.msrb.mxu2 %v9597_v46  ;;  %1906 = vmatpush.msra.mxu1 %v9651_v56  ;;  %v9650_v48 = vld [vmem:[%s18568_s4 + $0x330] sm:$0xff]  ;;  %v1092_v46 = vrot.slane %v11513_v37, 1 }
 0x182   : > { %1804 = vmatpush.msrb.mxu0 %v9631_v20  ;;  %1699 = vmatpush.msrb.mxu3 %v9614_v27  ;;  %v9629_v20 = vld [vmem:[%s18568_s4 + $0x2c8] sm:$0xff]  ;;  %v1196_v27 = vrot.slane %v11475_v9, 2  ;;  %v1312_v8 = vsel %vm1309_vm8, %v1303_v50, %v1304_v16  ;;  %v1201_v50 = vrot.slane %v11551_v6, 2  ;;  %v3398_v16 = vld [vmem:[#allocation2 + $0x70] sm:$0xff] }
 0x183   : > { %1907 = vmatpush.msra.mxu1 %v9650_v48  ;;  %v4349_v48 = vld [vmem:[#allocation2 + $0xb0] sm:$0xff]  ;;  %v5187_v55 = vrot.slane %v3398_v16, 4 }
 0x184   : > { %1805 = vmatpush.msrb.mxu0 %v9630_v19  ;;  %1700 = vmatpush.msrb.mxu3 %v9613_v51  ;;  %v11855_v19 = vsel %vm1202_vm7, %v1196_v27, %v1197_v10  ;;  %v1198_v51 = vrot.slane %v11519_v49, 2  ;;  %v1093_v27 = vrot.slane %v11557_v18, 1  ;;  %v1200_v10 = vrot.slane %v11557_v18, 2 }
 0x185   : > { %v11908_v59 = vrot.slane %v4349_v48, 4 }
 0x186   : > { %9528 = vmatmul.msk.f32.gmra.mxu1 %vm387_vm1, %v11422_v36  ;;  %9544 = vmatmul.msk.f32.gmra.mxu2 %vm387_vm1, %v11802_v33  ;;  %v9596_v36 = vld [vmem:[%s18568_s4 + $0x240] sm:$0xff] }
 0x187   : > { %9560 = vmatmul.msk.f32.gmra.mxu3 %vm387_vm1, %v11816_v4  ;;  %9576 = vmatmul.msk.f32.gmra.mxu0 %vm387_vm1, %v1313_v22  ;;  %v1199_v22 = vrot.slane %v11513_v37, 2  ;;  %18748 = vst [vmem:[#allocation20_spill] sm:$0xff] %v11908_v59 }
 0x188   : > { %1806 = vmatpush.msrb.mxu0 %v9629_v20  ;;  %1595 = vmatpush.msrb.mxu2 %v9596_v36  ;;  %v1305_v20 = vrot.slane %v11519_v49, 3  ;;  %v1306_v36 = vrot.slane %v11513_v37, 3  ;;  %v9649_v37 = vld [vmem:[%s18568_s4 + $0x328] sm:$0xff] }
 0x189   : > { %1701 = vmatpush.msrb.mxu3 %v9612_v54  ;;  %v11881_v56 = vsel %vm1202_vm7, %v1198_v51, %v1199_v22  ;;  %1908 = vmatpush.msra.mxu1 %v9649_v37  ;;  %v3401_v51 = vld [vmem:[#allocation2 + $0x88] sm:$0xff]  ;;  %v11902_v37 = vrot.slane %v4343_v41, 4 }
 0x18a   : > { %1807 = vmatpush.msrb.mxu0 %v9628_v26  ;;  %18744 = vst [vmem:[#allocation16_spill] sm:$0xff] %v11881_v56  ;;  %v1311_v26 = vsel %vm1309_vm8, %v1305_v20, %v1306_v36  ;;  %v11900_v20 = vpop.f32.mrf.mxu1  ;;  %v3404_v36 = vld [vmem:[#allocation2 + $0xa0] sm:$0xff]  ;;  %v5188_v22 = vrot.slane %v3401_v51, 4 }
 0x18b   : > { %18746 = vst [vmem:[#allocation18_spill] sm:$0xff] %v11902_v37 }
 0x18e   : > { %9529 = vmatmul.msk.f32.gmra.mxu1 %vm387_vm1, %v11475_v9  ;;  %9545 = vmatmul.msk.f32.gmra.mxu2 %vm387_vm1, %v11847_v5  ;;  %v1091_v9 = vrot.slane %v11519_v49, 1 }
 0x18f   : > { %9561 = vmatmul.msk.f32.gmra.mxu3 %vm387_vm1, %v11855_v19  ;;  %9577 = vmatmul.msk.f32.gmra.mxu0 %vm387_vm1, %v1312_v8  ;;  %v4346_v8 = vld [vmem:[#allocation2 + $0x98] sm:$0xff] }
 0x190   : > { %v11873_v54 = vsel %vm1095_vm6, %v1091_v9, %v1092_v46  ;;  %v1307_v9 = vrot.slane %v11557_v18, 3  ;;  %v1308_v46 = vrot.slane %v11551_v6, 3  ;;  %v11906_v63 = vrot.slane %v4346_v8, 4 }
 0x191   : > { %v11916_v6 = vsel %vm1202_vm7, %v1200_v10, %v1201_v50  ;;  %v9648_v10 = vld [vmem:[%s18568_s4 + $0x320] sm:$0xff]  ;;  %v11940_v50 = vsel %vm618_vm4, %v11902_v37, %v5188_v22 }
 0x192   : > { %18747 = vst [vmem:[#allocation19_spill] sm:$0xff] %v11906_v63  ;;  %v1310_v41 = vsel %vm1309_vm8, %v1307_v9, %v1308_v46  ;;  %1909 = vmatpush.msra.mxu1 %v9648_v10  ;;  %v11954_v9 = vpop.f32.mrf.mxu2  ;;  %v18754_v46 = vrot.slane %v11120_v43, 4  ;;  %v11960_v22 = vpop.f32.mrf.mxu1  ;;  %v1401_v43 = vrot.slane %v11609_v14, 4 }
 0x193   : > { %18751 = vst [vmem:[#allocation22_spill] sm:$0xff] %v11940_v50 }
 0x196   : > { %9530 = vmatmul.msk.f32.gmra.mxu1 %vm387_vm1, %v11519_v49  ;;  %9546 = vmatmul.msk.f32.gmra.mxu2 %vm387_vm1, %v11873_v54  ;;  %v11891_v49 = vld [vmem:[#allocation2 + $0x68] sm:$0xff] }
 0x197   : > { %9562 = vmatmul.msk.f32.gmra.mxu3 %vm387_vm1, %v11881_v56  ;;  %9578 = vmatmul.msk.f32.gmra.mxu0 %vm387_vm1, %v1311_v26  ;;  %18745 = vst [vmem:[#allocation17_spill] sm:$0xff] %v11891_v49  ;;  %v3407_v26 = vld [vmem:[#allocation2 + $0xb8] sm:$0xff]  ;;  %v11912_v56 = vsel %vm1095_vm6, %v1093_v27, %v1094_v17  ;;  %v18749_v16 = vrot.slane %v11891_v49, 4  ;;  %v5189_v27 = vrot.slane %v3404_v36, 4  ;;  %v11965_v36 = vpop.f32.mrf.mxu0 }
 0x198   : > { %v5190_v8 = vrot.slane %v3407_v26, 4  ;;  %v9647_v26 = vld [vmem:[%s18568_s4 + $0x318] sm:$0xff] }
 0x199   : > { %v11928_v17 = vsel %vm618_vm4, %v18749_v16, %v5187_v55  ;;  %v11945_v55 = vsel %vm618_vm4, %v11906_v63, %v5189_v27  ;;  %1910 = vmatpush.msra.mxu1 %v9647_v26  ;;  %v11977_v16 = vld [vmem:[#allocation2 + $0x98] sm:$0xff]  ;;  %v9646_v26 = vld [vmem:[%s18568_s4 + $0x310] sm:$0xff] }
 0x19a   : > { %18750 = vst [vmem:[#allocation21_spill] sm:$0xff] %v11928_v17  ;;  %v11950_v48 = vsel %vm618_vm4, %v11908_v59, %v5190_v8  ;;  %v18596_v14 = vrot.slane %v11977_v16, 4  ;;  %v11991_v10 = vpop.f32.mrf.mxu2 }
 0x19b   : > { %18752 = vst [vmem:[#allocation23_spill] sm:$0xff] %v11945_v55  ;;  %1911 = vmatpush.msra.mxu1 %v9646_v26  ;;  %v18768_v55 = vld [vmem:[#allocation4_spill] sm:$0xff] }
 0x19c   : > { %18753 = vst [vmem:[#allocation24_spill] sm:$0xff] %v11950_v48  ;;  %v12234_v48 = vld [vmem:[#allocation2 + $0xe0] sm:$0xff] }
 0x19d   : > { %18756 = vst [vmem:[#allocation26_spill] sm:$0xff] %v11977_v16 }
 0x19e   : > { %9531 = vmatmul.msk.f32.gmra.mxu1 %vm387_vm1, %v11557_v18  ;;  %9547 = vmatmul.msk.f32.gmra.mxu2 %vm387_vm1, %v11912_v56  ;;  %v1400_v18 = vrot.slane %v11564_v31, 4  ;;  %v11952_v31 = vpop.f32.mrf.mxu3  ;;  %18767 = vst [vmem:[#allocation33_spill] sm:$0xff] %v12234_v48 }
 0x19f   : > { %9563 = vmatmul.msk.f32.gmra.mxu3 %vm387_vm1, %v11916_v6  ;;  %9579 = vmatmul.msk.f32.gmra.mxu0 %vm387_vm1, %v1310_v41  ;;  %v11975_v41 = vld [vmem:[#allocation2 + $0xa0] sm:$0xff]  ;;  %v974_v50 = vadd.f32 %v11904_v23, %v11952_v31  ;;  %v10807_v31 = vld [vmem:[#allocation2 + $0x48] sm:$0xff] }
 0x1a0   : > { %v1415_v51 = vsel %vm618_vm4, %v18754_v46, %v1400_v18  ;;  %18755 = vst [vmem:[#allocation25_spill] sm:$0xff] %v11975_v41  ;;  %v18595_v18 = vrot.slane %v11975_v41, 4  ;;  %v9712_v41 = vld [vmem:[%s18568_s4 + $0x420] sm:$0xff] }
 0x1a1   : > { %v18772_v23 = vld [vmem:[#allocation7_spill] sm:$0xff] }
 0x1a2   : > { %v12039_v26 = vpop.f32.mrf.mxu2 }
 0x1a6   : > { %9588 = vmatmul.msk.f32.vlgmr.msrb.gmra.mxu1 %vm387_vm1, %v1415_v51  ;;  %9604 = vmatmul.msk.f32.vlgmr.msrb.gmra.mxu2 %vm387_vm1, %v11258_v13  ;;  %v18757_v13 = vrot.slane %v11169_v58, 4  ;;  %v11987_v8 = vpop.f32.mrf.mxu3  ;;  %v12004_v51 = vpop.f32.mrf.mxu1 }
 0x1a7   : > { %9620 = vmatmul.msk.f32.vlgmr.msrb.gmra.mxu3 %vm387_vm1, %v11195_v2  ;;  %9636 = vmatmul.msk.f32.vlgmr.msrb.gmra.mxu0 %vm387_vm1, %v11191_v1  ;;  %v11985_v2 = vld [vmem:[#allocation2 + $0xb8] sm:$0xff]  ;;  %v6237_v1 = vld [vmem:[#allocation2 + $0xb0] sm:$0xff] }
 0x1a8   : > { %v11983_v27 = vsel %vm618_vm4, %v18757_v13, %v1401_v43  ;;  %18758 = vst [vmem:[#allocation27_spill] sm:$0xff] %v11985_v2  ;;  %v11997_v58 = vrot.slane %v6237_v1, 4  ;;  %v18594_v46 = vrot.slane %v11985_v2, 4  ;;  %v1402_v43 = vrot.slane %v11637_v60, 4  ;;  %v12010_v13 = vpop.f32.mrf.mxu0 }
 0x1aa   : > { %18759 = vst [vmem:[#allocation28_spill] sm:$0xff] %v11997_v58 }
 0x1ae   : > { %9589 = vmatmul.msk.f32.gmra.mxu1 %vm387_vm1, %v11983_v27  ;;  %9605 = vmatmul.msk.f32.gmra.mxu2 %vm387_vm1, %v11280_v21  ;;  %v12018_v21 = vsel %vm618_vm4, %v18596_v14, %v18595_v18  ;;  %v12037_v1 = vpop.f32.mrf.mxu3  ;;  %v9679_v14 = vld [vmem:[%s18568_s4 + $0x398] sm:$0xff] }
 0x1af   : > { %9621 = vmatmul.msk.f32.gmra.mxu3 %vm387_vm1, %v11302_v34  ;;  %9637 = vmatmul.msk.f32.gmra.mxu0 %vm387_vm1, %v11292_v30  ;;  %18760 = vst [vmem:[#allocation29_spill] sm:$0xff] %v12018_v21  ;;  %v12025_v30 = vsel %vm618_vm4, %v11997_v58, %v18594_v46  ;;  %v18762_v34 = vrot.slane %v11262_v15, 4  ;;  %v1403_v15 = vrot.slane %v11664_v11, 4  ;;  %v18763_v46 = vrot.slane %v11288_v29, 4  ;;  %v9665_v29 = vld [vmem:[%s18568_s4 + $0x368] sm:$0xff]  ;;  %v18765_v58 = vld [vmem:[#allocation3_spill] sm:$0xff] }
 0x1b0   : > { %18761 = vst [vmem:[#allocation30_spill] sm:$0xff] %v12025_v30  ;;  %v12060_v11 = vpop.f32.mrf.mxu0 }
 0x1b1   : > { %v12031_v60 = vsel %vm618_vm4, %v18762_v34, %v1402_v43  ;;  %v9645_v43 = vld [vmem:[%s18568_s4 + $0x308] sm:$0xff]  ;;  %v9683_v34 = vld [vmem:[%s18568_s4 + $0x3b8] sm:$0xff]  ;;  %v12066_v18 = vsel %vm618_vm4, %v18763_v46, %v1403_v15 }
 0x1b2   : > { %1912 = vmatpush.msra.mxu1 %v9645_v43  ;;  %2094 = vmatpush.msra.mxu3 %v9683_v34  ;;  %v9666_v43 = vld [vmem:[%s18568_s4 + $0x370] sm:$0xff]  ;;  %v9681_v46 = vld [vmem:[%s18568_s4 + $0x3a8] sm:$0xff] }
 0x1b3   : > { %v9698_v34 = vld [vmem:[%s18568_s4 + $0x3f0] sm:$0xff]  ;;  %v9697_v15 = vld [vmem:[%s18568_s4 + $0x3e8] sm:$0xff] }
 0x1b6   : > { %9590 = vmatmul.msk.f32.gmra.mxu1 %vm387_vm1, %v12031_v60  ;;  %9606 = vmatmul.msk.f32.gmra.mxu2 %vm387_vm1, %v11310_v35  ;;  %v9667_v35 = vld [vmem:[%s18568_s4 + $0x378] sm:$0xff] }
 0x1b7   : > { %9622 = vmatmul.msk.f32.gmra.mxu3 %vm387_vm1, %v11331_v47  ;;  %9638 = vmatmul.msk.f32.gmra.mxu0 %vm387_vm1, %v11322_v45  ;;  %v9699_v45 = vld [vmem:[%s18568_s4 + $0x3f8] sm:$0xff]  ;;  %v12058_v47 = vpop.f32.mrf.mxu1 }
 0x1b8   : > { %1988 = vmatpush.msra.mxu2 %v9667_v35  ;;  %2200 = vmatpush.msra.mxu0 %v9699_v45  ;;  %v9682_v35 = vld [vmem:[%s18568_s4 + $0x3b0] sm:$0xff]  ;;  %v9664_v45 = vld [vmem:[%s18568_s4 + $0x360] sm:$0xff] }
 0x1b9   : > { %2095 = vmatpush.msra.mxu3 %v9682_v35  ;;  %v12103_v35 = vpop.f32.mrf.mxu3 }
 0x1ba   : > { %1989 = vmatpush.msra.mxu2 %v9666_v43  ;;  %2201 = vmatpush.msra.mxu0 %v9698_v34  ;;  %v9680_v43 = vld [vmem:[%s18568_s4 + $0x3a0] sm:$0xff]  ;;  %v9663_v34 = vld [vmem:[%s18568_s4 + $0x358] sm:$0xff] }
 0x1bb   : > { %2096 = vmatpush.msra.mxu3 %v9681_v46 }
 0x1bc   : > { %1990 = vmatpush.msra.mxu2 %v9665_v29  ;;  %2202 = vmatpush.msra.mxu0 %v9697_v15  ;;  %v9695_v29 = vld [vmem:[%s18568_s4 + $0x3d8] sm:$0xff]  ;;  %v9662_v15 = vld [vmem:[%s18568_s4 + $0x350] sm:$0xff] }
 0x1bd   : > { %2097 = vmatpush.msra.mxu3 %v9680_v43  ;;  %v9677_v43 = vld [vmem:[%s18568_s4 + $0x388] sm:$0xff] }
 0x1be   : > { %9591 = vmatmul.msk.f32.gmra.mxu1 %vm387_vm1, %v12066_v18  ;;  %9607 = vmatmul.msk.f32.gmra.mxu2 %vm387_vm1, %v11441_v53  ;;  %v9644_v53 = vld [vmem:[%s18568_s4 + $0x300] sm:$0xff] }
 0x1bf   : > { %9623 = vmatmul.msk.f32.gmra.mxu3 %vm387_vm1, %v11457_v57  ;;  %9639 = vmatmul.msk.f32.gmra.mxu0 %vm387_vm1, %v11437_v52  ;;  %v9696_v52 = vld [vmem:[%s18568_s4 + $0x3e0] sm:$0xff]  ;;  %v12108_v57 = vpop.f32.mrf.mxu2 }
 0x1c0   : > { %1913 = vmatpush.msra.mxu1 %v9644_v53  ;;  %1991 = vmatpush.msra.mxu2 %v9664_v45  ;;  %v9678_v53 = vld [vmem:[%s18568_s4 + $0x390] sm:$0xff] }
 0x1c1   : > { %2203 = vmatpush.msra.mxu0 %v9696_v52  ;;  %2098 = vmatpush.msra.mxu3 %v9679_v14  ;;  %v9694_v45 = vld [vmem:[%s18568_s4 + $0x3d0] sm:$0xff]  ;;  %v9661_v14 = vld [vmem:[%s18568_s4 + $0x348] sm:$0xff] }
 0x1c2   : > { %1992 = vmatpush.msra.mxu2 %v9663_v34  ;;  %v9676_v34 = vld [vmem:[%s18568_s4 + $0x380] sm:$0xff] }
 0x1c3   : > { %v756_v46 = vpop.f32.mrf.mxu1  ;;  %2204 = vmatpush.msra.mxu0 %v9695_v29  ;;  %2099 = vmatpush.msra.mxu3 %v9678_v53 }
 0x1c4   : > { %v985_v30 = vpop.f32.mrf.mxu0  ;;  %1993 = vmatpush.msra.mxu2 %v9662_v15  ;;  %v9692_v15 = vld [vmem:[%s18568_s4 + $0x3c0] sm:$0xff] }
 0x1c5   : > { %2205 = vmatpush.msra.mxu0 %v9694_v45  ;;  %2100 = vmatpush.msra.mxu3 %v9677_v43 }
 0x1c6   : > { %9592 = vmatmul.msk.f32.gmra.mxu1 %vm387_vm1, %v11479_v12  ;;  %9608 = vmatmul.msk.f32.gmra.mxu2 %vm387_vm1, %v11494_v25  ;;  %v9715_v25 = vld [vmem:[%s18568_s4 + $0x438] sm:$0xff] }
 0x1c7   : > { %9624 = vmatmul.msk.f32.gmra.mxu3 %vm387_vm1, %v11504_v28  ;;  %9640 = vmatmul.msk.f32.gmra.mxu0 %vm387_vm1, %v11490_v24  ;;  %v9693_v28 = vld [vmem:[%s18568_s4 + $0x3c8] sm:$0xff]  ;;  %v9660_v24 = vld [vmem:[%s18568_s4 + $0x340] sm:$0xff] }
 0x1c8   : > { %2306 = vmatpush.msrb.mxu1 %v9715_v25  ;;  %1994 = vmatpush.msra.mxu2 %v9661_v14 }
 0x1c9   : > { %v821_v52 = vpop.f32.mrf.mxu2  ;;  %2206 = vmatpush.msra.mxu0 %v9693_v28  ;;  %2101 = vmatpush.msra.mxu3 %v9676_v34 }
 0x1ca   : > { %v12154_v29 = vadd.f32 %v821_v52, %v756_v46  ;;  %v920_v21 = vpop.f32.mrf.mxu3  ;;  %1995 = vmatpush.msra.mxu2 %v9660_v24 }
 0x1cb   : > { %v12159_v53 = vadd.f32 %v985_v30, %v920_v21  ;;  %v759_v45 = vpop.f32.mrf.mxu1  ;;  %2207 = vmatpush.msra.mxu0 %v9692_v15  ;;  %v9714_v21 = vld [vmem:[%s18568_s4 + $0x430] sm:$0xff] }
 0x1cc   : > { %v988_v2 = vpop.f32.mrf.mxu0  ;;  %2307 = vmatpush.msrb.mxu1 %v9714_v21 }
 0x1ce   : > { %9593 = vmatmul.msk.f32.gmra.mxu1 %vm387_vm1, %v11517_v40  ;;  %9609 = vmatmul.msk.f32.gmra.mxu2 %vm387_vm1, %v11533_v62  ;;  %v12182_v62 = vld [vmem:[#allocation2 + $0xc8] sm:$0xff] }
 0x1cf   : > { %9625 = vmatmul.msk.f32.gmra.mxu3 %vm387_vm1, %v11539_v0  ;;  %9641 = vmatmul.msk.f32.gmra.mxu0 %vm387_vm1, %v11529_v61  ;;  %v12180_v61 = vld [vmem:[#allocation2 + $0xc0] sm:$0xff]  ;;  %v9713_v0 = vld [vmem:[%s18568_s4 + $0x428] sm:$0xff] }
 0x1d0   : > { %2308 = vmatpush.msrb.mxu1 %v9713_v0  ;;  %v1537_v52 = vrot.slane %v12180_v61, 4  ;;  %v1643_v24 = vrot.slane %v12180_v61, 5 }
 0x1d1   : > { %v824_v30 = vpop.f32.mrf.mxu2 }
 0x1d2   : > { %v12172_v46 = vadd.f32 %v824_v30, %v759_v45  ;;  %v923_v14 = vpop.f32.mrf.mxu3  ;;  %v1749_v45 = vrot.slane %v12180_v61, 6  ;;  %2309 = vmatpush.msrb.mxu1 %v9712_v41  ;;  %v2469_v41 = vld [vmem:[#allocation2 + $0xe8] sm:$0xff] }
 0x1d3   : > { %v12174_v43 = vadd.f32 %v988_v2, %v923_v14  ;;  %v762_v25 = vpop.f32.mrf.mxu1  ;;  %v3301_v17 = vrot.slane %v2469_v41, 4  ;;  %v1845_v41 = vrot.slane %v10807_v31, 7 }
 0x1d4   : > { %v991_v28 = vpop.f32.mrf.mxu0 }
 0x1d6   : > { %9594 = vmatmul.msk.f32.gmra.mxu1 %vm387_vm1, %v11555_v7  ;;  %9610 = vmatmul.msk.f32.gmra.mxu2 %vm387_vm1, %v11572_v38  ;;  %v18600_v38 = vrot.slane %v12182_v62, 4 }
 0x1d7   : > { %9626 = vmatmul.msk.f32.gmra.mxu3 %vm387_vm1, %v11578_v42  ;;  %9642 = vmatmul.msk.f32.gmra.mxu0 %vm387_vm1, %v11568_v32  ;;  %v1644_v42 = vrot.slane %v12182_v62, 5  ;;  %v1750_v32 = vrot.slane %v12182_v62, 6 }
 0x1d8   : > { %v12205_v0 = vsel %vm618_vm4, %v1537_v52, %v18600_v38 }
 0x1d9   : > { %v827_v2 = vpop.f32.mrf.mxu2  ;;  %18764 = vst [vmem:[#allocation31_spill] sm:$0xff] %v12205_v0 }
 0x1da   : > { %v12194_v34 = vadd.f32 %v827_v2, %v762_v25  ;;  %v926_v15 = vpop.f32.mrf.mxu3  ;;  %v12213_v25 = vsel %vm651_vm3, %v1643_v24, %v1644_v42  ;;  %v10803_v2 = vld [vmem:[#allocation2 + $0x18] sm:$0xff] }
 0x1db   : > { %v12199_v21 = vadd.f32 %v991_v28, %v926_v15  ;;  %v765_v30 = vpop.f32.mrf.mxu1  ;;  %18766 = vst [vmem:[#allocation32_spill] sm:$0xff] %v12213_v25  ;;  %v1751_v28 = vsel %vm685_vm2, %v1749_v45, %v1750_v32  ;;  %v1841_v52 = vrot.slane %v10803_v2, 7  ;;  %v12220_v15 = vld [vmem:[#allocation2 + $0x20] sm:$0xff] }
 0x1dc   : > { %v994_v14 = vpop.f32.mrf.mxu0  ;;  %v1842_v38 = vrot.slane %v12220_v15, 7 }
 0x1de   : > { %9595 = vmatmul.msk.f32.gmra.mxu1 %vm387_vm1, %v18765_v58  ;;  %9611 = vmatmul.msk.f32.gmra.mxu2 %vm387_vm1, %v12205_v0  ;;  %v4358_v58 = vld [vmem:[#allocation2 + $0xf8] sm:$0xff] }
 0x1df   : > { %9627 = vmatmul.msk.f32.gmra.mxu3 %vm387_vm1, %v12213_v25  ;;  %9643 = vmatmul.msk.f32.gmra.mxu0 %vm387_vm1, %v1751_v28  ;;  %v1864_v28 = vsel %vm849_vm5, %v1841_v52, %v1842_v38  ;;  %v9711_v52 = vld [vmem:[%s18568_s4 + $0x418] sm:$0xff] }
 0x1e0   : > { %2310 = vmatpush.msrb.mxu1 %v9711_v52 }
 0x1e1   : > { %v830_v24 = vpop.f32.mrf.mxu2 }
 0x1e2   : > { %v12226_v42 = vadd.f32 %v830_v24, %v765_v30  ;;  %v929_v45 = vpop.f32.mrf.mxu3  ;;  %v18769_v30 = vld [vmem:[#allocation5_spill] sm:$0xff] }
 0x1e3   : > { %v12228_v32 = vadd.f32 %v994_v14, %v929_v45  ;;  %v12230_v16 = vpop.f32.mrf.mxu1  ;;  %v10805_v14 = vld [vmem:[#allocation2 + $0x30] sm:$0xff]  ;;  %v12243_v45 = vld [vmem:[#allocation2 + $0x38] sm:$0xff] }
 0x1e4   : > { %v1368_v2 = vpop.f32.mrf.mxu0  ;;  %v1843_v24 = vrot.slane %v10805_v14, 7  ;;  %v1844_v38 = vrot.slane %v12243_v45, 7 }
 0x1e6   : > { %9652 = vmatmul.msk.f32.vlgmr.msra.gmra.mxu1 %vm387_vm1, %v1864_v28  ;;  %9668 = vmatmul.msk.f32.vlgmr.msra.gmra.mxu2 %vm387_vm1, %v12220_v15  ;;  %v12250_v28 = vrot.slane %v12234_v48, 4  ;;  %v1863_v63 = vsel %vm849_vm5, %v1843_v24, %v1844_v38  ;;  %v12274_v24 = vld [vmem:[#allocation2 + $0x50] sm:$0xff] }
 0x1e7   : > { %9684 = vmatmul.msk.f32.vlgmr.msra.gmra.mxu3 %vm387_vm1, %v18768_v55  ;;  %9700 = vmatmul.msk.f32.vlgmr.msra.gmra.mxu0 %vm387_vm1, %v18769_v30 }
 0x1e8   : > { %18770 = vst [vmem:[#allocation4_spill] sm:$0xff] %v12250_v28  ;;  %v12263_v37 = vsel %vm618_vm4, %v12250_v28, %v3301_v17  ;;  %v1846_v17 = vrot.slane %v12274_v24, 7  ;;  %v9727_v28 = vld [vmem:[%s18568_s4 + $0x458] sm:$0xff] }
 0x1e9   : > { %v1154_v55 = vpop.f32.mrf.mxu2  ;;  %18771 = vst [vmem:[#allocation5_spill] sm:$0xff] %v12263_v37 }
 0x1ea   : > { %v1178_v30 = vadd.f32 %v1154_v55, %v974_v50  ;;  %v12254_v59 = vpop.f32.mrf.mxu3  ;;  %v18773_v50 = vld [vmem:[#allocation9_spill] sm:$0xff] }
 0x1eb   : > { %v12256_v14 = vpop.f32.mrf.mxu1 }
 0x1ec   : > { %v1371_v49 = vpop.f32.mrf.mxu0  ;;  %v12265_v48 = vadd.f32 %v1368_v2, %v1178_v30  ;;  %v9710_v2 = vld [vmem:[%s18568_s4 + $0x410] sm:$0xff] }
 0x1ed   : > { %2311 = vmatpush.msrb.mxu1 %v9710_v2 }
 0x1ee   : > { %9653 = vmatmul.msk.f32.gmra.mxu1 %vm387_vm1, %v1863_v63  ;;  %9669 = vmatmul.msk.f32.gmra.mxu2 %vm387_vm1, %v12243_v45  ;;  %v977_v63 = vadd.f32 %v11965_v36, %v11987_v8  ;;  %v9709_v36 = vld [vmem:[%s18568_s4 + $0x408] sm:$0xff]  ;;  %v9747_v8 = vld [vmem:[%s18568_s4 + $0x4b8] sm:$0xff] }
 0x1ef   : > { %9685 = vmatmul.msk.f32.gmra.mxu3 %vm387_vm1, %v18772_v23  ;;  %9701 = vmatmul.msk.f32.gmra.mxu0 %vm387_vm1, %v18773_v50  ;;  %v1862_v23 = vsel %vm849_vm5, %v1845_v41, %v1846_v17  ;;  %v980_v41 = vadd.f32 %v12010_v13, %v12037_v1  ;;  %v10809_v17 = vld [vmem:[#allocation2 + $0x60] sm:$0xff]  ;;  %v9730_v13 = vld [vmem:[%s18568_s4 + $0x470] sm:$0xff] }
 0x1f0   : > { %2312 = vmatpush.msrb.mxu1 %v9709_v36  ;;  %v1847_v2 = vrot.slane %v10809_v17, 7  ;;  %2535 = vmatpush.msrb.mxu3 %v9747_v8  ;;  %v9746_v1 = vld [vmem:[%s18568_s4 + $0x4b0] sm:$0xff]  ;;  %v9728_v17 = vld [vmem:[%s18568_s4 + $0x460] sm:$0xff] }
 0x1f1   : > { %v1157_v38 = vpop.f32.mrf.mxu2  ;;  %v9762_v36 = vld [vmem:[%s18568_s4 + $0x4f0] sm:$0xff] }
 0x1f2   : > { %v1179_v52 = vadd.f32 %v1157_v38, %v977_v63  ;;  %v12282_v55 = vpop.f32.mrf.mxu3  ;;  %v12311_v63 = vld [vmem:[#allocation2 + $0x68] sm:$0xff]  ;;  %2536 = vmatpush.msrb.mxu3 %v9746_v1 }
 0x1f3   : > { %v12284_v30 = vpop.f32.mrf.mxu1  ;;  %v1848_v38 = vrot.slane %v12311_v63, 7 }
 0x1f4   : > { %v1374_v50 = vpop.f32.mrf.mxu0  ;;  %v12288_v31 = vadd.f32 %v1371_v49, %v1179_v52  ;;  %v9731_v49 = vld [vmem:[%s18568_s4 + $0x478] sm:$0xff] }
 0x1f5   : > { %2404 = vmatpush.msrb.mxu2 %v9731_v49 }
 0x1f6   : > { %9654 = vmatmul.msk.f32.gmra.mxu1 %vm387_vm1, %v1862_v23  ;;  %9670 = vmatmul.msk.f32.gmra.mxu2 %vm387_vm1, %v12274_v24 }
 0x1f7   : > { %9686 = vmatmul.msk.f32.gmra.mxu3 %vm387_vm1, %v11741_v44  ;;  %9702 = vmatmul.msk.f32.gmra.mxu0 %vm387_vm1, %v11750_v3  ;;  %v9763_v44 = vld [vmem:[%s18568_s4 + $0x4f8] sm:$0xff] }
 0x1f8   : > { %2641 = vmatpush.msrb.mxu0 %v9763_v44  ;;  %2405 = vmatpush.msrb.mxu2 %v9730_v13  ;;  %v9729_v44 = vld [vmem:[%s18568_s4 + $0x468] sm:$0xff]  ;;  %v10811_v13 = vld [vmem:[#allocation2 + $0x78] sm:$0xff] }
 0x1f9   : > { %v1160_v3 = vpop.f32.mrf.mxu2  ;;  %v1849_v1 = vrot.slane %v10811_v13, 7 }
 0x1fa   : > { %v1180_v52 = vadd.f32 %v1160_v3, %v980_v41  ;;  %v12314_v23 = vpop.f32.mrf.mxu3  ;;  %v1861_v41 = vsel %vm849_vm5, %v1847_v2, %v1848_v38  ;;  %2642 = vmatpush.msrb.mxu0 %v9762_v36  ;;  %v9745_v3 = vld [vmem:[%s18568_s4 + $0x4a8] sm:$0xff]  ;;  %v9744_v2 = vld [vmem:[%s18568_s4 + $0x4a0] sm:$0xff]  ;;  %2406 = vmatpush.msrb.mxu2 %v9729_v44 }
 0x1fb   : > { %v12316_v37 = vpop.f32.mrf.mxu1  ;;  %v9708_v38 = vld [vmem:[%s18568_s4 + $0x400] sm:$0xff]  ;;  %2537 = vmatpush.msrb.mxu3 %v9745_v3  ;;  %v9759_v3 = vld [vmem:[%s18568_s4 + $0x4d8] sm:$0xff] }
 0x1fc   : > { %v1377_v49 = vpop.f32.mrf.mxu0  ;;  %v12327_v8 = vadd.f32 %v1374_v50, %v1180_v52  ;;  %v9761_v50 = vld [vmem:[%s18568_s4 + $0x4e8] sm:$0xff]  ;;  %v983_v52 = vadd.f32 %v12060_v11, %v12103_v35  ;;  %v12361_v36 = vld [vmem:[#allocation2 + $0x80] sm:$0xff]  ;;  %2313 = vmatpush.msrb.mxu1 %v9708_v38  ;;  %v9743_v11 = vld [vmem:[%s18568_s4 + $0x498] sm:$0xff]  ;;  %2407 = vmatpush.msrb.mxu2 %v9728_v17 }
 0x1fd   : > { %2643 = vmatpush.msrb.mxu0 %v9761_v50  ;;  %2538 = vmatpush.msrb.mxu3 %v9744_v2  ;;  %v9726_v17 = vld [vmem:[%s18568_s4 + $0x450] sm:$0xff] }
 0x1fe   : > { %9655 = vmatmul.msk.f32.gmra.mxu1 %vm387_vm1, %v1861_v41  ;;  %9671 = vmatmul.msk.f32.gmra.mxu2 %vm387_vm1, %v12311_v63  ;;  %v1850_v41 = vrot.slane %v12361_v36, 7  ;;  %v9742_v2 = vld [vmem:[%s18568_s4 + $0x490] sm:$0xff] }
 0x1ff   : > { %9687 = vmatmul.msk.f32.gmra.mxu3 %vm387_vm1, %v11802_v33  ;;  %9703 = vmatmul.msk.f32.gmra.mxu0 %vm387_vm1, %v11816_v4  ;;  %v9760_v33 = vld [vmem:[%s18568_s4 + $0x4e0] sm:$0xff] }
 0x200   : > { %2644 = vmatpush.msrb.mxu0 %v9760_v33  ;;  %2408 = vmatpush.msrb.mxu2 %v9727_v28  ;;  %v1860_v25 = vsel %vm849_vm5, %v1849_v1, %v1850_v41  ;;  %v9758_v28 = vld [vmem:[%s18568_s4 + $0x4d0] sm:$0xff]  ;;  %v12408_v41 = vld [vmem:[#allocation2 + $0x98] sm:$0xff] }
 0x201   : > { %v1163_v4 = vpop.f32.mrf.mxu2  ;;  %2539 = vmatpush.msrb.mxu3 %v9743_v11  ;;  %v1852_v11 = vrot.slane %v12408_v41, 7 }
 0x202   : > { %v1181_v35 = vadd.f32 %v1163_v4, %v983_v52  ;;  %v12370_v44 = vpop.f32.mrf.mxu3  ;;  %2645 = vmatpush.msrb.mxu0 %v9759_v3  ;;  %v9779_v52 = vld [vmem:[%s18568_s4 + $0x538] sm:$0xff]  ;;  %2409 = vmatpush.msrb.mxu2 %v9726_v17  ;;  %v10813_v4 = vld [vmem:[#allocation2 + $0x90] sm:$0xff]  ;;  %v9740_v3 = vld [vmem:[%s18568_s4 + $0x480] sm:$0xff] }
 0x203   : > { %v1059_v13 = vpop.f32.mrf.mxu1  ;;  %2540 = vmatpush.msrb.mxu3 %v9742_v2  ;;  %v1851_v1 = vrot.slane %v10813_v4, 7  ;;  %2747 = vmatpush.msra.mxu1 %v9779_v52 }
 0x204   : > { %v1380_v50 = vpop.f32.mrf.mxu0  ;;  %v12375_v38 = vadd.f32 %v1377_v49, %v1181_v35  ;;  %v9725_v49 = vld [vmem:[%s18568_s4 + $0x448] sm:$0xff]  ;;  %2646 = vmatpush.msrb.mxu0 %v9758_v28  ;;  %v9724_v35 = vld [vmem:[%s18568_s4 + $0x440] sm:$0xff] }
 0x205   : > { %2410 = vmatpush.msrb.mxu2 %v9725_v49  ;;  %v1859_v52 = vsel %vm849_vm5, %v1851_v1, %v1852_v11 }
 0x206   : > { %9656 = vmatmul.msk.f32.gmra.mxu1 %vm387_vm1, %v1860_v25  ;;  %9672 = vmatmul.msk.f32.gmra.mxu2 %vm387_vm1, %v12361_v36  ;;  %v9741_v25 = vld [vmem:[%s18568_s4 + $0x488] sm:$0xff] }
 0x207   : > { %9688 = vmatmul.msk.f32.gmra.mxu3 %vm387_vm1, %v11847_v5  ;;  %9704 = vmatmul.msk.f32.gmra.mxu0 %vm387_vm1, %v11855_v19  ;;  %v9757_v5 = vld [vmem:[%s18568_s4 + $0x4c8] sm:$0xff]  ;;  %v1075_v19 = vadd.f32 %v1059_v13, %v12154_v29  ;;  %v9756_v13 = vld [vmem:[%s18568_s4 + $0x4c0] sm:$0xff] }
 0x208   : > { %2541 = vmatpush.msrb.mxu3 %v9741_v25  ;;  %2647 = vmatpush.msrb.mxu0 %v9757_v5  ;;  %v10815_v5 = vld [vmem:[#allocation2 + $0xa8] sm:$0xff] }
 0x209   : > { %v1166_v33 = vpop.f32.mrf.mxu2  ;;  %2411 = vmatpush.msrb.mxu2 %v9724_v35  ;;  %v4352_v35 = vld [vmem:[#allocation2 + $0xc8] sm:$0xff] }
 0x20a   : > { %v1182_v17 = vadd.f32 %v1166_v33, %v12159_v53  ;;  %v1273_v29 = vpop.f32.mrf.mxu3  ;;  %2542 = vmatpush.msrb.mxu3 %v9740_v3  ;;  %2648 = vmatpush.msrb.mxu0 %v9756_v13  ;;  %v18774_v53 = vld [vmem:[#allocation16_spill] sm:$0xff]  ;;  %v12438_v33 = vld [vmem:[#allocation2 + $0xb0] sm:$0xff]  ;;  %v4355_v3 = vld [vmem:[#allocation2 + $0xe0] sm:$0xff] }
 0x20b   : > { %v12421_v2 = vadd.f32 %v1273_v29, %v1075_v19  ;;  %v1062_v28 = vpop.f32.mrf.mxu1  ;;  %v1853_v19 = vrot.slane %v10815_v5, 7  ;;  %v1854_v1 = vrot.slane %v12438_v33, 7  ;;  %v12450_v5 = vrot.slane %v4355_v3, 4 }
 0x20c   : > { %v1383_v4 = vpop.f32.mrf.mxu0  ;;  %v12423_v0 = vadd.f32 %v1380_v50, %v1182_v17  ;;  %v9778_v50 = vld [vmem:[%s18568_s4 + $0x530] sm:$0xff]  ;;  %v1076_v49 = vadd.f32 %v1062_v28, %v12172_v46  ;;  %v3413_v46 = vld [vmem:[#allocation2 + $0xe8] sm:$0xff] }
 0x20d   : > { %2748 = vmatpush.msra.mxu1 %v9778_v50  ;;  %v1858_v28 = vsel %vm849_vm5, %v1853_v19, %v1854_v1  ;;  %v12448_v50 = vrot.slane %v4352_v35, 4  ;;  %18777 = vst [vmem:[#allocation16_spill] sm:$0xff] %v12450_v5  ;;  %v5192_v19 = vrot.slane %v3413_v46, 4  ;;  %v1855_v1 = vrot.slane %v12180_v61, 7 }
 0x20e   : > { %9657 = vmatmul.msk.f32.gmra.mxu1 %vm387_vm1, %v1859_v52  ;;  %9673 = vmatmul.msk.f32.gmra.mxu2 %vm387_vm1, %v12408_v41  ;;  %v12467_v35 = vrot.slane %v4358_v58, 4 }
 0x20f   : > { %9689 = vmatmul.msk.f32.gmra.mxu3 %vm387_vm1, %v11873_v54  ;;  %9705 = vmatmul.msk.f32.gmra.mxu0 %vm387_vm1, %v18774_v53  ;;  %v3410_v53 = vld [vmem:[#allocation2 + $0xd0] sm:$0xff]  ;;  %18776 = vst [vmem:[#allocation9_spill] sm:$0xff] %v12448_v50 }
 0x210   : > { %18778 = vst [vmem:[#allocation34_spill] sm:$0xff] %v12467_v35 }
 0x211   : > { %v1169_v25 = vpop.f32.mrf.mxu2 }
 0x212   : > { %v1183_v11 = vadd.f32 %v1169_v25, %v12174_v43  ;;  %v1276_v54 = vpop.f32.mrf.mxu3  ;;  %v3416_v43 = vld [vmem:[#allocation2 + $0x100] sm:$0xff]  ;;  %v5191_v25 = vrot.slane %v3410_v53, 4  ;;  %v12478_v53 = vsel %vm618_vm4, %v12450_v5, %v5192_v19  ;;  %v12496_v19 = vld [vmem:[#allocation2 + $0x38] sm:$0xff]  ;;  %v810_v5 = vadd.f32 %v11954_v9, %v11900_v20 }
 0x213   : > { %v12442_v17 = vadd.f32 %v1276_v54, %v1076_v49  ;;  %v1065_v29 = vpop.f32.mrf.mxu1  ;;  %v9777_v49 = vld [vmem:[%s18568_s4 + $0x528] sm:$0xff]  ;;  %v2043_v54 = vrot.slane %v12182_v62, 1  ;;  %18780 = vst [vmem:[#allocation36_spill] sm:$0xff] %v12478_v53  ;;  %v5193_v61 = vrot.slane %v3416_v43, 4 }
 0x214   : > { %v1386_v13 = vpop.f32.mrf.mxu0  ;;  %v12444_v52 = vadd.f32 %v1383_v4, %v1183_v11  ;;  %v12459_v4 = vld [vmem:[#allocation2 + $0xd0] sm:$0xff]  ;;  %v1856_v11 = vrot.slane %v12182_v62, 7  ;;  %2749 = vmatpush.msra.mxu1 %v9777_v49  ;;  %v12473_v3 = vsel %vm618_vm4, %v12448_v50, %v5191_v25  ;;  %v2149_v49 = vrot.slane %v12182_v62, 2 }
 0x215   : > { %18779 = vst [vmem:[#allocation35_spill] sm:$0xff] %v12473_v3  ;;  %v2044_v58 = vrot.slane %v12459_v4, 1  ;;  %v12488_v50 = vld [vmem:[#allocation2 + $0x110] sm:$0xff] }
 0x216   : > { %18775 = vst [vmem:[#allocation7_spill] sm:$0xff] %v12444_v52  ;;  %9658 = vmatmul.msk.f32.gmra.mxu1 %vm387_vm1, %v1858_v28  ;;  %9674 = vmatmul.msk.f32.gmra.mxu2 %vm387_vm1, %v12438_v33  ;;  %v12492_v43 = vsel %vm849_vm5, %v1855_v1, %v1856_v11  ;;  %v4362_v11 = vld [vmem:[#allocation2 + $0x118] sm:$0xff] }
 0x217   : > { %9690 = vmatmul.msk.f32.gmra.mxu3 %vm387_vm1, %v11912_v56  ;;  %9706 = vmatmul.msk.f32.gmra.mxu0 %vm387_vm1, %v11916_v6  ;;  %v1077_v56 = vadd.f32 %v1065_v29, %v12194_v34  ;;  %v2150_v34 = vrot.slane %v12459_v4, 2  ;;  %18781 = vst [vmem:[#allocation37_spill] sm:$0xff] %v12488_v50  ;;  %v5194_v53 = vrot.slane %v4362_v11, 4  ;;  %v12548_v11 = vld [vmem:[#allocation2 + $0x48] sm:$0xff] }
 0x218   : > { %18782 = vst [vmem:[#allocation38_spill] sm:$0xff] %v12492_v43 }
 0x219   : > { %v1172_v6 = vpop.f32.mrf.mxu2  ;;  %v2151_v1 = vsel %vm1202_vm7, %v2149_v49, %v2150_v34 }
 0x21a   : > { %v1184_v46 = vadd.f32 %v1172_v6, %v12199_v21  ;;  %v1279_v28 = vpop.f32.mrf.mxu3  ;;  %v12494_v21 = vld [vmem:[#allocation2 + $0x30] sm:$0xff]  ;;  %v12501_v6 = vsel %vm618_vm4, %v12467_v35, %v5193_v61  ;;  %v10817_v61 = vld [vmem:[#allocation2 + $0x28] sm:$0xff] }
 0x21b   : > { %v12484_v29 = vadd.f32 %v1279_v28, %v1077_v56  ;;  %v1068_v52 = vpop.f32.mrf.mxu1  ;;  %18783 = vst [vmem:[#allocation39_spill] sm:$0xff] %v12501_v6  ;;  %v2241_v56 = vrot.slane %v12220_v15, 3  ;;  %v9776_v28 = vld [vmem:[%s18568_s4 + $0x520] sm:$0xff]  ;;  %v2576_v34 = vrot.slane %v12494_v21, 5  ;;  %v2577_v6 = vrot.slane %v12496_v19, 5 }
 0x21c   : > { %v1389_v25 = vpop.f32.mrf.mxu0  ;;  %v12486_v3 = vadd.f32 %v1386_v13, %v1184_v46  ;;  %v12509_v13 = vsel %vm1095_vm6, %v2043_v54, %v2044_v58  ;;  %v2242_v46 = vrot.slane %v10817_v61, 3  ;;  %v2470_v58 = vrot.slane %v12494_v21, 4  ;;  %2750 = vmatpush.msra.mxu1 %v9776_v28 }
 0x21d   : > { %18784 = vst [vmem:[#allocation40_spill] sm:$0xff] %v12509_v13  ;;  %v2599_v20 = vsel %vm651_vm3, %v2576_v34, %v2577_v6 }
 0x21e   : > { %9659 = vmatmul.msk.f32.gmra.mxu1 %vm387_vm1, %v12492_v43  ;;  %9675 = vmatmul.msk.f32.gmra.mxu2 %vm387_vm1, %v12182_v62  ;;  %v2264_v49 = vsel %vm1309_vm8, %v2241_v56, %v2242_v46  ;;  %v18785_v43 = vrot.slane %v12488_v50, 4  ;;  %v12550_v56 = vld [vmem:[#allocation2 + $0x50] sm:$0xff] }
 0x21f   : > { %9691 = vmatmul.msk.f32.gmra.mxu3 %vm387_vm1, %v12509_v13  ;;  %9707 = vmatmul.msk.f32.gmra.mxu0 %vm387_vm1, %v2151_v1  ;;  %v1078_v1 = vadd.f32 %v1068_v52, %v12226_v42  ;;  %v18787_v52 = vrot.slane %v12496_v19, 4  ;;  %v12564_v46 = vrot.slane %v12550_v56, 4 }
 0x220   : > { %v12537_v28 = vsel %vm618_vm4, %v18785_v43, %v5194_v53  ;;  %v10818_v43 = vld [vmem:[#allocation2 + $0x40] sm:$0xff] }
 0x221   : > { %v1175_v15 = vpop.f32.mrf.mxu2  ;;  %18786 = vst [vmem:[#allocation41_spill] sm:$0xff] %v12537_v28  ;;  %v2244_v6 = vrot.slane %v10818_v43, 3 }
 0x222   : > { %v1185_v61 = vadd.f32 %v1175_v15, %v12228_v32  ;;  %v1282_v35 = vpop.f32.mrf.mxu3  ;;  %v2493_v32 = vsel %vm618_vm4, %v2470_v58, %v18787_v52 }
 0x223   : > { %v12529_v54 = vadd.f32 %v1282_v35, %v1078_v1  ;;  %v1466_v13 = vpop.f32.mrf.mxu1  ;;  %v1071_v35 = vadd.f32 %v12230_v16, %v810_v5  ;;  %v9775_v16 = vld [vmem:[%s18568_s4 + $0x518] sm:$0xff]  ;;  %v2472_v5 = vrot.slane %v12548_v11, 4  ;;  %v813_v1 = vadd.f32 %v11991_v10, %v11960_v22 }
 0x224   : > { %v1809_v42 = vpop.f32.mrf.mxu0  ;;  %v12545_v9 = vadd.f32 %v1389_v25, %v1185_v61  ;;  %v2243_v25 = vrot.slane %v12243_v45, 3  ;;  %2751 = vmatpush.msra.mxu1 %v9775_v16  ;;  %v2245_v10 = vrot.slane %v12274_v24, 3 }
 0x225   : > { %v1285_v53 = vadd.f32 %v12254_v59, %v1071_v35  ;;  %v2579_v59 = vrot.slane %v12550_v56, 5  ;;  %v1072_v35 = vadd.f32 %v12256_v14, %v813_v1  ;;  %v9774_v14 = vld [vmem:[%s18568_s4 + $0x510] sm:$0xff] }
 0x226   : > { %9716 = vmatmul.msk.f32.vlgmr.msrb.gmra.mxu1 %vm387_vm1, %v2264_v49  ;;  %9732 = vmatmul.msk.f32.vlgmr.msrb.gmra.mxu2 %vm387_vm1, %v11983_v27  ;;  %v2578_v27 = vrot.slane %v12548_v11, 5  ;;  %v2263_v52 = vsel %vm1309_vm8, %v2243_v25, %v2244_v6 }
 0x227   : > { %9748 = vmatmul.msk.f32.vlgmr.msrb.gmra.mxu3 %vm387_vm1, %v2493_v32  ;;  %9764 = vmatmul.msk.f32.vlgmr.msrb.gmra.mxu0 %vm387_vm1, %v2599_v20  ;;  %v1490_v58 = vadd.f32 %v1466_v13, %v1285_v53  ;;  %v12578_v20 = vsel %vm618_vm4, %v2472_v5, %v12564_v46  ;;  %v1286_v22 = vadd.f32 %v12282_v55, %v1072_v35  ;;  %v10819_v53 = vld [vmem:[#allocation2 + $0x58] sm:$0xff] }
 0x228   : > { %v2598_v13 = vsel %vm651_vm3, %v2578_v27, %v2579_v59  ;;  %v2246_v25 = vrot.slane %v10819_v53, 3  ;;  %2752 = vmatpush.msra.mxu1 %v9774_v14  ;;  %v12601_v27 = vld [vmem:[#allocation2 + $0x68] sm:$0xff]  ;;  %v12604_v59 = vld [vmem:[#allocation2 + $0xd0] sm:$0xff] }
 0x229   : > { %v1597_v49 = vpop.f32.mrf.mxu2  ;;  %v2581_v24 = vrot.slane %v12601_v27, 5  ;;  %18788 = vst [vmem:[#allocation42_spill] sm:$0xff] %v12604_v59  ;;  %v18623_v53 = vrot.slane %v12604_v59, 4  ;;  %v12926_v59 = vld [vmem:[#allocation2 + $0xe0] sm:$0xff] }
 0x22a   : > { %v1621_v45 = vadd.f32 %v1597_v49, %v12265_v48  ;;  %v1703_v34 = vpop.f32.mrf.mxu3  ;;  %v816_v49 = vadd.f32 %v12039_v26, %v12004_v51  ;;  %v18791_v51 = vld [vmem:[#allocation6_spill] sm:$0xff] }
 0x22b   : > { %v12571_v15 = vadd.f32 %v1703_v34, %v1490_v58  ;;  %v1469_v61 = vpop.f32.mrf.mxu1  ;;  %v6240_v58 = vld [vmem:[#allocation2 + $0xc8] sm:$0xff] }
 0x22c   : > { %v1812_v32 = vpop.f32.mrf.mxu0  ;;  %v12582_v48 = vadd.f32 %v1809_v42, %v1621_v45  ;;  %v12593_v42 = vld [vmem:[#allocation2 + $0x60] sm:$0xff]  ;;  %v1491_v43 = vadd.f32 %v1469_v61, %v1286_v22  ;;  %v1073_v35 = vadd.f32 %v12284_v30, %v816_v49  ;;  %v12619_v22 = vrot.slane %v6240_v58, 4 }
 0x22d   : > { %v2474_v16 = vrot.slane %v12593_v42, 4  ;;  %v2580_v5 = vrot.slane %v12593_v42, 5  ;;  %v12634_v30 = vld [vmem:[#allocation2 + $0x100] sm:$0xff] }
 0x22e   : > { %9717 = vmatmul.msk.f32.gmra.mxu1 %vm387_vm1, %v2263_v52  ;;  %9733 = vmatmul.msk.f32.gmra.mxu2 %vm387_vm1, %v12031_v60  ;;  %v12616_v52 = vld [vmem:[#allocation2 + $0xe8] sm:$0xff]  ;;  %18790 = vst [vmem:[#allocation44_spill] sm:$0xff] %v12619_v22  ;;  %v1287_v14 = vadd.f32 %v12314_v23, %v1073_v35  ;;  %v6249_v35 = vld [vmem:[#allocation2 + $0x110] sm:$0xff] }
 0x22f   : > { %9749 = vmatmul.msk.f32.gmra.mxu3 %vm387_vm1, %v12578_v20  ;;  %9765 = vmatmul.msk.f32.gmra.mxu0 %vm387_vm1, %v2598_v13  ;;  %18789 = vst [vmem:[#allocation43_spill] sm:$0xff] %v12616_v52  ;;  %v6243_v13 = vld [vmem:[#allocation2 + $0xe0] sm:$0xff]  ;;  %v12628_v26 = vsel %vm618_vm4, %v2474_v16, %v18791_v51  ;;  %v18625_v23 = vrot.slane %v12616_v52, 4  ;;  %v10821_v16 = vld [vmem:[#allocation2 + $0x70] sm:$0xff]  ;;  %v9793_v52 = vld [vmem:[%s18568_s4 + $0x568] sm:$0xff] }
 0x230   : > { %18792 = vst [vmem:[#allocation45_spill] sm:$0xff] %v12634_v30 }
 0x231   : > { %v1600_v60 = vpop.f32.mrf.mxu2 }
 0x232   : > { %v1622_v55 = vadd.f32 %v1600_v60, %v12288_v31  ;;  %v1706_v6 = vpop.f32.mrf.mxu3  ;;  %v2262_v31 = vsel %vm1309_vm8, %v2245_v10, %v2246_v25  ;;  %v12632_v10 = vld [vmem:[#allocation2 + $0x78] sm:$0xff] }
 0x233   : > { %v12608_v45 = vadd.f32 %v1706_v6, %v1491_v43  ;;  %v1472_v34 = vpop.f32.mrf.mxu1  ;;  %v6246_v25 = vld [vmem:[#allocation2 + $0xf8] sm:$0xff]  ;;  %v2247_v6 = vrot.slane %v12311_v63, 3  ;;  %v12664_v63 = vsel %vm618_vm4, %v12619_v22, %v18623_v53  ;;  %v9826_v53 = vld [vmem:[%s18568_s4 + $0x5f0] sm:$0xff] }
 0x234   : > { %v12612_v1 = vpop.f32.mrf.mxu0  ;;  %v12614_v61 = vadd.f32 %v1812_v32, %v1622_v55  ;;  %v2597_v32 = vsel %vm651_vm3, %v2580_v5, %v2581_v24  ;;  %v9795_v43 = vld [vmem:[%s18568_s4 + $0x578] sm:$0xff]  ;;  %v12649_v55 = vrot.slane %v6243_v13, 4  ;;  %v2248_v5 = vrot.slane %v10821_v16, 3  ;;  %18795 = vst [vmem:[#allocation48_spill] sm:$0xff] %v12664_v63 }
 0x235   : > { %v9811_v60 = vld [vmem:[%s18568_s4 + $0x5b8] sm:$0xff]  ;;  %2853 = vmatpush.msra.mxu2 %v9795_v43  ;;  %v1492_v58 = vadd.f32 %v1472_v34, %v1287_v14  ;;  %v2476_v34 = vrot.slane %v12632_v10, 4  ;;  %v2582_v14 = vrot.slane %v12632_v10, 5  ;;  %v12669_v43 = vld [vmem:[#allocation2 + $0x80] sm:$0xff]  ;;  %v819_v16 = vadd.f32 %v12108_v57, %v12058_v47 }
 0x236   : > { %9718 = vmatmul.msk.f32.gmra.mxu1 %vm387_vm1, %v2262_v31  ;;  %9734 = vmatmul.msk.f32.gmra.mxu2 %vm387_vm1, %v12066_v18  ;;  %v9773_v18 = vld [vmem:[%s18568_s4 + $0x508] sm:$0xff]  ;;  %18793 = vst [vmem:[#allocation46_spill] sm:$0xff] %v12649_v55  ;;  %v9827_v24 = vld [vmem:[%s18568_s4 + $0x5f8] sm:$0xff]  ;;  %v12656_v31 = vrot.slane %v6246_v25, 4  ;;  %v2583_v25 = vrot.slane %v12669_v43, 5  ;;  %v12690_v47 = vsel %vm618_vm4, %v12649_v55, %v18625_v23  ;;  %v2261_v63 = vsel %vm1309_vm8, %v2247_v6, %v2248_v5  ;;  %v12722_v5 = vld [vmem:[#allocation2 + $0x90] sm:$0xff] }
 0x237   : > { %9750 = vmatmul.msk.f32.gmra.mxu3 %vm387_vm1, %v12628_v26  ;;  %9766 = vmatmul.msk.f32.gmra.mxu0 %vm387_vm1, %v2597_v32  ;;  %18796 = vst [vmem:[#allocation49_spill] sm:$0xff] %v12690_v47  ;;  %v9809_v23 = vld [vmem:[%s18568_s4 + $0x5a8] sm:$0xff]  ;;  %v18798_v47 = vrot.slane %v12634_v30, 4 }
 0x238   : > { %2753 = vmatpush.msra.mxu1 %v9773_v18  ;;  %2935 = vmatpush.msra.mxu3 %v9811_v60  ;;  %18794 = vst [vmem:[#allocation47_spill] sm:$0xff] %v12656_v31  ;;  %v6250_v60 = vld [vmem:[#allocation2 + $0x118] sm:$0xff]  ;;  %v2596_v6 = vsel %vm651_vm3, %v2582_v14, %v2583_v25  ;;  %v9772_v14 = vld [vmem:[%s18568_s4 + $0x500] sm:$0xff] }
 0x239   : > { %v1603_v49 = vpop.f32.mrf.mxu2  ;;  %3041 = vmatpush.msra.mxu0 %v9827_v24 }
 0x23a   : > { %v1623_v32 = vadd.f32 %v1603_v49, %v12327_v8  ;;  %v1709_v18 = vpop.f32.mrf.mxu3  ;;  %v9794_v8 = vld [vmem:[%s18568_s4 + $0x570] sm:$0xff]  ;;  %2754 = vmatpush.msra.mxu1 %v9772_v14 }
 0x23b   : > { %v12674_v24 = vadd.f32 %v1709_v18, %v1492_v58  ;;  %v1475_v13 = vpop.f32.mrf.mxu1  ;;  %v9810_v49 = vld [vmem:[%s18568_s4 + $0x5b0] sm:$0xff]  ;;  %2854 = vmatpush.msra.mxu2 %v9794_v8  ;;  %v12694_v58 = vrot.slane %v6249_v35, 4  ;;  %v1074_v18 = vadd.f32 %v12316_v37, %v819_v16  ;;  %3042 = vmatpush.msra.mxu0 %v9826_v53  ;;  %v12710_v35 = vsel %vm618_vm4, %v12656_v31, %v18798_v47  ;;  %v18800_v37 = vld [vmem:[#allocation8_spill] sm:$0xff] }
 0x23c   : > { %v12692_v57 = vpop.f32.mrf.mxu0  ;;  %2936 = vmatpush.msra.mxu3 %v9810_v49  ;;  %18799 = vst [vmem:[#allocation51_spill] sm:$0xff] %v12710_v35  ;;  %v12718_v53 = vsel %vm618_vm4, %v2476_v34, %v18800_v37  ;;  %v9825_v16 = vld [vmem:[%s18568_s4 + $0x5e8] sm:$0xff]  ;;  %v7086_v8 = vrot.slane %v6250_v60, 4  ;;  %v9808_v34 = vld [vmem:[%s18568_s4 + $0x5a0] sm:$0xff]  ;;  %v2249_v47 = vrot.slane %v12361_v36, 3  ;;  %v2478_v35 = vrot.slane %v12722_v5, 4 }
 0x23d   : > { %18797 = vst [vmem:[#allocation50_spill] sm:$0xff] %v12694_v58  ;;  %2855 = vmatpush.msra.mxu2 %v9793_v52  ;;  %3043 = vmatpush.msra.mxu0 %v9825_v16  ;;  %v9791_v52 = vld [vmem:[%s18568_s4 + $0x558] sm:$0xff]  ;;  %v12765_v14 = vadd.f32 %v12612_v1, %v1623_v32  ;;  %v9806_v1 = vld [vmem:[%s18568_s4 + $0x590] sm:$0xff] }
 0x23e   : > { %9719 = vmatmul.msk.f32.gmra.mxu1 %vm387_vm1, %v2261_v63  ;;  %9735 = vmatmul.msk.f32.gmra.mxu2 %vm387_vm1, %v11479_v12  ;;  %v1288_v63 = vadd.f32 %v12370_v44, %v1074_v18  ;;  %v9792_v12 = vld [vmem:[%s18568_s4 + $0x560] sm:$0xff]  ;;  %v12746_v25 = vsel %vm618_vm4, %v12694_v58, %v7086_v8  ;;  %v10823_v18 = vld [vmem:[#allocation2 + $0x88] sm:$0xff]  ;;  %v12758_v36 = vld [vmem:[#allocation2 + $0x98] sm:$0xff] }
 0x23f   : > { %9751 = vmatmul.msk.f32.gmra.mxu3 %vm387_vm1, %v12718_v53  ;;  %9767 = vmatmul.msk.f32.gmra.mxu0 %vm387_vm1, %v2596_v6  ;;  %v9824_v44 = vld [vmem:[%s18568_s4 + $0x5e0] sm:$0xff]  ;;  %18801 = vst [vmem:[#allocation52_spill] sm:$0xff] %v12746_v25  ;;  %v2250_v6 = vrot.slane %v10823_v18, 3  ;;  %v2585_v18 = vrot.slane %v12758_v36, 5  ;;  %v9823_v16 = vld [vmem:[%s18568_s4 + $0x5d8] sm:$0xff] }
 0x240   : > { %2937 = vmatpush.msra.mxu3 %v9809_v23  ;;  %v1493_v60 = vadd.f32 %v1475_v13, %v1288_v63  ;;  %v9807_v23 = vld [vmem:[%s18568_s4 + $0x598] sm:$0xff]  ;;  %v2584_v63 = vrot.slane %v12722_v5, 5  ;;  %2856 = vmatpush.msra.mxu2 %v9792_v12  ;;  %v9790_v12 = vld [vmem:[%s18568_s4 + $0x550] sm:$0xff] }
 0x241   : > { %v1606_v49 = vpop.f32.mrf.mxu2  ;;  %3044 = vmatpush.msra.mxu0 %v9824_v44  ;;  %v18802_v32 = vld [vmem:[#allocation10_spill] sm:$0xff] }
 0x242   : > { %v1624_v8 = vadd.f32 %v1606_v49, %v12375_v38  ;;  %v1712_v13 = vpop.f32.mrf.mxu3  ;;  %2938 = vmatpush.msra.mxu3 %v9808_v34  ;;  %2857 = vmatpush.msra.mxu2 %v9791_v52  ;;  %v2260_v49 = vsel %vm1309_vm8, %v2249_v47, %v2250_v6  ;;  %v12785_v34 = vsel %vm618_vm4, %v2478_v35, %v18802_v32  ;;  %v9822_v47 = vld [vmem:[%s18568_s4 + $0x5d0] sm:$0xff]  ;;  %v9805_v35 = vld [vmem:[%s18568_s4 + $0x588] sm:$0xff]  ;;  %v9843_v6 = vld [vmem:[%s18568_s4 + $0x638] sm:$0xff] }
 0x243   : > { %v12767_v25 = vadd.f32 %v1712_v13, %v1493_v60  ;;  %v1478_v58 = vpop.f32.mrf.mxu1  ;;  %3045 = vmatpush.msra.mxu0 %v9823_v16  ;;  %v2595_v44 = vsel %vm651_vm3, %v2584_v63, %v2585_v18  ;;  %v12789_v60 = vld [vmem:[#allocation2 + $0xa8] sm:$0xff]  ;;  %v2251_v63 = vrot.slane %v12408_v41, 3  ;;  %v10825_v18 = vld [vmem:[#allocation2 + $0xa0] sm:$0xff]  ;;  %3147 = vmatpush.msrb.mxu1 %v9843_v6  ;;  %v12820_v41 = vld [vmem:[#allocation2 + $0xb0] sm:$0xff] }
 0x244   : > { %v12769_v38 = vpop.f32.mrf.mxu0  ;;  %2939 = vmatpush.msra.mxu3 %v9807_v23  ;;  %2858 = vmatpush.msra.mxu2 %v9790_v12  ;;  %v9821_v52 = vld [vmem:[%s18568_s4 + $0x5c8] sm:$0xff]  ;;  %v1494_v23 = vadd.f32 %v1478_v58, %v12421_v2  ;;  %v2252_v16 = vrot.slane %v10825_v18, 3  ;;  %v9804_v12 = vld [vmem:[%s18568_s4 + $0x580] sm:$0xff]  ;;  %v2586_v58 = vrot.slane %v12789_v60, 5  ;;  %v2587_v18 = vrot.slane %v12820_v41, 5 }
 0x245   : > { %3046 = vmatpush.msra.mxu0 %v9822_v47  ;;  %v9820_v47 = vld [vmem:[%s18568_s4 + $0x5c0] sm:$0xff]  ;;  %v12827_v30 = vadd.f32 %v12692_v57, %v1624_v8 }
 0x246   : > { %9720 = vmatmul.msk.f32.gmra.mxu1 %vm387_vm1, %v2260_v49  ;;  %9736 = vmatmul.msk.f32.gmra.mxu2 %vm387_vm1, %v11517_v40  ;;  %v9789_v40 = vld [vmem:[%s18568_s4 + $0x548] sm:$0xff]  ;;  %v2480_v49 = vrot.slane %v12789_v60, 4  ;;  %v2594_v8 = vsel %vm651_vm3, %v2586_v58, %v2587_v18 }
 0x247   : > { %9752 = vmatmul.msk.f32.gmra.mxu3 %vm387_vm1, %v12785_v34  ;;  %9768 = vmatmul.msk.f32.gmra.mxu0 %vm387_vm1, %v2595_v44  ;;  %v9788_v44 = vld [vmem:[%s18568_s4 + $0x540] sm:$0xff] }
 0x248   : > { %2940 = vmatpush.msra.mxu3 %v9806_v1  ;;  %2859 = vmatpush.msra.mxu2 %v9789_v40  ;;  %v18803_v40 = vld [vmem:[#allocation12_spill] sm:$0xff] }
 0x249   : > { %v1609_v13 = vpop.f32.mrf.mxu2  ;;  %3047 = vmatpush.msra.mxu0 %v9821_v52  ;;  %v12839_v57 = vsel %vm618_vm4, %v2480_v49, %v18803_v40  ;;  %v18804_v49 = vld [vmem:[#allocation7_spill] sm:$0xff] }
 0x24a   : > { %v1625_v1 = vadd.f32 %v1609_v13, %v12423_v0  ;;  %v1715_v2 = vpop.f32.mrf.mxu3  ;;  %2941 = vmatpush.msra.mxu3 %v9805_v35  ;;  %2860 = vmatpush.msra.mxu2 %v9788_v44  ;;  %v2259_v13 = vsel %vm1309_vm8, %v2251_v63, %v2252_v16  ;;  %v9842_v35 = vld [vmem:[%s18568_s4 + $0x630] sm:$0xff]  ;;  %v10827_v63 = vld [vmem:[#allocation2 + $0xb8] sm:$0xff] }
 0x24b   : > { %v12829_v31 = vadd.f32 %v1715_v2, %v1494_v23  ;;  %v1481_v6 = vpop.f32.mrf.mxu1  ;;  %3048 = vmatpush.msra.mxu0 %v9820_v47  ;;  %3148 = vmatpush.msrb.mxu1 %v9842_v35  ;;  %v2253_v23 = vrot.slane %v12438_v33, 3  ;;  %v2254_v16 = vrot.slane %v10827_v63, 3  ;;  %v12862_v33 = vld [vmem:[#allocation2 + $0xd8] sm:$0xff] }
 0x24c   : > { %v1824_v0 = vpop.f32.mrf.mxu0  ;;  %2942 = vmatpush.msra.mxu3 %v9804_v12  ;;  %v12853_v2 = vadd.f32 %v12769_v38, %v1625_v1  ;;  %v9841_v38 = vld [vmem:[%s18568_s4 + $0x628] sm:$0xff]  ;;  %v2255_v1 = vrot.slane %v12182_v62, 3  ;;  %v2484_v63 = vrot.slane %v12862_v33, 4 }
 0x24d   : > { %3149 = vmatpush.msrb.mxu1 %v9841_v38 }
 0x24e   : > { %9721 = vmatmul.msk.f32.gmra.mxu1 %vm387_vm1, %v2259_v13  ;;  %9737 = vmatmul.msk.f32.gmra.mxu2 %vm387_vm1, %v11555_v7  ;;  %v1495_v7 = vadd.f32 %v1481_v6, %v12442_v17  ;;  %v2258_v13 = vsel %vm1309_vm8, %v2253_v23, %v2254_v16  ;;  %v18805_v17 = vld [vmem:[#allocation3_spill] sm:$0xff]  ;;  %v2354_v23 = vrot.slane %v12459_v4, 4 }
 0x24f   : > { %9753 = vmatmul.msk.f32.gmra.mxu3 %vm387_vm1, %v12839_v57  ;;  %9769 = vmatmul.msk.f32.gmra.mxu0 %vm387_vm1, %v2594_v8  ;;  %v18806_v6 = vld [vmem:[#allocation31_spill] sm:$0xff]  ;;  %v18807_v8 = vld [vmem:[#allocation32_spill] sm:$0xff] }
 0x250   : > { %18814 = vst [vmem:[#allocation32_spill] sm:$0xff] %v12926_v59 }
 0x251   : > { %v1612_v52 = vpop.f32.mrf.mxu2 }
 0x252   : > { %v1626_v44 = vadd.f32 %v1612_v52, %v18804_v49  ;;  %v1718_v12 = vpop.f32.mrf.mxu3  ;;  %v2256_v52 = vrot.slane %v12459_v4, 3  ;;  %v18809_v4 = vrot.slane %v12182_v62, 4 }
 0x253   : > { %v12855_v58 = vadd.f32 %v1718_v12, %v1495_v7  ;;  %v1484_v18 = vpop.f32.mrf.mxu1  ;;  %v2590_v12 = vrot.slane %v12862_v33, 5 }
 0x254   : > { %v1827_v47 = vpop.f32.mrf.mxu0  ;;  %v1496_v35 = vadd.f32 %v1484_v18, %v12484_v29  ;;  %v12887_v18 = vsel %vm1309_vm8, %v2255_v1, %v2256_v52  ;;  %v2682_v1 = vrot.slane %v12494_v21, 6  ;;  %v2788_v52 = vrot.slane %v12494_v21, 7 }
 0x256   : > { %9722 = vmatmul.msk.f32.gmra.mxu1 %vm387_vm1, %v2258_v13  ;;  %9738 = vmatmul.msk.f32.gmra.mxu2 %vm387_vm1, %v18805_v17  ;;  %v18808_v13 = vld [vmem:[#allocation33_spill] sm:$0xff] }
 0x257   : > { %9754 = vmatmul.msk.f32.gmra.mxu3 %vm387_vm1, %v18806_v6  ;;  %9770 = vmatmul.msk.f32.gmra.mxu0 %vm387_vm1, %v18807_v8  ;;  %v2591_v17 = vrot.slane %v18808_v13, 5  ;;  %v12879_v6 = vadd.f32 %v1824_v0, %v1626_v44  ;;  %v18811_v0 = vld [vmem:[#allocation4_spill] sm:$0xff] }
 0x258   : > { %v12904_v44 = vsel %vm618_vm4, %v2484_v63, %v18811_v0  ;;  %v9840_v63 = vld [vmem:[%s18568_s4 + $0x620] sm:$0xff]  ;;  %v12936_v0 = vld [vmem:[#allocation2 + $0x110] sm:$0xff] }
 0x259   : > { %v1615_v7 = vpop.f32.mrf.mxu2  ;;  %18812 = vst [vmem:[#allocation3_spill] sm:$0xff] %v12904_v44  ;;  %v2592_v62 = vsel %vm651_vm3, %v2590_v12, %v2591_v17  ;;  %3150 = vmatpush.msrb.mxu1 %v9840_v63 }
 0x25a   : > { %v1627_v16 = vadd.f32 %v1615_v7, %v12486_v3  ;;  %v1721_v49 = vpop.f32.mrf.mxu3  ;;  %v12893_v3 = vsel %vm618_vm4, %v18809_v4, %v2354_v23  ;;  %v12895_v7 = vld [vmem:[#allocation2 + $0x40] sm:$0xff]  ;;  %v2789_v23 = vrot.slane %v12496_v19, 7  ;;  %v12921_v4 = vld [vmem:[#allocation2 + $0xc8] sm:$0xff]  ;;  %18816 = vst [vmem:[#allocation53_spill] sm:$0xff] %v12936_v0 }
 0x25b   : > { %v12881_v8 = vadd.f32 %v1721_v49, %v1496_v35  ;;  %v1487_v38 = vpop.f32.mrf.mxu1  ;;  %18810 = vst [vmem:[#allocation7_spill] sm:$0xff] %v12893_v3  ;;  %v2683_v35 = vrot.slane %v12496_v19, 6  ;;  %v2976_v49 = vrot.slane %v12496_v19, 1  ;;  %v2977_v12 = vrot.slane %v12895_v7, 1 }
 0x25c   : > { %v12883_v29 = vpop.f32.mrf.mxu0  ;;  %v1497_v13 = vadd.f32 %v1487_v38, %v12529_v54  ;;  %18813 = vst [vmem:[#allocation31_spill] sm:$0xff] %v12921_v4  ;;  %v12924_v21 = vadd.f32 %v1827_v47, %v1627_v16  ;;  %v2811_v63 = vsel %vm849_vm5, %v2788_v52, %v2789_v23  ;;  %v7185_v54 = vld [vmem:[#allocation2 + $0xd0] sm:$0xff]  ;;  %v12934_v38 = vld [vmem:[#allocation2 + $0xf8] sm:$0xff]  ;;  %v7188_v16 = vld [vmem:[#allocation2 + $0xe8] sm:$0xff]  ;;  %v2685_v23 = vrot.slane %v12550_v56, 6 }
 0x25d   : > { %v2705_v50 = vsel %vm685_vm2, %v2682_v1, %v2683_v35  ;;  %18815 = vst [vmem:[#allocation33_spill] sm:$0xff] %v12934_v38  ;;  %v2999_v47 = vsel %vm1095_vm6, %v2976_v49, %v2977_v12  ;;  %v7191_v1 = vld [vmem:[#allocation2 + $0x100] sm:$0xff]  ;;  %v7194_v35 = vld [vmem:[#allocation2 + $0x118] sm:$0xff]  ;;  %v8975_v12 = vrot.slane %v7185_v54, 4  ;;  %v2791_v52 = vrot.slane %v12550_v56, 7 }
 0x25e   : > { %9723 = vmatmul.msk.f32.gmra.mxu1 %vm387_vm1, %v12887_v18  ;;  %9739 = vmatmul.msk.f32.gmra.mxu2 %vm387_vm1, %v12893_v3  ;;  %v8976_v32 = vrot.slane %v7188_v16, 4  ;;  %v18817_v54 = vrot.slane %v12921_v4, 4 }
 0x25f   : > { %9755 = vmatmul.msk.f32.gmra.mxu3 %vm387_vm1, %v12904_v44  ;;  %9771 = vmatmul.msk.f32.gmra.mxu0 %vm387_vm1, %v2592_v62  ;;  %v18819_v44 = vrot.slane %v12926_v59, 4  ;;  %v13197_v59 = vld [vmem:[#allocation2 + $0xb8] sm:$0xff] }
 0x260   : > { %v12964_v49 = vsel %vm618_vm4, %v18817_v54, %v8975_v12  ;;  %v18821_v12 = vrot.slane %v12934_v38, 4 }
 0x261   : > { %v1618_v17 = vpop.f32.mrf.mxu2  ;;  %18818 = vst [vmem:[#allocation54_spill] sm:$0xff] %v12964_v49  ;;  %v12971_v3 = vsel %vm618_vm4, %v18819_v44, %v8976_v32  ;;  %v13136_v49 = vld [vmem:[#allocation2 + $0xa0] sm:$0xff] }
 0x262   : > { %v1628_v62 = vadd.f32 %v1618_v17, %v12545_v9  ;;  %v1724_v55 = vpop.f32.mrf.mxu3  ;;  %v12942_v17 = vld [vmem:[#allocation2 + $0x58] sm:$0xff]  ;;  %18820 = vst [vmem:[#allocation55_spill] sm:$0xff] %v12971_v3 }
 0x263   : > { %v12928_v22 = vadd.f32 %v1724_v55, %v1497_v13  ;;  %v1915_v28 = vpop.f32.mrf.mxu1  ;;  %v2684_v13 = vrot.slane %v12548_v11, 6  ;;  %v2790_v55 = vrot.slane %v12548_v11, 7  ;;  %v2979_v40 = vrot.slane %v12942_v17, 1 }
 0x264   : > { %v2209_v9 = vpop.f32.mrf.mxu0  ;;  %v8978_v11 = vrot.slane %v7194_v35, 4  ;;  %v1939_v37 = vadd.f32 %v1915_v28, %v12571_v15  ;;  %v12975_v4 = vadd.f32 %v12883_v29, %v1628_v62  ;;  %v18823_v28 = vrot.slane %v12936_v0, 4 }
 0x265   : > { %v2687_v35 = vrot.slane %v12601_v27, 6 }
 0x266   : > { %9780 = vmatmul.msk.f32.vlgmr.msra.gmra.mxu1 %vm387_vm1, %v2705_v50  ;;  %9796 = vmatmul.msk.f32.vlgmr.msra.gmra.mxu2 %vm387_vm1, %v2811_v63  ;;  %v2978_v50 = vrot.slane %v12550_v56, 1  ;;  %v9839_v63 = vld [vmem:[%s18568_s4 + $0x618] sm:$0xff]  ;;  %v12987_v15 = vsel %vm618_vm4, %v18823_v28, %v8978_v11  ;;  %v13018_v11 = vld [vmem:[#allocation2 + $0x70] sm:$0xff] }
 0x267   : > { %9812 = vmatmul.msk.f32.vlgmr.msra.gmra.mxu3 %vm387_vm1, %v12496_v19  ;;  %9828 = vmatmul.msk.f32.vlgmr.msra.gmra.mxu0 %vm387_vm1, %v2999_v47  ;;  %v8977_v47 = vrot.slane %v7191_v1, 4  ;;  %18824 = vst [vmem:[#allocation57_spill] sm:$0xff] %v12987_v15 }
 0x268   : > { %3151 = vmatpush.msrb.mxu1 %v9839_v63  ;;  %v2998_v62 = vsel %vm1095_vm6, %v2978_v50, %v2979_v40 }
 0x269   : > { %v1997_v51 = vpop.f32.mrf.mxu2  ;;  %v12981_v1 = vsel %vm618_vm4, %v18821_v12, %v8977_v47  ;;  %v2980_v47 = vrot.slane %v12601_v27, 1 }
 0x26a   : > { %v2021_v16 = vadd.f32 %v1997_v51, %v12582_v48  ;;  %v2103_v63 = vpop.f32.mrf.mxu3  ;;  %18822 = vst [vmem:[#allocation56_spill] sm:$0xff] %v12981_v1  ;;  %v12993_v48 = vsel %vm685_vm2, %v2684_v13, %v2685_v23  ;;  %v12997_v51 = vsel %vm849_vm5, %v2790_v55, %v2791_v52  ;;  %v2686_v55 = vrot.slane %v12593_v42, 6 }
 0x26b   : > { %v12989_v32 = vadd.f32 %v2103_v63, %v1939_v37  ;;  %v1918_v44 = vpop.f32.mrf.mxu1  ;;  %v9838_v37 = vld [vmem:[%s18568_s4 + $0x610] sm:$0xff]  ;;  %v2792_v52 = vrot.slane %v12593_v42, 7  ;;  %v2793_v23 = vrot.slane %v12601_v27, 7  ;;  %v2981_v63 = vrot.slane %v13018_v11, 1 }
 0x26c   : > { %v2212_v29 = vpop.f32.mrf.mxu0  ;;  %3152 = vmatpush.msrb.mxu1 %v9838_v37  ;;  %v1940_v40 = vadd.f32 %v1918_v44, %v12608_v45  ;;  %v13021_v12 = vadd.f32 %v2209_v9, %v2021_v16  ;;  %v13029_v42 = vsel %vm685_vm2, %v2686_v55, %v2687_v35  ;;  %v9837_v16 = vld [vmem:[%s18568_s4 + $0x608] sm:$0xff]  ;;  %v9875_v37 = vld [vmem:[%s18568_s4 + $0x6b8] sm:$0xff]  ;;  %v2688_v55 = vrot.slane %v12632_v10, 6 }
 0x26d   : > { %v2997_v9 = vsel %vm1095_vm6, %v2980_v47, %v2981_v63  ;;  %3351 = vmatpush.msrb.mxu3 %v9875_v37  ;;  %v9890_v37 = vld [vmem:[%s18568_s4 + $0x6f0] sm:$0xff]  ;;  %v2797_v1 = vrot.slane %v12758_v36, 7 }
 0x26e   : > { %9781 = vmatmul.msk.f32.gmra.mxu1 %vm387_vm1, %v12993_v48  ;;  %9797 = vmatmul.msk.f32.gmra.mxu2 %vm387_vm1, %v12997_v51 }
 0x26f   : > { %9813 = vmatmul.msk.f32.gmra.mxu3 %vm387_vm1, %v12550_v56  ;;  %9829 = vmatmul.msk.f32.gmra.mxu0 %vm387_vm1, %v2998_v62  ;;  %v9859_v62 = vld [vmem:[%s18568_s4 + $0x678] sm:$0xff] }
 0x270   : > { %3153 = vmatpush.msrb.mxu1 %v9837_v16  ;;  %3253 = vmatpush.msrb.mxu2 %v9859_v62  ;;  %v13065_v16 = vld [vmem:[#allocation2 + $0x88] sm:$0xff] }
 0x271   : > { %v2000_v13 = vpop.f32.mrf.mxu2  ;;  %v2983_v62 = vrot.slane %v13065_v16, 1 }
 0x272   : > { %v2022_v50 = vadd.f32 %v2000_v13, %v12614_v61  ;;  %v2106_v54 = vpop.f32.mrf.mxu3  ;;  %v13033_v61 = vsel %vm849_vm5, %v2792_v52, %v2793_v23  ;;  %v2689_v52 = vrot.slane %v12669_v43, 6  ;;  %v2794_v23 = vrot.slane %v12632_v10, 7  ;;  %v9858_v10 = vld [vmem:[%s18568_s4 + $0x670] sm:$0xff] }
 0x273   : > { %v13023_v28 = vadd.f32 %v2106_v54, %v1940_v40  ;;  %v1921_v45 = vpop.f32.mrf.mxu1  ;;  %v9891_v40 = vld [vmem:[%s18568_s4 + $0x6f8] sm:$0xff]  ;;  %v2795_v54 = vrot.slane %v12669_v43, 7  ;;  %3254 = vmatpush.msrb.mxu2 %v9858_v10 }
 0x274   : > { %v13025_v44 = vpop.f32.mrf.mxu0  ;;  %v1941_v13 = vadd.f32 %v1921_v45, %v12674_v24  ;;  %3482 = vmatpush.msrb.mxu0 %v9891_v40  ;;  %v13068_v24 = vadd.f32 %v2212_v29, %v2022_v50  ;;  %v13085_v29 = vsel %vm685_vm2, %v2688_v55, %v2689_v52  ;;  %v9889_v52 = vld [vmem:[%s18568_s4 + $0x6e8] sm:$0xff] }
 0x275   : > { %v13089_v50 = vsel %vm849_vm5, %v2794_v23, %v2795_v54  ;;  %v9856_v23 = vld [vmem:[%s18568_s4 + $0x660] sm:$0xff] }
 0x276   : > { %9782 = vmatmul.msk.f32.gmra.mxu1 %vm387_vm1, %v13029_v42  ;;  %9798 = vmatmul.msk.f32.gmra.mxu2 %vm387_vm1, %v13033_v61  ;;  %v9872_v54 = vld [vmem:[%s18568_s4 + $0x6a0] sm:$0xff] }
 0x277   : > { %9814 = vmatmul.msk.f32.gmra.mxu3 %vm387_vm1, %v12601_v27  ;;  %9830 = vmatmul.msk.f32.gmra.mxu0 %vm387_vm1, %v2997_v9  ;;  %v2982_v9 = vrot.slane %v12669_v43, 1 }
 0x278   : > { %3483 = vmatpush.msrb.mxu0 %v9890_v37  ;;  %v2691_v37 = vrot.slane %v12758_v36, 6 }
 0x279   : > { %v2003_v35 = vpop.f32.mrf.mxu2  ;;  %v2996_v55 = vsel %vm1095_vm6, %v2982_v9, %v2983_v62  ;;  %v2690_v9 = vrot.slane %v12722_v5, 6  ;;  %v9888_v62 = vld [vmem:[%s18568_s4 + $0x6e0] sm:$0xff] }
 0x27a   : > { %v13062_v47 = vadd.f32 %v2003_v35, %v12765_v14  ;;  %v2109_v63 = vpop.f32.mrf.mxu3  ;;  %v9874_v14 = vld [vmem:[%s18568_s4 + $0x6b0] sm:$0xff]  ;;  %v9873_v35 = vld [vmem:[%s18568_s4 + $0x6a8] sm:$0xff]  ;;  %3484 = vmatpush.msrb.mxu0 %v9889_v52  ;;  %v9887_v52 = vld [vmem:[%s18568_s4 + $0x6d8] sm:$0xff] }
 0x27b   : > { %v13070_v45 = vadd.f32 %v2109_v63, %v1941_v13  ;;  %v1924_v15 = vpop.f32.mrf.mxu1  ;;  %3352 = vmatpush.msrb.mxu3 %v9874_v14  ;;  %v9857_v13 = vld [vmem:[%s18568_s4 + $0x668] sm:$0xff]  ;;  %v9836_v63 = vld [vmem:[%s18568_s4 + $0x600] sm:$0xff] }
 0x27c   : > { %v13081_v40 = vpop.f32.mrf.mxu0  ;;  %3255 = vmatpush.msrb.mxu2 %v9857_v13  ;;  %v1942_v10 = vadd.f32 %v1924_v15, %v12767_v25  ;;  %3154 = vmatpush.msrb.mxu1 %v9836_v63  ;;  %v9855_v13 = vld [vmem:[%s18568_s4 + $0x658] sm:$0xff]  ;;  %v2984_v15 = vrot.slane %v12758_v36, 1 }
 0x27d   : > { %3353 = vmatpush.msrb.mxu3 %v9873_v35  ;;  %v9871_v35 = vld [vmem:[%s18568_s4 + $0x698] sm:$0xff]  ;;  %3485 = vmatpush.msrb.mxu0 %v9888_v62  ;;  %v9870_v62 = vld [vmem:[%s18568_s4 + $0x690] sm:$0xff] }
 0x27e   : > { %9783 = vmatmul.msk.f32.gmra.mxu1 %vm387_vm1, %v13085_v29  ;;  %9799 = vmatmul.msk.f32.gmra.mxu2 %vm387_vm1, %v13089_v50 }
 0x27f   : > { %9815 = vmatmul.msk.f32.gmra.mxu3 %vm387_vm1, %v12669_v43  ;;  %9831 = vmatmul.msk.f32.gmra.mxu0 %vm387_vm1, %v2996_v55  ;;  %v2796_v55 = vrot.slane %v12722_v5, 7  ;;  %v2985_v5 = vrot.slane %v13136_v49, 1 }
 0x280   : > { %3256 = vmatpush.msrb.mxu2 %v9856_v23  ;;  %3354 = vmatpush.msrb.mxu3 %v9872_v54  ;;  %v9854_v54 = vld [vmem:[%s18568_s4 + $0x650] sm:$0xff] }
 0x281   : > { %v2006_v14 = vpop.f32.mrf.mxu2  ;;  %v13152_v23 = vsel %vm849_vm5, %v2796_v55, %v2797_v1  ;;  %3486 = vmatpush.msrb.mxu0 %v9887_v52  ;;  %v9886_v1 = vld [vmem:[%s18568_s4 + $0x6d0] sm:$0xff]  ;;  %v2692_v55 = vrot.slane %v12789_v60, 6  ;;  %v2799_v52 = vrot.slane %v12820_v41, 7 }
 0x282   : > { %v13133_v3 = vadd.f32 %v2006_v14, %v12827_v30  ;;  %v2112_v25 = vpop.f32.mrf.mxu3  ;;  %3257 = vmatpush.msrb.mxu2 %v9855_v13  ;;  %3355 = vmatpush.msrb.mxu3 %v9871_v35  ;;  %v13148_v30 = vsel %vm685_vm2, %v2690_v9, %v2691_v37  ;;  %18826 = vst [vmem:[#allocation59_spill] sm:$0xff] %v13152_v23  ;;  %v9869_v14 = vld [vmem:[%s18568_s4 + $0x688] sm:$0xff]  ;;  %v9907_v37 = vld [vmem:[%s18568_s4 + $0x738] sm:$0xff] }
 0x283   : > { %v13142_v63 = vadd.f32 %v2112_v25, %v1942_v10  ;;  %v1927_v0 = vpop.f32.mrf.mxu1  ;;  %18825 = vst [vmem:[#allocation58_spill] sm:$0xff] %v13148_v30  ;;  %v2995_v9 = vsel %vm1095_vm6, %v2984_v15, %v2985_v5  ;;  %v9853_v10 = vld [vmem:[%s18568_s4 + $0x648] sm:$0xff]  ;;  %v2693_v15 = vrot.slane %v12820_v41, 6  ;;  %v2798_v5 = vrot.slane %v12789_v60, 7  ;;  %3487 = vmatpush.msrb.mxu0 %v9886_v1  ;;  %3588 = vmatpush.msra.mxu1 %v9907_v37  ;;  %v9884_v1 = vld [vmem:[%s18568_s4 + $0x6c0] sm:$0xff] }
 0x284   : > { %v13144_v38 = vpop.f32.mrf.mxu0  ;;  %3258 = vmatpush.msrb.mxu2 %v9854_v54  ;;  %3356 = vmatpush.msrb.mxu3 %v9870_v62  ;;  %v9885_v13 = vld [vmem:[%s18568_s4 + $0x6c8] sm:$0xff]  ;;  %v1943_v35 = vadd.f32 %v1927_v0, %v12829_v31  ;;  %v9868_v54 = vld [vmem:[%s18568_s4 + $0x680] sm:$0xff]  ;;  %v2986_v0 = vrot.slane %v12820_v41, 1  ;;  %v2987_v60 = vrot.slane %v13197_v59, 1 }
 0x285   : > { %3488 = vmatpush.msrb.mxu0 %v9885_v13 }
 0x286   : > { %9784 = vmatmul.msk.f32.gmra.mxu1 %vm387_vm1, %v13148_v30  ;;  %9800 = vmatmul.msk.f32.gmra.mxu2 %vm387_vm1, %v13152_v23  ;;  %v2994_v13 = vsel %vm1095_vm6, %v2986_v0, %v2987_v60  ;;  %v13242_v60 = vadd.f32 %v13081_v40, %v13133_v3  ;;  %v2696_v3 = vrot.slane %v12862_v33, 6 }
 0x287   : > { %9816 = vmatmul.msk.f32.gmra.mxu3 %vm387_vm1, %v12758_v36  ;;  %9832 = vmatmul.msk.f32.gmra.mxu0 %vm387_vm1, %v2995_v9  ;;  %v9852_v9 = vld [vmem:[%s18568_s4 + $0x640] sm:$0xff] }
 0x288   : > { %3259 = vmatpush.msrb.mxu2 %v9853_v10  ;;  %3357 = vmatpush.msrb.mxu3 %v9869_v14  ;;  %v13213_v10 = vsel %vm685_vm2, %v2692_v55, %v2693_v15  ;;  %v13217_v14 = vsel %vm849_vm5, %v2798_v5, %v2799_v52  ;;  %v13232_v15 = vld [vmem:[#allocation2 + $0xc8] sm:$0xff] }
 0x289   : > { %v2009_v25 = vpop.f32.mrf.mxu2  ;;  %18827 = vst [vmem:[#allocation60_spill] sm:$0xff] %v13213_v10  ;;  %3489 = vmatpush.msrb.mxu0 %v9884_v1  ;;  %v2695_v5 = vrot.slane %v13232_v15, 6  ;;  %v9905_v1 = vld [vmem:[%s18568_s4 + $0x728] sm:$0xff] }
 0x28a   : > { %v2025_v62 = vadd.f32 %v2009_v25, %v12853_v2  ;;  %v2115_v31 = vpop.f32.mrf.mxu3  ;;  %3260 = vmatpush.msrb.mxu2 %v9852_v9  ;;  %3358 = vmatpush.msrb.mxu3 %v9868_v54  ;;  %v13209_v2 = vadd.f32 %v13025_v44, %v13062_v47  ;;  %18828 = vst [vmem:[#allocation61_spill] sm:$0xff] %v13217_v14  ;;  %v9906_v44 = vld [vmem:[%s18568_s4 + $0x730] sm:$0xff] }
 0x28b   : > { %v13203_v23 = vadd.f32 %v2115_v31, %v1943_v35  ;;  %v1930_v30 = vpop.f32.mrf.mxu1  ;;  %3589 = vmatpush.msra.mxu1 %v9906_v44  ;;  %v10832_v35 = vld [vmem:[#allocation2 + $0xc0] sm:$0xff] }
 0x28c   : > { %v13205_v37 = vpop.f32.mrf.mxu0  ;;  %v1944_v47 = vadd.f32 %v1930_v30, %v12855_v58  ;;  %v2694_v25 = vrot.slane %v10832_v35, 6  ;;  %v18829_v30 = vld [vmem:[#allocation38_spill] sm:$0xff]  ;;  %v13258_v44 = vld [vmem:[#allocation2 + $0xe0] sm:$0xff] }
 0x28d   : > { %3590 = vmatpush.msra.mxu1 %v9905_v1  ;;  %v2803_v35 = vrot.slane %v13258_v44, 7  ;;  %v13273_v1 = vadd.f32 %v13144_v38, %v2025_v62  ;;  %v10836_v38 = vld [vmem:[#allocation2 + $0x38] sm:$0xff] }
 0x28e   : > { %9785 = vmatmul.msk.f32.gmra.mxu1 %vm387_vm1, %v13213_v10  ;;  %9801 = vmatmul.msk.f32.gmra.mxu2 %vm387_vm1, %v13217_v14  ;;  %v2699_v58 = vsel %vm685_vm2, %v2694_v25, %v2695_v5  ;;  %v3082_v62 = vrot.slane %v10836_v38, 2 }
 0x28f   : > { %9817 = vmatmul.msk.f32.gmra.mxu3 %vm387_vm1, %v12820_v41  ;;  %9833 = vmatmul.msk.f32.gmra.mxu0 %vm387_vm1, %v2994_v13 }
 0x291   : > { %v2012_v55 = vpop.f32.mrf.mxu2 }
 0x292   : > { %v2026_v52 = vadd.f32 %v2012_v55, %v12879_v6  ;;  %v2118_v9 = vpop.f32.mrf.mxu3  ;;  %v18830_v6 = vld [vmem:[#allocation40_spill] sm:$0xff]  ;;  %v2802_v55 = vrot.slane %v12862_v33, 7 }
 0x293   : > { %v13236_v54 = vadd.f32 %v2118_v9, %v1944_v47  ;;  %v1933_v31 = vpop.f32.mrf.mxu1  ;;  %v2697_v47 = vrot.slane %v13258_v44, 6  ;;  %v2990_v9 = vrot.slane %v13258_v44, 1 }
 0x294   : > { %v13238_v0 = vpop.f32.mrf.mxu0  ;;  %v1945_v40 = vadd.f32 %v1933_v31, %v12881_v8 }
 0x295   : > { %v13277_v33 = vsel %vm685_vm2, %v2696_v3, %v2697_v47  ;;  %v3083_v3 = vrot.slane %v12895_v7, 2  ;;  %v3189_v47 = vrot.slane %v12895_v7, 3 }
 0x296   : > { %9786 = vmatmul.msk.f32.gmra.mxu1 %vm387_vm1, %v2699_v58  ;;  %9802 = vmatmul.msk.f32.gmra.mxu2 %vm387_vm1, %v18829_v30  ;;  %v13265_v58 = vld [vmem:[#allocation2 + $0xe8] sm:$0xff]  ;;  %18831 = vst [vmem:[#allocation38_spill] sm:$0xff] %v13277_v33 }
 0x297   : > { %9818 = vmatmul.msk.f32.gmra.mxu3 %vm387_vm1, %v13232_v15  ;;  %9834 = vmatmul.msk.f32.gmra.mxu0 %vm387_vm1, %v18830_v6  ;;  %v2991_v30 = vrot.slane %v13265_v58, 1 }
 0x299   : > { %v2015_v13 = vpop.f32.mrf.mxu2 }
 0x29a   : > { %v2027_v25 = vadd.f32 %v2015_v13, %v12924_v21  ;;  %v2121_v5 = vpop.f32.mrf.mxu3  ;;  %v13281_v21 = vsel %vm849_vm5, %v2802_v55, %v2803_v35  ;;  %v3188_v13 = vrot.slane %v10836_v38, 3  ;;  %v9904_v55 = vld [vmem:[%s18568_s4 + $0x720] sm:$0xff]  ;;  %v3294_v35 = vrot.slane %v12895_v7, 4 }
 0x29b   : > { %v13268_v6 = vadd.f32 %v2121_v5, %v1945_v40  ;;  %v1936_v8 = vpop.f32.mrf.mxu1  ;;  %18832 = vst [vmem:[#allocation40_spill] sm:$0xff] %v13281_v21  ;;  %v2992_v40 = vsel %vm1095_vm6, %v2990_v9, %v2991_v30  ;;  %3591 = vmatpush.msra.mxu1 %v9904_v55  ;;  %v3105_v38 = vsel %vm1202_vm7, %v3082_v62, %v3083_v3  ;;  %v18833_v7 = vrot.slane %v12496_v19, 4 }
 0x29c   : > { %v13270_v31 = vpop.f32.mrf.mxu0  ;;  %v1946_v5 = vadd.f32 %v1936_v8, %v12928_v22  ;;  %v3211_v14 = vsel %vm1309_vm8, %v3188_v13, %v3189_v47  ;;  %v13313_v8 = vadd.f32 %v13205_v37, %v2026_v52  ;;  %v3085_v62 = vrot.slane %v12942_v17, 2  ;;  %v9903_v37 = vld [vmem:[%s18568_s4 + $0x718] sm:$0xff] }
 0x29d   : > { %v3309_v22 = vsel %vm618_vm4, %v18833_v7, %v3294_v35  ;;  %v3190_v19 = vrot.slane %v12550_v56, 3  ;;  %v3191_v3 = vrot.slane %v12942_v17, 3  ;;  %v3295_v52 = vrot.slane %v12942_v17, 4  ;;  %3592 = vmatpush.msra.mxu1 %v9903_v37 }
 0x29e   : > { %9787 = vmatmul.msk.f32.gmra.mxu1 %vm387_vm1, %v13277_v33  ;;  %9803 = vmatmul.msk.f32.gmra.mxu2 %vm387_vm1, %v13281_v21  ;;  %v3192_v7 = vrot.slane %v12601_v27, 3 }
 0x29f   : > { %9819 = vmatmul.msk.f32.gmra.mxu3 %vm387_vm1, %v13258_v44  ;;  %9835 = vmatmul.msk.f32.gmra.mxu0 %vm387_vm1, %v2992_v40  ;;  %v3210_v17 = vsel %vm1309_vm8, %v3190_v19, %v3191_v3 }
 0x2a1   : > { %v2018_v9 = vpop.f32.mrf.mxu2 }
 0x2a2   : > { %v2028_v30 = vadd.f32 %v2018_v9, %v12975_v4  ;;  %v2124_v40 = vpop.f32.mrf.mxu3  ;;  %v3084_v4 = vrot.slane %v12550_v56, 2 }
 0x2a3   : > { %v13300_v21 = vadd.f32 %v2124_v40, %v1946_v5  ;;  %v2315_v33 = vpop.f32.mrf.mxu1  ;;  %v3086_v40 = vrot.slane %v12601_v27, 2 }
 0x2a4   : > { %v13306_v10 = vpop.f32.mrf.mxu0  ;;  %v3104_v5 = vsel %vm1202_vm7, %v3084_v4, %v3085_v62 }
 0x2a6   : > { %9844 = vmatmul.msk.f32.vlgmr.msrb.gmra.mxu1 %vm387_vm1, %v3105_v38  ;;  %9860 = vmatmul.msk.f32.vlgmr.msrb.gmra.mxu2 %vm387_vm1, %v3211_v14  ;;  %v2339_v14 = vadd.f32 %v2315_v33, %v12989_v32  ;;  %v3308_v32 = vsel %vm618_vm4, %v12564_v46, %v3295_v52  ;;  %v9902_v33 = vld [vmem:[%s18568_s4 + $0x710] sm:$0xff] }
 0x2a7   : > { %9876 = vmatmul.msk.f32.vlgmr.msrb.gmra.mxu3 %vm387_vm1, %v3309_v22  ;;  %9892 = vmatmul.msk.f32.vlgmr.msrb.gmra.mxu0 %vm387_vm1, %v12578_v20  ;;  %v3193_v22 = vrot.slane %v13018_v11, 3 }
 0x2a8   : > { %3593 = vmatpush.msra.mxu1 %v9902_v33  ;;  %v3195_v33 = vrot.slane %v13065_v16, 3 }
 0x2a9   : > { %v2413_v13 = vpop.f32.mrf.mxu2 }
 0x2aa   : > { %v2437_v20 = vadd.f32 %v2413_v13, %v13021_v12  ;;  %v2544_v47 = vpop.f32.mrf.mxu3  ;;  %v13346_v12 = vadd.f32 %v13238_v0, %v2027_v25  ;;  %v3087_v25 = vrot.slane %v13018_v11, 2  ;;  %v3209_v11 = vsel %vm1309_vm8, %v3192_v7, %v3193_v22  ;;  %v9939_v13 = vld [vmem:[%s18568_s4 + $0x7b8] sm:$0xff] }
 0x2ab   : > { %v13330_v55 = vadd.f32 %v2544_v47, %v2339_v14  ;;  %v2318_v35 = vpop.f32.mrf.mxu1  ;;  %v13369_v14 = vadd.f32 %v13270_v31, %v2028_v30  ;;  %v9901_v31 = vld [vmem:[%s18568_s4 + $0x708] sm:$0xff]  ;;  %v9923_v30 = vld [vmem:[%s18568_s4 + $0x778] sm:$0xff]  ;;  %v3088_v47 = vrot.slane %v12669_v43, 2  ;;  %3800 = vmatpush.msra.mxu3 %v9939_v13  ;;  %v9936_v13 = vld [vmem:[%s18568_s4 + $0x7a0] sm:$0xff] }
 0x2ac   : > { %v13340_v9 = vpop.f32.mrf.mxu0  ;;  %v2340_v38 = vadd.f32 %v2318_v35, %v13023_v28  ;;  %v3103_v28 = vsel %vm1202_vm7, %v3086_v40, %v3087_v25  ;;  %3594 = vmatpush.msra.mxu1 %v9901_v31  ;;  %3694 = vmatpush.msra.mxu2 %v9923_v30  ;;  %v18835_v31 = vld [vmem:[#allocation13_spill] sm:$0xff]  ;;  %v9920_v30 = vld [vmem:[%s18568_s4 + $0x760] sm:$0xff] }
 0x2ae   : > { %9845 = vmatmul.msk.f32.gmra.mxu1 %vm387_vm1, %v3104_v5  ;;  %9861 = vmatmul.msk.f32.gmra.mxu2 %vm387_vm1, %v3210_v17  ;;  %v3089_v17 = vrot.slane %v13065_v16, 2  ;;  %v9954_v16 = vld [vmem:[%s18568_s4 + $0x7f0] sm:$0xff] }
 0x2af   : > { %9877 = vmatmul.msk.f32.gmra.mxu3 %vm387_vm1, %v3308_v32  ;;  %9893 = vmatmul.msk.f32.gmra.mxu0 %vm387_vm1, %v12628_v26  ;;  %v3194_v32 = vrot.slane %v12669_v43, 3  ;;  %v10067_v43 = vld [vmem:[%s18568_s4 + $0x9b8] sm:$0xff] }
 0x2b1   : > { %v2416_v0 = vpop.f32.mrf.mxu2 }
 0x2b2   : > { %v13362_v62 = vadd.f32 %v2416_v0, %v13068_v24  ;;  %v2547_v26 = vpop.f32.mrf.mxu3  ;;  %v18834_v24 = vld [vmem:[#allocation11_spill] sm:$0xff] }
 0x2b3   : > { %v13364_v3 = vadd.f32 %v2547_v26, %v2340_v38  ;;  %v2321_v37 = vpop.f32.mrf.mxu1  ;;  %v9938_v26 = vld [vmem:[%s18568_s4 + $0x7b0] sm:$0xff] }
 0x2b4   : > { %v13366_v52 = vpop.f32.mrf.mxu0  ;;  %v2341_v35 = vadd.f32 %v2321_v37, %v13070_v45  ;;  %v9922_v45 = vld [vmem:[%s18568_s4 + $0x770] sm:$0xff]  ;;  %3801 = vmatpush.msra.mxu3 %v9938_v26  ;;  %v9919_v26 = vld [vmem:[%s18568_s4 + $0x758] sm:$0xff] }
 0x2b5   : > { %3695 = vmatpush.msra.mxu2 %v9922_v45  ;;  %v3197_v45 = vrot.slane %v13136_v49, 3 }
 0x2b6   : > { %9846 = vmatmul.msk.f32.gmra.mxu1 %vm387_vm1, %v3103_v28  ;;  %9862 = vmatmul.msk.f32.gmra.mxu2 %vm387_vm1, %v3209_v11  ;;  %v3102_v28 = vsel %vm1202_vm7, %v3088_v47, %v3089_v17  ;;  %v3208_v11 = vsel %vm1309_vm8, %v3194_v32, %v3195_v33  ;;  %v3091_v33 = vrot.slane %v13136_v49, 2  ;;  %v9951_v49 = vld [vmem:[%s18568_s4 + $0x7d8] sm:$0xff] }
 0x2b7   : > { %9878 = vmatmul.msk.f32.gmra.mxu3 %vm387_vm1, %v18834_v24  ;;  %9894 = vmatmul.msk.f32.gmra.mxu0 %vm387_vm1, %v12718_v53  ;;  %v9955_v53 = vld [vmem:[%s18568_s4 + $0x7f8] sm:$0xff]  ;;  %v9921_v24 = vld [vmem:[%s18568_s4 + $0x768] sm:$0xff] }
 0x2b8   : > { %3882 = vmatpush.msra.mxu0 %v9955_v53  ;;  %v9900_v53 = vld [vmem:[%s18568_s4 + $0x700] sm:$0xff]  ;;  %3696 = vmatpush.msra.mxu2 %v9921_v24 }
 0x2b9   : > { %v2419_v5 = vpop.f32.mrf.mxu2  ;;  %3595 = vmatpush.msra.mxu1 %v9900_v53  ;;  %v9950_v53 = vld [vmem:[%s18568_s4 + $0x7d0] sm:$0xff] }
 0x2ba   : > { %v13403_v38 = vadd.f32 %v2419_v5, %v13209_v2  ;;  %v2550_v0 = vpop.f32.mrf.mxu3  ;;  %v13419_v2 = vadd.f32 %v13306_v10, %v2437_v20  ;;  %3883 = vmatpush.msra.mxu0 %v9954_v16  ;;  %v9937_v10 = vld [vmem:[%s18568_s4 + $0x7a8] sm:$0xff]  ;;  %v9935_v16 = vld [vmem:[%s18568_s4 + $0x798] sm:$0xff]  ;;  %3697 = vmatpush.msra.mxu2 %v9920_v30  ;;  %v13493_v30 = vld [vmem:[#allocation2 + $0xc0] sm:$0xff] }
 0x2bb   : > { %v13405_v25 = vadd.f32 %v2550_v0, %v2341_v35  ;;  %v2324_v22 = vpop.f32.mrf.mxu1  ;;  %v9953_v20 = vld [vmem:[%s18568_s4 + $0x7e8] sm:$0xff]  ;;  %v3090_v35 = vrot.slane %v12758_v36, 2  ;;  %3802 = vmatpush.msra.mxu3 %v9937_v10  ;;  %v18650_v0 = vrot.slane %v12758_v36, 3 }
 0x2bc   : > { %v13416_v37 = vpop.f32.mrf.mxu0  ;;  %v2342_v5 = vadd.f32 %v2324_v22, %v13142_v63  ;;  %3884 = vmatpush.msra.mxu0 %v9953_v20  ;;  %3698 = vmatpush.msra.mxu2 %v9919_v26  ;;  %v9918_v20 = vld [vmem:[%s18568_s4 + $0x750] sm:$0xff] }
 0x2bd   : > { %3803 = vmatpush.msra.mxu3 %v9936_v13  ;;  %v3207_v10 = vsel %vm1309_vm8, %v18650_v0, %v3197_v45  ;;  %v13495_v13 = vld [vmem:[#allocation2 + $0xc8] sm:$0xff]  ;;  %v3092_v45 = vrot.slane %v12820_v41, 2 }
 0x2be   : > { %9847 = vmatmul.msk.f32.gmra.mxu1 %vm387_vm1, %v3102_v28  ;;  %9863 = vmatmul.msk.f32.gmra.mxu2 %vm387_vm1, %v3208_v11 }
 0x2bf   : > { %9879 = vmatmul.msk.f32.gmra.mxu3 %vm387_vm1, %v18835_v31  ;;  %9895 = vmatmul.msk.f32.gmra.mxu0 %vm387_vm1, %v12785_v34  ;;  %v9952_v34 = vld [vmem:[%s18568_s4 + $0x7e0] sm:$0xff]  ;;  %v9934_v31 = vld [vmem:[%s18568_s4 + $0x790] sm:$0xff] }
 0x2c0   : > { %3885 = vmatpush.msra.mxu0 %v9952_v34  ;;  %3804 = vmatpush.msra.mxu3 %v9935_v16  ;;  %v18836_v34 = vld [vmem:[#allocation14_spill] sm:$0xff] }
 0x2c1   : > { %v2422_v17 = vpop.f32.mrf.mxu2  ;;  %3699 = vmatpush.msra.mxu2 %v9918_v20  ;;  %v9932_v20 = vld [vmem:[%s18568_s4 + $0x780] sm:$0xff] }
 0x2c2   : > { %v13468_v28 = vadd.f32 %v2422_v17, %v13242_v60  ;;  %v2553_v63 = vpop.f32.mrf.mxu3  ;;  %v3101_v60 = vsel %vm1202_vm7, %v3090_v35, %v3091_v33  ;;  %3886 = vmatpush.msra.mxu0 %v9951_v49  ;;  %v9933_v17 = vld [vmem:[%s18568_s4 + $0x788] sm:$0xff]  ;;  %v9971_v33 = vld [vmem:[%s18568_s4 + $0x838] sm:$0xff]  ;;  %3805 = vmatpush.msra.mxu3 %v9934_v31  ;;  %v18655_v49 = vrot.slane %v12820_v41, 3 }
 0x2c3   : > { %v13473_v22 = vadd.f32 %v2553_v63, %v2342_v5  ;;  %v2327_v11 = vpop.f32.mrf.mxu1  ;;  %v9917_v5 = vld [vmem:[%s18568_s4 + $0x748] sm:$0xff]  ;;  %v3093_v63 = vrot.slane %v13197_v59, 2  ;;  %3988 = vmatpush.msrb.mxu1 %v9971_v33  ;;  %v13539_v33 = vadd.f32 %v13340_v9, %v13362_v62  ;;  %v18837_v62 = vld [vmem:[#allocation15_spill] sm:$0xff] }
 0x2c4   : > { %v13475_v24 = vpop.f32.mrf.mxu0  ;;  %v2343_v26 = vadd.f32 %v2327_v11, %v13203_v23  ;;  %3887 = vmatpush.msra.mxu0 %v9950_v53  ;;  %v3427_v11 = vrot.slane %v13493_v30, 4  ;;  %3700 = vmatpush.msra.mxu2 %v9917_v5 }
 0x2c5   : > { %3806 = vmatpush.msra.mxu3 %v9933_v17  ;;  %v3100_v5 = vsel %vm1202_vm7, %v3092_v45, %v3093_v63  ;;  %v3094_v63 = vrot.slane %v13232_v15, 2  ;;  %v18838_v15 = vld [vmem:[#allocation7_spill] sm:$0xff] }
 0x2c6   : > { %9848 = vmatmul.msk.f32.gmra.mxu1 %vm387_vm1, %v3101_v60  ;;  %9864 = vmatmul.msk.f32.gmra.mxu2 %vm387_vm1, %v3207_v10  ;;  %v3199_v60 = vrot.slane %v13197_v59, 3  ;;  %v9916_v10 = vld [vmem:[%s18568_s4 + $0x740] sm:$0xff] }
 0x2c7   : > { %9880 = vmatmul.msk.f32.gmra.mxu3 %vm387_vm1, %v18836_v34  ;;  %9896 = vmatmul.msk.f32.gmra.mxu0 %vm387_vm1, %v12839_v57  ;;  %v9949_v57 = vld [vmem:[%s18568_s4 + $0x7c8] sm:$0xff]  ;;  %v18654_v34 = vrot.slane %v13495_v13, 4  ;;  %v9948_v59 = vld [vmem:[%s18568_s4 + $0x7c0] sm:$0xff] }
 0x2c8   : > { %3888 = vmatpush.msra.mxu0 %v9949_v57  ;;  %3701 = vmatpush.msra.mxu2 %v9916_v10  ;;  %v3206_v17 = vsel %vm1309_vm8, %v18655_v49, %v3199_v60  ;;  %v9970_v57 = vld [vmem:[%s18568_s4 + $0x830] sm:$0xff] }
 0x2c9   : > { %v2425_v16 = vpop.f32.mrf.mxu2  ;;  %3807 = vmatpush.msra.mxu3 %v9932_v20  ;;  %v3435_v9 = vsel %vm618_vm4, %v3427_v11, %v18654_v34  ;;  %3989 = vmatpush.msrb.mxu1 %v9970_v57  ;;  %v10837_v60 = vld [vmem:[#allocation2 + $0xd0] sm:$0xff]  ;;  %v3097_v57 = vrot.slane %v13265_v58, 2 }
 0x2ca   : > { %v13528_v31 = vadd.f32 %v2425_v16, %v13273_v1  ;;  %v2556_v23 = vpop.f32.mrf.mxu3  ;;  %3889 = vmatpush.msra.mxu0 %v9948_v59  ;;  %v3095_v10 = vrot.slane %v10837_v60, 2 }
 0x2cb   : > { %v13535_v53 = vadd.f32 %v2556_v23, %v2343_v26  ;;  %v2330_v0 = vpop.f32.mrf.mxu1 }
 0x2cc   : > { %v13541_v1 = vpop.f32.mrf.mxu0  ;;  %v2344_v26 = vadd.f32 %v2330_v0, %v13236_v54  ;;  %v3099_v54 = vsel %vm1202_vm7, %v3094_v63, %v3095_v10  ;;  %v13585_v0 = vld [vmem:[#allocation2 + $0xf0] sm:$0xff] }
 0x2cd   : > { %v3431_v10 = vrot.slane %v13585_v0, 4 }
 0x2ce   : > { %9849 = vmatmul.msk.f32.gmra.mxu1 %vm387_vm1, %v3100_v5  ;;  %9865 = vmatmul.msk.f32.gmra.mxu2 %vm387_vm1, %v3206_v17  ;;  %v13572_v5 = vadd.f32 %v13366_v52, %v13403_v38  ;;  %v13587_v52 = vld [vmem:[#allocation2 + $0xf8] sm:$0xff]  ;;  %v9969_v38 = vld [vmem:[%s18568_s4 + $0x828] sm:$0xff] }
 0x2cf   : > { %9881 = vmatmul.msk.f32.gmra.mxu3 %vm387_vm1, %v18837_v62  ;;  %9897 = vmatmul.msk.f32.gmra.mxu0 %vm387_vm1, %v3435_v9  ;;  %v18653_v9 = vrot.slane %v13258_v44, 2 }
 0x2d0   : > { %3990 = vmatpush.msrb.mxu1 %v9969_v38 }
 0x2d1   : > { %v2428_v16 = vpop.f32.mrf.mxu2 }
 0x2d2   : > { %v13566_v20 = vadd.f32 %v2428_v16, %v13313_v8  ;;  %v2559_v23 = vpop.f32.mrf.mxu3  ;;  %v18839_v8 = vld [vmem:[#allocation3_spill] sm:$0xff]  ;;  %v3203_v16 = vrot.slane %v13265_v58, 3  ;;  %v3098_v58 = vsel %vm1202_vm7, %v18653_v9, %v3097_v57 }
 0x2d3   : > { %v13568_v11 = vadd.f32 %v2559_v23, %v2344_v26  ;;  %v2333_v59 = vpop.f32.mrf.mxu1  ;;  %v18652_v26 = vrot.slane %v13258_v44, 3  ;;  %v18651_v23 = vrot.slane %v13587_v52, 4  ;;  %v9968_v57 = vld [vmem:[%s18568_s4 + $0x820] sm:$0xff] }
 0x2d4   : > { %v13574_v17 = vpop.f32.mrf.mxu0  ;;  %v2345_v62 = vadd.f32 %v2333_v59, %v13268_v6  ;;  %v13606_v6 = vadd.f32 %v13416_v37, %v13468_v28  ;;  %v18840_v28 = vld [vmem:[#allocation5_spill] sm:$0xff]  ;;  %3991 = vmatpush.msrb.mxu1 %v9968_v57 }
 0x2d5   : > { %v3433_v37 = vsel %vm618_vm4, %v3431_v10, %v18651_v23 }
 0x2d6   : > { %9850 = vmatmul.msk.f32.gmra.mxu1 %vm387_vm1, %v3099_v54  ;;  %9866 = vmatmul.msk.f32.gmra.mxu2 %vm387_vm1, %v12887_v18 }
 0x2d7   : > { %9882 = vmatmul.msk.f32.gmra.mxu3 %vm387_vm1, %v18838_v15  ;;  %9898 = vmatmul.msk.f32.gmra.mxu0 %vm387_vm1, %v18839_v8  ;;  %v10838_v8 = vld [vmem:[#allocation2 + $0x48] sm:$0xff] }
 0x2d8   : > { %v3523_v38 = vrot.slane %v10838_v8, 5  ;;  %v13643_v8 = vadd.f32 %v13475_v24, %v13528_v31  ;;  %v10840_v31 = vld [vmem:[#allocation2 + $0x60] sm:$0xff] }
 0x2d9   : > { %v2431_v18 = vpop.f32.mrf.mxu2 }
 0x2da   : > { %v13598_v63 = vadd.f32 %v2431_v18, %v13346_v12  ;;  %v2562_v60 = vpop.f32.mrf.mxu3  ;;  %v3204_v12 = vsel %vm1309_vm8, %v18652_v26, %v3203_v16  ;;  %v3746_v26 = vrot.slane %v13495_v13, 7 }
 0x2db   : > { %v13602_v54 = vadd.f32 %v2562_v60, %v2345_v62  ;;  %v2336_v15 = vpop.f32.mrf.mxu1  ;;  %v13627_v62 = vld [vmem:[#allocation2 + $0x50] sm:$0xff] }
 0x2dc   : > { %v13608_v59 = vpop.f32.mrf.mxu0  ;;  %v3524_v18 = vrot.slane %v13627_v62, 5  ;;  %v2346_v16 = vadd.f32 %v2336_v15, %v13300_v21  ;;  %v9967_v21 = vld [vmem:[%s18568_s4 + $0x818] sm:$0xff]  ;;  %v3525_v15 = vrot.slane %v10840_v31, 5 }
 0x2dd   : > { %3992 = vmatpush.msrb.mxu1 %v9967_v21  ;;  %v13685_v21 = vld [vmem:[#allocation2 + $0x80] sm:$0xff] }
 0x2de   : > { %9851 = vmatmul.msk.f32.gmra.mxu1 %vm387_vm1, %v3098_v58  ;;  %9867 = vmatmul.msk.f32.gmra.mxu2 %vm387_vm1, %v3204_v12 }
 0x2df   : > { %9883 = vmatmul.msk.f32.gmra.mxu3 %vm387_vm1, %v18840_v28  ;;  %9899 = vmatmul.msk.f32.gmra.mxu0 %vm387_vm1, %v3433_v37  ;;  %v3546_v28 = vsel %vm651_vm3, %v3523_v38, %v3524_v18  ;;  %v13658_v38 = vld [vmem:[#allocation2 + $0x68] sm:$0xff] }
 0x2e1   : > { %v2434_v60 = vpop.f32.mrf.mxu2 }
 0x2e2   : > { %v13635_v10 = vadd.f32 %v2434_v60, %v13369_v14  ;;  %v2565_v58 = vpop.f32.mrf.mxu3  ;;  %v13668_v60 = vadd.f32 %v13541_v1, %v13566_v20 }
 0x2e3   : > { %v13637_v12 = vadd.f32 %v2565_v58, %v2346_v16  ;;  %v2756_v37 = vpop.f32.mrf.mxu1 }
 0x2e4   : > { %v13645_v23 = vpop.f32.mrf.mxu0  ;;  %v2780_v14 = vadd.f32 %v2756_v37, %v13330_v55  ;;  %v10842_v37 = vld [vmem:[#allocation2 + $0x78] sm:$0xff] }
 0x2e6   : > { %9908 = vmatmul.msk.f32.vlgmr.msra.gmra.mxu1 %vm387_vm1, %v3546_v28  ;;  %9924 = vmatmul.msk.f32.vlgmr.msra.gmra.mxu2 %vm387_vm1, %v12993_v48  ;;  %v3526_v48 = vrot.slane %v13658_v38, 5  ;;  %v3527_v28 = vrot.slane %v10842_v37, 5 }
 0x2e7   : > { %9940 = vmatmul.msk.f32.vlgmr.msra.gmra.mxu3 %vm387_vm1, %v12997_v51  ;;  %9956 = vmatmul.msk.f32.vlgmr.msra.gmra.mxu0 %vm387_vm1, %v13627_v62 }
 0x2e8   : > { %v3545_v55 = vsel %vm651_vm3, %v3525_v15, %v3526_v48  ;;  %v13695_v15 = vadd.f32 %v13574_v17, %v13598_v63  ;;  %v9987_v17 = vld [vmem:[%s18568_s4 + $0x878] sm:$0xff] }
 0x2e9   : > { %v2862_v24 = vpop.f32.mrf.mxu2  ;;  %v10003_v63 = vld [vmem:[%s18568_s4 + $0x8b8] sm:$0xff]  ;;  %4094 = vmatpush.msrb.mxu2 %v9987_v17  ;;  %v9985_v17 = vld [vmem:[%s18568_s4 + $0x868] sm:$0xff] }
 0x2ea   : > { %v13662_v18 = vadd.f32 %v2862_v24, %v13419_v2  ;;  %v2944_v51 = vpop.f32.mrf.mxu3  ;;  %v9966_v2 = vld [vmem:[%s18568_s4 + $0x810] sm:$0xff]  ;;  %4200 = vmatpush.msrb.mxu3 %v10003_v63  ;;  %v10001_v63 = vld [vmem:[%s18568_s4 + $0x8a8] sm:$0xff] }
 0x2eb   : > { %v13664_v57 = vadd.f32 %v2944_v51, %v2780_v14  ;;  %v2759_v16 = vpop.f32.mrf.mxu1  ;;  %3993 = vmatpush.msrb.mxu1 %v9966_v2  ;;  %v13721_v2 = vld [vmem:[#allocation2 + $0x98] sm:$0xff] }
 0x2ec   : > { %v13670_v58 = vpop.f32.mrf.mxu0  ;;  %v2781_v1 = vadd.f32 %v2759_v16, %v13364_v3  ;;  %v10844_v16 = vld [vmem:[#allocation2 + $0x90] sm:$0xff] }
 0x2ee   : > { %9909 = vmatmul.msk.f32.gmra.mxu1 %vm387_vm1, %v3545_v55  ;;  %9925 = vmatmul.msk.f32.gmra.mxu2 %vm387_vm1, %v13029_v42  ;;  %v3528_v42 = vrot.slane %v13685_v21, 5  ;;  %v3529_v55 = vrot.slane %v10844_v16, 5  ;;  %v9964_v16 = vld [vmem:[%s18568_s4 + $0x800] sm:$0xff] }
 0x2ef   : > { %9941 = vmatmul.msk.f32.gmra.mxu3 %vm387_vm1, %v13033_v61  ;;  %9957 = vmatmul.msk.f32.gmra.mxu0 %vm387_vm1, %v13658_v38 }
 0x2f0   : > { %v3544_v3 = vsel %vm651_vm3, %v3527_v28, %v3528_v42 }
 0x2f1   : > { %v2865_v20 = vpop.f32.mrf.mxu2 }
 0x2f2   : > { %v13689_v14 = vadd.f32 %v2865_v20, %v13539_v33  ;;  %v2947_v61 = vpop.f32.mrf.mxu3  ;;  %v9965_v33 = vld [vmem:[%s18568_s4 + $0x808] sm:$0xff] }
 0x2f3   : > { %v13691_v24 = vadd.f32 %v2947_v61, %v2781_v1  ;;  %v2762_v31 = vpop.f32.mrf.mxu1  ;;  %3994 = vmatpush.msrb.mxu1 %v9965_v33  ;;  %v3530_v1 = vrot.slane %v13721_v2, 5  ;;  %v10002_v61 = vld [vmem:[%s18568_s4 + $0x8b0] sm:$0xff] }
 0x2f4   : > { %v13697_v48 = vpop.f32.mrf.mxu0  ;;  %4201 = vmatpush.msrb.mxu3 %v10002_v61 }
 0x2f5   : > { %v3543_v33 = vsel %vm651_vm3, %v3529_v55, %v3530_v1  ;;  %v10016_v55 = vld [vmem:[%s18568_s4 + $0x8e0] sm:$0xff]  ;;  %3995 = vmatpush.msrb.mxu1 %v9964_v16  ;;  %v13794_v16 = vadd.f32 %v13645_v23, %v13662_v18  ;;  %v18843_v23 = vld [vmem:[#allocation60_spill] sm:$0xff]  ;;  %v10014_v18 = vld [vmem:[%s18568_s4 + $0x8d0] sm:$0xff] }
 0x2f6   : > { %9910 = vmatmul.msk.f32.gmra.mxu1 %vm387_vm1, %v3544_v3  ;;  %9926 = vmatmul.msk.f32.gmra.mxu2 %vm387_vm1, %v13085_v29  ;;  %v10019_v29 = vld [vmem:[%s18568_s4 + $0x8f8] sm:$0xff] }
 0x2f7   : > { %9942 = vmatmul.msk.f32.gmra.mxu3 %vm387_vm1, %v13089_v50  ;;  %9958 = vmatmul.msk.f32.gmra.mxu0 %vm387_vm1, %v13685_v21  ;;  %v2782_v50 = vadd.f32 %v2762_v31, %v13405_v25  ;;  %v9986_v25 = vld [vmem:[%s18568_s4 + $0x870] sm:$0xff] }
 0x2f8   : > { %4298 = vmatpush.msrb.mxu0 %v10019_v29  ;;  %v10018_v31 = vld [vmem:[%s18568_s4 + $0x8f0] sm:$0xff]  ;;  %4095 = vmatpush.msrb.mxu2 %v9986_v25  ;;  %v18842_v29 = vld [vmem:[#allocation59_spill] sm:$0xff]  ;;  %v10846_v25 = vld [vmem:[#allocation2 + $0xa8] sm:$0xff] }
 0x2f9   : > { %v2868_v51 = vpop.f32.mrf.mxu2  ;;  %4202 = vmatpush.msrb.mxu3 %v10001_v63  ;;  %v3531_v61 = vrot.slane %v10846_v25, 5  ;;  %v9999_v63 = vld [vmem:[%s18568_s4 + $0x898] sm:$0xff] }
 0x2fa   : > { %v13725_v20 = vadd.f32 %v2868_v51, %v13572_v5  ;;  %v2950_v37 = vpop.f32.mrf.mxu3  ;;  %v13740_v5 = vadd.f32 %v13608_v59, %v13635_v10  ;;  %4299 = vmatpush.msrb.mxu0 %v10018_v31  ;;  %v18841_v59 = vld [vmem:[#allocation58_spill] sm:$0xff]  ;;  %v10017_v10 = vld [vmem:[%s18568_s4 + $0x8e8] sm:$0xff]  ;;  %v10000_v51 = vld [vmem:[%s18568_s4 + $0x8a0] sm:$0xff]  ;;  %4096 = vmatpush.msrb.mxu2 %v9985_v17 }
 0x2fb   : > { %v13727_v28 = vadd.f32 %v2950_v37, %v2782_v50  ;;  %v2765_v42 = vpop.f32.mrf.mxu1  ;;  %v9984_v50 = vld [vmem:[%s18568_s4 + $0x860] sm:$0xff]  ;;  %v13775_v31 = vld [vmem:[#allocation2 + $0xb0] sm:$0xff]  ;;  %v9983_v17 = vld [vmem:[%s18568_s4 + $0x858] sm:$0xff]  ;;  %4203 = vmatpush.msrb.mxu3 %v10000_v51 }
 0x2fc   : > { %v13742_v3 = vpop.f32.mrf.mxu0  ;;  %v2783_v1 = vadd.f32 %v2765_v42, %v13473_v22  ;;  %4300 = vmatpush.msrb.mxu0 %v10017_v10  ;;  %4097 = vmatpush.msrb.mxu2 %v9984_v50  ;;  %v10015_v42 = vld [vmem:[%s18568_s4 + $0x8d8] sm:$0xff]  ;;  %v9982_v50 = vld [vmem:[%s18568_s4 + $0x850] sm:$0xff] }
 0x2fd   : > { %4204 = vmatpush.msrb.mxu3 %v9999_v63  ;;  %v9998_v51 = vld [vmem:[%s18568_s4 + $0x890] sm:$0xff] }
 0x2fe   : > { %9911 = vmatmul.msk.f32.gmra.mxu1 %vm387_vm1, %v3543_v33  ;;  %9927 = vmatmul.msk.f32.gmra.mxu2 %vm387_vm1, %v18841_v59  ;;  %v3532_v33 = vrot.slane %v13775_v31, 5 }
 0x2ff   : > { %9943 = vmatmul.msk.f32.gmra.mxu3 %vm387_vm1, %v18842_v29  ;;  %9959 = vmatmul.msk.f32.gmra.mxu0 %vm387_vm1, %v13721_v2 }
 0x300   : > { %4301 = vmatpush.msrb.mxu0 %v10016_v55  ;;  %4098 = vmatpush.msrb.mxu2 %v9983_v17  ;;  %v18844_v55 = vld [vmem:[#allocation61_spill] sm:$0xff]  ;;  %v10035_v17 = vld [vmem:[%s18568_s4 + $0x938] sm:$0xff] }
 0x301   : > { %v2871_v37 = vpop.f32.mrf.mxu2  ;;  %4205 = vmatpush.msrb.mxu3 %v9998_v51  ;;  %v9996_v51 = vld [vmem:[%s18568_s4 + $0x880] sm:$0xff]  ;;  %4428 = vmatpush.msra.mxu1 %v10035_v17 }
 0x302   : > { %v13785_v59 = vadd.f32 %v2871_v37, %v13606_v6  ;;  %v2953_v22 = vpop.f32.mrf.mxu3  ;;  %v3542_v6 = vsel %vm651_vm3, %v3531_v61, %v3532_v33  ;;  %4302 = vmatpush.msrb.mxu0 %v10015_v42  ;;  %v9997_v37 = vld [vmem:[%s18568_s4 + $0x888] sm:$0xff]  ;;  %v3533_v61 = vrot.slane %v13493_v30, 5  ;;  %4099 = vmatpush.msrb.mxu2 %v9982_v50  ;;  %v3534_v42 = vrot.slane %v13495_v13, 5  ;;  %v9980_v50 = vld [vmem:[%s18568_s4 + $0x840] sm:$0xff] }
 0x303   : > { %v13790_v10 = vadd.f32 %v2953_v22, %v2783_v1  ;;  %v2768_v29 = vpop.f32.mrf.mxu1  ;;  %v9981_v1 = vld [vmem:[%s18568_s4 + $0x848] sm:$0xff]  ;;  %4206 = vmatpush.msrb.mxu3 %v9997_v37  ;;  %v10034_v37 = vld [vmem:[%s18568_s4 + $0x930] sm:$0xff] }
 0x304   : > { %v13796_v25 = vpop.f32.mrf.mxu0  ;;  %v10013_v33 = vld [vmem:[%s18568_s4 + $0x8c8] sm:$0xff]  ;;  %v2784_v63 = vadd.f32 %v2768_v29, %v13535_v53  ;;  %4303 = vmatpush.msrb.mxu0 %v10014_v18  ;;  %v3745_v29 = vrot.slane %v13493_v30, 7  ;;  %4100 = vmatpush.msrb.mxu2 %v9981_v1  ;;  %v10012_v18 = vld [vmem:[%s18568_s4 + $0x8c0] sm:$0xff] }
 0x305   : > { %4207 = vmatpush.msrb.mxu3 %v9996_v51  ;;  %4429 = vmatpush.msra.mxu1 %v10034_v37 }
 0x306   : > { %9912 = vmatmul.msk.f32.gmra.mxu1 %vm387_vm1, %v3542_v6  ;;  %9928 = vmatmul.msk.f32.gmra.mxu2 %vm387_vm1, %v18843_v23  ;;  %v3639_v6 = vrot.slane %v13493_v30, 6  ;;  %v3640_v23 = vrot.slane %v13495_v13, 6  ;;  %v3541_v30 = vsel %vm651_vm3, %v3533_v61, %v3534_v42  ;;  %v3753_v1 = vsel %vm849_vm5, %v3745_v29, %v3746_v26 }
 0x307   : > { %9944 = vmatmul.msk.f32.gmra.mxu3 %vm387_vm1, %v18844_v55  ;;  %9960 = vmatmul.msk.f32.gmra.mxu0 %vm387_vm1, %v13775_v31  ;;  %v13867_v61 = vadd.f32 %v13670_v58, %v13689_v14  ;;  %v3536_v26 = vrot.slane %v13258_v44, 5  ;;  %v13892_v14 = vadd.f32 %v13697_v48, %v13725_v20  ;;  %v3750_v48 = vrot.slane %v13587_v52, 7 }
 0x308   : > { %4304 = vmatpush.msrb.mxu0 %v10013_v33  ;;  %4101 = vmatpush.msrb.mxu2 %v9980_v50 }
 0x309   : > { %v2874_v22 = vpop.f32.mrf.mxu2  ;;  %4640 = vmatpush.msra.mxu3 %v10067_v43  ;;  %v10080_v43 = vld [vmem:[%s18568_s4 + $0x9e0] sm:$0xff] }
 0x30a   : > { %v13840_v55 = vadd.f32 %v2874_v22, %v13643_v8  ;;  %v2956_v53 = vpop.f32.mrf.mxu3  ;;  %v3647_v8 = vsel %vm685_vm2, %v3639_v6, %v3640_v23  ;;  %4305 = vmatpush.msrb.mxu0 %v10012_v18 }
 0x30b   : > { %v13847_v9 = vadd.f32 %v2956_v53, %v2784_v63  ;;  %v2771_v34 = vpop.f32.mrf.mxu1  ;;  %v10848_v63 = vld [vmem:[#allocation2 + $0xd8] sm:$0xff]  ;;  %v3537_v53 = vrot.slane %v13585_v0, 5 }
 0x30c   : > { %v13849_v49 = vpop.f32.mrf.mxu0  ;;  %v2785_v33 = vadd.f32 %v2771_v34, %v13568_v11  ;;  %v3535_v22 = vrot.slane %v10848_v63, 5  ;;  %v18845_v34 = vld [vmem:[#allocation38_spill] sm:$0xff]  ;;  %v18846_v11 = vld [vmem:[#allocation40_spill] sm:$0xff]  ;;  %v13957_v56 = vadd.f32 %v13796_v25, %v13840_v55 }
 0x30e   : > { %9913 = vmatmul.msk.f32.gmra.mxu1 %vm387_vm1, %v3541_v30  ;;  %9929 = vmatmul.msk.f32.gmra.mxu2 %vm387_vm1, %v3647_v8  ;;  %v3540_v58 = vsel %vm651_vm3, %v3535_v22, %v3536_v26  ;;  %v3538_v30 = vrot.slane %v13587_v52, 5  ;;  %v3643_v8 = vrot.slane %v13585_v0, 6 }
 0x30f   : > { %9945 = vmatmul.msk.f32.gmra.mxu3 %vm387_vm1, %v3753_v1  ;;  %9961 = vmatmul.msk.f32.gmra.mxu0 %vm387_vm1, %v13495_v13  ;;  %v3644_v1 = vrot.slane %v13587_v52, 6 }
 0x310   : > { %v3539_v26 = vsel %vm651_vm3, %v3537_v53, %v3538_v30 }
 0x311   : > { %v2877_v17 = vpop.f32.mrf.mxu2 }
 0x312   : > { %v13872_v42 = vadd.f32 %v2877_v17, %v13668_v60  ;;  %v2959_v6 = vpop.f32.mrf.mxu3  ;;  %v10033_v60 = vld [vmem:[%s18568_s4 + $0x928] sm:$0xff]  ;;  %v3749_v17 = vrot.slane %v13585_v0, 7 }
 0x313   : > { %v13874_v23 = vadd.f32 %v2959_v6, %v2785_v33  ;;  %v2774_v50 = vpop.f32.mrf.mxu1  ;;  %4430 = vmatpush.msra.mxu1 %v10033_v60  ;;  %v3645_v6 = vsel %vm685_vm2, %v3643_v8, %v3644_v1 }
 0x314   : > { %v13876_v51 = vpop.f32.mrf.mxu0  ;;  %v2786_v29 = vadd.f32 %v2774_v50, %v13602_v54  ;;  %v3395_v54 = vld [vmem:[#allocation2 + $0x58] sm:$0xff]  ;;  %v3751_v0 = vsel %vm849_vm5, %v3749_v17, %v3750_v48  ;;  %v3925_v17 = vrot.slane %v13658_v38, 1  ;;  %v13961_v48 = vld [vmem:[#allocation2 + $0x70] sm:$0xff] }
 0x315   : > { %v3924_v50 = vrot.slane %v3395_v54, 1  ;;  %v4136_v60 = vrot.slane %v3395_v54, 3  ;;  %v4241_v53 = vrot.slane %v3395_v54, 4  ;;  %v4242_v25 = vrot.slane %v13961_v48, 4 }
 0x316   : > { %9914 = vmatmul.msk.f32.gmra.mxu1 %vm387_vm1, %v3540_v58  ;;  %9930 = vmatmul.msk.f32.gmra.mxu2 %vm387_vm1, %v18845_v34  ;;  %v4030_v58 = vrot.slane %v3395_v54, 2  ;;  %v10032_v34 = vld [vmem:[%s18568_s4 + $0x920] sm:$0xff]  ;;  %v18675_v54 = vrot.slane %v13961_v48, 2 }
 0x317   : > { %9946 = vmatmul.msk.f32.gmra.mxu3 %vm387_vm1, %v18846_v11  ;;  %9962 = vmatmul.msk.f32.gmra.mxu0 %vm387_vm1, %v13258_v44  ;;  %v13925_v11 = vadd.f32 %v13742_v3, %v13785_v59 }
 0x318   : > { %4431 = vmatpush.msra.mxu1 %v10032_v34  ;;  %v4052_v3 = vsel %vm1202_vm7, %v3084_v4, %v4030_v58  ;;  %v10031_v4 = vld [vmem:[%s18568_s4 + $0x918] sm:$0xff] }
 0x319   : > { %v2880_v18 = vpop.f32.mrf.mxu2  ;;  %v18847_v58 = vld [vmem:[#allocation6_spill] sm:$0xff] }
 0x31a   : > { %v13900_v37 = vadd.f32 %v2880_v18, %v13695_v15  ;;  %v2962_v33 = vpop.f32.mrf.mxu3  ;;  %v3923_v15 = vrot.slane %v13627_v62, 1  ;;  %4432 = vmatpush.msra.mxu1 %v10031_v4  ;;  %v4255_v34 = vsel %vm618_vm4, %v18847_v58, %v4242_v25  ;;  %v18848_v4 = vld [vmem:[#allocation8_spill] sm:$0xff] }
 0x31b   : > { %v13904_v20 = vadd.f32 %v2962_v33, %v2786_v29  ;;  %v2777_v63 = vpop.f32.mrf.mxu1 }
 0x31c   : > { %v13906_v22 = vpop.f32.mrf.mxu0  ;;  %v2787_v29 = vadd.f32 %v2777_v63, %v13637_v12  ;;  %v3946_v33 = vsel %vm1095_vm6, %v3923_v15, %v3924_v50  ;;  %v4158_v12 = vsel %vm1309_vm8, %v3190_v19, %v4136_v60  ;;  %v18676_v63 = vrot.slane %v13961_v48, 1 }
 0x31d   : > { %v14002_v60 = vadd.f32 %v13849_v49, %v13872_v42 }
 0x31e   : > { %9915 = vmatmul.msk.f32.gmra.mxu1 %vm387_vm1, %v3539_v26  ;;  %9931 = vmatmul.msk.f32.gmra.mxu2 %vm387_vm1, %v3645_v6  ;;  %v3945_v38 = vsel %vm1095_vm6, %v3925_v17, %v18676_v63  ;;  %v10083_v17 = vld [vmem:[%s18568_s4 + $0x9f8] sm:$0xff] }
 0x31f   : > { %9947 = vmatmul.msk.f32.gmra.mxu3 %vm387_vm1, %v3751_v0  ;;  %9963 = vmatmul.msk.f32.gmra.mxu0 %vm387_vm1, %v13587_v52  ;;  %v18674_v0 = vrot.slane %v13961_v48, 3 }
 0x320   : > { %4746 = vmatpush.msra.mxu0 %v10083_v17 }
 0x321   : > { %v2883_v18 = vpop.f32.mrf.mxu2  ;;  %v4157_v50 = vsel %vm1309_vm8, %v3192_v7, %v18674_v0 }
 0x322   : > { %v13929_v30 = vadd.f32 %v2883_v18, %v13740_v5  ;;  %v2965_v62 = vpop.f32.mrf.mxu3  ;;  %v4256_v5 = vsel %vm618_vm4, %v12564_v46, %v4241_v53  ;;  %v3927_v53 = vrot.slane %v13685_v21, 1 }
 0x323   : > { %v13931_v8 = vadd.f32 %v2965_v62, %v2787_v29  ;;  %v3156_v1 = vpop.f32.mrf.mxu1  ;;  %v14006_v29 = vld [vmem:[#allocation2 + $0x88] sm:$0xff] }
 0x324   : > { %v13939_v59 = vpop.f32.mrf.mxu0  ;;  %v3180_v19 = vadd.f32 %v3156_v1, %v13664_v57  ;;  %v18673_v18 = vrot.slane %v14006_v29, 1  ;;  %v18672_v62 = vrot.slane %v14006_v29, 2  ;;  %v4243_v49 = vrot.slane %v14006_v29, 4 }
 0x326   : > { %9972 = vmatmul.msk.f32.vlgmr.msrb.gmra.mxu1 %vm387_vm1, %v3946_v33  ;;  %9988 = vmatmul.msk.f32.vlgmr.msrb.gmra.mxu2 %vm387_vm1, %v4052_v3  ;;  %v18671_v3 = vrot.slane %v14006_v29, 3  ;;  %v3944_v21 = vsel %vm1095_vm6, %v3927_v53, %v18673_v18 }
 0x327   : > { %10004 = vmatmul.msk.f32.vlgmr.msrb.gmra.mxu3 %vm387_vm1, %v4158_v12  ;;  %10020 = vmatmul.msk.f32.vlgmr.msrb.gmra.mxu0 %vm387_vm1, %v4256_v5 }
 0x328   : > { %v4156_v5 = vsel %vm1309_vm8, %v3194_v32, %v18671_v3  ;;  %v14053_v32 = vadd.f32 %v13876_v51, %v13900_v37 }
 0x329   : > { %v3262_v46 = vpop.f32.mrf.mxu2 }
 0x32a   : > { %v13966_v26 = vadd.f32 %v3262_v46, %v13794_v16  ;;  %v3360_v6 = vpop.f32.mrf.mxu3  ;;  %v4051_v16 = vsel %vm1202_vm7, %v3086_v40, %v18675_v54  ;;  %v10030_v40 = vld [vmem:[%s18568_s4 + $0x910] sm:$0xff]  ;;  %v10051_v46 = vld [vmem:[%s18568_s4 + $0x978] sm:$0xff] }
 0x32b   : > { %v13970_v55 = vadd.f32 %v3360_v6, %v3180_v19  ;;  %v3159_v57 = vpop.f32.mrf.mxu1  ;;  %4433 = vmatpush.msra.mxu1 %v10030_v40  ;;  %v4254_v19 = vsel %vm618_vm4, %v18848_v4, %v4243_v49  ;;  %4534 = vmatpush.msra.mxu2 %v10051_v46  ;;  %v10049_v49 = vld [vmem:[%s18568_s4 + $0x968] sm:$0xff]  ;;  %v14125_v46 = vadd.f32 %v13906_v22, %v13929_v30  ;;  %v10047_v22 = vld [vmem:[%s18568_s4 + $0x958] sm:$0xff] }
 0x32c   : > { %v13972_v15 = vpop.f32.mrf.mxu0  ;;  %v3181_v27 = vadd.f32 %v3159_v57, %v13691_v24  ;;  %v3929_v57 = vrot.slane %v13721_v2, 1  ;;  %v10050_v2 = vld [vmem:[%s18568_s4 + $0x970] sm:$0xff]  ;;  %v10081_v4 = vld [vmem:[%s18568_s4 + $0x9e8] sm:$0xff]  ;;  %v10063_v30 = vld [vmem:[%s18568_s4 + $0x998] sm:$0xff] }
 0x32d   : > { %4535 = vmatpush.msra.mxu2 %v10050_v2 }
 0x32e   : > { %9973 = vmatmul.msk.f32.gmra.mxu1 %vm387_vm1, %v3945_v38  ;;  %9989 = vmatmul.msk.f32.gmra.mxu2 %vm387_vm1, %v4051_v16  ;;  %v14060_v38 = vld [vmem:[#allocation2 + $0xa0] sm:$0xff] }
 0x32f   : > { %10005 = vmatmul.msk.f32.gmra.mxu3 %vm387_vm1, %v4157_v50  ;;  %10021 = vmatmul.msk.f32.gmra.mxu0 %vm387_vm1, %v4255_v34  ;;  %v18670_v16 = vrot.slane %v14060_v38, 1  ;;  %v18669_v50 = vrot.slane %v14060_v38, 2  ;;  %v18668_v58 = vrot.slane %v14060_v38, 3  ;;  %v4244_v34 = vrot.slane %v14060_v38, 4 }
 0x330   : > { %4536 = vmatpush.msra.mxu2 %v10049_v49 }
 0x331   : > { %v3265_v7 = vpop.f32.mrf.mxu2  ;;  %v3943_v53 = vsel %vm1095_vm6, %v3929_v57, %v18670_v16  ;;  %v14132_v57 = vld [vmem:[#allocation2 + $0xb8] sm:$0xff] }
 0x332   : > { %v14011_v1 = vadd.f32 %v3265_v7, %v13867_v61  ;;  %v3363_v33 = vpop.f32.mrf.mxu3  ;;  %v4050_v61 = vsel %vm1202_vm7, %v3088_v47, %v18672_v62  ;;  %v10029_v47 = vld [vmem:[%s18568_s4 + $0x908] sm:$0xff]  ;;  %v4245_v2 = vrot.slane %v14132_v57, 4 }
 0x333   : > { %v14015_v42 = vadd.f32 %v3363_v33, %v3181_v27  ;;  %v3162_v24 = vpop.f32.mrf.mxu1  ;;  %4434 = vmatpush.msra.mxu1 %v10029_v47  ;;  %v10066_v27 = vld [vmem:[%s18568_s4 + $0x9b0] sm:$0xff]  ;;  %v4049_v33 = vsel %vm1202_vm7, %v3090_v35, %v18669_v50  ;;  %v10028_v47 = vld [vmem:[%s18568_s4 + $0x900] sm:$0xff]  ;;  %v10113_v50 = vld [vmem:[%s18568_s4 + $0xa68] sm:$0xff] }
 0x334   : > { %v14017_v12 = vpop.f32.mrf.mxu0  ;;  %v3182_v6 = vadd.f32 %v3162_v24, %v13727_v28  ;;  %4641 = vmatpush.msra.mxu3 %v10066_v27  ;;  %v10065_v24 = vld [vmem:[%s18568_s4 + $0x9a8] sm:$0xff]  ;;  %v10079_v27 = vld [vmem:[%s18568_s4 + $0x9d8] sm:$0xff] }
 0x335   : > { %4435 = vmatpush.msra.mxu1 %v10028_v47  ;;  %v14197_v47 = vadd.f32 %v13939_v59, %v13966_v26  ;;  %v10044_v26 = vld [vmem:[%s18568_s4 + $0x940] sm:$0xff]  ;;  %v14540_v62 = vld [vmem:[#allocation2 + $0xc8] sm:$0xff] }
 0x336   : > { %9974 = vmatmul.msk.f32.gmra.mxu1 %vm387_vm1, %v3944_v21  ;;  %9990 = vmatmul.msk.f32.gmra.mxu2 %vm387_vm1, %v4050_v61  ;;  %v18849_v21 = vrot.slane %v12758_v36, 3  ;;  %v18850_v61 = vld [vmem:[#allocation10_spill] sm:$0xff]  ;;  %v10064_v36 = vld [vmem:[%s18568_s4 + $0x9a0] sm:$0xff]  ;;  %v4478_v18 = vrot.slane %v14540_v62, 5  ;;  %v4690_v54 = vrot.slane %v14540_v62, 7 }
 0x337   : > { %10006 = vmatmul.msk.f32.gmra.mxu3 %vm387_vm1, %v4156_v5  ;;  %10022 = vmatmul.msk.f32.gmra.mxu0 %vm387_vm1, %v4254_v19  ;;  %v4253_v5 = vsel %vm618_vm4, %v18850_v61, %v4244_v34  ;;  %v10048_v19 = vld [vmem:[%s18568_s4 + $0x960] sm:$0xff]  ;;  %v18666_v34 = vrot.slane %v14132_v57, 2  ;;  %v18852_v61 = vld [vmem:[#allocation12_spill] sm:$0xff] }
 0x338   : > { %v4155_v35 = vsel %vm1309_vm8, %v18849_v21, %v18668_v58  ;;  %4642 = vmatpush.msra.mxu3 %v10065_v24  ;;  %4537 = vmatpush.msra.mxu2 %v10048_v19  ;;  %v10046_v24 = vld [vmem:[%s18568_s4 + $0x950] sm:$0xff]  ;;  %v10045_v19 = vld [vmem:[%s18568_s4 + $0x948] sm:$0xff] }
 0x339   : > { %v3268_v25 = vpop.f32.mrf.mxu2  ;;  %v4048_v49 = vsel %vm1202_vm7, %v3092_v45, %v18666_v34  ;;  %v10062_v21 = vld [vmem:[%s18568_s4 + $0x990] sm:$0xff] }
 0x33a   : > { %v14065_v51 = vadd.f32 %v3268_v25, %v13892_v14  ;;  %v3366_v37 = vpop.f32.mrf.mxu3  ;;  %v10082_v14 = vld [vmem:[%s18568_s4 + $0x9f0] sm:$0xff]  ;;  %v3931_v25 = vrot.slane %v13775_v31, 1  ;;  %4643 = vmatpush.msra.mxu3 %v10064_v36  ;;  %4538 = vmatpush.msra.mxu2 %v10047_v22  ;;  %v10099_v36 = vld [vmem:[%s18568_s4 + $0xa38] sm:$0xff] }
 0x33b   : > { %v14069_v28 = vadd.f32 %v3366_v37, %v3182_v6  ;;  %v3165_v40 = vpop.f32.mrf.mxu1  ;;  %4747 = vmatpush.msra.mxu0 %v10082_v14  ;;  %v18667_v37 = vrot.slane %v14132_v57, 1  ;;  %v14204_v22 = vld [vmem:[#allocation2 + $0xd0] sm:$0xff]  ;;  %4828 = vmatpush.msrb.mxu1 %v10099_v36  ;;  %v14253_v36 = vadd.f32 %v13972_v15, %v14011_v1 }
 0x33c   : > { %v14080_v7 = vpop.f32.mrf.mxu0  ;;  %v3183_v17 = vadd.f32 %v3165_v40, %v13790_v10  ;;  %v18665_v40 = vrot.slane %v14132_v57, 3  ;;  %4644 = vmatpush.msra.mxu3 %v10063_v30  ;;  %4539 = vmatpush.msra.mxu2 %v10046_v24  ;;  %v18664_v30 = vrot.slane %v14204_v22, 1  ;;  %v18663_v59 = vrot.slane %v14204_v22, 2  ;;  %v10076_v24 = vld [vmem:[%s18568_s4 + $0x9c0] sm:$0xff] }
 0x33d   : > { %4748 = vmatpush.msra.mxu0 %v10081_v4  ;;  %v10078_v4 = vld [vmem:[%s18568_s4 + $0x9d0] sm:$0xff] }
 0x33e   : > { %9975 = vmatmul.msk.f32.gmra.mxu1 %vm387_vm1, %v3943_v53  ;;  %9991 = vmatmul.msk.f32.gmra.mxu2 %vm387_vm1, %v4049_v33 }
 0x33f   : > { %10007 = vmatmul.msk.f32.gmra.mxu3 %vm387_vm1, %v4155_v35  ;;  %10023 = vmatmul.msk.f32.gmra.mxu0 %vm387_vm1, %v4253_v5  ;;  %v18851_v35 = vrot.slane %v12820_v41, 3  ;;  %v4252_v5 = vsel %vm618_vm4, %v18852_v61, %v4245_v2  ;;  %v10061_v41 = vld [vmem:[%s18568_s4 + $0x988] sm:$0xff]  ;;  %v10060_v2 = vld [vmem:[%s18568_s4 + $0x980] sm:$0xff] }
 0x340   : > { %4749 = vmatpush.msra.mxu0 %v10080_v43  ;;  %v3933_v43 = vrot.slane %v13495_v13, 1  ;;  %4645 = vmatpush.msra.mxu3 %v10062_v21 }
 0x341   : > { %v3271_v6 = vpop.f32.mrf.mxu2  ;;  %v4154_v45 = vsel %vm1309_vm8, %v18851_v35, %v18665_v40  ;;  %4540 = vmatpush.msra.mxu2 %v10045_v19 }
 0x342   : > { %v14143_v10 = vadd.f32 %v3271_v6, %v13925_v11  ;;  %v3369_v31 = vpop.f32.mrf.mxu3  ;;  %v3942_v11 = vsel %vm1095_vm6, %v3931_v25, %v18667_v37  ;;  %4750 = vmatpush.msra.mxu0 %v10079_v27  ;;  %4646 = vmatpush.msra.mxu3 %v10061_v41  ;;  %v10098_v41 = vld [vmem:[%s18568_s4 + $0xa30] sm:$0xff] }
 0x343   : > { %v14150_v14 = vadd.f32 %v3369_v31, %v3183_v17  ;;  %v3168_v53 = vpop.f32.mrf.mxu1  ;;  %v10077_v17 = vld [vmem:[%s18568_s4 + $0x9c8] sm:$0xff]  ;;  %v4039_v31 = vrot.slane %v13495_v13, 2  ;;  %4541 = vmatpush.msra.mxu2 %v10044_v26  ;;  %4829 = vmatpush.msrb.mxu1 %v10098_v41  ;;  %v14297_v41 = vadd.f32 %v14017_v12, %v14065_v51  ;;  %v4149_v12 = vrot.slane %v13587_v52, 3 }
 0x344   : > { %v14152_v33 = vpop.f32.mrf.mxu0  ;;  %v3184_v6 = vadd.f32 %v3168_v53, %v13847_v9  ;;  %4751 = vmatpush.msra.mxu0 %v10078_v4  ;;  %v4145_v53 = vrot.slane %v13495_v13, 3  ;;  %4647 = vmatpush.msra.mxu3 %v10060_v2  ;;  %v18853_v4 = vrot.slane %v13495_v13, 4  ;;  %v10854_v13 = vld [vmem:[#allocation2 + $0xe0] sm:$0xff] }
 0x345   : > { %v4047_v61 = vsel %vm1202_vm7, %v4039_v31, %v18663_v59 }
 0x346   : > { %9976 = vmatmul.msk.f32.gmra.mxu1 %vm387_vm1, %v3942_v11  ;;  %9992 = vmatmul.msk.f32.gmra.mxu2 %vm387_vm1, %v4048_v49  ;;  %v18662_v11 = vrot.slane %v14204_v22, 3  ;;  %v4246_v49 = vrot.slane %v14204_v22, 4 }
 0x347   : > { %10008 = vmatmul.msk.f32.gmra.mxu3 %vm387_vm1, %v4154_v45  ;;  %10024 = vmatmul.msk.f32.gmra.mxu0 %vm387_vm1, %v4252_v5 }
 0x348   : > { %4752 = vmatpush.msra.mxu0 %v10077_v17  ;;  %v4153_v5 = vsel %vm1309_vm8, %v4145_v53, %v18662_v11  ;;  %v4251_v19 = vsel %vm618_vm4, %v18853_v4, %v4246_v49 }
 0x349   : > { %v3274_v25 = vpop.f32.mrf.mxu2 }
 0x34a   : > { %v14216_v9 = vadd.f32 %v3274_v25, %v13957_v56  ;;  %v3372_v27 = vpop.f32.mrf.mxu3  ;;  %v3941_v56 = vsel %vm1095_vm6, %v3933_v43, %v18664_v30  ;;  %4753 = vmatpush.msra.mxu0 %v10076_v24  ;;  %v14256_v25 = vld [vmem:[#allocation2 + $0xe8] sm:$0xff]  ;;  %v14471_v30 = vld [vmem:[#allocation2 + $0xb0] sm:$0xff] }
 0x34b   : > { %v14224_v21 = vadd.f32 %v3372_v27, %v3184_v6  ;;  %v3171_v35 = vpop.f32.mrf.mxu1  ;;  %v3935_v6 = vrot.slane %v10854_v13, 1  ;;  %v18661_v31 = vrot.slane %v14256_v25, 1  ;;  %v18660_v26 = vrot.slane %v14256_v25, 2  ;;  %v14301_v13 = vld [vmem:[#allocation2 + $0x100] sm:$0xff] }
 0x34c   : > { %v14226_v45 = vpop.f32.mrf.mxu0  ;;  %v3185_v43 = vadd.f32 %v3171_v35, %v13874_v23  ;;  %v18659_v53 = vrot.slane %v14256_v25, 3  ;;  %v4247_v15 = vrot.slane %v14256_v25, 4  ;;  %v18656_v51 = vrot.slane %v14301_v13, 3 }
 0x34d   : > { %v3940_v24 = vsel %vm1095_vm6, %v3935_v6, %v18661_v31  ;;  %v18658_v6 = vrot.slane %v14301_v13, 1  ;;  %v4476_v40 = vrot.slane %v14471_v30, 5  ;;  %v4688_v37 = vrot.slane %v14471_v30, 7 }
 0x34e   : > { %9977 = vmatmul.msk.f32.gmra.mxu1 %vm387_vm1, %v3941_v56  ;;  %9993 = vmatmul.msk.f32.gmra.mxu2 %vm387_vm1, %v4047_v61  ;;  %v18855_v56 = vrot.slane %v13258_v44, 3 }
 0x34f   : > { %10009 = vmatmul.msk.f32.gmra.mxu3 %vm387_vm1, %v4153_v5  ;;  %10025 = vmatmul.msk.f32.gmra.mxu0 %vm387_vm1, %v4251_v19  ;;  %v18856_v5 = vld [vmem:[#allocation4_spill] sm:$0xff] }
 0x350   : > { %v4152_v61 = vsel %vm1309_vm8, %v18855_v56, %v18659_v53  ;;  %v4250_v4 = vsel %vm618_vm4, %v18856_v5, %v4247_v15  ;;  %v10097_v19 = vld [vmem:[%s18568_s4 + $0xa28] sm:$0xff]  ;;  %v18657_v15 = vrot.slane %v14301_v13, 2  ;;  %v4339_v5 = vld [vmem:[#allocation2 + $0x60] sm:$0xff] }
 0x351   : > { %v3277_v17 = vpop.f32.mrf.mxu2  ;;  %4830 = vmatpush.msrb.mxu1 %v10097_v19  ;;  %v18857_v19 = vrot.slane %v13587_v52, 4 }
 0x352   : > { %v14261_v2 = vadd.f32 %v3277_v17, %v14002_v60  ;;  %v3375_v27 = vpop.f32.mrf.mxu3  ;;  %v18854_v60 = vrot.slane %v13258_v44, 2  ;;  %v3937_v44 = vrot.slane %v13587_v52, 1 }
 0x353   : > { %v14265_v1 = vadd.f32 %v3375_v27, %v3185_v43  ;;  %v3174_v23 = vpop.f32.mrf.mxu1  ;;  %v4043_v27 = vrot.slane %v13587_v52, 2 }
 0x354   : > { %v14267_v49 = vpop.f32.mrf.mxu0  ;;  %v4046_v35 = vsel %vm1202_vm7, %v18854_v60, %v18660_v26  ;;  %v3186_v43 = vadd.f32 %v3174_v23, %v13904_v20 }
 0x356   : > { %9978 = vmatmul.msk.f32.gmra.mxu1 %vm387_vm1, %v3940_v24  ;;  %9994 = vmatmul.msk.f32.gmra.mxu2 %vm387_vm1, %v4046_v35  ;;  %v4248_v35 = vrot.slane %v14301_v13, 4 }
 0x357   : > { %10010 = vmatmul.msk.f32.gmra.mxu3 %vm387_vm1, %v4152_v61  ;;  %10026 = vmatmul.msk.f32.gmra.mxu0 %vm387_vm1, %v4250_v4  ;;  %v3939_v61 = vsel %vm1095_vm6, %v3937_v44, %v18658_v6  ;;  %v4151_v4 = vsel %vm1309_vm8, %v4149_v12, %v18656_v51  ;;  %v4469_v12 = vrot.slane %v4339_v5, 5  ;;  %v4681_v51 = vrot.slane %v4339_v5, 7 }
 0x358   : > { %v4249_v44 = vsel %vm618_vm4, %v18857_v19, %v4248_v35 }
 0x359   : > { %v3280_v17 = vpop.f32.mrf.mxu2 }
 0x35a   : > { %v14307_v24 = vadd.f32 %v3280_v17, %v14053_v32  ;;  %v3378_v60 = vpop.f32.mrf.mxu3  ;;  %v4045_v32 = vsel %vm1202_vm7, %v4043_v27, %v18657_v15  ;;  %v14341_v17 = vadd.f32 %v14080_v7, %v14143_v10  ;;  %v4363_v27 = vrot.slane %v4339_v5, 4 }
 0x35b   : > { %v14312_v20 = vadd.f32 %v3378_v60, %v3186_v43  ;;  %v3177_v23 = vpop.f32.mrf.mxu1  ;;  %v10096_v43 = vld [vmem:[%s18568_s4 + $0xa20] sm:$0xff] }
 0x35c   : > { %v14314_v56 = vpop.f32.mrf.mxu0  ;;  %4831 = vmatpush.msrb.mxu1 %v10096_v43  ;;  %v3187_v60 = vadd.f32 %v3177_v23, %v13931_v8  ;;  %v18858_v23 = vld [vmem:[#allocation17_spill] sm:$0xff] }
 0x35d   : > { %v18859_v15 = vrot.slane %v18858_v23, 4 }
 0x35e   : > { %9979 = vmatmul.msk.f32.gmra.mxu1 %vm387_vm1, %v3939_v61  ;;  %9995 = vmatmul.msk.f32.gmra.mxu2 %vm387_vm1, %v4045_v32  ;;  %v14344_v61 = vld [vmem:[#allocation2 + $0x68] sm:$0xff]  ;;  %v4575_v32 = vrot.slane %v4339_v5, 6 }
 0x35f   : > { %10011 = vmatmul.msk.f32.gmra.mxu3 %vm387_vm1, %v4151_v4  ;;  %10027 = vmatmul.msk.f32.gmra.mxu0 %vm387_vm1, %v4249_v44  ;;  %v4470_v35 = vrot.slane %v14344_v61, 5  ;;  %v4576_v44 = vrot.slane %v14344_v61, 6  ;;  %v4682_v7 = vrot.slane %v14344_v61, 7  ;;  %v4386_v6 = vsel %vm618_vm4, %v4363_v27, %v18859_v15  ;;  %v10095_v15 = vld [vmem:[%s18568_s4 + $0xa18] sm:$0xff] }
 0x360   : > { %v14375_v27 = vadd.f32 %v14152_v33, %v14216_v9  ;;  %4832 = vmatpush.msrb.mxu1 %v10095_v15 }
 0x361   : > { %v3283_v52 = vpop.f32.mrf.mxu2  ;;  %v4598_v5 = vsel %vm685_vm2, %v4575_v32, %v4576_v44 }
 0x362   : > { %v14348_v4 = vadd.f32 %v3283_v52, %v14125_v46  ;;  %v3381_v19 = vpop.f32.mrf.mxu3  ;;  %v4492_v46 = vsel %vm651_vm3, %v4469_v12, %v4470_v35  ;;  %v4342_v52 = vld [vmem:[#allocation2 + $0x78] sm:$0xff] }
 0x363   : > { %v14352_v10 = vadd.f32 %v3381_v19, %v3187_v60  ;;  %v3597_v43 = vpop.f32.mrf.mxu1  ;;  %v4704_v60 = vsel %vm849_vm5, %v4681_v51, %v4682_v7  ;;  %v4471_v32 = vrot.slane %v4342_v52, 5  ;;  %v14378_v19 = vld [vmem:[#allocation2 + $0x80] sm:$0xff]  ;;  %v4577_v44 = vrot.slane %v4342_v52, 6 }
 0x364   : > { %v14354_v8 = vpop.f32.mrf.mxu0  ;;  %v3621_v12 = vadd.f32 %v3597_v43, %v13970_v55  ;;  %v4472_v51 = vrot.slane %v14378_v19, 5  ;;  %v4684_v33 = vrot.slane %v14378_v19, 7  ;;  %v18860_v43 = vld [vmem:[#allocation18_spill] sm:$0xff] }
 0x366   : > { %10036 = vmatmul.msk.f32.vlgmr.msra.gmra.mxu1 %vm387_vm1, %v4386_v6  ;;  %10052 = vmatmul.msk.f32.vlgmr.msra.gmra.mxu2 %vm387_vm1, %v4492_v46  ;;  %v4365_v6 = vrot.slane %v4342_v52, 4  ;;  %v4578_v46 = vrot.slane %v14378_v19, 6 }
 0x367   : > { %10068 = vmatmul.msk.f32.vlgmr.msra.gmra.mxu3 %vm387_vm1, %v4598_v5  ;;  %10084 = vmatmul.msk.f32.vlgmr.msra.gmra.mxu0 %vm387_vm1, %v4704_v60  ;;  %v4683_v5 = vrot.slane %v4342_v52, 7 }
 0x368   : > { %v14393_v15 = vsel %vm618_vm4, %v4365_v6, %v18860_v43  ;;  %v14405_v52 = vsel %vm685_vm2, %v4577_v44, %v4578_v46  ;;  %v10094_v6 = vld [vmem:[%s18568_s4 + $0xa10] sm:$0xff] }
 0x369   : > { %v3703_v35 = vpop.f32.mrf.mxu2  ;;  %4833 = vmatpush.msrb.mxu1 %v10094_v6 }
 0x36a   : > { %v14382_v7 = vadd.f32 %v3703_v35, %v14197_v47  ;;  %v3809_v23 = vpop.f32.mrf.mxu3  ;;  %v14397_v47 = vsel %vm651_vm3, %v4471_v32, %v4472_v51  ;;  %v4345_v35 = vld [vmem:[#allocation2 + $0x90] sm:$0xff]  ;;  %v14417_v32 = vadd.f32 %v14226_v45, %v14261_v2 }
 0x36b   : > { %v14386_v9 = vadd.f32 %v3809_v23, %v3621_v12  ;;  %v3600_v60 = vpop.f32.mrf.mxu1  ;;  %v4703_v12 = vsel %vm849_vm5, %v4683_v5, %v4684_v33  ;;  %v4367_v51 = vrot.slane %v4345_v35, 4  ;;  %v4473_v46 = vrot.slane %v4345_v35, 5  ;;  %v14420_v5 = vld [vmem:[#allocation2 + $0x98] sm:$0xff] }
 0x36c   : > { %v14388_v55 = vpop.f32.mrf.mxu0  ;;  %v3622_v44 = vadd.f32 %v3600_v60, %v14015_v42  ;;  %v4474_v33 = vrot.slane %v14420_v5, 5  ;;  %v4579_v53 = vrot.slane %v4345_v35, 6  ;;  %v4580_v31 = vrot.slane %v14420_v5, 6  ;;  %v18861_v60 = vld [vmem:[#allocation19_spill] sm:$0xff] }
 0x36d   : > { %v4685_v11 = vrot.slane %v4345_v35, 7  ;;  %v4686_v45 = vrot.slane %v14420_v5, 7  ;;  %v14435_v59 = vsel %vm618_vm4, %v4367_v51, %v18861_v60  ;;  %v10093_v51 = vld [vmem:[%s18568_s4 + $0xa08] sm:$0xff] }
 0x36e   : > { %10037 = vmatmul.msk.f32.gmra.mxu1 %vm387_vm1, %v14393_v15  ;;  %10053 = vmatmul.msk.f32.gmra.mxu2 %vm387_vm1, %v14397_v47 }
 0x36f   : > { %10069 = vmatmul.msk.f32.gmra.mxu3 %vm387_vm1, %v14405_v52  ;;  %10085 = vmatmul.msk.f32.gmra.mxu0 %vm387_vm1, %v4703_v12  ;;  %v4702_v35 = vsel %vm849_vm5, %v4685_v11, %v4686_v45  ;;  %v14465_v11 = vadd.f32 %v14267_v49, %v14307_v24 }
 0x370   : > { %4834 = vmatpush.msrb.mxu1 %v10093_v51  ;;  %v4582_v51 = vrot.slane %v14471_v30, 6 }
 0x371   : > { %v3706_v23 = vpop.f32.mrf.mxu2 }
 0x372   : > { %v14424_v12 = vadd.f32 %v3706_v23, %v14253_v36  ;;  %v3812_v26 = vpop.f32.mrf.mxu3  ;;  %v14439_v36 = vsel %vm651_vm3, %v4473_v46, %v4474_v33  ;;  %v4348_v23 = vld [vmem:[#allocation2 + $0xa8] sm:$0xff]  ;;  %v10147_v46 = vld [vmem:[%s18568_s4 + $0xaf8] sm:$0xff] }
 0x373   : > { %v14428_v2 = vadd.f32 %v3812_v26, %v3622_v44  ;;  %v3603_v6 = vpop.f32.mrf.mxu1  ;;  %v14447_v26 = vsel %vm685_vm2, %v4579_v53, %v4580_v31  ;;  %v10115_v44 = vld [vmem:[%s18568_s4 + $0xa78] sm:$0xff]  ;;  %v4369_v53 = vrot.slane %v4348_v23, 4  ;;  %v4581_v34 = vrot.slane %v4348_v23, 6  ;;  %5146 = vmatpush.msrb.mxu0 %v10147_v46 }
 0x374   : > { %v14430_v42 = vpop.f32.mrf.mxu0  ;;  %v10131_v31 = vld [vmem:[%s18568_s4 + $0xab8] sm:$0xff]  ;;  %4934 = vmatpush.msrb.mxu2 %v10115_v44  ;;  %v3623_v33 = vadd.f32 %v3603_v6, %v14069_v28  ;;  %v4687_v44 = vrot.slane %v4348_v23, 7  ;;  %v10114_v6 = vld [vmem:[%s18568_s4 + $0xa70] sm:$0xff] }
 0x375   : > { %5040 = vmatpush.msrb.mxu3 %v10131_v31  ;;  %v10130_v31 = vld [vmem:[%s18568_s4 + $0xab0] sm:$0xff] }
 0x376   : > { %10038 = vmatmul.msk.f32.gmra.mxu1 %vm387_vm1, %v14435_v59  ;;  %10054 = vmatmul.msk.f32.gmra.mxu2 %vm387_vm1, %v14439_v36 }
 0x377   : > { %10070 = vmatmul.msk.f32.gmra.mxu3 %vm387_vm1, %v14447_v26  ;;  %10086 = vmatmul.msk.f32.gmra.mxu0 %vm387_vm1, %v4702_v35  ;;  %v4475_v35 = vrot.slane %v4348_v23, 5  ;;  %v18862_v23 = vld [vmem:[#allocation20_spill] sm:$0xff] }
 0x378   : > { %4935 = vmatpush.msrb.mxu2 %v10114_v6  ;;  %5041 = vmatpush.msrb.mxu3 %v10130_v31  ;;  %v10129_v6 = vld [vmem:[%s18568_s4 + $0xaa8] sm:$0xff]  ;;  %v10112_v31 = vld [vmem:[%s18568_s4 + $0xa60] sm:$0xff] }
 0x379   : > { %v3709_v45 = vpop.f32.mrf.mxu2 }
 0x37a   : > { %v14475_v49 = vadd.f32 %v3709_v45, %v14297_v41  ;;  %v3815_v24 = vpop.f32.mrf.mxu3  ;;  %v10146_v41 = vld [vmem:[%s18568_s4 + $0xaf0] sm:$0xff]  ;;  %v14499_v45 = vsel %vm651_vm3, %v4475_v35, %v4476_v40  ;;  %v14513_v40 = vsel %vm685_vm2, %v4581_v34, %v4582_v51  ;;  %v10145_v35 = vld [vmem:[%s18568_s4 + $0xae8] sm:$0xff]  ;;  %v10128_v34 = vld [vmem:[%s18568_s4 + $0xaa0] sm:$0xff]  ;;  %v14534_v51 = vadd.f32 %v14314_v56, %v14348_v4  ;;  %4936 = vmatpush.msrb.mxu2 %v10113_v50 }
 0x37b   : > { %v14479_v58 = vadd.f32 %v3815_v24, %v3623_v33  ;;  %v3606_v28 = vpop.f32.mrf.mxu1  ;;  %v14495_v33 = vsel %vm618_vm4, %v4369_v53, %v18862_v23  ;;  %v4351_v24 = vld [vmem:[#allocation2 + $0xc0] sm:$0xff]  ;;  %5147 = vmatpush.msrb.mxu0 %v10146_v41  ;;  %v4701_v53 = vsel %vm849_vm5, %v4687_v44, %v4688_v37  ;;  %5042 = vmatpush.msrb.mxu3 %v10129_v6  ;;  %v10111_v50 = vld [vmem:[%s18568_s4 + $0xa58] sm:$0xff] }
 0x37c   : > { %v14490_v46 = vpop.f32.mrf.mxu0  ;;  %v10092_v37 = vld [vmem:[%s18568_s4 + $0xa00] sm:$0xff]  ;;  %v4371_v44 = vrot.slane %v4351_v24, 4  ;;  %v4477_v3 = vrot.slane %v4351_v24, 5  ;;  %v4583_v0 = vrot.slane %v4351_v24, 6  ;;  %v10127_v56 = vld [vmem:[%s18568_s4 + $0xa98] sm:$0xff]  ;;  %v4689_v6 = vrot.slane %v4351_v24, 7  ;;  %4937 = vmatpush.msrb.mxu2 %v10112_v31 }
 0x37d   : > { %v10144_v41 = vld [vmem:[%s18568_s4 + $0xae0] sm:$0xff]  ;;  %5148 = vmatpush.msrb.mxu0 %v10145_v35  ;;  %4835 = vmatpush.msrb.mxu1 %v10092_v37  ;;  %v10143_v35 = vld [vmem:[%s18568_s4 + $0xad8] sm:$0xff] }
 0x37e   : > { %10039 = vmatmul.msk.f32.gmra.mxu1 %vm387_vm1, %v14495_v33  ;;  %10055 = vmatmul.msk.f32.gmra.mxu2 %vm387_vm1, %v14499_v45  ;;  %v14568_v24 = vsel %vm651_vm3, %v4477_v3, %v4478_v18  ;;  %v4354_v31 = vld [vmem:[#allocation2 + $0xd8] sm:$0xff]  ;;  %v4700_v3 = vsel %vm849_vm5, %v4689_v6, %v4690_v54 }
 0x37f   : > { %10071 = vmatmul.msk.f32.gmra.mxu3 %vm387_vm1, %v14513_v40  ;;  %10087 = vmatmul.msk.f32.gmra.mxu0 %vm387_vm1, %v4701_v53  ;;  %v3624_v53 = vadd.f32 %v3606_v28, %v14150_v14  ;;  %v4584_v28 = vrot.slane %v14540_v62, 6  ;;  %18864 = vst [vmem:[#allocation11_spill] sm:$0xff] %v14568_v24  ;;  %v10163_v54 = vld [vmem:[%s18568_s4 + $0xb38] sm:$0xff]  ;;  %v4585_v60 = vrot.slane %v4354_v31, 6 }
 0x380   : > { %5043 = vmatpush.msrb.mxu3 %v10128_v34  ;;  %5149 = vmatpush.msrb.mxu0 %v10144_v41  ;;  %v10110_v34 = vld [vmem:[%s18568_s4 + $0xa50] sm:$0xff] }
 0x381   : > { %v3712_v16 = vpop.f32.mrf.mxu2  ;;  %4938 = vmatpush.msrb.mxu2 %v10111_v50  ;;  %v10126_v41 = vld [vmem:[%s18568_s4 + $0xa90] sm:$0xff]  ;;  %v14582_v18 = vsel %vm685_vm2, %v4583_v0, %v4584_v28  ;;  %v10125_v0 = vld [vmem:[%s18568_s4 + $0xa88] sm:$0xff]  ;;  %v14603_v50 = vadd.f32 %v14354_v8, %v14382_v7  ;;  %v10108_v8 = vld [vmem:[%s18568_s4 + $0xa40] sm:$0xff]  ;;  %5244 = vmatpush.msra.mxu1 %v10163_v54 }
 0x382   : > { %v14550_v4 = vadd.f32 %v3712_v16, %v14341_v17  ;;  %v3818_v14 = vpop.f32.mrf.mxu3  ;;  %5044 = vmatpush.msrb.mxu3 %v10127_v56  ;;  %v18863_v16 = vld [vmem:[#allocation9_spill] sm:$0xff]  ;;  %5150 = vmatpush.msrb.mxu0 %v10143_v35  ;;  %18865 = vst [vmem:[#allocation13_spill] sm:$0xff] %v14582_v18  ;;  %v4373_v56 = vrot.slane %v4354_v31, 4  ;;  %v4479_v35 = vrot.slane %v4354_v31, 5  ;;  %v10124_v7 = vld [vmem:[%s18568_s4 + $0xa80] sm:$0xff] }
 0x383   : > { %v14557_v37 = vadd.f32 %v3818_v14, %v3624_v53  ;;  %v3609_v63 = vpop.f32.mrf.mxu1  ;;  %v14564_v17 = vsel %vm618_vm4, %v4371_v44, %v18863_v16  ;;  %v10142_v44 = vld [vmem:[%s18568_s4 + $0xad0] sm:$0xff]  ;;  %v10109_v53 = vld [vmem:[%s18568_s4 + $0xa48] sm:$0xff]  ;;  %4939 = vmatpush.msrb.mxu2 %v10110_v34 }
 0x384   : > { %v14559_v23 = vpop.f32.mrf.mxu0  ;;  %5045 = vmatpush.msrb.mxu3 %v10126_v41  ;;  %v10141_v14 = vld [vmem:[%s18568_s4 + $0xac8] sm:$0xff]  ;;  %v3625_v28 = vadd.f32 %v3609_v63, %v14224_v21  ;;  %5151 = vmatpush.msrb.mxu0 %v10142_v44  ;;  %v4691_v41 = vrot.slane %v4354_v31, 7  ;;  %v10140_v44 = vld [vmem:[%s18568_s4 + $0xac0] sm:$0xff] }
 0x385   : > { %4940 = vmatpush.msrb.mxu2 %v10109_v53 }
 0x386   : > { %10040 = vmatmul.msk.f32.gmra.mxu1 %vm387_vm1, %v14564_v17  ;;  %10056 = vmatmul.msk.f32.gmra.mxu2 %vm387_vm1, %v14568_v24 }
 0x387   : > { %10072 = vmatmul.msk.f32.gmra.mxu3 %vm387_vm1, %v14582_v18  ;;  %10088 = vmatmul.msk.f32.gmra.mxu0 %vm387_vm1, %v4700_v3  ;;  %v14609_v3 = vld [vmem:[#allocation2 + $0xe0] sm:$0xff] }
 0x388   : > { %v4480_v16 = vrot.slane %v14609_v3, 5  ;;  %v4586_v21 = vrot.slane %v14609_v3, 6  ;;  %v4692_v43 = vrot.slane %v14609_v3, 7  ;;  %5046 = vmatpush.msrb.mxu3 %v10125_v0  ;;  %5152 = vmatpush.msrb.mxu0 %v10141_v14  ;;  %v4357_v0 = vld [vmem:[#allocation2 + $0xf0] sm:$0xff] }
 0x389   : > { %v3715_v6 = vpop.f32.mrf.mxu2  ;;  %4941 = vmatpush.msrb.mxu2 %v10108_v8  ;;  %v4481_v8 = vrot.slane %v4357_v0, 5 }
 0x38a   : > { %v14619_v34 = vadd.f32 %v3715_v6, %v14375_v27  ;;  %v3821_v63 = vpop.f32.mrf.mxu3  ;;  %5047 = vmatpush.msrb.mxu3 %v10124_v7  ;;  %v18866_v27 = vld [vmem:[#allocation16_spill] sm:$0xff]  ;;  %v14637_v53 = vsel %vm651_vm3, %v4479_v35, %v4480_v16  ;;  %5153 = vmatpush.msrb.mxu0 %v10140_v44  ;;  %v14645_v14 = vsel %vm685_vm2, %v4585_v60, %v4586_v21  ;;  %v10162_v16 = vld [vmem:[%s18568_s4 + $0xb30] sm:$0xff]  ;;  %v4375_v6 = vrot.slane %v4357_v0, 4 }
 0x38b   : > { %v14626_v18 = vadd.f32 %v3821_v63, %v3625_v28  ;;  %v3612_v24 = vpop.f32.mrf.mxu1  ;;  %v14633_v31 = vsel %vm618_vm4, %v4373_v56, %v18866_v27  ;;  %18867 = vst [vmem:[#allocation14_spill] sm:$0xff] %v14637_v53  ;;  %v4699_v56 = vsel %vm849_vm5, %v4691_v41, %v4692_v43  ;;  %v14657_v28 = vadd.f32 %v14388_v55, %v14424_v12  ;;  %v14660_v43 = vld [vmem:[#allocation2 + $0xf8] sm:$0xff] }
 0x38c   : > { %v14628_v54 = vpop.f32.mrf.mxu0  ;;  %18868 = vst [vmem:[#allocation15_spill] sm:$0xff] %v14645_v14  ;;  %5245 = vmatpush.msra.mxu1 %v10162_v16  ;;  %v3626_v60 = vadd.f32 %v3612_v24, %v14265_v1  ;;  %v4482_v7 = vrot.slane %v14660_v43, 5  ;;  %v4587_v63 = vrot.slane %v4357_v0, 6  ;;  %v4588_v44 = vrot.slane %v14660_v43, 6  ;;  %v18869_v24 = vld [vmem:[#allocation34_spill] sm:$0xff] }
 0x38d   : > { %v4694_v55 = vrot.slane %v14660_v43, 7  ;;  %v14675_v27 = vsel %vm618_vm4, %v4375_v6, %v18869_v24  ;;  %v10161_v6 = vld [vmem:[%s18568_s4 + $0xb28] sm:$0xff] }
 0x38e   : > { %10041 = vmatmul.msk.f32.gmra.mxu1 %vm387_vm1, %v14633_v31  ;;  %10057 = vmatmul.msk.f32.gmra.mxu2 %vm387_vm1, %v14637_v53  ;;  %18870 = vst [vmem:[#allocation7_spill] sm:$0xff] %v14675_v27 }
 0x38f   : > { %10073 = vmatmul.msk.f32.gmra.mxu3 %vm387_vm1, %v14645_v14  ;;  %10089 = vmatmul.msk.f32.gmra.mxu0 %vm387_vm1, %v4699_v56  ;;  %v4693_v56 = vrot.slane %v4357_v0, 7  ;;  %v14687_v0 = vsel %vm685_vm2, %v4587_v63, %v4588_v44 }
 0x390   : > { %18872 = vst [vmem:[#allocation5_spill] sm:$0xff] %v14687_v0  ;;  %5246 = vmatpush.msra.mxu1 %v10161_v6 }
 0x391   : > { %v3718_v35 = vpop.f32.mrf.mxu2 }
 0x392   : > { %v14664_v21 = vadd.f32 %v3718_v35, %v14417_v32  ;;  %v3824_v41 = vpop.f32.mrf.mxu3  ;;  %v14679_v32 = vsel %vm651_vm3, %v4481_v8, %v4482_v7  ;;  %v4360_v35 = vld [vmem:[#allocation2 + $0x108] sm:$0xff]  ;;  %v14699_v8 = vadd.f32 %v14430_v42, %v14475_v49 }
 0x393   : > { %v14668_v12 = vadd.f32 %v3824_v41, %v3626_v60  ;;  %v3615_v16 = vpop.f32.mrf.mxu1  ;;  %18871 = vst [vmem:[#allocation3_spill] sm:$0xff] %v14679_v32  ;;  %v4698_v60 = vsel %vm849_vm5, %v4693_v56, %v4694_v55  ;;  %v4377_v7 = vrot.slane %v4360_v35, 4  ;;  %v4483_v44 = vrot.slane %v4360_v35, 5  ;;  %v14702_v56 = vld [vmem:[#allocation2 + $0x110] sm:$0xff] }
 0x394   : > { %v14670_v1 = vpop.f32.mrf.mxu0  ;;  %v3627_v63 = vadd.f32 %v3615_v16, %v14312_v20  ;;  %v4484_v55 = vrot.slane %v14702_v56, 5  ;;  %v4589_v24 = vrot.slane %v4360_v35, 6  ;;  %v4696_v42 = vrot.slane %v14702_v56, 7  ;;  %v18873_v16 = vld [vmem:[#allocation37_spill] sm:$0xff] }
 0x395   : > { %v18874_v14 = vrot.slane %v18873_v16, 4 }
 0x396   : > { %10042 = vmatmul.msk.f32.gmra.mxu1 %vm387_vm1, %v14675_v27  ;;  %10058 = vmatmul.msk.f32.gmra.mxu2 %vm387_vm1, %v14679_v32  ;;  %v4590_v32 = vrot.slane %v14702_v56, 6  ;;  %v4695_v27 = vrot.slane %v4360_v35, 7 }
 0x397   : > { %10074 = vmatmul.msk.f32.gmra.mxu3 %vm387_vm1, %v14687_v0  ;;  %10090 = vmatmul.msk.f32.gmra.mxu0 %vm387_vm1, %v4698_v60  ;;  %v14718_v53 = vsel %vm618_vm4, %v4377_v7, %v18874_v14  ;;  %v10160_v14 = vld [vmem:[%s18568_s4 + $0xb20] sm:$0xff]  ;;  %v14742_v7 = vadd.f32 %v14490_v46, %v14550_v4  ;;  %v18875_v46 = vrot.slane %v13961_v48, 1 }
 0x398   : > { %v14730_v35 = vsel %vm685_vm2, %v4589_v24, %v4590_v32  ;;  %5247 = vmatpush.msra.mxu1 %v10160_v14 }
 0x399   : > { %v3721_v41 = vpop.f32.mrf.mxu2 }
 0x39a   : > { %v14706_v60 = vadd.f32 %v3721_v41, %v14465_v11  ;;  %v3827_v0 = vpop.f32.mrf.mxu3  ;;  %v14722_v11 = vsel %vm651_vm3, %v4483_v44, %v4484_v55  ;;  %v4975_v44 = vrot.slane %v14344_v61, 2  ;;  %v5081_v55 = vrot.slane %v14344_v61, 3 }
 0x39b   : > { %v14710_v49 = vadd.f32 %v3827_v0, %v3627_v63  ;;  %v3618_v6 = vpop.f32.mrf.mxu1  ;;  %v4697_v0 = vsel %vm849_vm5, %v4695_v27, %v4696_v42  ;;  %v4869_v63 = vrot.slane %v14344_v61, 1 }
 0x39c   : > { %v14712_v20 = vpop.f32.mrf.mxu0  ;;  %v3628_v24 = vadd.f32 %v3618_v6, %v14352_v10  ;;  %v18877_v6 = vrot.slane %v13961_v48, 3 }
 0x39d   : > { %v4892_v10 = vsel %vm1095_vm6, %v4869_v63, %v18875_v46  ;;  %v5083_v46 = vrot.slane %v14378_v19, 3 }
 0x39e   : > { %10043 = vmatmul.msk.f32.gmra.mxu1 %vm387_vm1, %v14718_v53  ;;  %10059 = vmatmul.msk.f32.gmra.mxu2 %vm387_vm1, %v14722_v11  ;;  %v5104_v14 = vsel %vm1309_vm8, %v5081_v55, %v18877_v6  ;;  %v4977_v55 = vrot.slane %v14378_v19, 2 }
 0x39f   : > { %10075 = vmatmul.msk.f32.gmra.mxu3 %vm387_vm1, %v14730_v35  ;;  %10091 = vmatmul.msk.f32.gmra.mxu0 %vm387_vm1, %v4697_v0 }
 0x3a1   : > { %v3724_v32 = vpop.f32.mrf.mxu2 }
 0x3a2   : > { %v14747_v27 = vadd.f32 %v3724_v32, %v14534_v51  ;;  %v3830_v41 = vpop.f32.mrf.mxu3  ;;  %v18876_v51 = vrot.slane %v13961_v48, 2  ;;  %v4871_v48 = vrot.slane %v14378_v19, 1 }
 0x3a3   : > { %v14751_v42 = vadd.f32 %v3830_v41, %v3628_v24  ;;  %v3997_v16 = vpop.f32.mrf.mxu1  ;;  %v14777_v24 = vadd.f32 %v14559_v23, %v14619_v34  ;;  %v18878_v23 = vrot.slane %v14006_v29, 1 }
 0x3a4   : > { %v14753_v0 = vpop.f32.mrf.mxu0  ;;  %v4998_v4 = vsel %vm1202_vm7, %v4975_v44, %v18876_v51  ;;  %v4021_v32 = vadd.f32 %v3997_v16, %v14386_v9  ;;  %v18880_v16 = vrot.slane %v14006_v29, 3 }
 0x3a5   : > { %v4891_v9 = vsel %vm1095_vm6, %v4871_v48, %v18878_v23  ;;  %v4979_v23 = vrot.slane %v14420_v5, 2 }
 0x3a6   : > { %10100 = vmatmul.msk.f32.vlgmr.msrb.gmra.mxu1 %vm387_vm1, %v14344_v61  ;;  %10116 = vmatmul.msk.f32.vlgmr.msrb.gmra.mxu2 %vm387_vm1, %v4892_v10  ;;  %v10159_v61 = vld [vmem:[%s18568_s4 + $0xb18] sm:$0xff]  ;;  %v5103_v6 = vsel %vm1309_vm8, %v5083_v46, %v18880_v16 }
 0x3a7   : > { %10132 = vmatmul.msk.f32.vlgmr.msrb.gmra.mxu3 %vm387_vm1, %v4998_v4  ;;  %10148 = vmatmul.msk.f32.vlgmr.msrb.gmra.mxu0 %vm387_vm1, %v5104_v14  ;;  %v10158_v14 = vld [vmem:[%s18568_s4 + $0xb10] sm:$0xff] }
 0x3a8   : > { %5248 = vmatpush.msra.mxu1 %v10159_v61  ;;  %v14816_v61 = vadd.f32 %v14628_v54, %v14664_v21  ;;  %v18881_v54 = vrot.slane %v14060_v38, 1 }
 0x3a9   : > { %v4103_v63 = vpop.f32.mrf.mxu2 }
 0x3aa   : > { %v14782_v41 = vadd.f32 %v4103_v63, %v14603_v50  ;;  %v4209_v44 = vpop.f32.mrf.mxu3  ;;  %v18879_v50 = vrot.slane %v14006_v29, 2  ;;  %5249 = vmatpush.msra.mxu1 %v10158_v14  ;;  %v4873_v29 = vrot.slane %v14420_v5, 1  ;;  %v10157_v14 = vld [vmem:[%s18568_s4 + $0xb08] sm:$0xff] }
 0x3ab   : > { %v14786_v10 = vadd.f32 %v4209_v44, %v4021_v32  ;;  %v4000_v51 = vpop.f32.mrf.mxu1 }
 0x3ac   : > { %v14788_v4 = vpop.f32.mrf.mxu0  ;;  %v4997_v34 = vsel %vm1202_vm7, %v4977_v55, %v18879_v50  ;;  %v4022_v32 = vadd.f32 %v4000_v51, %v14428_v2  ;;  %v4890_v2 = vsel %vm1095_vm6, %v4873_v29, %v18881_v54  ;;  %v18883_v51 = vrot.slane %v14060_v38, 3  ;;  %5250 = vmatpush.msra.mxu1 %v10157_v14 }
 0x3ae   : > { %10101 = vmatmul.msk.f32.gmra.mxu1 %vm387_vm1, %v14378_v19  ;;  %10117 = vmatmul.msk.f32.gmra.mxu2 %vm387_vm1, %v4891_v9  ;;  %v5085_v9 = vrot.slane %v14420_v5, 3  ;;  %v10868_v19 = vld [vmem:[#allocation2 + $0x90] sm:$0xff] }
 0x3af   : > { %10133 = vmatmul.msk.f32.gmra.mxu3 %vm387_vm1, %v4997_v34  ;;  %10149 = vmatmul.msk.f32.gmra.mxu0 %vm387_vm1, %v5103_v6 }
 0x3b0   : > { %v5102_v6 = vsel %vm1309_vm8, %v5085_v9, %v18883_v51 }
 0x3b1   : > { %v4106_v63 = vpop.f32.mrf.mxu2 }
 0x3b2   : > { %v14821_v44 = vadd.f32 %v4106_v63, %v14657_v28  ;;  %v4212_v46 = vpop.f32.mrf.mxu3  ;;  %v18882_v28 = vrot.slane %v14060_v38, 2  ;;  %v10195_v63 = vld [vmem:[%s18568_s4 + $0xbb8] sm:$0xff]  ;;  %v14861_v38 = vadd.f32 %v14670_v1, %v14706_v60  ;;  %v18684_v1 = vrot.slane %v14471_v30, 2 }
 0x3b3   : > { %v14825_v50 = vadd.f32 %v4212_v46, %v4022_v32  ;;  %v4003_v34 = vpop.f32.mrf.mxu1  ;;  %v10179_v32 = vld [vmem:[%s18568_s4 + $0xb78] sm:$0xff]  ;;  %5481 = vmatpush.msra.mxu3 %v10195_v63  ;;  %v5087_v60 = vrot.slane %v14471_v30, 3 }
 0x3b4   : > { %v14827_v16 = vpop.f32.mrf.mxu0  ;;  %v4996_v21 = vsel %vm1202_vm7, %v4979_v23, %v18882_v28  ;;  %5375 = vmatpush.msra.mxu2 %v10179_v32  ;;  %v10211_v46 = vld [vmem:[%s18568_s4 + $0xbf8] sm:$0xff]  ;;  %v4023_v9 = vadd.f32 %v4003_v34, %v14479_v58  ;;  %v10178_v58 = vld [vmem:[%s18568_s4 + $0xb70] sm:$0xff]  ;;  %v18884_v32 = vrot.slane %v14132_v57, 1 }
 0x3b5   : > { %5587 = vmatpush.msra.mxu0 %v10211_v46  ;;  %v10194_v34 = vld [vmem:[%s18568_s4 + $0xbb0] sm:$0xff]  ;;  %v10177_v46 = vld [vmem:[%s18568_s4 + $0xb68] sm:$0xff] }
 0x3b6   : > { %10102 = vmatmul.msk.f32.gmra.mxu1 %vm387_vm1, %v14420_v5  ;;  %10118 = vmatmul.msk.f32.gmra.mxu2 %vm387_vm1, %v4890_v2  ;;  %v18685_v2 = vrot.slane %v14471_v30, 1  ;;  %v10871_v5 = vld [vmem:[#allocation2 + $0xa8] sm:$0xff] }
 0x3b7   : > { %10134 = vmatmul.msk.f32.gmra.mxu3 %vm387_vm1, %v4996_v21  ;;  %10150 = vmatmul.msk.f32.gmra.mxu0 %vm387_vm1, %v5102_v6 }
 0x3b8   : > { %5376 = vmatpush.msra.mxu2 %v10178_v58  ;;  %5482 = vmatpush.msra.mxu3 %v10194_v34  ;;  %v4889_v63 = vsel %vm1095_vm6, %v18685_v2, %v18884_v32  ;;  %v18886_v58 = vrot.slane %v14132_v57, 3  ;;  %v10176_v32 = vld [vmem:[%s18568_s4 + $0xb60] sm:$0xff] }
 0x3b9   : > { %v4109_v54 = vpop.f32.mrf.mxu2 }
 0x3ba   : > { %v14869_v28 = vadd.f32 %v4109_v54, %v14699_v8  ;;  %v4215_v21 = vpop.f32.mrf.mxu3  ;;  %v10210_v8 = vld [vmem:[%s18568_s4 + $0xbf0] sm:$0xff]  ;;  %v18885_v54 = vrot.slane %v14132_v57, 2  ;;  %v5101_v34 = vsel %vm1309_vm8, %v5087_v60, %v18886_v58  ;;  %v10156_v57 = vld [vmem:[%s18568_s4 + $0xb00] sm:$0xff]  ;;  %v14927_v60 = vadd.f32 %v14712_v20, %v14747_v27  ;;  %5377 = vmatpush.msra.mxu2 %v10177_v46  ;;  %v10191_v20 = vld [vmem:[%s18568_s4 + $0xb98] sm:$0xff] }
 0x3bb   : > { %v14873_v51 = vadd.f32 %v4215_v21, %v4023_v9  ;;  %v4006_v6 = vpop.f32.mrf.mxu1  ;;  %5588 = vmatpush.msra.mxu0 %v10210_v8  ;;  %v10193_v9 = vld [vmem:[%s18568_s4 + $0xba8] sm:$0xff]  ;;  %5251 = vmatpush.msra.mxu1 %v10156_v57 }
 0x3bc   : > { %v14884_v14 = vpop.f32.mrf.mxu0  ;;  %v4995_v21 = vsel %vm1202_vm7, %v18684_v1, %v18885_v54  ;;  %v10209_v8 = vld [vmem:[%s18568_s4 + $0xbe8] sm:$0xff]  ;;  %5483 = vmatpush.msra.mxu3 %v10193_v9  ;;  %v10208_v54 = vld [vmem:[%s18568_s4 + $0xbe0] sm:$0xff]  ;;  %v10175_v1 = vld [vmem:[%s18568_s4 + $0xb58] sm:$0xff]  ;;  %v18686_v9 = vrot.slane %v14540_v62, 2  ;;  %5378 = vmatpush.msra.mxu2 %v10176_v32 }
 0x3bd   : > { %5589 = vmatpush.msra.mxu0 %v10209_v8 }
 0x3be   : > { %10103 = vmatmul.msk.f32.gmra.mxu1 %vm387_vm1, %v14471_v30  ;;  %10119 = vmatmul.msk.f32.gmra.mxu2 %vm387_vm1, %v4889_v63  ;;  %v10192_v63 = vld [vmem:[%s18568_s4 + $0xba0] sm:$0xff] }
 0x3bf   : > { %10135 = vmatmul.msk.f32.gmra.mxu3 %vm387_vm1, %v4995_v21  ;;  %10151 = vmatmul.msk.f32.gmra.mxu0 %vm387_vm1, %v5101_v34  ;;  %v4024_v21 = vadd.f32 %v4006_v6, %v14557_v37  ;;  %v18687_v34 = vrot.slane %v14540_v62, 1  ;;  %v5089_v37 = vrot.slane %v14540_v62, 3  ;;  %v10207_v6 = vld [vmem:[%s18568_s4 + $0xbd8] sm:$0xff] }
 0x3c0   : > { %5484 = vmatpush.msra.mxu3 %v10192_v63  ;;  %5590 = vmatpush.msra.mxu0 %v10208_v54  ;;  %v10174_v63 = vld [vmem:[%s18568_s4 + $0xb50] sm:$0xff] }
 0x3c1   : > { %v4112_v58 = vpop.f32.mrf.mxu2  ;;  %5379 = vmatpush.msra.mxu2 %v10175_v1  ;;  %v10190_v54 = vld [vmem:[%s18568_s4 + $0xb90] sm:$0xff]  ;;  %v18888_v1 = vrot.slane %v14204_v22, 2 }
 0x3c2   : > { %v14941_v27 = vadd.f32 %v4112_v58, %v14742_v7  ;;  %v4218_v46 = vpop.f32.mrf.mxu3  ;;  %5485 = vmatpush.msra.mxu3 %v10191_v20  ;;  %v18887_v7 = vrot.slane %v14204_v22, 1  ;;  %5591 = vmatpush.msra.mxu0 %v10207_v6  ;;  %v18889_v58 = vrot.slane %v14204_v22, 3  ;;  %v10173_v6 = vld [vmem:[%s18568_s4 + $0xb48] sm:$0xff]  ;;  %v10227_v22 = vld [vmem:[%s18568_s4 + $0xc38] sm:$0xff] }
 0x3c3   : > { %v14948_v8 = vadd.f32 %v4218_v46, %v4024_v21  ;;  %v4009_v57 = vpop.f32.mrf.mxu1  ;;  %v4994_v21 = vsel %vm1202_vm7, %v18686_v9, %v18888_v1  ;;  %v10206_v46 = vld [vmem:[%s18568_s4 + $0xbd0] sm:$0xff]  ;;  %5380 = vmatpush.msra.mxu2 %v10174_v63  ;;  %5693 = vmatpush.msrb.mxu1 %v10227_v22 }
 0x3c4   : > { %v14950_v2 = vpop.f32.mrf.mxu0  ;;  %v4888_v32 = vsel %vm1095_vm6, %v18687_v34, %v18887_v7  ;;  %v5100_v20 = vsel %vm1309_vm8, %v5089_v37, %v18889_v58  ;;  %v10189_v7 = vld [vmem:[%s18568_s4 + $0xb88] sm:$0xff]  ;;  %v14993_v37 = vadd.f32 %v14753_v0, %v14782_v41  ;;  %5486 = vmatpush.msra.mxu3 %v10190_v54  ;;  %v4025_v1 = vadd.f32 %v4009_v57, %v14626_v18  ;;  %v10188_v0 = vld [vmem:[%s18568_s4 + $0xb80] sm:$0xff] }
 0x3c5   : > { %v4879_v58 = vrot.slane %v14609_v3, 1  ;;  %5592 = vmatpush.msra.mxu0 %v10206_v46  ;;  %v4985_v54 = vrot.slane %v14609_v3, 2  ;;  %v5091_v18 = vrot.slane %v14609_v3, 3  ;;  %5381 = vmatpush.msra.mxu2 %v10173_v6  ;;  %v10204_v57 = vld [vmem:[%s18568_s4 + $0xbc0] sm:$0xff] }
 0x3c6   : > { %10104 = vmatmul.msk.f32.gmra.mxu1 %vm387_vm1, %v14540_v62  ;;  %10120 = vmatmul.msk.f32.gmra.mxu2 %vm387_vm1, %v4888_v32  ;;  %v10205_v32 = vld [vmem:[%s18568_s4 + $0xbc8] sm:$0xff] }
 0x3c7   : > { %10136 = vmatmul.msk.f32.gmra.mxu3 %vm387_vm1, %v4994_v21  ;;  %10152 = vmatmul.msk.f32.gmra.mxu0 %vm387_vm1, %v5100_v20  ;;  %v10172_v20 = vld [vmem:[%s18568_s4 + $0xb40] sm:$0xff] }
 0x3c8   : > { %5487 = vmatpush.msra.mxu3 %v10189_v7  ;;  %5593 = vmatpush.msra.mxu0 %v10205_v32  ;;  %v18891_v7 = vrot.slane %v14256_v25, 2  ;;  %v18892_v32 = vrot.slane %v14256_v25, 3 }
 0x3c9   : > { %v4115_v21 = vpop.f32.mrf.mxu2  ;;  %5382 = vmatpush.msra.mxu2 %v10172_v20  ;;  %v15044_v20 = vadd.f32 %v14788_v4, %v14821_v44  ;;  %v18893_v4 = vrot.slane %v14301_v13, 1 }
 0x3ca   : > { %v15007_v41 = vadd.f32 %v4115_v21, %v14777_v24  ;;  %v4221_v63 = vpop.f32.mrf.mxu3  ;;  %5488 = vmatpush.msra.mxu3 %v10188_v0  ;;  %v18890_v24 = vrot.slane %v14256_v25, 1  ;;  %5594 = vmatpush.msra.mxu0 %v10204_v57  ;;  %v4993_v22 = vsel %vm1202_vm7, %v4985_v54, %v18891_v7  ;;  %v10226_v21 = vld [vmem:[%s18568_s4 + $0xc30] sm:$0xff]  ;;  %v18689_v25 = vrot.slane %v14660_v43, 1 }
 0x3cb   : > { %v15014_v46 = vadd.f32 %v4221_v63, %v4025_v1  ;;  %v4012_v9 = vpop.f32.mrf.mxu1  ;;  %v5099_v1 = vsel %vm1309_vm8, %v5091_v18, %v18892_v32  ;;  %5694 = vmatpush.msrb.mxu1 %v10226_v21  ;;  %v10225_v21 = vld [vmem:[%s18568_s4 + $0xc28] sm:$0xff] }
 0x3cc   : > { %v15016_v34 = vpop.f32.mrf.mxu0  ;;  %v4887_v6 = vsel %vm1095_vm6, %v4879_v58, %v18890_v24  ;;  %v4026_v0 = vadd.f32 %v4012_v9, %v14668_v12  ;;  %v18688_v24 = vrot.slane %v14660_v43, 2  ;;  %v4886_v12 = vsel %vm1095_vm6, %v18689_v25, %v18893_v4  ;;  %v10865_v4 = vld [vmem:[#allocation2 + $0x118] sm:$0xff] }
 0x3cd   : > { %v18895_v9 = vrot.slane %v14301_v13, 3  ;;  %5695 = vmatpush.msrb.mxu1 %v10225_v21  ;;  %v10224_v21 = vld [vmem:[%s18568_s4 + $0xc20] sm:$0xff] }
 0x3ce   : > { %10105 = vmatmul.msk.f32.gmra.mxu1 %vm387_vm1, %v14609_v3  ;;  %10121 = vmatmul.msk.f32.gmra.mxu2 %vm387_vm1, %v4887_v6  ;;  %v5093_v6 = vrot.slane %v14660_v43, 3  ;;  %v10355_v3 = vld [vmem:[%s18568_s4 + $0xe38] sm:$0xff] }
 0x3cf   : > { %10137 = vmatmul.msk.f32.gmra.mxu3 %vm387_vm1, %v4993_v22  ;;  %10153 = vmatmul.msk.f32.gmra.mxu0 %vm387_vm1, %v5099_v1 }
 0x3d0   : > { %v5098_v1 = vsel %vm1309_vm8, %v5093_v6, %v18895_v9  ;;  %v4884_v6 = vrot.slane %v10865_v4, 1  ;;  %v4990_v9 = vrot.slane %v10865_v4, 2  ;;  %5696 = vmatpush.msrb.mxu1 %v10224_v21 }
 0x3d1   : > { %v4118_v63 = vpop.f32.mrf.mxu2 }
 0x3d2   : > { %v15049_v18 = vadd.f32 %v4118_v63, %v14816_v61  ;;  %v4224_v57 = vpop.f32.mrf.mxu3  ;;  %v18894_v61 = vrot.slane %v14301_v13, 2  ;;  %v4883_v13 = vrot.slane %v14702_v56, 1 }
 0x3d3   : > { %v15053_v7 = vadd.f32 %v4224_v57, %v4026_v0  ;;  %v4015_v22 = vpop.f32.mrf.mxu1  ;;  %v15083_v0 = vadd.f32 %v14827_v16, %v14869_v28 }
 0x3d4   : > { %v15055_v32 = vpop.f32.mrf.mxu0  ;;  %v4992_v44 = vsel %vm1202_vm7, %v18688_v24, %v18894_v61  ;;  %v4027_v63 = vadd.f32 %v4015_v22, %v14710_v49  ;;  %v5096_v24 = vrot.slane %v10865_v4, 3  ;;  %v15096_v49 = vsel %vm1095_vm6, %v4883_v13, %v4884_v6 }
 0x3d6   : > { %10106 = vmatmul.msk.f32.gmra.mxu1 %vm387_vm1, %v14660_v43  ;;  %10122 = vmatmul.msk.f32.gmra.mxu2 %vm387_vm1, %v4886_v12  ;;  %v4989_v12 = vrot.slane %v14702_v56, 2 }
 0x3d7   : > { %10138 = vmatmul.msk.f32.gmra.mxu3 %vm387_vm1, %v4992_v44  ;;  %10154 = vmatmul.msk.f32.gmra.mxu0 %vm387_vm1, %v5098_v1  ;;  %v5095_v1 = vrot.slane %v14702_v56, 3 }
 0x3d9   : > { %v4121_v57 = vpop.f32.mrf.mxu2  ;;  %v5097_v22 = vsel %vm1309_vm8, %v5095_v1, %v5096_v24 }
 0x3da   : > { %v4133_v61 = vadd.f32 %v4121_v57, %v14861_v38  ;;  %v4227_v44 = vpop.f32.mrf.mxu3  ;;  %v15104_v38 = vsel %vm1202_vm7, %v4989_v12, %v4990_v9 }
 0x3db   : > { %v15090_v25 = vadd.f32 %v4227_v44, %v4027_v63  ;;  %v4018_v16 = vpop.f32.mrf.mxu1  ;;  %v18896_v44 = vld [vmem:[#allocation21_spill] sm:$0xff] }
 0x3dc   : > { %v15092_v28 = vpop.f32.mrf.mxu0  ;;  %v4028_v63 = vadd.f32 %v4018_v16, %v14751_v42  ;;  %v10223_v42 = vld [vmem:[%s18568_s4 + $0xc18] sm:$0xff] }
 0x3dd   : > { %5697 = vmatpush.msrb.mxu1 %v10223_v42  ;;  %v18897_v16 = vld [vmem:[#allocation22_spill] sm:$0xff] }
 0x3de   : > { %10107 = vmatmul.msk.f32.gmra.mxu1 %vm387_vm1, %v14702_v56  ;;  %10123 = vmatmul.msk.f32.gmra.mxu2 %vm387_vm1, %v15096_v49  ;;  %v15116_v56 = vadd.f32 %v14884_v14, %v14941_v27  ;;  %v15139_v14 = vadd.f32 %v14950_v2, %v15007_v41  ;;  %v15162_v2 = vadd.f32 %v15016_v34, %v15049_v18  ;;  %v10243_v34 = vld [vmem:[%s18568_s4 + $0xc78] sm:$0xff] }
 0x3df   : > { %10139 = vmatmul.msk.f32.gmra.mxu3 %vm387_vm1, %v15104_v38  ;;  %10155 = vmatmul.msk.f32.gmra.mxu0 %vm387_vm1, %v5097_v22 }
 0x3e0   : > { %5775 = vmatpush.msrb.mxu2 %v10243_v34  ;;  %v10255_v34 = vld [vmem:[%s18568_s4 + $0xc98] sm:$0xff] }
 0x3e1   : > { %v4124_v57 = vpop.f32.mrf.mxu2 }
 0x3e2   : > { %v15120_v13 = vadd.f32 %v4124_v57, %v14927_v60  ;;  %v4230_v24 = vpop.f32.mrf.mxu3 }
 0x3e3   : > { %v15122_v4 = vadd.f32 %v4230_v24, %v4028_v63  ;;  %v4437_v6 = vpop.f32.mrf.mxu1  ;;  %v18898_v63 = vld [vmem:[#allocation23_spill] sm:$0xff] }
 0x3e4   : > { %v15124_v12 = vpop.f32.mrf.mxu0  ;;  %v4461_v60 = vadd.f32 %v4437_v6, %v14786_v10  ;;  %v10222_v10 = vld [vmem:[%s18568_s4 + $0xc10] sm:$0xff] }
 0x3e5   : > { %5698 = vmatpush.msrb.mxu1 %v10222_v10  ;;  %v10240_v10 = vld [vmem:[%s18568_s4 + $0xc60] sm:$0xff] }
 0x3e6   : > { %10164 = vmatmul.msk.f32.vlgmr.msra.gmra.mxu1 %vm387_vm1, %v18896_v44  ;;  %10180 = vmatmul.msk.f32.vlgmr.msra.gmra.mxu2 %vm387_vm1, %v14393_v15 }
 0x3e7   : > { %10196 = vmatmul.msk.f32.vlgmr.msra.gmra.mxu3 %vm387_vm1, %v14397_v47  ;;  %10212 = vmatmul.msk.f32.vlgmr.msra.gmra.mxu0 %vm387_vm1, %v14405_v52 }
 0x3e9   : > { %v4543_v27 = vpop.f32.mrf.mxu2 }
 0x3ea   : > { %v15143_v15 = vadd.f32 %v4543_v27, %v14993_v37  ;;  %v4649_v9 = vpop.f32.mrf.mxu3  ;;  %v18899_v27 = vld [vmem:[#allocation24_spill] sm:$0xff] }
 0x3eb   : > { %v15145_v47 = vadd.f32 %v4649_v9, %v4461_v60  ;;  %v4440_v1 = vpop.f32.mrf.mxu1  ;;  %v10257_v60 = vld [vmem:[%s18568_s4 + $0xca8] sm:$0xff] }
 0x3ec   : > { %v15147_v52 = vpop.f32.mrf.mxu0  ;;  %v4462_v37 = vadd.f32 %v4440_v1, %v14825_v50  ;;  %v10221_v50 = vld [vmem:[%s18568_s4 + $0xc08] sm:$0xff]  ;;  %v18900_v1 = vld [vmem:[#allocation11_spill] sm:$0xff] }
 0x3ed   : > { %5699 = vmatpush.msrb.mxu1 %v10221_v50  ;;  %v10273_v9 = vld [vmem:[%s18568_s4 + $0xce8] sm:$0xff]  ;;  %v10239_v50 = vld [vmem:[%s18568_s4 + $0xc58] sm:$0xff] }
 0x3ee   : > { %10165 = vmatmul.msk.f32.gmra.mxu1 %vm387_vm1, %v18897_v16  ;;  %10181 = vmatmul.msk.f32.gmra.mxu2 %vm387_vm1, %v14435_v59  ;;  %v18901_v16 = vld [vmem:[#allocation13_spill] sm:$0xff] }
 0x3ef   : > { %10197 = vmatmul.msk.f32.gmra.mxu3 %vm387_vm1, %v14439_v36  ;;  %10213 = vmatmul.msk.f32.gmra.mxu0 %vm387_vm1, %v14447_v26 }
 0x3f1   : > { %v4546_v41 = vpop.f32.mrf.mxu2 }
 0x3f2   : > { %v15166_v59 = vadd.f32 %v4546_v41, %v15044_v20  ;;  %v4652_v22 = vpop.f32.mrf.mxu3  ;;  %v10259_v20 = vld [vmem:[%s18568_s4 + $0xcb8] sm:$0xff]  ;;  %v10272_v41 = vld [vmem:[%s18568_s4 + $0xce0] sm:$0xff] }
 0x3f3   : > { %v15168_v36 = vadd.f32 %v4652_v22, %v4462_v37  ;;  %v4443_v21 = vpop.f32.mrf.mxu1  ;;  %5881 = vmatpush.msrb.mxu3 %v10259_v20  ;;  %v10256_v37 = vld [vmem:[%s18568_s4 + $0xca0] sm:$0xff]  ;;  %v15243_v22 = vadd.f32 %v15092_v28, %v15120_v13 }
 0x3f4   : > { %v15170_v26 = vpop.f32.mrf.mxu0 }
 0x3f6   : > { %10166 = vmatmul.msk.f32.gmra.mxu1 %vm387_vm1, %v18898_v63  ;;  %10182 = vmatmul.msk.f32.gmra.mxu2 %vm387_vm1, %v14495_v33  ;;  %v15190_v33 = vadd.f32 %v15055_v32, %v4133_v61  ;;  %v10242_v32 = vld [vmem:[%s18568_s4 + $0xc70] sm:$0xff] }
 0x3f7   : > { %10198 = vmatmul.msk.f32.gmra.mxu3 %vm387_vm1, %v14499_v45  ;;  %10214 = vmatmul.msk.f32.gmra.mxu0 %vm387_vm1, %v14513_v40  ;;  %v10275_v45 = vld [vmem:[%s18568_s4 + $0xcf8] sm:$0xff]  ;;  %v4463_v40 = vadd.f32 %v4443_v21, %v14873_v51  ;;  %v10258_v61 = vld [vmem:[%s18568_s4 + $0xcb0] sm:$0xff] }
 0x3f8   : > { %5987 = vmatpush.msrb.mxu0 %v10275_v45  ;;  %v10274_v51 = vld [vmem:[%s18568_s4 + $0xcf0] sm:$0xff]  ;;  %5776 = vmatpush.msrb.mxu2 %v10242_v32  ;;  %v18903_v32 = vld [vmem:[#allocation14_spill] sm:$0xff] }
 0x3f9   : > { %v4549_v18 = vpop.f32.mrf.mxu2  ;;  %5882 = vmatpush.msrb.mxu3 %v10258_v61  ;;  %v18904_v61 = vld [vmem:[#allocation15_spill] sm:$0xff] }
 0x3fa   : > { %v15197_v57 = vadd.f32 %v4549_v18, %v15083_v0  ;;  %v4655_v24 = vpop.f32.mrf.mxu3  ;;  %5988 = vmatpush.msrb.mxu0 %v10274_v51  ;;  %v10241_v0 = vld [vmem:[%s18568_s4 + $0xc68] sm:$0xff]  ;;  %v10254_v18 = vld [vmem:[%s18568_s4 + $0xc90] sm:$0xff] }
 0x3fb   : > { %v15199_v6 = vadd.f32 %v4655_v24, %v4463_v40  ;;  %v4446_v44 = vpop.f32.mrf.mxu1  ;;  %5777 = vmatpush.msrb.mxu2 %v10241_v0  ;;  %5883 = vmatpush.msrb.mxu3 %v10257_v60  ;;  %v18902_v24 = vld [vmem:[#allocation35_spill] sm:$0xff]  ;;  %v10237_v51 = vld [vmem:[%s18568_s4 + $0xc48] sm:$0xff]  ;;  %v15290_v60 = vadd.f32 %v15124_v12, %v15143_v15 }
 0x3fc   : > { %v15210_v42 = vpop.f32.mrf.mxu0  ;;  %v4464_v21 = vadd.f32 %v4446_v44, %v14948_v8  ;;  %5989 = vmatpush.msrb.mxu0 %v10273_v9  ;;  %v10271_v8 = vld [vmem:[%s18568_s4 + $0xcd8] sm:$0xff]  ;;  %v10270_v44 = vld [vmem:[%s18568_s4 + $0xcd0] sm:$0xff]  ;;  %v10253_v0 = vld [vmem:[%s18568_s4 + $0xc88] sm:$0xff] }
 0x3fd   : > { %5778 = vmatpush.msrb.mxu2 %v10240_v10  ;;  %5884 = vmatpush.msrb.mxu3 %v10256_v37  ;;  %v10252_v10 = vld [vmem:[%s18568_s4 + $0xc80] sm:$0xff] }
 0x3fe   : > { %10167 = vmatmul.msk.f32.gmra.mxu1 %vm387_vm1, %v18899_v27  ;;  %10183 = vmatmul.msk.f32.gmra.mxu2 %vm387_vm1, %v14564_v17  ;;  %v10220_v17 = vld [vmem:[%s18568_s4 + $0xc00] sm:$0xff]  ;;  %v10269_v27 = vld [vmem:[%s18568_s4 + $0xcc8] sm:$0xff] }
 0x3ff   : > { %10199 = vmatmul.msk.f32.gmra.mxu3 %vm387_vm1, %v18900_v1  ;;  %10215 = vmatmul.msk.f32.gmra.mxu0 %vm387_vm1, %v18901_v16  ;;  %v10236_v16 = vld [vmem:[%s18568_s4 + $0xc40] sm:$0xff] }
 0x400   : > { %5700 = vmatpush.msrb.mxu1 %v10220_v17  ;;  %5990 = vmatpush.msrb.mxu0 %v10272_v41 }
 0x401   : > { %v4552_v63 = vpop.f32.mrf.mxu2  ;;  %5779 = vmatpush.msrb.mxu2 %v10239_v50  ;;  %5885 = vmatpush.msrb.mxu3 %v10255_v34  ;;  %v18908_v50 = vld [vmem:[#allocation5_spill] sm:$0xff] }
 0x402   : > { %v15253_v20 = vadd.f32 %v4552_v63, %v15116_v56  ;;  %v4658_v45 = vpop.f32.mrf.mxu3  ;;  %5991 = vmatpush.msrb.mxu0 %v10271_v8  ;;  %v10238_v56 = vld [vmem:[%s18568_s4 + $0xc50] sm:$0xff]  ;;  %v18907_v63 = vld [vmem:[#allocation3_spill] sm:$0xff] }
 0x403   : > { %v15258_v28 = vadd.f32 %v4658_v45, %v4464_v21  ;;  %v4449_v13 = vpop.f32.mrf.mxu1  ;;  %5780 = vmatpush.msrb.mxu2 %v10238_v56  ;;  %5886 = vmatpush.msrb.mxu3 %v10254_v18  ;;  %v18905_v21 = vld [vmem:[#allocation36_spill] sm:$0xff]  ;;  %v10290_v34 = vld [vmem:[%s18568_s4 + $0xd30] sm:$0xff]  ;;  %v15325_v45 = vadd.f32 %v15147_v52, %v15166_v59  ;;  %v15354_v59 = vadd.f32 %v15170_v26, %v15197_v57 }
 0x404   : > { %v15260_v40 = vpop.f32.mrf.mxu0  ;;  %v4465_v9 = vadd.f32 %v4449_v13, %v15014_v46  ;;  %5992 = vmatpush.msrb.mxu0 %v10270_v44  ;;  %v10268_v46 = vld [vmem:[%s18568_s4 + $0xcc0] sm:$0xff] }
 0x405   : > { %5781 = vmatpush.msrb.mxu2 %v10237_v51  ;;  %5887 = vmatpush.msrb.mxu3 %v10253_v0  ;;  %v15337_v51 = vld [vmem:[#allocation2 + $0x128] sm:$0xff]  ;;  %v18909_v0 = vld [vmem:[#allocation39_spill] sm:$0xff] }
 0x406   : > { %10168 = vmatmul.msk.f32.gmra.mxu1 %vm387_vm1, %v18902_v24  ;;  %10184 = vmatmul.msk.f32.gmra.mxu2 %vm387_vm1, %v14633_v31  ;;  %v10291_v31 = vld [vmem:[%s18568_s4 + $0xd38] sm:$0xff]  ;;  %v18697_v52 = vrot.slane %v15337_v51, 4 }
 0x407   : > { %10200 = vmatmul.msk.f32.gmra.mxu3 %vm387_vm1, %v18903_v32  ;;  %10216 = vmatmul.msk.f32.gmra.mxu0 %vm387_vm1, %v18904_v61  ;;  %v15335_v61 = vld [vmem:[#allocation2 + $0x120] sm:$0xff] }
 0x408   : > { %6093 = vmatpush.msra.mxu1 %v10291_v31  ;;  %5993 = vmatpush.msrb.mxu0 %v10269_v27  ;;  %v5431_v31 = vrot.slane %v15337_v51, 5 }
 0x409   : > { %v4555_v1 = vpop.f32.mrf.mxu2  ;;  %5782 = vmatpush.msrb.mxu2 %v10236_v16  ;;  %5888 = vmatpush.msrb.mxu3 %v10252_v10 }
 0x40a   : > { %v15303_v12 = vadd.f32 %v4555_v1, %v15139_v14  ;;  %v4661_v15 = vpop.f32.mrf.mxu3  ;;  %5994 = vmatpush.msrb.mxu0 %v10268_v46  ;;  %v18906_v14 = vld [vmem:[#allocation7_spill] sm:$0xff]  ;;  %6094 = vmatpush.msra.mxu1 %v10290_v34  ;;  %v10866_v34 = vld [vmem:[#allocation2 + $0x78] sm:$0xff] }
 0x40b   : > { %v15308_v37 = vadd.f32 %v4661_v15, %v4465_v9  ;;  %v4452_v17 = vpop.f32.mrf.mxu1 }
 0x40c   : > { %v15310_v41 = vpop.f32.mrf.mxu0  ;;  %v4466_v8 = vadd.f32 %v4452_v17, %v15053_v7  ;;  %v5324_v7 = vrot.slane %v15335_v61, 4  ;;  %v15387_v17 = vld [vmem:[#allocation2 + $0x88] sm:$0xff] }
 0x40e   : > { %10169 = vmatmul.msk.f32.gmra.mxu1 %vm387_vm1, %v18905_v21  ;;  %10185 = vmatmul.msk.f32.gmra.mxu2 %vm387_vm1, %v18906_v14  ;;  %v15370_v57 = vsel %vm618_vm4, %v5324_v7, %v18697_v52  ;;  %v10288_v21 = vld [vmem:[%s18568_s4 + $0xd20] sm:$0xff]  ;;  %v15394_v14 = vadd.f32 %v15210_v42, %v15253_v20  ;;  %v5817_v7 = vrot.slane %v15387_v17, 1  ;;  %v10369_v52 = vld [vmem:[%s18568_s4 + $0xe68] sm:$0xff] }
 0x40f   : > { %10201 = vmatmul.msk.f32.gmra.mxu3 %vm387_vm1, %v18907_v63  ;;  %10217 = vmatmul.msk.f32.gmra.mxu0 %vm387_vm1, %v18908_v50 }
 0x411   : > { %v4558_v13 = vpop.f32.mrf.mxu2 }
 0x412   : > { %v15329_v56 = vadd.f32 %v4558_v13, %v15162_v2  ;;  %v4664_v18 = vpop.f32.mrf.mxu3  ;;  %v10289_v2 = vld [vmem:[%s18568_s4 + $0xd28] sm:$0xff]  ;;  %v15397_v13 = vld [vmem:[#allocation2 + $0x80] sm:$0xff] }
 0x413   : > { %v15331_v24 = vadd.f32 %v4664_v18, %v4466_v8  ;;  %v4455_v44 = vpop.f32.mrf.mxu1  ;;  %6095 = vmatpush.msra.mxu1 %v10289_v2  ;;  %v5628_v8 = vrot.slane %v10866_v34, 7  ;;  %v5629_v18 = vrot.slane %v15397_v13, 7  ;;  %v5923_v2 = vrot.slane %v15387_v17, 2 }
 0x414   : > { %v15333_v32 = vpop.f32.mrf.mxu0  ;;  %v4467_v27 = vadd.f32 %v4455_v44, %v15090_v25 }
 0x415   : > { %6096 = vmatpush.msra.mxu1 %v10288_v21  ;;  %v15438_v21 = vld [vmem:[#allocation2 + $0xa0] sm:$0xff] }
 0x416   : > { %10170 = vmatmul.msk.f32.gmra.mxu1 %vm387_vm1, %v18909_v0  ;;  %10186 = vmatmul.msk.f32.gmra.mxu2 %vm387_vm1, %v14718_v53  ;;  %v5430_v53 = vrot.slane %v15335_v61, 5 }
 0x417   : > { %10202 = vmatmul.msk.f32.gmra.mxu3 %vm387_vm1, %v14722_v11  ;;  %10218 = vmatmul.msk.f32.gmra.mxu0 %vm387_vm1, %v14730_v35  ;;  %v5536_v11 = vrot.slane %v15335_v61, 6  ;;  %v5537_v35 = vrot.slane %v15337_v51, 6 }
 0x418   : > { %v15376_v46 = vsel %vm651_vm3, %v5430_v53, %v5431_v31  ;;  %v5945_v31 = vsel %vm1202_vm7, %v4977_v55, %v5923_v2  ;;  %v5632_v2 = vrot.slane %v10871_v5, 7 }
 0x419   : > { %v4561_v9 = vpop.f32.mrf.mxu2  ;;  %v5538_v25 = vsel %vm685_vm2, %v5536_v11, %v5537_v35  ;;  %v10287_v11 = vld [vmem:[%s18568_s4 + $0xd18] sm:$0xff]  ;;  %v15429_v35 = vadd.f32 %v15260_v40, %v15303_v12  ;;  %v5925_v40 = vrot.slane %v15438_v21, 2 }
 0x41a   : > { %v15362_v1 = vadd.f32 %v4561_v9, %v15190_v33  ;;  %v4667_v16 = vpop.f32.mrf.mxu3  ;;  %v18910_v33 = vld [vmem:[#allocation41_spill] sm:$0xff]  ;;  %6097 = vmatpush.msra.mxu1 %v10287_v11  ;;  %v5630_v9 = vrot.slane %v10868_v19, 7 }
 0x41b   : > { %v15364_v10 = vadd.f32 %v4667_v16, %v4467_v27  ;;  %v4458_v26 = vpop.f32.mrf.mxu1  ;;  %v15432_v16 = vld [vmem:[#allocation2 + $0x98] sm:$0xff] }
 0x41c   : > { %v15372_v15 = vpop.f32.mrf.mxu0  ;;  %v4468_v63 = vadd.f32 %v4458_v26, %v15122_v4  ;;  %v5651_v4 = vsel %vm849_vm5, %v5628_v8, %v5629_v18  ;;  %v5631_v55 = vrot.slane %v15432_v16, 7  ;;  %v5944_v8 = vsel %vm1202_vm7, %v4979_v23, %v5925_v40  ;;  %v10286_v18 = vld [vmem:[%s18568_s4 + $0xd10] sm:$0xff]  ;;  %v10307_v40 = vld [vmem:[%s18568_s4 + $0xd78] sm:$0xff] }
 0x41d   : > { %6098 = vmatpush.msra.mxu1 %v10286_v18  ;;  %6191 = vmatpush.msra.mxu2 %v10307_v40  ;;  %v10874_v18 = vld [vmem:[#allocation2 + $0xc0] sm:$0xff] }
 0x41e   : > { %10171 = vmatmul.msk.f32.gmra.mxu1 %vm387_vm1, %v18910_v33  ;;  %10187 = vmatmul.msk.f32.gmra.mxu2 %vm387_vm1, %v15370_v57  ;;  %v5650_v34 = vsel %vm849_vm5, %v5630_v9, %v5631_v55  ;;  %v18912_v9 = vrot.slane %v14471_v30, 2 }
 0x41f   : > { %10203 = vmatmul.msk.f32.gmra.mxu3 %vm387_vm1, %v15376_v46  ;;  %10219 = vmatmul.msk.f32.gmra.mxu0 %vm387_vm1, %v5538_v25 }
 0x421   : > { %v4564_v50 = vpop.f32.mrf.mxu2 }
 0x422   : > { %v15401_v44 = vadd.f32 %v4564_v50, %v15243_v22  ;;  %v4670_v0 = vpop.f32.mrf.mxu3  ;;  %v5839_v22 = vsel %vm1095_vm6, %v4871_v48, %v5817_v7 }
 0x423   : > { %v15405_v42 = vadd.f32 %v4670_v0, %v4468_v63  ;;  %v4837_v20 = vpop.f32.mrf.mxu1  ;;  %v18696_v63 = vrot.slane %v15438_v21, 1  ;;  %v15468_v0 = vadd.f32 %v15310_v41, %v15329_v56 }
 0x424   : > { %v15407_v53 = vpop.f32.mrf.mxu0  ;;  %v4861_v48 = vadd.f32 %v4837_v20, %v15145_v47  ;;  %v15471_v20 = vld [vmem:[#allocation2 + $0xb0] sm:$0xff] }
 0x425   : > { %v5633_v23 = vrot.slane %v15471_v20, 7 }
 0x426   : > { %10228 = vmatmul.msk.f32.vlgmr.msrb.gmra.mxu1 %vm387_vm1, %v5651_v4  ;;  %10244 = vmatmul.msk.f32.vlgmr.msrb.gmra.mxu2 %vm387_vm1, %v15397_v13 }
 0x427   : > { %10260 = vmatmul.msk.f32.vlgmr.msrb.gmra.mxu3 %vm387_vm1, %v5839_v22  ;;  %10276 = vmatmul.msk.f32.vlgmr.msrb.gmra.mxu0 %vm387_vm1, %v5945_v31  ;;  %v15477_v31 = vld [vmem:[#allocation2 + $0xb8] sm:$0xff] }
 0x428   : > { %v18695_v11 = vrot.slane %v15477_v31, 1  ;;  %v5927_v41 = vrot.slane %v15477_v31, 2 }
 0x429   : > { %v4943_v27 = vpop.f32.mrf.mxu2 }
 0x42a   : > { %v15436_v26 = vadd.f32 %v4943_v27, %v15290_v60  ;;  %v5049_v25 = vpop.f32.mrf.mxu3  ;;  %v5838_v60 = vsel %vm1095_vm6, %v4873_v29, %v18696_v63  ;;  %v5649_v27 = vsel %vm849_vm5, %v5632_v2, %v5633_v23  ;;  %v5943_v55 = vsel %vm1202_vm7, %v18912_v9, %v5927_v41  ;;  %v15525_v2 = vld [vmem:[#allocation2 + $0xd0] sm:$0xff]  ;;  %v10305_v9 = vld [vmem:[%s18568_s4 + $0xd68] sm:$0xff] }
 0x42b   : > { %v15442_v12 = vadd.f32 %v5049_v25, %v4861_v48  ;;  %v4840_v47 = vpop.f32.mrf.mxu1  ;;  %v10285_v25 = vld [vmem:[%s18568_s4 + $0xd08] sm:$0xff]  ;;  %v18693_v23 = vrot.slane %v15525_v2, 1 }
 0x42c   : > { %v15444_v50 = vpop.f32.mrf.mxu0  ;;  %v4862_v29 = vadd.f32 %v4840_v47, %v15168_v36  ;;  %v10323_v47 = vld [vmem:[%s18568_s4 + $0xdb8] sm:$0xff]  ;;  %6099 = vmatpush.msra.mxu1 %v10285_v25  ;;  %v18913_v25 = vrot.slane %v14540_v62, 1 }
 0x42d   : > { %6322 = vmatpush.msra.mxu3 %v10323_v47  ;;  %v18914_v47 = vrot.slane %v14540_v62, 2  ;;  %v10284_v62 = vld [vmem:[%s18568_s4 + $0xd00] sm:$0xff] }
 0x42e   : > { %10229 = vmatmul.msk.f32.gmra.mxu1 %vm387_vm1, %v5650_v34  ;;  %10245 = vmatmul.msk.f32.gmra.mxu2 %vm387_vm1, %v15432_v16  ;;  %v10339_v34 = vld [vmem:[%s18568_s4 + $0xdf8] sm:$0xff]  ;;  %v5836_v40 = vsel %vm1095_vm6, %v18913_v25, %v18693_v23 }
 0x42f   : > { %10261 = vmatmul.msk.f32.gmra.mxu3 %vm387_vm1, %v5838_v60  ;;  %10277 = vmatmul.msk.f32.gmra.mxu0 %vm387_vm1, %v5944_v8  ;;  %v15885_v23 = vld [vmem:[#allocation2 + $0xd8] sm:$0xff] }
 0x430   : > { %6428 = vmatpush.msra.mxu0 %v10339_v34  ;;  %6100 = vmatpush.msra.mxu1 %v10284_v62 }
 0x431   : > { %v4946_v7 = vpop.f32.mrf.mxu2 }
 0x432   : > { %v15475_v4 = vadd.f32 %v4946_v7, %v15325_v45  ;;  %v5052_v22 = vpop.f32.mrf.mxu3  ;;  %v18911_v45 = vrot.slane %v14471_v30, 1  ;;  %v15513_v30 = vadd.f32 %v15333_v32, %v15362_v1  ;;  %v15519_v7 = vld [vmem:[#allocation2 + $0xc8] sm:$0xff]  ;;  %6534 = vmatpush.msrb.mxu1 %v10355_v3  ;;  %v18916_v3 = vrot.slane %v14660_v43, 2 }
 0x433   : > { %v15481_v56 = vadd.f32 %v5052_v22, %v4862_v29  ;;  %v4843_v36 = vpop.f32.mrf.mxu1  ;;  %v5634_v29 = vrot.slane %v10874_v18, 7  ;;  %v5635_v5 = vrot.slane %v15519_v7, 7  ;;  %v5929_v22 = vrot.slane %v15525_v2, 2  ;;  %v10320_v18 = vld [vmem:[%s18568_s4 + $0xda0] sm:$0xff] }
 0x434   : > { %v15483_v48 = vpop.f32.mrf.mxu0  ;;  %v5837_v19 = vsel %vm1095_vm6, %v18911_v45, %v18695_v11  ;;  %v4863_v60 = vadd.f32 %v4843_v36, %v15199_v6  ;;  %v10306_v36 = vld [vmem:[%s18568_s4 + $0xd70] sm:$0xff] }
 0x435   : > { %6192 = vmatpush.msra.mxu2 %v10306_v36  ;;  %v5942_v34 = vsel %vm1202_vm7, %v18914_v47, %v5929_v22  ;;  %v10877_v36 = vld [vmem:[#allocation2 + $0xd8] sm:$0xff]  ;;  %v18932_v11 = vld [vmem:[#allocation9_spill] sm:$0xff] }
 0x436   : > { %10230 = vmatmul.msk.f32.gmra.mxu1 %vm387_vm1, %v5649_v27  ;;  %10246 = vmatmul.msk.f32.gmra.mxu2 %vm387_vm1, %v15471_v20  ;;  %v10322_v27 = vld [vmem:[%s18568_s4 + $0xdb0] sm:$0xff] }
 0x437   : > { %10262 = vmatmul.msk.f32.gmra.mxu3 %vm387_vm1, %v5837_v19  ;;  %10278 = vmatmul.msk.f32.gmra.mxu0 %vm387_vm1, %v5943_v55  ;;  %v5648_v19 = vsel %vm849_vm5, %v5634_v29, %v5635_v5  ;;  %v10321_v55 = vld [vmem:[%s18568_s4 + $0xda8] sm:$0xff]  ;;  %v15579_v29 = vadd.f32 %v15372_v15, %v15401_v44  ;;  %v10336_v5 = vld [vmem:[%s18568_s4 + $0xde0] sm:$0xff]  ;;  %v10303_v15 = vld [vmem:[%s18568_s4 + $0xd58] sm:$0xff] }
 0x438   : > { %6323 = vmatpush.msra.mxu3 %v10322_v27  ;;  %6193 = vmatpush.msra.mxu2 %v10305_v9  ;;  %v5636_v27 = vrot.slane %v10877_v36, 7  ;;  %v10319_v44 = vld [vmem:[%s18568_s4 + $0xd98] sm:$0xff]  ;;  %v10333_v36 = vld [vmem:[%s18568_s4 + $0xdc8] sm:$0xff] }
 0x439   : > { %v4949_v8 = vpop.f32.mrf.mxu2 }
 0x43a   : > { %v15523_v32 = vadd.f32 %v4949_v8, %v15354_v59  ;;  %v5055_v1 = vpop.f32.mrf.mxu3  ;;  %v10338_v59 = vld [vmem:[%s18568_s4 + $0xdf0] sm:$0xff]  ;;  %v10304_v8 = vld [vmem:[%s18568_s4 + $0xd60] sm:$0xff]  ;;  %6324 = vmatpush.msra.mxu3 %v10321_v55 }
 0x43b   : > { %v15529_v6 = vadd.f32 %v5055_v1, %v4863_v60  ;;  %v4846_v41 = vpop.f32.mrf.mxu1  ;;  %6429 = vmatpush.msra.mxu0 %v10338_v59  ;;  %v10337_v60 = vld [vmem:[%s18568_s4 + $0xde8] sm:$0xff]  ;;  %v15585_v59 = vld [vmem:[#allocation2 + $0xe0] sm:$0xff]  ;;  %6194 = vmatpush.msra.mxu2 %v10304_v8  ;;  %v10302_v8 = vld [vmem:[%s18568_s4 + $0xd50] sm:$0xff] }
 0x43c   : > { %v15540_v45 = vpop.f32.mrf.mxu0  ;;  %v4864_v1 = vadd.f32 %v4846_v41, %v15258_v28  ;;  %v15597_v41 = vld [vmem:[#allocation2 + $0xe8] sm:$0xff]  ;;  %6325 = vmatpush.msra.mxu3 %v10320_v18  ;;  %v10318_v18 = vld [vmem:[%s18568_s4 + $0xd90] sm:$0xff] }
 0x43d   : > { %6430 = vmatpush.msra.mxu0 %v10337_v60  ;;  %v18692_v55 = vrot.slane %v15597_v41, 1  ;;  %v5931_v25 = vrot.slane %v15597_v41, 2  ;;  %6195 = vmatpush.msra.mxu2 %v10303_v15  ;;  %v10880_v15 = vld [vmem:[#allocation2 + $0xf0] sm:$0xff] }
 0x43e   : > { %10231 = vmatmul.msk.f32.gmra.mxu1 %vm387_vm1, %v5648_v19  ;;  %10247 = vmatmul.msk.f32.gmra.mxu2 %vm387_vm1, %v15519_v7  ;;  %v5637_v19 = vrot.slane %v15585_v59, 7 }
 0x43f   : > { %10263 = vmatmul.msk.f32.gmra.mxu3 %vm387_vm1, %v5836_v40  ;;  %10279 = vmatmul.msk.f32.gmra.mxu0 %vm387_vm1, %v5942_v34  ;;  %v10335_v40 = vld [vmem:[%s18568_s4 + $0xdd8] sm:$0xff]  ;;  %v5835_v62 = vsel %vm1095_vm6, %v4879_v58, %v18692_v55  ;;  %v10317_v58 = vld [vmem:[%s18568_s4 + $0xd88] sm:$0xff] }
 0x440   : > { %6431 = vmatpush.msra.mxu0 %v10336_v5  ;;  %6326 = vmatpush.msra.mxu3 %v10319_v44  ;;  %v5941_v5 = vsel %vm1202_vm7, %v4985_v54, %v5931_v25  ;;  %v15645_v54 = vadd.f32 %v15407_v53, %v15436_v26  ;;  %v5638_v44 = vrot.slane %v10880_v15, 7  ;;  %v10300_v53 = vld [vmem:[%s18568_s4 + $0xd40] sm:$0xff] }
 0x441   : > { %v4952_v22 = vpop.f32.mrf.mxu2  ;;  %6196 = vmatpush.msra.mxu2 %v10302_v8  ;;  %v10316_v26 = vld [vmem:[%s18568_s4 + $0xd80] sm:$0xff] }
 0x442   : > { %v15595_v9 = vadd.f32 %v4952_v22, %v15394_v14  ;;  %v5058_v28 = vpop.f32.mrf.mxu3  ;;  %v5647_v14 = vsel %vm849_vm5, %v5636_v27, %v5637_v19  ;;  %6432 = vmatpush.msra.mxu0 %v10335_v40  ;;  %v10301_v22 = vld [vmem:[%s18568_s4 + $0xd48] sm:$0xff]  ;;  %6327 = vmatpush.msra.mxu3 %v10318_v18  ;;  %v10332_v18 = vld [vmem:[%s18568_s4 + $0xdc0] sm:$0xff] }
 0x443   : > { %v15604_v47 = vadd.f32 %v5058_v28, %v4864_v1  ;;  %v4849_v34 = vpop.f32.mrf.mxu1  ;;  %v10334_v1 = vld [vmem:[%s18568_s4 + $0xdd0] sm:$0xff]  ;;  %v15651_v28 = vld [vmem:[#allocation2 + $0xf8] sm:$0xff]  ;;  %6197 = vmatpush.msra.mxu2 %v10301_v22  ;;  %v18915_v22 = vrot.slane %v14660_v43, 1  ;;  %v10883_v43 = vld [vmem:[#allocation2 + $0x108] sm:$0xff] }
 0x444   : > { %v15606_v60 = vpop.f32.mrf.mxu0  ;;  %v4865_v27 = vadd.f32 %v4849_v34, %v15308_v37  ;;  %v5639_v25 = vrot.slane %v15651_v28, 7  ;;  %6433 = vmatpush.msra.mxu0 %v10334_v1  ;;  %v15663_v34 = vld [vmem:[#allocation2 + $0x100] sm:$0xff]  ;;  %6328 = vmatpush.msra.mxu3 %v10317_v58 }
 0x445   : > { %v5933_v8 = vrot.slane %v15663_v34, 2  ;;  %6198 = vmatpush.msra.mxu2 %v10300_v53  ;;  %v15699_v53 = vld [vmem:[#allocation2 + $0x110] sm:$0xff] }
 0x446   : > { %10232 = vmatmul.msk.f32.gmra.mxu1 %vm387_vm1, %v5647_v14  ;;  %10248 = vmatmul.msk.f32.gmra.mxu2 %vm387_vm1, %v15585_v59  ;;  %v18691_v14 = vrot.slane %v15663_v34, 1 }
 0x447   : > { %10264 = vmatmul.msk.f32.gmra.mxu3 %vm387_vm1, %v5835_v62  ;;  %10280 = vmatmul.msk.f32.gmra.mxu0 %vm387_vm1, %v5941_v5 }
 0x448   : > { %6434 = vmatpush.msra.mxu0 %v10333_v36  ;;  %6329 = vmatpush.msra.mxu3 %v10316_v26  ;;  %v5834_v58 = vsel %vm1095_vm6, %v18915_v22, %v18691_v14  ;;  %v5940_v36 = vsel %vm1202_vm7, %v18916_v3, %v5933_v8  ;;  %v5641_v26 = vrot.slane %v15699_v53, 7  ;;  %v5830_v3 = vrot.slane %v15337_v51, 1 }
 0x449   : > { %v4955_v19 = vpop.f32.mrf.mxu2 }
 0x44a   : > { %v15661_v40 = vadd.f32 %v4955_v19, %v15429_v35  ;;  %v5061_v37 = vpop.f32.mrf.mxu3  ;;  %v5646_v35 = vsel %vm849_vm5, %v5638_v44, %v5639_v25  ;;  %6435 = vmatpush.msra.mxu0 %v10332_v18  ;;  %v15696_v19 = vadd.f32 %v15444_v50, %v15475_v4  ;;  %v5640_v25 = vrot.slane %v10883_v43, 7 }
 0x44b   : > { %v15670_v62 = vadd.f32 %v5061_v37, %v4865_v27  ;;  %v4852_v5 = vpop.f32.mrf.mxu1  ;;  %v10354_v27 = vld [vmem:[%s18568_s4 + $0xe30] sm:$0xff]  ;;  %v5643_v4 = vrot.slane %v15337_v51, 7 }
 0x44c   : > { %v15672_v1 = vpop.f32.mrf.mxu0  ;;  %6535 = vmatpush.msrb.mxu1 %v10354_v27  ;;  %v4866_v15 = vadd.f32 %v4852_v5, %v15331_v24  ;;  %v5645_v50 = vsel %vm849_vm5, %v5640_v25, %v5641_v26  ;;  %v15711_v24 = vld [vmem:[#allocation2 + $0x130] sm:$0xff]  ;;  %v10353_v5 = vld [vmem:[%s18568_s4 + $0xe28] sm:$0xff] }
 0x44e   : > { %10233 = vmatmul.msk.f32.gmra.mxu1 %vm387_vm1, %v5646_v35  ;;  %10249 = vmatmul.msk.f32.gmra.mxu2 %vm387_vm1, %v15651_v28 }
 0x44f   : > { %10265 = vmatmul.msk.f32.gmra.mxu3 %vm387_vm1, %v5834_v58  ;;  %10281 = vmatmul.msk.f32.gmra.mxu0 %vm387_vm1, %v5940_v36  ;;  %v15727_v58 = vadd.f32 %v15483_v48, %v15523_v32  ;;  %v5831_v36 = vrot.slane %v15711_v24, 1 }
 0x450   : > { %6536 = vmatpush.msrb.mxu1 %v10353_v5  ;;  %v6029_v5 = vrot.slane %v15387_v17, 3 }
 0x451   : > { %v4958_v44 = vpop.f32.mrf.mxu2  ;;  %v15747_v26 = vsel %vm1095_vm6, %v5830_v3, %v5831_v36  ;;  %v6134_v3 = vrot.slane %v15387_v17, 4 }
 0x452   : > { %v15703_v37 = vadd.f32 %v4958_v44, %v15468_v0  ;;  %v5064_v8 = vpop.f32.mrf.mxu3  ;;  %v5642_v0 = vrot.slane %v15335_v61, 7 }
 0x453   : > { %v15705_v18 = vadd.f32 %v5064_v8, %v4866_v15  ;;  %v4855_v35 = vpop.f32.mrf.mxu1  ;;  %v10352_v8 = vld [vmem:[%s18568_s4 + $0xe20] sm:$0xff] }
 0x454   : > { %v15707_v22 = vpop.f32.mrf.mxu0  ;;  %v4867_v61 = vadd.f32 %v4855_v35, %v15364_v10  ;;  %v15741_v32 = vsel %vm849_vm5, %v5642_v0, %v5643_v4  ;;  %v15765_v35 = vadd.f32 %v15540_v45, %v15595_v9  ;;  %6537 = vmatpush.msrb.mxu1 %v10352_v8  ;;  %v6028_v4 = vrot.slane %v15397_v13, 3  ;;  %v15776_v45 = vld [vmem:[#allocation2 + $0x98] sm:$0xff] }
 0x455   : > { %v6364_v9 = vrot.slane %v15776_v45, 5 }
 0x456   : > { %10234 = vmatmul.msk.f32.gmra.mxu1 %vm387_vm1, %v5645_v50  ;;  %10250 = vmatmul.msk.f32.gmra.mxu2 %vm387_vm1, %v15699_v53  ;;  %v6051_v17 = vsel %vm1309_vm8, %v6028_v4, %v6029_v5  ;;  %v10351_v4 = vld [vmem:[%s18568_s4 + $0xe18] sm:$0xff]  ;;  %v15805_v5 = vadd.f32 %v15606_v60, %v15661_v40 }
 0x457   : > { %10266 = vmatmul.msk.f32.gmra.mxu3 %vm387_vm1, %v15096_v49  ;;  %10282 = vmatmul.msk.f32.gmra.mxu0 %vm387_vm1, %v15104_v38  ;;  %v5936_v49 = vrot.slane %v15337_v51, 2  ;;  %v5937_v38 = vrot.slane %v15711_v24, 2 }
 0x458   : > { %6538 = vmatpush.msrb.mxu1 %v10351_v4  ;;  %v18923_v4 = vld [vmem:[#allocation28_spill] sm:$0xff] }
 0x459   : > { %v4961_v27 = vpop.f32.mrf.mxu2  ;;  %v5938_v10 = vsel %vm1202_vm7, %v5936_v49, %v5937_v38 }
 0x45a   : > { %v15735_v15 = vadd.f32 %v4961_v27, %v15513_v30  ;;  %v5067_v44 = vpop.f32.mrf.mxu3  ;;  %v15758_v30 = vld [vmem:[#allocation2 + $0x90] sm:$0xff] }
 0x45b   : > { %v15737_v43 = vadd.f32 %v5067_v44, %v4867_v61  ;;  %v4858_v48 = vpop.f32.mrf.mxu1  ;;  %v6257_v38 = vrot.slane %v15758_v30, 4  ;;  %v6363_v61 = vrot.slane %v15758_v30, 5  ;;  %v18917_v44 = vld [vmem:[#allocation18_spill] sm:$0xff] }
 0x45c   : > { %v15743_v25 = vpop.f32.mrf.mxu0  ;;  %v4868_v50 = vadd.f32 %v4858_v48, %v15405_v42  ;;  %v18918_v48 = vld [vmem:[#allocation26_spill] sm:$0xff] }
 0x45e   : > { %10235 = vmatmul.msk.f32.gmra.mxu1 %vm387_vm1, %v15741_v32  ;;  %10251 = vmatmul.msk.f32.gmra.mxu2 %vm387_vm1, %v15337_v51 }
 0x45f   : > { %10267 = vmatmul.msk.f32.gmra.mxu3 %vm387_vm1, %v15747_v26  ;;  %10283 = vmatmul.msk.f32.gmra.mxu0 %vm387_vm1, %v5938_v10  ;;  %v18919_v10 = vrot.slane %v18918_v48, 4  ;;  %v15815_v48 = vld [vmem:[#allocation2 + $0xb0] sm:$0xff] }
 0x460   : > { %v6366_v60 = vrot.slane %v15815_v48, 5 }
 0x461   : > { %v4964_v0 = vpop.f32.mrf.mxu2  ;;  %v6280_v8 = vsel %vm618_vm4, %v6257_v38, %v18919_v10  ;;  %v6030_v38 = vrot.slane %v15432_v16, 3 }
 0x462   : > { %v15772_v36 = vadd.f32 %v4964_v0, %v15579_v29  ;;  %v5070_v49 = vpop.f32.mrf.mxu3  ;;  %v6149_v29 = vsel %vm618_vm4, %v18917_v44, %v6134_v3  ;;  %v15798_v0 = vld [vmem:[#allocation2 + $0xa8] sm:$0xff] }
 0x463   : > { %v15779_v42 = vadd.f32 %v5070_v49, %v4868_v50  ;;  %v5253_v27 = vpop.f32.mrf.mxu1  ;;  %v6386_v50 = vsel %vm651_vm3, %v6363_v61, %v6364_v9  ;;  %v18690_v61 = vrot.slane %v15438_v21, 3  ;;  %v6259_v44 = vrot.slane %v15798_v0, 4 }
 0x464   : > { %v15781_v13 = vpop.f32.mrf.mxu0  ;;  %v5277_v3 = vadd.f32 %v5253_v27, %v15442_v12 }
 0x465   : > { %v6050_v16 = vsel %vm1309_vm8, %v6030_v38, %v18690_v61  ;;  %v15843_v38 = vld [vmem:[#allocation2 + $0xc0] sm:$0xff]  ;;  %v15860_v61 = vld [vmem:[#allocation2 + $0xc8] sm:$0xff] }
 0x466   : > { %10292 = vmatmul.msk.f32.vlgmr.msra.gmra.mxu1 %vm387_vm1, %v6051_v17  ;;  %10308 = vmatmul.msk.f32.vlgmr.msra.gmra.mxu2 %vm387_vm1, %v6149_v29  ;;  %v6365_v29 = vrot.slane %v15798_v0, 5 }
 0x467   : > { %10324 = vmatmul.msk.f32.vlgmr.msra.gmra.mxu3 %vm387_vm1, %v6280_v8  ;;  %10340 = vmatmul.msk.f32.vlgmr.msra.gmra.mxu0 %vm387_vm1, %v6386_v50  ;;  %v18922_v8 = vld [vmem:[#allocation19_spill] sm:$0xff] }
 0x469   : > { %v5384_v49 = vpop.f32.mrf.mxu2 }
 0x46a   : > { %v15811_v9 = vadd.f32 %v5384_v49, %v15645_v54  ;;  %v5490_v17 = vpop.f32.mrf.mxu3  ;;  %v18920_v54 = vld [vmem:[#allocation25_spill] sm:$0xff]  ;;  %v6385_v49 = vsel %vm651_vm3, %v6365_v29, %v6366_v60  ;;  %v6032_v29 = vrot.slane %v15471_v20, 3  ;;  %v18694_v60 = vrot.slane %v15477_v31, 3 }
 0x46b   : > { %v15818_v40 = vadd.f32 %v5490_v17, %v5277_v3  ;;  %v5256_v12 = vpop.f32.mrf.mxu1  ;;  %v18921_v10 = vrot.slane %v18920_v54, 4  ;;  %v15836_v3 = vsel %vm618_vm4, %v6259_v44, %v18923_v4  ;;  %v10350_v17 = vld [vmem:[%s18568_s4 + $0xe10] sm:$0xff] }
 0x46c   : > { %v15820_v27 = vpop.f32.mrf.mxu0  ;;  %18924 = vst [vmem:[#allocation58_spill] sm:$0xff] %v15836_v3  ;;  %6539 = vmatpush.msrb.mxu1 %v10350_v17  ;;  %v5278_v44 = vadd.f32 %v5256_v12, %v15481_v56  ;;  %v6049_v20 = vsel %vm1309_vm8, %v6032_v29, %v18694_v60  ;;  %v10349_v29 = vld [vmem:[%s18568_s4 + $0xe08] sm:$0xff] }
 0x46d   : > { %v6148_v50 = vsel %vm618_vm4, %v18922_v8, %v18921_v10 }
 0x46e   : > { %10293 = vmatmul.msk.f32.gmra.mxu1 %vm387_vm1, %v6050_v16  ;;  %10309 = vmatmul.msk.f32.gmra.mxu2 %vm387_vm1, %v6148_v50  ;;  %v15850_v16 = vadd.f32 %v15672_v1, %v15703_v37  ;;  %v6261_v50 = vrot.slane %v15843_v38, 4  ;;  %v6368_v1 = vrot.slane %v15860_v61, 5 }
 0x46f   : > { %10325 = vmatmul.msk.f32.gmra.mxu3 %vm387_vm1, %v15836_v3  ;;  %10341 = vmatmul.msk.f32.gmra.mxu0 %vm387_vm1, %v6385_v49  ;;  %v6367_v49 = vrot.slane %v15843_v38, 5 }
 0x470   : > { %6540 = vmatpush.msrb.mxu1 %v10349_v29  ;;  %v6369_v29 = vrot.slane %v15885_v23, 5 }
 0x471   : > { %v5387_v54 = vpop.f32.mrf.mxu2  ;;  %v6384_v55 = vsel %vm651_vm3, %v6367_v49, %v6368_v1  ;;  %v15901_v49 = vadd.f32 %v15707_v22, %v15735_v15  ;;  %v6263_v15 = vrot.slane %v15885_v23, 4 }
 0x472   : > { %v15856_v10 = vadd.f32 %v5387_v54, %v15696_v19  ;;  %v5493_v8 = vpop.f32.mrf.mxu3  ;;  %v18925_v19 = vld [vmem:[#allocation27_spill] sm:$0xff]  ;;  %v18927_v54 = vld [vmem:[#allocation20_spill] sm:$0xff] }
 0x473   : > { %v15863_v37 = vadd.f32 %v5493_v8, %v5278_v44  ;;  %v5259_v56 = vpop.f32.mrf.mxu1  ;;  %v18926_v17 = vrot.slane %v18925_v19, 4  ;;  %v18928_v44 = vld [vmem:[#allocation44_spill] sm:$0xff]  ;;  %v6034_v19 = vrot.slane %v15519_v7, 3  ;;  %v10370_v7 = vld [vmem:[%s18568_s4 + $0xe70] sm:$0xff] }
 0x474   : > { %v15865_v12 = vpop.f32.mrf.mxu0  ;;  %v15881_v8 = vsel %vm618_vm4, %v6261_v50, %v18928_v44  ;;  %v10387_v50 = vld [vmem:[%s18568_s4 + $0xeb8] sm:$0xff]  ;;  %v5279_v1 = vadd.f32 %v5259_v56, %v15529_v6 }
 0x475   : > { %v6147_v14 = vsel %vm618_vm4, %v18927_v54, %v18926_v17  ;;  %18929 = vst [vmem:[#allocation59_spill] sm:$0xff] %v15881_v8  ;;  %v18698_v17 = vrot.slane %v15525_v2, 3  ;;  %6722 = vmatpush.msrb.mxu3 %v10387_v50  ;;  %v10402_v50 = vld [vmem:[%s18568_s4 + $0xef0] sm:$0xff] }
 0x476   : > { %10294 = vmatmul.msk.f32.gmra.mxu1 %vm387_vm1, %v6049_v20  ;;  %10310 = vmatmul.msk.f32.gmra.mxu2 %vm387_vm1, %v6147_v14  ;;  %v10371_v14 = vld [vmem:[%s18568_s4 + $0xe78] sm:$0xff] }
 0x477   : > { %10326 = vmatmul.msk.f32.gmra.mxu3 %vm387_vm1, %v15881_v8  ;;  %10342 = vmatmul.msk.f32.gmra.mxu0 %vm387_vm1, %v6384_v55  ;;  %v10403_v55 = vld [vmem:[%s18568_s4 + $0xef8] sm:$0xff] }
 0x478   : > { %6640 = vmatpush.msrb.mxu2 %v10371_v14  ;;  %6828 = vmatpush.msrb.mxu0 %v10403_v55  ;;  %v15914_v14 = vld [vmem:[#allocation2 + $0xe0] sm:$0xff] }
 0x479   : > { %v5390_v20 = vpop.f32.mrf.mxu2  ;;  %v6370_v60 = vrot.slane %v15914_v14, 5 }
 0x47a   : > { %v15910_v54 = vadd.f32 %v5390_v20, %v15727_v58  ;;  %v5496_v22 = vpop.f32.mrf.mxu3  ;;  %v10386_v58 = vld [vmem:[%s18568_s4 + $0xeb0] sm:$0xff]  ;;  %6641 = vmatpush.msrb.mxu2 %v10370_v7  ;;  %v18930_v20 = vld [vmem:[#allocation42_spill] sm:$0xff]  ;;  %6829 = vmatpush.msrb.mxu0 %v10402_v50  ;;  %v10385_v7 = vld [vmem:[%s18568_s4 + $0xea8] sm:$0xff] }
 0x47b   : > { %v15917_v6 = vadd.f32 %v5496_v22, %v5279_v1  ;;  %v5262_v56 = vpop.f32.mrf.mxu1  ;;  %6723 = vmatpush.msrb.mxu3 %v10386_v58  ;;  %v6048_v1 = vsel %vm1309_vm8, %v6034_v19, %v18698_v17  ;;  %v18931_v22 = vrot.slane %v18930_v20, 4  ;;  %v18933_v19 = vld [vmem:[#allocation46_spill] sm:$0xff]  ;;  %v15954_v50 = vld [vmem:[#allocation2 + $0xf0] sm:$0xff]  ;;  %v10401_v20 = vld [vmem:[%s18568_s4 + $0xee8] sm:$0xff]  ;;  %v6036_v17 = vrot.slane %v15585_v59, 3 }
 0x47c   : > { %v15928_v55 = vpop.f32.mrf.mxu0  ;;  %v15950_v58 = vsel %vm618_vm4, %v6263_v15, %v18933_v19  ;;  %v10384_v15 = vld [vmem:[%s18568_s4 + $0xea0] sm:$0xff]  ;;  %6642 = vmatpush.msrb.mxu2 %v10369_v52  ;;  %6830 = vmatpush.msrb.mxu0 %v10401_v20  ;;  %v10367_v52 = vld [vmem:[%s18568_s4 + $0xe58] sm:$0xff]  ;;  %v6371_v59 = vrot.slane %v15954_v50, 5 }
 0x47d   : > { %v6146_v63 = vsel %vm618_vm4, %v18932_v11, %v18931_v22  ;;  %18934 = vst [vmem:[#allocation60_spill] sm:$0xff] %v15950_v58  ;;  %v6383_v11 = vsel %vm651_vm3, %v6369_v29, %v6370_v60  ;;  %v10348_v60 = vld [vmem:[%s18568_s4 + $0xe00] sm:$0xff]  ;;  %6724 = vmatpush.msrb.mxu3 %v10385_v7  ;;  %v5280_v22 = vadd.f32 %v5262_v56, %v15604_v47  ;;  %v10383_v7 = vld [vmem:[%s18568_s4 + $0xe98] sm:$0xff]  ;;  %v6265_v47 = vrot.slane %v15954_v50, 4 }
 0x47e   : > { %10295 = vmatmul.msk.f32.gmra.mxu1 %vm387_vm1, %v6048_v1  ;;  %10311 = vmatmul.msk.f32.gmra.mxu2 %vm387_vm1, %v6146_v63  ;;  %v10368_v63 = vld [vmem:[%s18568_s4 + $0xe60] sm:$0xff]  ;;  %v15976_v1 = vadd.f32 %v15743_v25, %v15772_v36  ;;  %v15992_v56 = vld [vmem:[#allocation2 + $0xf8] sm:$0xff] }
 0x47f   : > { %10327 = vmatmul.msk.f32.gmra.mxu3 %vm387_vm1, %v15950_v58  ;;  %10343 = vmatmul.msk.f32.gmra.mxu0 %vm387_vm1, %v6383_v11  ;;  %v10400_v29 = vld [vmem:[%s18568_s4 + $0xee0] sm:$0xff]  ;;  %v6372_v20 = vrot.slane %v15992_v56, 5 }
 0x480   : > { %6541 = vmatpush.msrb.mxu1 %v10348_v60  ;;  %6643 = vmatpush.msrb.mxu2 %v10368_v63  ;;  %v10399_v60 = vld [vmem:[%s18568_s4 + $0xed8] sm:$0xff]  ;;  %v18936_v58 = vld [vmem:[#allocation43_spill] sm:$0xff] }
 0x481   : > { %v5393_v11 = vpop.f32.mrf.mxu2  ;;  %6725 = vmatpush.msrb.mxu3 %v10384_v15  ;;  %6831 = vmatpush.msrb.mxu0 %v10400_v29  ;;  %v18937_v63 = vrot.slane %v18936_v58, 4  ;;  %v18938_v15 = vld [vmem:[#allocation16_spill] sm:$0xff]  ;;  %v10366_v29 = vld [vmem:[%s18568_s4 + $0xe50] sm:$0xff] }
 0x482   : > { %v15988_v25 = vadd.f32 %v5393_v11, %v15765_v35  ;;  %v5499_v36 = vpop.f32.mrf.mxu3  ;;  %6644 = vmatpush.msrb.mxu2 %v10367_v52  ;;  %v18935_v11 = vrot.slane %v15597_v41, 3  ;;  %v6382_v52 = vsel %vm651_vm3, %v6371_v59, %v6372_v20  ;;  %v16045_v59 = vadd.f32 %v15781_v13, %v15811_v9  ;;  %v10397_v20 = vld [vmem:[%s18568_s4 + $0xec8] sm:$0xff]  ;;  %v10380_v13 = vld [vmem:[%s18568_s4 + $0xe80] sm:$0xff] }
 0x483   : > { %v15998_v19 = vadd.f32 %v5499_v36, %v5280_v22  ;;  %v5265_v44 = vpop.f32.mrf.mxu1  ;;  %6726 = vmatpush.msrb.mxu3 %v10383_v7  ;;  %v6145_v8 = vsel %vm618_vm4, %v18938_v15, %v18937_v63  ;;  %6832 = vmatpush.msrb.mxu0 %v10399_v60  ;;  %v10382_v22 = vld [vmem:[%s18568_s4 + $0xe90] sm:$0xff]  ;;  %v16026_v7 = vld [vmem:[#allocation2 + $0x108] sm:$0xff]  ;;  %v6038_v63 = vrot.slane %v15651_v28, 3 }
 0x484   : > { %v16000_v35 = vpop.f32.mrf.mxu0  ;;  %v6047_v4 = vsel %vm1309_vm8, %v6036_v17, %v18935_v11  ;;  %v18939_v17 = vld [vmem:[#allocation47_spill] sm:$0xff]  ;;  %v10398_v36 = vld [vmem:[%s18568_s4 + $0xed0] sm:$0xff]  ;;  %6645 = vmatpush.msrb.mxu2 %v10366_v29  ;;  %v5281_v60 = vadd.f32 %v5265_v44, %v15670_v62  ;;  %v6267_v62 = vrot.slane %v16026_v7, 4  ;;  %v6373_v28 = vrot.slane %v16026_v7, 5 }
 0x485   : > { %v16022_v58 = vsel %vm618_vm4, %v6265_v47, %v18939_v17  ;;  %v10419_v47 = vld [vmem:[%s18568_s4 + $0xf38] sm:$0xff]  ;;  %6727 = vmatpush.msrb.mxu3 %v10382_v22  ;;  %6833 = vmatpush.msrb.mxu0 %v10398_v36  ;;  %v16064_v44 = vld [vmem:[#allocation2 + $0x110] sm:$0xff]  ;;  %v10396_v36 = vld [vmem:[%s18568_s4 + $0xec0] sm:$0xff] }
 0x486   : > { %10296 = vmatmul.msk.f32.gmra.mxu1 %vm387_vm1, %v6047_v4  ;;  %10312 = vmatmul.msk.f32.gmra.mxu2 %vm387_vm1, %v6145_v8  ;;  %18940 = vst [vmem:[#allocation61_spill] sm:$0xff] %v16022_v58  ;;  %v10365_v4 = vld [vmem:[%s18568_s4 + $0xe48] sm:$0xff]  ;;  %v6374_v22 = vrot.slane %v16064_v44, 5 }
 0x487   : > { %10328 = vmatmul.msk.f32.gmra.mxu3 %vm387_vm1, %v16022_v58  ;;  %10344 = vmatmul.msk.f32.gmra.mxu0 %vm387_vm1, %v6382_v52  ;;  %v10381_v8 = vld [vmem:[%s18568_s4 + $0xe88] sm:$0xff]  ;;  %v10364_v52 = vld [vmem:[%s18568_s4 + $0xe40] sm:$0xff]  ;;  %v18942_v58 = vld [vmem:[#allocation45_spill] sm:$0xff] }
 0x488   : > { %6934 = vmatpush.msra.mxu1 %v10419_v47  ;;  %6646 = vmatpush.msrb.mxu2 %v10365_v4  ;;  %v18943_v4 = vrot.slane %v18942_v58, 4  ;;  %v10418_v58 = vld [vmem:[%s18568_s4 + $0xf30] sm:$0xff] }
 0x489   : > { %v5396_v11 = vpop.f32.mrf.mxu2  ;;  %6728 = vmatpush.msrb.mxu3 %v10381_v8  ;;  %6834 = vmatpush.msrb.mxu0 %v10397_v20  ;;  %v18944_v8 = vld [vmem:[#allocation34_spill] sm:$0xff] }
 0x48a   : > { %v16060_v9 = vadd.f32 %v5396_v11, %v15805_v5  ;;  %v5502_v29 = vpop.f32.mrf.mxu3  ;;  %6647 = vmatpush.msrb.mxu2 %v10364_v52  ;;  %v18941_v11 = vrot.slane %v15663_v34, 3  ;;  %v6144_v3 = vsel %vm618_vm4, %v18944_v8, %v18943_v4  ;;  %v18945_v20 = vld [vmem:[#allocation50_spill] sm:$0xff]  ;;  %v6381_v52 = vsel %vm651_vm3, %v6373_v28, %v6374_v22  ;;  %6935 = vmatpush.msra.mxu1 %v10418_v58  ;;  %v10417_v8 = vld [vmem:[%s18568_s4 + $0xf28] sm:$0xff] }
 0x48b   : > { %v16070_v15 = vadd.f32 %v5502_v29, %v5281_v60  ;;  %v5268_v47 = vpop.f32.mrf.mxu1  ;;  %6729 = vmatpush.msrb.mxu3 %v10380_v13  ;;  %6835 = vmatpush.msrb.mxu0 %v10396_v36  ;;  %v16088_v60 = vsel %vm618_vm4, %v6267_v62, %v18945_v20  ;;  %v6040_v13 = vrot.slane %v15699_v53, 3  ;;  %v10891_v29 = vld [vmem:[#allocation2 + $0x118] sm:$0xff]  ;;  %v6042_v53 = vrot.slane %v15337_v51, 3 }
 0x48c   : > { %v16072_v5 = vpop.f32.mrf.mxu0  ;;  %v6046_v17 = vsel %vm1309_vm8, %v6038_v63, %v18941_v11  ;;  %v6041_v62 = vrot.slane %v10891_v29, 3  ;;  %6936 = vmatpush.msra.mxu1 %v10417_v8  ;;  %v6470_v8 = vrot.slane %v15776_v45, 6  ;;  %v6583_v20 = vrot.slane %v15954_v50, 7 }
 0x48e   : > { %10297 = vmatmul.msk.f32.gmra.mxu1 %vm387_vm1, %v6046_v17  ;;  %10313 = vmatmul.msk.f32.gmra.mxu2 %vm387_vm1, %v6144_v3  ;;  %v16100_v3 = vadd.f32 %v15820_v27, %v15856_v10  ;;  %v5282_v17 = vadd.f32 %v5268_v47, %v15705_v18  ;;  %v6045_v27 = vsel %vm1309_vm8, %v6040_v13, %v6041_v62  ;;  %v16113_v10 = vld [vmem:[#allocation2 + $0x138] sm:$0xff]  ;;  %v16115_v18 = vld [vmem:[#allocation2 + $0x140] sm:$0xff]  ;;  %v6141_v47 = vrot.slane %v15711_v24, 4 }
 0x48f   : > { %10329 = vmatmul.msk.f32.gmra.mxu3 %vm387_vm1, %v16088_v60  ;;  %10345 = vmatmul.msk.f32.gmra.mxu0 %vm387_vm1, %v6381_v52  ;;  %v16132_v52 = vadd.f32 %v15865_v12, %v15910_v54  ;;  %v6378_v58 = vrot.slane %v16115_v18, 5  ;;  %v18946_v62 = vrot.slane %v15337_v51, 4  ;;  %v10416_v51 = vld [vmem:[%s18568_s4 + $0xf20] sm:$0xff] }
 0x490   : > { %6937 = vmatpush.msra.mxu1 %v10416_v51  ;;  %v6471_v51 = vrot.slane %v15798_v0, 6 }
 0x491   : > { %v5399_v63 = vpop.f32.mrf.mxu2 }
 0x492   : > { %v16105_v28 = vadd.f32 %v5399_v63, %v15850_v16  ;;  %v5505_v22 = vpop.f32.mrf.mxu3  ;;  %v6043_v16 = vrot.slane %v15711_v24, 3 }
 0x493   : > { %v16107_v36 = vadd.f32 %v5505_v22, %v5282_v17  ;;  %v5271_v11 = vpop.f32.mrf.mxu1  ;;  %v16154_v22 = vsel %vm618_vm4, %v18946_v62, %v6141_v47  ;;  %v10415_v62 = vld [vmem:[%s18568_s4 + $0xf18] sm:$0xff] }
 0x494   : > { %v16109_v4 = vpop.f32.mrf.mxu0  ;;  %v5283_v24 = vadd.f32 %v5271_v11, %v15737_v43  ;;  %v16148_v54 = vsel %vm1309_vm8, %v6042_v53, %v6043_v16  ;;  %v16177_v11 = vadd.f32 %v15928_v55, %v15988_v25  ;;  %v6469_v53 = vrot.slane %v15758_v30, 6  ;;  %6938 = vmatpush.msra.mxu1 %v10415_v62 }
 0x496   : > { %10298 = vmatmul.msk.f32.gmra.mxu1 %vm387_vm1, %v6045_v27  ;;  %10314 = vmatmul.msk.f32.gmra.mxu2 %vm387_vm1, %v18910_v33  ;;  %v6271_v33 = vrot.slane %v16113_v10, 4 }
 0x497   : > { %10330 = vmatmul.msk.f32.gmra.mxu3 %vm387_vm1, %v15370_v57  ;;  %10346 = vmatmul.msk.f32.gmra.mxu0 %vm387_vm1, %v15376_v46  ;;  %v16136_v57 = vrot.slane %v16115_v18, 4  ;;  %v6377_v46 = vrot.slane %v16113_v10, 5 }
 0x499   : > { %v5402_v17 = vpop.f32.mrf.mxu2  ;;  %v16161_v43 = vsel %vm618_vm4, %v6271_v33, %v16136_v57  ;;  %v6575_v33 = vrot.slane %v15758_v30, 7  ;;  %v18947_v30 = vrot.slane %v15438_v21, 1 }
 0x49a   : > { %v16142_v63 = vadd.f32 %v5402_v17, %v15901_v49  ;;  %v5508_v13 = vpop.f32.mrf.mxu3  ;;  %v6379_v49 = vsel %vm651_vm3, %v6377_v46, %v6378_v58  ;;  %v6576_v46 = vrot.slane %v15776_v45, 7  ;;  %v6763_v17 = vrot.slane %v15776_v45, 1 }
 0x49b   : > { %v16144_v29 = vadd.f32 %v5508_v13, %v5283_v24  ;;  %v5274_v12 = vpop.f32.mrf.mxu1 }
 0x49c   : > { %v16156_v27 = vpop.f32.mrf.mxu0  ;;  %v5284_v16 = vadd.f32 %v5274_v12, %v15779_v42  ;;  %v6492_v42 = vsel %vm685_vm2, %v6469_v53, %v6470_v8  ;;  %v6598_v12 = vsel %vm849_vm5, %v6575_v33, %v6576_v46  ;;  %v6577_v8 = vrot.slane %v15798_v0, 7 }
 0x49d   : > { %v6578_v33 = vrot.slane %v15815_v48, 7 }
 0x49e   : > { %10299 = vmatmul.msk.f32.gmra.mxu1 %vm387_vm1, %v16148_v54  ;;  %10315 = vmatmul.msk.f32.gmra.mxu2 %vm387_vm1, %v16154_v22 }
 0x49f   : > { %10331 = vmatmul.msk.f32.gmra.mxu3 %vm387_vm1, %v16161_v43  ;;  %10347 = vmatmul.msk.f32.gmra.mxu0 %vm387_vm1, %v6379_v49  ;;  %v16210_v49 = vadd.f32 %v16000_v35, %v16060_v9  ;;  %v16231_v0 = vsel %vm849_vm5, %v6577_v8, %v6578_v33 }
 0x4a1   : > { %v5405_v47 = vpop.f32.mrf.mxu2 }
 0x4a2   : > { %v16185_v58 = vadd.f32 %v5405_v47, %v15976_v1  ;;  %v5511_v24 = vpop.f32.mrf.mxu3  ;;  %v6786_v1 = vsel %vm1095_vm6, %v6763_v17, %v18947_v30  ;;  %v6472_v47 = vrot.slane %v15815_v48, 6  ;;  %v6765_v17 = vrot.slane %v15815_v48, 1 }
 0x4a3   : > { %v16188_v55 = vadd.f32 %v5511_v24, %v5284_v16  ;;  %v5702_v25 = vpop.f32.mrf.mxu1  ;;  %v16249_v30 = vadd.f32 %v16072_v5, %v16105_v28 }
 0x4a4   : > { %v16190_v13 = vpop.f32.mrf.mxu0  ;;  %v5726_v53 = vadd.f32 %v5702_v25, %v15818_v40  ;;  %v16227_v40 = vsel %vm685_vm2, %v6471_v51, %v6472_v47  ;;  %v6580_v47 = vrot.slane %v15860_v61, 7 }
 0x4a6   : > { %10356 = vmatmul.msk.f32.vlgmr.msrb.gmra.mxu1 %vm387_vm1, %v6492_v42  ;;  %10372 = vmatmul.msk.f32.vlgmr.msrb.gmra.mxu2 %vm387_vm1, %v6598_v12  ;;  %v10414_v12 = vld [vmem:[%s18568_s4 + $0xf10] sm:$0xff] }
 0x4a7   : > { %10388 = vmatmul.msk.f32.vlgmr.msrb.gmra.mxu3 %vm387_vm1, %v15776_v45  ;;  %10404 = vmatmul.msk.f32.vlgmr.msrb.gmra.mxu0 %vm387_vm1, %v6786_v1  ;;  %v6473_v1 = vrot.slane %v15843_v38, 6 }
 0x4a8   : > { %6939 = vmatpush.msra.mxu1 %v10414_v12  ;;  %v10451_v12 = vld [vmem:[%s18568_s4 + $0xfb8] sm:$0xff] }
 0x4a9   : > { %v5784_v16 = vpop.f32.mrf.mxu2  ;;  %7138 = vmatpush.msra.mxu3 %v10451_v12 }
 0x4aa   : > { %v16218_v46 = vadd.f32 %v5784_v16, %v16045_v59  ;;  %v5890_v24 = vpop.f32.mrf.mxu3  ;;  %v18948_v59 = vrot.slane %v15477_v31, 1  ;;  %v6579_v16 = vrot.slane %v15843_v38, 7 }
 0x4ab   : > { %v16221_v35 = vadd.f32 %v5890_v24, %v5726_v53  ;;  %v5705_v9 = vpop.f32.mrf.mxu1  ;;  %v6474_v53 = vrot.slane %v15860_v61, 6  ;;  %v6767_v24 = vrot.slane %v15860_v61, 1 }
 0x4ac   : > { %v16223_v42 = vpop.f32.mrf.mxu0  ;;  %v6785_v25 = vsel %vm1095_vm6, %v6765_v17, %v18948_v59  ;;  %v5727_v62 = vadd.f32 %v5705_v9, %v15863_v37  ;;  %v16270_v38 = vsel %vm849_vm5, %v6579_v16, %v6580_v47  ;;  %v10413_v59 = vld [vmem:[%s18568_s4 + $0xf08] sm:$0xff]  ;;  %v6476_v47 = vrot.slane %v15914_v14, 6 }
 0x4ad   : > { %v16266_v37 = vsel %vm685_vm2, %v6473_v1, %v6474_v53  ;;  %v16294_v1 = vadd.f32 %v16109_v4, %v16142_v63  ;;  %6940 = vmatpush.msra.mxu1 %v10413_v59 }
 0x4ae   : > { %10357 = vmatmul.msk.f32.gmra.mxu1 %vm387_vm1, %v16227_v40  ;;  %10373 = vmatmul.msk.f32.gmra.mxu2 %vm387_vm1, %v16231_v0 }
 0x4af   : > { %10389 = vmatmul.msk.f32.gmra.mxu3 %vm387_vm1, %v15815_v48  ;;  %10405 = vmatmul.msk.f32.gmra.mxu0 %vm387_vm1, %v6785_v25  ;;  %v10435_v25 = vld [vmem:[%s18568_s4 + $0xf78] sm:$0xff] }
 0x4b0   : > { %7040 = vmatpush.msra.mxu2 %v10435_v25 }
 0x4b1   : > { %v5787_v51 = vpop.f32.mrf.mxu2 }
 0x4b2   : > { %v16257_v8 = vadd.f32 %v5787_v51, %v16100_v3  ;;  %v5893_v33 = vpop.f32.mrf.mxu3  ;;  %v18949_v3 = vrot.slane %v15525_v2, 1  ;;  %v10467_v51 = vld [vmem:[%s18568_s4 + $0xff8] sm:$0xff] }
 0x4b3   : > { %v16260_v5 = vadd.f32 %v5893_v33, %v5727_v62  ;;  %v5708_v28 = vpop.f32.mrf.mxu1  ;;  %v6475_v62 = vrot.slane %v15885_v23, 6  ;;  %v6581_v33 = vrot.slane %v15885_v23, 7  ;;  %7269 = vmatpush.msra.mxu0 %v10467_v51  ;;  %v10450_v23 = vld [vmem:[%s18568_s4 + $0xfb0] sm:$0xff]  ;;  %v10433_v51 = vld [vmem:[%s18568_s4 + $0xf68] sm:$0xff] }
 0x4b4   : > { %v16262_v17 = vpop.f32.mrf.mxu0  ;;  %v6784_v9 = vsel %vm1095_vm6, %v6767_v24, %v18949_v3  ;;  %v5728_v53 = vadd.f32 %v5708_v28, %v15917_v6  ;;  %v6582_v24 = vrot.slane %v15914_v14, 7  ;;  %v6769_v3 = vrot.slane %v15914_v14, 1  ;;  %v10434_v6 = vld [vmem:[%s18568_s4 + $0xf70] sm:$0xff]  ;;  %7139 = vmatpush.msra.mxu3 %v10450_v23  ;;  %v10464_v23 = vld [vmem:[%s18568_s4 + $0xfe0] sm:$0xff] }
 0x4b5   : > { %v10466_v28 = vld [vmem:[%s18568_s4 + $0xff0] sm:$0xff]  ;;  %7041 = vmatpush.msra.mxu2 %v10434_v6  ;;  %v16323_v25 = vsel %vm685_vm2, %v6475_v62, %v6476_v47  ;;  %v18952_v62 = vrot.slane %v15597_v41, 1  ;;  %v10465_v47 = vld [vmem:[%s18568_s4 + $0xfe8] sm:$0xff]  ;;  %v6477_v6 = vrot.slane %v15954_v50, 6  ;;  %v10463_v50 = vld [vmem:[%s18568_s4 + $0xfd8] sm:$0xff] }
 0x4b6   : > { %10358 = vmatmul.msk.f32.gmra.mxu1 %vm387_vm1, %v16266_v37  ;;  %10374 = vmatmul.msk.f32.gmra.mxu2 %vm387_vm1, %v16270_v38  ;;  %18950 = vst [vmem:[#allocation38_spill] sm:$0xff] %v16323_v25  ;;  %v16327_v12 = vsel %vm849_vm5, %v6581_v33, %v6582_v24  ;;  %v10432_v33 = vld [vmem:[%s18568_s4 + $0xf60] sm:$0xff] }
 0x4b7   : > { %10390 = vmatmul.msk.f32.gmra.mxu3 %vm387_vm1, %v15860_v61  ;;  %10406 = vmatmul.msk.f32.gmra.mxu0 %vm387_vm1, %v6784_v9  ;;  %18951 = vst [vmem:[#allocation40_spill] sm:$0xff] %v16327_v12  ;;  %v10448_v24 = vld [vmem:[%s18568_s4 + $0xfa0] sm:$0xff] }
 0x4b8   : > { %7270 = vmatpush.msra.mxu0 %v10466_v28  ;;  %7042 = vmatpush.msra.mxu2 %v10433_v51 }
 0x4b9   : > { %v5790_v16 = vpop.f32.mrf.mxu2 }
 0x4ba   : > { %v16305_v4 = vadd.f32 %v5790_v16, %v16132_v52  ;;  %v5896_v63 = vpop.f32.mrf.mxu3  ;;  %v6783_v16 = vsel %vm1095_vm6, %v6769_v3, %v18952_v62  ;;  %v16360_v3 = vadd.f32 %v16156_v27, %v16185_v58  ;;  %7271 = vmatpush.msra.mxu0 %v10465_v47  ;;  %v10431_v27 = vld [vmem:[%s18568_s4 + $0xf58] sm:$0xff]  ;;  %7043 = vmatpush.msra.mxu2 %v10432_v33 }
 0x4bb   : > { %v16308_v9 = vadd.f32 %v5896_v63, %v5728_v53  ;;  %v5711_v59 = vpop.f32.mrf.mxu1  ;;  %v10449_v53 = vld [vmem:[%s18568_s4 + $0xfa8] sm:$0xff]  ;;  %v10412_v63 = vld [vmem:[%s18568_s4 + $0xf00] sm:$0xff]  ;;  %v10447_v58 = vld [vmem:[%s18568_s4 + $0xf98] sm:$0xff] }
 0x4bc   : > { %v16319_v52 = vpop.f32.mrf.mxu0  ;;  %7140 = vmatpush.msra.mxu3 %v10449_v53  ;;  %v5729_v28 = vadd.f32 %v5711_v59, %v15998_v19  ;;  %6941 = vmatpush.msra.mxu1 %v10412_v63  ;;  %v6771_v59 = vrot.slane %v15992_v56, 1 }
 0x4bd   : > { %7272 = vmatpush.msra.mxu0 %v10464_v23  ;;  %7044 = vmatpush.msra.mxu2 %v10431_v27  ;;  %v10446_v23 = vld [vmem:[%s18568_s4 + $0xf90] sm:$0xff]  ;;  %v16426_v27 = vadd.f32 %v16190_v13, %v16218_v46  ;;  %v10428_v13 = vld [vmem:[%s18568_s4 + $0xf40] sm:$0xff] }
 0x4be   : > { %10359 = vmatmul.msk.f32.gmra.mxu1 %vm387_vm1, %v16323_v25  ;;  %10375 = vmatmul.msk.f32.gmra.mxu2 %vm387_vm1, %v16327_v12  ;;  %v6584_v12 = vrot.slane %v15992_v56, 7  ;;  %v10444_v46 = vld [vmem:[%s18568_s4 + $0xf80] sm:$0xff] }
 0x4bf   : > { %10391 = vmatmul.msk.f32.gmra.mxu3 %vm387_vm1, %v15914_v14  ;;  %10407 = vmatmul.msk.f32.gmra.mxu0 %vm387_vm1, %v6783_v16  ;;  %v6478_v16 = vrot.slane %v15992_v56, 6 }
 0x4c0   : > { %7141 = vmatpush.msra.mxu3 %v10448_v24  ;;  %v16393_v33 = vsel %vm849_vm5, %v6583_v20, %v6584_v12  ;;  %7273 = vmatpush.msra.mxu0 %v10463_v50  ;;  %v10430_v24 = vld [vmem:[%s18568_s4 + $0xf50] sm:$0xff] }
 0x4c1   : > { %v5793_v62 = vpop.f32.mrf.mxu2  ;;  %18954 = vst [vmem:[#allocation8_spill] sm:$0xff] %v16393_v33  ;;  %v10462_v12 = vld [vmem:[%s18568_s4 + $0xfd0] sm:$0xff]  ;;  %7045 = vmatpush.msra.mxu2 %v10430_v24 }
 0x4c2   : > { %v16377_v51 = vadd.f32 %v5793_v62, %v16177_v11  ;;  %v5899_v19 = vpop.f32.mrf.mxu3  ;;  %7142 = vmatpush.msra.mxu3 %v10447_v58  ;;  %v16389_v11 = vsel %vm685_vm2, %v6477_v6, %v6478_v16  ;;  %v18955_v6 = vrot.slane %v15663_v34, 1  ;;  %v10445_v62 = vld [vmem:[%s18568_s4 + $0xf88] sm:$0xff]  ;;  %v10483_v16 = vld [vmem:[%s18568_s4 + $0x1038] sm:$0xff]  ;;  %v6479_v58 = vrot.slane %v16026_v7, 6  ;;  %7274 = vmatpush.msra.mxu0 %v10462_v12  ;;  %v10460_v12 = vld [vmem:[%s18568_s4 + $0xfc0] sm:$0xff] }
 0x4c3   : > { %v16383_v53 = vadd.f32 %v5899_v19, %v5729_v28  ;;  %v5714_v47 = vpop.f32.mrf.mxu1  ;;  %18953 = vst [vmem:[#allocation6_spill] sm:$0xff] %v16389_v11  ;;  %v10429_v28 = vld [vmem:[%s18568_s4 + $0xf48] sm:$0xff]  ;;  %7375 = vmatpush.msrb.mxu1 %v10483_v16 }
 0x4c4   : > { %v16385_v63 = vpop.f32.mrf.mxu0  ;;  %v6782_v20 = vsel %vm1095_vm6, %v6771_v59, %v18955_v6  ;;  %7143 = vmatpush.msra.mxu3 %v10446_v23  ;;  %v10461_v19 = vld [vmem:[%s18568_s4 + $0xfc8] sm:$0xff]  ;;  %v5730_v59 = vadd.f32 %v5714_v47, %v16070_v15  ;;  %v6480_v6 = vrot.slane %v16064_v44, 6  ;;  %v6773_v47 = vrot.slane %v16064_v44, 1  ;;  %v16446_v23 = vld [vmem:[#allocation2 + $0x118] sm:$0xff]  ;;  %7046 = vmatpush.msra.mxu2 %v10429_v28 }
 0x4c5   : > { %7275 = vmatpush.msra.mxu0 %v10461_v19 }
 0x4c6   : > { %10360 = vmatmul.msk.f32.gmra.mxu1 %vm387_vm1, %v16389_v11  ;;  %10376 = vmatmul.msk.f32.gmra.mxu2 %vm387_vm1, %v16393_v33  ;;  %v6586_v33 = vrot.slane %v16064_v44, 7 }
 0x4c7   : > { %10392 = vmatmul.msk.f32.gmra.mxu3 %vm387_vm1, %v15992_v56  ;;  %10408 = vmatmul.msk.f32.gmra.mxu0 %vm387_vm1, %v6782_v20  ;;  %v6585_v20 = vrot.slane %v16026_v7, 7  ;;  %v6774_v7 = vrot.slane %v16446_v23, 1 }
 0x4c8   : > { %7144 = vmatpush.msra.mxu3 %v10445_v62  ;;  %7047 = vmatpush.msra.mxu2 %v10428_v13 }
 0x4c9   : > { %v5796_v50 = vpop.f32.mrf.mxu2  ;;  %v16462_v28 = vsel %vm849_vm5, %v6585_v20, %v6586_v33  ;;  %7276 = vmatpush.msra.mxu0 %v10460_v12  ;;  %v6781_v62 = vsel %vm1095_vm6, %v6773_v47, %v6774_v7 }
 0x4ca   : > { %v16443_v24 = vadd.f32 %v5796_v50, %v16210_v49  ;;  %v5902_v15 = vpop.f32.mrf.mxu3  ;;  %7145 = vmatpush.msra.mxu3 %v10444_v46  ;;  %v16458_v49 = vsel %vm685_vm2, %v6479_v58, %v6480_v6  ;;  %v10893_v58 = vld [vmem:[#allocation2 + $0x120] sm:$0xff]  ;;  %v10482_v50 = vld [vmem:[%s18568_s4 + $0x1030] sm:$0xff]  ;;  %v16481_v6 = vadd.f32 %v16223_v42, %v16257_v8  ;;  %v6484_v42 = vrot.slane %v16115_v18, 6 }
 0x4cb   : > { %v16452_v11 = vadd.f32 %v5902_v15, %v5730_v59  ;;  %v5717_v25 = vpop.f32.mrf.mxu1  ;;  %v6481_v19 = vrot.slane %v10893_v58, 6  ;;  %v16473_v59 = vld [vmem:[#allocation2 + $0x128] sm:$0xff]  ;;  %7376 = vmatpush.msrb.mxu1 %v10482_v50  ;;  %v6590_v8 = vrot.slane %v16115_v18, 7 }
 0x4cc   : > { %v16454_v16 = vpop.f32.mrf.mxu0  ;;  %v6482_v33 = vrot.slane %v16473_v59, 6  ;;  %v5731_v20 = vadd.f32 %v5717_v25, %v16107_v36  ;;  %v16493_v58 = vld [vmem:[#allocation2 + $0x148] sm:$0xff]  ;;  %v6483_v36 = vrot.slane %v16113_v10, 6 }
 0x4cd   : > { %v10481_v25 = vld [vmem:[%s18568_s4 + $0x1028] sm:$0xff] }
 0x4ce   : > { %10361 = vmatmul.msk.f32.gmra.mxu1 %vm387_vm1, %v16458_v49  ;;  %10377 = vmatmul.msk.f32.gmra.mxu2 %vm387_vm1, %v16462_v28  ;;  %v6486_v12 = vsel %vm685_vm2, %v6481_v19, %v6482_v33  ;;  %v6777_v19 = vrot.slane %v16115_v18, 1  ;;  %v6778_v33 = vrot.slane %v16493_v58, 1 }
 0x4cf   : > { %10393 = vmatmul.msk.f32.gmra.mxu3 %vm387_vm1, %v16064_v44  ;;  %10409 = vmatmul.msk.f32.gmra.mxu0 %vm387_vm1, %v6781_v62 }
 0x4d0   : > { %7377 = vmatpush.msrb.mxu1 %v10481_v25 }
 0x4d1   : > { %v5799_v13 = vpop.f32.mrf.mxu2 }
 0x4d2   : > { %v16485_v46 = vadd.f32 %v5799_v13, %v16249_v30  ;;  %v5905_v15 = vpop.f32.mrf.mxu3  ;;  %v6589_v30 = vrot.slane %v16113_v10, 7 }
 0x4d3   : > { %v16487_v47 = vadd.f32 %v5905_v15, %v5731_v20  ;;  %v5720_v7 = vpop.f32.mrf.mxu1 }
 0x4d4   : > { %v16491_v62 = vpop.f32.mrf.mxu0 }
 0x4d6   : > { %10362 = vmatmul.msk.f32.gmra.mxu1 %vm387_vm1, %v6486_v12  ;;  %10378 = vmatmul.msk.f32.gmra.mxu2 %vm387_vm1, %v15741_v32  ;;  %v16511_v32 = vadd.f32 %v16262_v17, %v16305_v4  ;;  %v16523_v12 = vsel %vm685_vm2, %v6483_v36, %v6484_v42  ;;  %v16527_v17 = vsel %vm849_vm5, %v6589_v30, %v6590_v8  ;;  %v6869_v30 = vrot.slane %v15776_v45, 2  ;;  %v10895_v8 = vld [vmem:[#allocation2 + $0xa0] sm:$0xff] }
 0x4d7   : > { %10394 = vmatmul.msk.f32.gmra.mxu3 %vm387_vm1, %v16473_v59  ;;  %10410 = vmatmul.msk.f32.gmra.mxu0 %vm387_vm1, %v15747_v26  ;;  %v5732_v26 = vadd.f32 %v5720_v7, %v16144_v29  ;;  %v6779_v29 = vsel %vm1095_vm6, %v6777_v19, %v6778_v33  ;;  %v16545_v7 = vadd.f32 %v16319_v52, %v16377_v51  ;;  %v6870_v25 = vrot.slane %v10895_v8, 2 }
 0x4d8   : > { %v6975_v19 = vrot.slane %v15776_v45, 3  ;;  %v18957_v45 = vld [vmem:[#allocation29_spill] sm:$0xff] }
 0x4d9   : > { %v5802_v50 = vpop.f32.mrf.mxu2  ;;  %v6892_v52 = vsel %vm1202_vm7, %v6869_v30, %v6870_v25  ;;  %v10896_v30 = vld [vmem:[#allocation2 + $0xb8] sm:$0xff]  ;;  %v6977_v25 = vrot.slane %v15815_v48, 3 }
 0x4da   : > { %v16517_v10 = vadd.f32 %v5802_v50, %v16294_v1  ;;  %v5908_v20 = vpop.f32.mrf.mxu3  ;;  %v10480_v1 = vld [vmem:[%s18568_s4 + $0x1020] sm:$0xff]  ;;  %v6872_v8 = vrot.slane %v10896_v30, 2 }
 0x4db   : > { %v16519_v13 = vadd.f32 %v5908_v20, %v5732_v26  ;;  %v5723_v15 = vpop.f32.mrf.mxu1  ;;  %7378 = vmatpush.msrb.mxu1 %v10480_v1 }
 0x4dc   : > { %v16529_v4 = vpop.f32.mrf.mxu0  ;;  %v5733_v36 = vadd.f32 %v5723_v15, %v16188_v55  ;;  %v18956_v55 = vrot.slane %v15438_v21, 3  ;;  %v10479_v15 = vld [vmem:[%s18568_s4 + $0x1018] sm:$0xff]  ;;  %v16574_v21 = vadd.f32 %v16385_v63, %v16443_v24  ;;  %v18959_v63 = vrot.slane %v15477_v31, 3 }
 0x4dd   : > { %7379 = vmatpush.msrb.mxu1 %v10479_v15  ;;  %v16607_v31 = vadd.f32 %v16454_v16, %v16485_v46  ;;  %v18962_v16 = vrot.slane %v15525_v2, 3  ;;  %v10499_v2 = vld [vmem:[%s18568_s4 + $0x1078] sm:$0xff] }
 0x4de   : > { %10363 = vmatmul.msk.f32.gmra.mxu1 %vm387_vm1, %v16523_v12  ;;  %10379 = vmatmul.msk.f32.gmra.mxu2 %vm387_vm1, %v16527_v17  ;;  %v6998_v51 = vsel %vm1309_vm8, %v6975_v19, %v18956_v55  ;;  %v6997_v24 = vsel %vm1309_vm8, %v6977_v25, %v18959_v63 }
 0x4df   : > { %10395 = vmatmul.msk.f32.gmra.mxu3 %vm387_vm1, %v16115_v18  ;;  %10411 = vmatmul.msk.f32.gmra.mxu0 %vm387_vm1, %v6779_v29 }
 0x4e0   : > { %7481 = vmatpush.msrb.mxu2 %v10499_v2 }
 0x4e1   : > { %v5805_v42 = vpop.f32.mrf.mxu2 }
 0x4e2   : > { %v16551_v33 = vadd.f32 %v5805_v42, %v16360_v3  ;;  %v5911_v26 = vpop.f32.mrf.mxu3  ;;  %v18958_v3 = vld [vmem:[#allocation58_spill] sm:$0xff]  ;;  %v6871_v42 = vrot.slane %v15815_v48, 2 }
 0x4e3   : > { %v16553_v50 = vadd.f32 %v5911_v26, %v5733_v36  ;;  %v6102_v20 = vpop.f32.mrf.mxu1 }
 0x4e4   : > { %v16555_v29 = vpop.f32.mrf.mxu0  ;;  %v6126_v1 = vadd.f32 %v6102_v20, %v16221_v35  ;;  %v6891_v35 = vsel %vm1202_vm7, %v6871_v42, %v6872_v8  ;;  %v18961_v20 = vld [vmem:[#allocation59_spill] sm:$0xff]  ;;  %v18711_v8 = vrot.slane %v15860_v61, 3 }
 0x4e6   : > { %10420 = vmatmul.msk.f32.vlgmr.msra.gmra.mxu1 %vm387_vm1, %v6892_v52  ;;  %10436 = vmatmul.msk.f32.vlgmr.msra.gmra.mxu2 %vm387_vm1, %v6998_v51  ;;  %v6996_v46 = vsel %vm1309_vm8, %v18711_v8, %v18962_v16  ;;  %v10492_v8 = vld [vmem:[%s18568_s4 + $0x1040] sm:$0xff] }
 0x4e7   : > { %10452 = vmatmul.msk.f32.vlgmr.msra.gmra.mxu3 %vm387_vm1, %v18957_v45  ;;  %10468 = vmatmul.msk.f32.vlgmr.msra.gmra.mxu0 %vm387_vm1, %v18958_v3  ;;  %v10478_v45 = vld [vmem:[%s18568_s4 + $0x1010] sm:$0xff] }
 0x4e8   : > { %7380 = vmatpush.msrb.mxu1 %v10478_v45  ;;  %v10515_v45 = vld [vmem:[%s18568_s4 + $0x10b8] sm:$0xff] }
 0x4e9   : > { %v6200_v36 = vpop.f32.mrf.mxu2  ;;  %7587 = vmatpush.msrb.mxu3 %v10515_v45  ;;  %v18965_v45 = vrot.slane %v15597_v41, 3  ;;  %v10529_v41 = vld [vmem:[%s18568_s4 + $0x10e8] sm:$0xff] }
 0x4ea   : > { %v16580_v19 = vadd.f32 %v6200_v36, %v16426_v27  ;;  %v6331_v26 = vpop.f32.mrf.mxu3  ;;  %v18960_v27 = vld [vmem:[#allocation30_spill] sm:$0xff]  ;;  %v10897_v36 = vld [vmem:[#allocation2 + $0xd0] sm:$0xff] }
 0x4eb   : > { %v16582_v52 = vadd.f32 %v6331_v26, %v6126_v1  ;;  %v6105_v55 = vpop.f32.mrf.mxu1  ;;  %v18712_v1 = vrot.slane %v15860_v61, 2  ;;  %v6874_v30 = vrot.slane %v10897_v36, 2 }
 0x4ec   : > { %v16584_v51 = vpop.f32.mrf.mxu0  ;;  %v6127_v3 = vadd.f32 %v6105_v55, %v16260_v5  ;;  %v18964_v55 = vld [vmem:[#allocation60_spill] sm:$0xff] }
 0x4ed   : > { %v6890_v5 = vsel %vm1202_vm7, %v18712_v1, %v6874_v30 }
 0x4ee   : > { %10421 = vmatmul.msk.f32.gmra.mxu1 %vm387_vm1, %v6891_v35  ;;  %10437 = vmatmul.msk.f32.gmra.mxu2 %vm387_vm1, %v6997_v24 }
 0x4ef   : > { %10453 = vmatmul.msk.f32.gmra.mxu3 %vm387_vm1, %v18960_v27  ;;  %10469 = vmatmul.msk.f32.gmra.mxu0 %vm387_vm1, %v18961_v20  ;;  %v10477_v20 = vld [vmem:[%s18568_s4 + $0x1008] sm:$0xff] }
 0x4f0   : > { %7381 = vmatpush.msrb.mxu1 %v10477_v20  ;;  %v10530_v20 = vld [vmem:[%s18568_s4 + $0x10f0] sm:$0xff] }
 0x4f1   : > { %v6203_v15 = vpop.f32.mrf.mxu2 }
 0x4f2   : > { %v16613_v26 = vadd.f32 %v6203_v15, %v16481_v6  ;;  %v6334_v35 = vpop.f32.mrf.mxu3  ;;  %v18963_v6 = vld [vmem:[#allocation48_spill] sm:$0xff]  ;;  %v10531_v15 = vld [vmem:[%s18568_s4 + $0x10f8] sm:$0xff] }
 0x4f3   : > { %v16615_v63 = vadd.f32 %v6334_v35, %v6127_v3  ;;  %v6108_v24 = vpop.f32.mrf.mxu1  ;;  %v16646_v3 = vadd.f32 %v16491_v62, %v16517_v10  ;;  %v18708_v35 = vrot.slane %v15914_v14, 2  ;;  %7669 = vmatpush.msrb.mxu0 %v10531_v15 }
 0x4f4   : > { %v16617_v27 = vpop.f32.mrf.mxu0  ;;  %v6128_v36 = vadd.f32 %v6108_v24, %v16308_v9  ;;  %v10498_v9 = vld [vmem:[%s18568_s4 + $0x1070] sm:$0xff] }
 0x4f5   : > { %v10514_v24 = vld [vmem:[%s18568_s4 + $0x10b0] sm:$0xff]  ;;  %7482 = vmatpush.msrb.mxu2 %v10498_v9  ;;  %7670 = vmatpush.msrb.mxu0 %v10530_v20  ;;  %v10512_v9 = vld [vmem:[%s18568_s4 + $0x10a0] sm:$0xff]  ;;  %v16706_v20 = vadd.f32 %v16529_v4, %v16551_v33  ;;  %v10495_v4 = vld [vmem:[%s18568_s4 + $0x1058] sm:$0xff] }
 0x4f6   : > { %10422 = vmatmul.msk.f32.gmra.mxu1 %vm387_vm1, %v6890_v5  ;;  %10438 = vmatmul.msk.f32.gmra.mxu2 %vm387_vm1, %v6996_v46  ;;  %v10898_v5 = vld [vmem:[#allocation2 + $0xe8] sm:$0xff]  ;;  %v18707_v46 = vrot.slane %v15914_v14, 3  ;;  %v10511_v33 = vld [vmem:[%s18568_s4 + $0x1098] sm:$0xff] }
 0x4f7   : > { %10454 = vmatmul.msk.f32.gmra.mxu3 %vm387_vm1, %v18963_v6  ;;  %10470 = vmatmul.msk.f32.gmra.mxu0 %vm387_vm1, %v18964_v55  ;;  %v6876_v16 = vrot.slane %v10898_v5, 2  ;;  %v18966_v5 = vld [vmem:[#allocation49_spill] sm:$0xff] }
 0x4f8   : > { %7588 = vmatpush.msrb.mxu3 %v10514_v24  ;;  %v6995_v15 = vsel %vm1309_vm8, %v18707_v46, %v18965_v45  ;;  %v10476_v24 = vld [vmem:[%s18568_s4 + $0x1000] sm:$0xff]  ;;  %7671 = vmatpush.msrb.mxu0 %v10529_v41 }
 0x4f9   : > { %v6206_v30 = vpop.f32.mrf.mxu2  ;;  %7382 = vmatpush.msrb.mxu1 %v10476_v24 }
 0x4fa   : > { %v16655_v62 = vadd.f32 %v6206_v30, %v16511_v32  ;;  %v6337_v10 = vpop.f32.mrf.mxu3  ;;  %v6889_v32 = vsel %vm1202_vm7, %v18708_v35, %v6876_v16  ;;  %v10513_v30 = vld [vmem:[%s18568_s4 + $0x10a8] sm:$0xff]  ;;  %v18967_v16 = vld [vmem:[#allocation61_spill] sm:$0xff]  ;;  %v18709_v35 = vrot.slane %v15992_v56, 3 }
 0x4fb   : > { %v16657_v6 = vadd.f32 %v6337_v10, %v6128_v36  ;;  %v6111_v55 = vpop.f32.mrf.mxu1  ;;  %v10497_v36 = vld [vmem:[%s18568_s4 + $0x1068] sm:$0xff]  ;;  %v10496_v10 = vld [vmem:[%s18568_s4 + $0x1060] sm:$0xff]  ;;  %7589 = vmatpush.msrb.mxu3 %v10513_v30 }
 0x4fc   : > { %v16668_v2 = vpop.f32.mrf.mxu0  ;;  %7483 = vmatpush.msrb.mxu2 %v10497_v36  ;;  %v6129_v45 = vadd.f32 %v6111_v55, %v16383_v53  ;;  %v10527_v55 = vld [vmem:[%s18568_s4 + $0x10d8] sm:$0xff] }
 0x4fd   : > { %7590 = vmatpush.msrb.mxu3 %v10512_v9 }
 0x4fe   : > { %10423 = vmatmul.msk.f32.gmra.mxu1 %vm387_vm1, %v6889_v32  ;;  %10439 = vmatmul.msk.f32.gmra.mxu2 %vm387_vm1, %v6995_v15  ;;  %v10528_v32 = vld [vmem:[%s18568_s4 + $0x10e0] sm:$0xff] }
 0x4ff   : > { %10455 = vmatmul.msk.f32.gmra.mxu3 %vm387_vm1, %v18966_v5  ;;  %10471 = vmatmul.msk.f32.gmra.mxu0 %vm387_vm1, %v18967_v16  ;;  %v18710_v5 = vrot.slane %v15992_v56, 2  ;;  %v10899_v16 = vld [vmem:[#allocation2 + $0x100] sm:$0xff] }
 0x500   : > { %v6878_v46 = vrot.slane %v10899_v16, 2  ;;  %7484 = vmatpush.msrb.mxu2 %v10496_v10  ;;  %7672 = vmatpush.msrb.mxu0 %v10528_v32  ;;  %v16730_v16 = vld [vmem:[#allocation2 + $0x120] sm:$0xff]  ;;  %v18968_v10 = vrot.slane %v15663_v34, 3  ;;  %v10494_v32 = vld [vmem:[%s18568_s4 + $0x1050] sm:$0xff] }
 0x501   : > { %v6209_v15 = vpop.f32.mrf.mxu2  ;;  %7591 = vmatpush.msrb.mxu3 %v10511_v33  ;;  %v10526_v34 = vld [vmem:[%s18568_s4 + $0x10d0] sm:$0xff]  ;;  %v10509_v33 = vld [vmem:[%s18568_s4 + $0x1088] sm:$0xff] }
 0x502   : > { %v16721_v36 = vadd.f32 %v6209_v15, %v16545_v7  ;;  %v6340_v53 = vpop.f32.mrf.mxu3  ;;  %7485 = vmatpush.msrb.mxu2 %v10495_v4  ;;  %v6888_v7 = vsel %vm1202_vm7, %v18710_v5, %v6878_v46  ;;  %v6994_v9 = vsel %vm1309_vm8, %v18709_v35, %v18968_v10  ;;  %7673 = vmatpush.msrb.mxu0 %v10527_v55  ;;  %v10510_v15 = vld [vmem:[%s18568_s4 + $0x1090] sm:$0xff]  ;;  %v18969_v46 = vld [vmem:[#allocation51_spill] sm:$0xff]  ;;  %v10493_v4 = vld [vmem:[%s18568_s4 + $0x1048] sm:$0xff]  ;;  %v6880_v5 = vrot.slane %v16446_v23, 2 }
 0x503   : > { %v16726_v30 = vadd.f32 %v6340_v53, %v6129_v45  ;;  %v6114_v41 = vpop.f32.mrf.mxu1  ;;  %v16742_v45 = vld [vmem:[#allocation2 + $0x128] sm:$0xff]  ;;  %v10547_v53 = vld [vmem:[%s18568_s4 + $0x1138] sm:$0xff]  ;;  %v16770_v55 = vadd.f32 %v16555_v29, %v16580_v19  ;;  %7592 = vmatpush.msrb.mxu3 %v10510_v15  ;;  %v6985_v29 = vrot.slane %v16064_v44, 3  ;;  %v6986_v19 = vrot.slane %v16446_v23, 3  ;;  %v10524_v23 = vld [vmem:[%s18568_s4 + $0x10c0] sm:$0xff] }
 0x504   : > { %v16728_v24 = vpop.f32.mrf.mxu0  ;;  %v7215_v10 = vrot.slane %v16742_v45, 4  ;;  %7486 = vmatpush.msrb.mxu2 %v10494_v32  ;;  %7674 = vmatpush.msrb.mxu0 %v10526_v34  ;;  %v10508_v32 = vld [vmem:[%s18568_s4 + $0x1080] sm:$0xff] }
 0x505   : > { %7775 = vmatpush.msra.mxu1 %v10547_v53  ;;  %7593 = vmatpush.msrb.mxu3 %v10509_v33  ;;  %v10900_v33 = vld [vmem:[#allocation2 + $0x130] sm:$0xff] }
 0x506   : > { %10424 = vmatmul.msk.f32.gmra.mxu1 %vm387_vm1, %v6888_v7  ;;  %10440 = vmatmul.msk.f32.gmra.mxu2 %vm387_vm1, %v6994_v9  ;;  %v6879_v7 = vrot.slane %v16064_v44, 2  ;;  %v10525_v9 = vld [vmem:[%s18568_s4 + $0x10c8] sm:$0xff]  ;;  %v7826_v44 = vrot.slane %v16742_v45, 2 }
 0x507   : > { %10456 = vmatmul.msk.f32.gmra.mxu3 %vm387_vm1, %v18969_v46  ;;  %10472 = vmatmul.msk.f32.gmra.mxu0 %vm387_vm1, %v16088_v60  ;;  %v7214_v60 = vrot.slane %v16730_v16, 4  ;;  %v6130_v46 = vadd.f32 %v6114_v41, %v16452_v11 }
 0x508   : > { %7487 = vmatpush.msrb.mxu2 %v10493_v4  ;;  %7675 = vmatpush.msrb.mxu0 %v10525_v9  ;;  %v18970_v4 = vld [vmem:[#allocation52_spill] sm:$0xff]  ;;  %v16821_v9 = vadd.f32 %v16584_v51, %v16613_v26  ;;  %v16835_v51 = vld [vmem:[#allocation2 + $0x158] sm:$0xff]  ;;  %v18714_v26 = vrot.slane %v16115_v18, 3 }
 0x509   : > { %v6212_v35 = vpop.f32.mrf.mxu2  ;;  %v7222_v53 = vsel %vm618_vm4, %v7214_v60, %v7215_v10  ;;  %7594 = vmatpush.msrb.mxu3 %v10508_v32  ;;  %v6882_v60 = vrot.slane %v10900_v33, 2 }
 0x50a   : > { %v16789_v15 = vadd.f32 %v6212_v35, %v16574_v21  ;;  %v6343_v11 = vpop.f32.mrf.mxu3  ;;  %7488 = vmatpush.msrb.mxu2 %v10492_v8  ;;  %v6887_v21 = vsel %vm1202_vm7, %v6879_v7, %v6880_v5  ;;  %v6993_v35 = vsel %vm1309_vm8, %v6985_v29, %v6986_v19  ;;  %7676 = vmatpush.msrb.mxu0 %v10524_v23  ;;  %v6881_v8 = vrot.slane %v16473_v59, 2  ;;  %v10546_v5 = vld [vmem:[%s18568_s4 + $0x1130] sm:$0xff] }
 0x50b   : > { %v16794_v41 = vadd.f32 %v6343_v11, %v6130_v46  ;;  %v6117_v34 = vpop.f32.mrf.mxu1  ;;  %7776 = vmatpush.msra.mxu1 %v10546_v5 }
 0x50c   : > { %v16796_v1 = vpop.f32.mrf.mxu0  ;;  %v6131_v46 = vadd.f32 %v6117_v34, %v16487_v47  ;;  %v6883_v47 = vrot.slane %v16115_v18, 2  ;;  %v6990_v34 = vrot.slane %v16493_v58, 3 }
 0x50e   : > { %10425 = vmatmul.msk.f32.gmra.mxu1 %vm387_vm1, %v6887_v21  ;;  %10441 = vmatmul.msk.f32.gmra.mxu2 %vm387_vm1, %v6993_v35  ;;  %v16833_v35 = vld [vmem:[#allocation2 + $0x150] sm:$0xff] }
 0x50f   : > { %10457 = vmatmul.msk.f32.gmra.mxu3 %vm387_vm1, %v18970_v4  ;;  %10473 = vmatmul.msk.f32.gmra.mxu0 %vm387_vm1, %v7222_v53  ;;  %v6886_v53 = vsel %vm1202_vm7, %v6881_v8, %v6882_v60  ;;  %v10545_v4 = vld [vmem:[%s18568_s4 + $0x1128] sm:$0xff]  ;;  %v7088_v8 = vrot.slane %v16493_v58, 4 }
 0x510   : > { %7777 = vmatpush.msra.mxu1 %v10545_v4  ;;  %v10901_v4 = vld [vmem:[#allocation2 + $0xa8] sm:$0xff] }
 0x511   : > { %v6215_v19 = vpop.f32.mrf.mxu2 }
 0x512   : > { %v16825_v32 = vadd.f32 %v6215_v19, %v16607_v31  ;;  %v6346_v11 = vpop.f32.mrf.mxu3  ;;  %v6884_v31 = vrot.slane %v16493_v58, 2 }
 0x513   : > { %v16827_v23 = vadd.f32 %v6346_v11, %v6131_v46  ;;  %v6120_v59 = vpop.f32.mrf.mxu1 }
 0x514   : > { %v16831_v21 = vpop.f32.mrf.mxu0  ;;  %v6132_v33 = vadd.f32 %v6120_v59, %v16519_v13  ;;  %v6885_v58 = vsel %vm1202_vm7, %v6883_v47, %v6884_v31  ;;  %v7089_v13 = vsel %vm618_vm4, %v16136_v57, %v7088_v8  ;;  %v10544_v59 = vld [vmem:[%s18568_s4 + $0x1120] sm:$0xff]  ;;  %v7310_v8 = vrot.slane %v10901_v4, 5 }
 0x515   : > { %7778 = vmatpush.msra.mxu1 %v10544_v59  ;;  %v16920_v59 = vld [vmem:[#allocation2 + $0xc8] sm:$0xff] }
 0x516   : > { %10426 = vmatmul.msk.f32.gmra.mxu1 %vm387_vm1, %v6886_v53  ;;  %10442 = vmatmul.msk.f32.gmra.mxu2 %vm387_vm1, %v16148_v54  ;;  %v16853_v54 = vadd.f32 %v16617_v27, %v16655_v62  ;;  %v6991_v27 = vsel %vm1309_vm8, %v18714_v26, %v6990_v34  ;;  %v16890_v53 = vadd.f32 %v16668_v2, %v16721_v36  ;;  %v10556_v26 = vld [vmem:[%s18568_s4 + $0x1140] sm:$0xff] }
 0x517   : > { %10458 = vmatmul.msk.f32.gmra.mxu3 %vm387_vm1, %v16154_v22  ;;  %10474 = vmatmul.msk.f32.gmra.mxu0 %vm387_vm1, %v16161_v43  ;;  %v7218_v22 = vrot.slane %v16833_v35, 4  ;;  %v18713_v43 = vrot.slane %v16835_v51, 4 }
 0x519   : > { %v6218_v60 = vpop.f32.mrf.mxu2 }
 0x51a   : > { %v16860_v5 = vadd.f32 %v6218_v60, %v16646_v3  ;;  %v6349_v46 = vpop.f32.mrf.mxu3  ;;  %v7220_v3 = vsel %vm618_vm4, %v7218_v22, %v18713_v43  ;;  %v16893_v22 = vld [vmem:[#allocation2 + $0xb0] sm:$0xff] }
 0x51b   : > { %v16862_v19 = vadd.f32 %v6349_v46, %v6132_v33  ;;  %v6123_v11 = vpop.f32.mrf.mxu1  ;;  %v7311_v33 = vrot.slane %v16893_v22, 5 }
 0x51c   : > { %v16872_v62 = vpop.f32.mrf.mxu0  ;;  %v6133_v31 = vadd.f32 %v6123_v11, %v16553_v50  ;;  %v10543_v50 = vld [vmem:[%s18568_s4 + $0x1118] sm:$0xff] }
 0x51d   : > { %v7333_v2 = vsel %vm651_vm3, %v7310_v8, %v7311_v33  ;;  %7779 = vmatpush.msra.mxu1 %v10543_v50 }
 0x51e   : > { %10427 = vmatmul.msk.f32.gmra.mxu1 %vm387_vm1, %v6885_v58  ;;  %10443 = vmatmul.msk.f32.gmra.mxu2 %vm387_vm1, %v6991_v27 }
 0x51f   : > { %10459 = vmatmul.msk.f32.gmra.mxu3 %vm387_vm1, %v7089_v13  ;;  %10475 = vmatmul.msk.f32.gmra.mxu0 %vm387_vm1, %v7220_v3  ;;  %v10903_v3 = vld [vmem:[#allocation2 + $0xc0] sm:$0xff] }
 0x521   : > { %v6221_v34 = vpop.f32.mrf.mxu2 }
 0x522   : > { %v16897_v60 = vadd.f32 %v6221_v34, %v16706_v20  ;;  %v6352_v46 = vpop.f32.mrf.mxu3  ;;  %v16917_v20 = vadd.f32 %v16728_v24, %v16789_v15 }
 0x523   : > { %v16899_v58 = vadd.f32 %v6352_v46, %v6133_v31  ;;  %v6543_v27 = vpop.f32.mrf.mxu1 }
 0x524   : > { %v16901_v13 = vpop.f32.mrf.mxu0  ;;  %v6567_v36 = vadd.f32 %v6543_v27, %v16582_v52  ;;  %v10542_v52 = vld [vmem:[%s18568_s4 + $0x1110] sm:$0xff]  ;;  %v10905_v27 = vld [vmem:[#allocation2 + $0xd8] sm:$0xff] }
 0x525   : > { %7780 = vmatpush.msra.mxu1 %v10542_v52 }
 0x526   : > { %10484 = vmatmul.msk.f32.vlgmr.msrb.gmra.mxu1 %vm387_vm1, %v7333_v2  ;;  %10500 = vmatmul.msk.f32.vlgmr.msrb.gmra.mxu2 %vm387_vm1, %v16227_v40  ;;  %v7312_v40 = vrot.slane %v10903_v3, 5  ;;  %v16947_v2 = vld [vmem:[#allocation2 + $0xe0] sm:$0xff] }
 0x527   : > { %10516 = vmatmul.msk.f32.vlgmr.msrb.gmra.mxu3 %vm387_vm1, %v16231_v0  ;;  %10532 = vmatmul.msk.f32.vlgmr.msrb.gmra.mxu0 %vm387_vm1, %v16893_v22  ;;  %v7313_v0 = vrot.slane %v16920_v59, 5 }
 0x529   : > { %v6649_v11 = vpop.f32.mrf.mxu2  ;;  %v7332_v24 = vsel %vm651_vm3, %v7312_v40, %v7313_v0  ;;  %v10563_v0 = vld [vmem:[%s18568_s4 + $0x1178] sm:$0xff] }
 0x52a   : > { %v16924_v31 = vadd.f32 %v6649_v11, %v16770_v55  ;;  %v6731_v34 = vpop.f32.mrf.mxu3  ;;  %v16944_v55 = vadd.f32 %v16796_v1, %v16825_v32  ;;  %v18972_v32 = vld [vmem:[#allocation40_spill] sm:$0xff]  ;;  %7881 = vmatpush.msra.mxu2 %v10563_v0 }
 0x52b   : > { %v16926_v4 = vadd.f32 %v6731_v34, %v6567_v36  ;;  %v6546_v8 = vpop.f32.mrf.mxu1  ;;  %v10579_v34 = vld [vmem:[%s18568_s4 + $0x11b8] sm:$0xff]  ;;  %v10577_v0 = vld [vmem:[%s18568_s4 + $0x11a8] sm:$0xff] }
 0x52c   : > { %v16928_v33 = vpop.f32.mrf.mxu0  ;;  %v6568_v15 = vadd.f32 %v6546_v8, %v16615_v63  ;;  %v18971_v63 = vld [vmem:[#allocation38_spill] sm:$0xff]  ;;  %v16977_v8 = vadd.f32 %v16831_v21, %v16860_v5  ;;  %7987 = vmatpush.msra.mxu3 %v10579_v34 }
 0x52d   : > { %v18973_v34 = vld [vmem:[#allocation6_spill] sm:$0xff] }
 0x52e   : > { %10485 = vmatmul.msk.f32.gmra.mxu1 %vm387_vm1, %v7332_v24  ;;  %10501 = vmatmul.msk.f32.gmra.mxu2 %vm387_vm1, %v16266_v37  ;;  %v7314_v37 = vrot.slane %v10905_v27, 5  ;;  %v10595_v24 = vld [vmem:[%s18568_s4 + $0x11f8] sm:$0xff] }
 0x52f   : > { %10517 = vmatmul.msk.f32.gmra.mxu3 %vm387_vm1, %v16270_v38  ;;  %10533 = vmatmul.msk.f32.gmra.mxu0 %vm387_vm1, %v16920_v59  ;;  %v7315_v38 = vrot.slane %v16947_v2, 5 }
 0x530   : > { %8085 = vmatpush.msra.mxu0 %v10595_v24  ;;  %v10593_v24 = vld [vmem:[%s18568_s4 + $0x11e8] sm:$0xff] }
 0x531   : > { %v6652_v46 = vpop.f32.mrf.mxu2  ;;  %v7331_v1 = vsel %vm651_vm3, %v7314_v37, %v7315_v38  ;;  %v16983_v37 = vld [vmem:[#allocation2 + $0xf8] sm:$0xff] }
 0x532   : > { %v16951_v50 = vadd.f32 %v6652_v46, %v16821_v9  ;;  %v6734_v36 = vpop.f32.mrf.mxu3  ;;  %v10541_v9 = vld [vmem:[%s18568_s4 + $0x1108] sm:$0xff]  ;;  %v10907_v46 = vld [vmem:[#allocation2 + $0xf0] sm:$0xff]  ;;  %v7317_v38 = vrot.slane %v16983_v37, 5 }
 0x533   : > { %v16953_v11 = vadd.f32 %v6734_v36, %v6568_v15  ;;  %v6549_v3 = vpop.f32.mrf.mxu1  ;;  %7781 = vmatpush.msra.mxu1 %v10541_v9  ;;  %v7316_v27 = vrot.slane %v10907_v46, 5  ;;  %v10561_v9 = vld [vmem:[%s18568_s4 + $0x1168] sm:$0xff]  ;;  %v10576_v46 = vld [vmem:[%s18568_s4 + $0x11a0] sm:$0xff] }
 0x534   : > { %v16955_v40 = vpop.f32.mrf.mxu0  ;;  %v6569_v52 = vadd.f32 %v6549_v3, %v16657_v6  ;;  %v10562_v6 = vld [vmem:[%s18568_s4 + $0x1170] sm:$0xff] }
 0x535   : > { %v10578_v3 = vld [vmem:[%s18568_s4 + $0x11b0] sm:$0xff]  ;;  %7882 = vmatpush.msra.mxu2 %v10562_v6 }
 0x536   : > { %10486 = vmatmul.msk.f32.gmra.mxu1 %vm387_vm1, %v7331_v1  ;;  %10502 = vmatmul.msk.f32.gmra.mxu2 %vm387_vm1, %v18971_v63  ;;  %v10594_v63 = vld [vmem:[%s18568_s4 + $0x11f0] sm:$0xff] }
 0x537   : > { %10518 = vmatmul.msk.f32.gmra.mxu3 %vm387_vm1, %v18972_v32  ;;  %10534 = vmatmul.msk.f32.gmra.mxu0 %vm387_vm1, %v16947_v2 }
 0x538   : > { %7988 = vmatpush.msra.mxu3 %v10578_v3  ;;  %8086 = vmatpush.msra.mxu0 %v10594_v63  ;;  %v10909_v63 = vld [vmem:[#allocation2 + $0x108] sm:$0xff] }
 0x539   : > { %v6655_v15 = vpop.f32.mrf.mxu2  ;;  %7883 = vmatpush.msra.mxu2 %v10561_v9 }
 0x53a   : > { %v16987_v21 = vadd.f32 %v6655_v15, %v16853_v54  ;;  %v6737_v5 = vpop.f32.mrf.mxu3  ;;  %v7330_v54 = vsel %vm651_vm3, %v7316_v27, %v7317_v38  ;;  %v10560_v15 = vld [vmem:[%s18568_s4 + $0x1160] sm:$0xff]  ;;  %v17031_v38 = vadd.f32 %v16872_v62, %v16897_v60  ;;  %7989 = vmatpush.msra.mxu3 %v10577_v0  ;;  %8087 = vmatpush.msra.mxu0 %v10593_v24  ;;  %v10559_v62 = vld [vmem:[%s18568_s4 + $0x1158] sm:$0xff] }
 0x53b   : > { %v16989_v36 = vadd.f32 %v6737_v5, %v6569_v52  ;;  %v6552_v1 = vpop.f32.mrf.mxu1  ;;  %v18974_v52 = vld [vmem:[#allocation8_spill] sm:$0xff]  ;;  %v10540_v27 = vld [vmem:[%s18568_s4 + $0x1100] sm:$0xff]  ;;  %v10575_v60 = vld [vmem:[%s18568_s4 + $0x1198] sm:$0xff]  ;;  %7884 = vmatpush.msra.mxu2 %v10560_v15 }
 0x53c   : > { %v17000_v32 = vpop.f32.mrf.mxu0  ;;  %v10592_v5 = vld [vmem:[%s18568_s4 + $0x11e0] sm:$0xff]  ;;  %v6570_v6 = vadd.f32 %v6552_v1, %v16726_v30  ;;  %7782 = vmatpush.msra.mxu1 %v10540_v27  ;;  %7990 = vmatpush.msra.mxu3 %v10576_v46  ;;  %v10591_v1 = vld [vmem:[%s18568_s4 + $0x11d8] sm:$0xff]  ;;  %v10574_v15 = vld [vmem:[%s18568_s4 + $0x1190] sm:$0xff]  ;;  %v7320_v46 = vrot.slane %v16730_v16, 5 }
 0x53d   : > { %8088 = vmatpush.msra.mxu0 %v10592_v5  ;;  %7885 = vmatpush.msra.mxu2 %v10559_v62  ;;  %v10590_v5 = vld [vmem:[%s18568_s4 + $0x11d0] sm:$0xff]  ;;  %v17089_v62 = vadd.f32 %v16901_v13, %v16924_v31 }
 0x53e   : > { %10487 = vmatmul.msk.f32.gmra.mxu1 %vm387_vm1, %v7330_v54  ;;  %10503 = vmatmul.msk.f32.gmra.mxu2 %vm387_vm1, %v18973_v34  ;;  %v7318_v54 = vrot.slane %v10909_v63, 5  ;;  %v17037_v34 = vld [vmem:[#allocation2 + $0x110] sm:$0xff] }
 0x53f   : > { %10519 = vmatmul.msk.f32.gmra.mxu3 %vm387_vm1, %v18974_v52  ;;  %10535 = vmatmul.msk.f32.gmra.mxu0 %vm387_vm1, %v16983_v37  ;;  %v7319_v52 = vrot.slane %v17037_v34, 5 }
 0x540   : > { %7991 = vmatpush.msra.mxu3 %v10575_v60  ;;  %8089 = vmatpush.msra.mxu0 %v10591_v1  ;;  %v7532_v60 = vrot.slane %v16730_v16, 7  ;;  %v10589_v1 = vld [vmem:[%s18568_s4 + $0x11c8] sm:$0xff] }
 0x541   : > { %v6658_v3 = vpop.f32.mrf.mxu2  ;;  %v7329_v63 = vsel %vm651_vm3, %v7318_v54, %v7319_v52  ;;  %v7427_v54 = vrot.slane %v16742_v45, 6  ;;  %v10573_v52 = vld [vmem:[%s18568_s4 + $0x1188] sm:$0xff] }
 0x542   : > { %v17047_v9 = vadd.f32 %v6658_v3, %v16890_v53  ;;  %v6740_v30 = vpop.f32.mrf.mxu3  ;;  %v10558_v53 = vld [vmem:[%s18568_s4 + $0x1150] sm:$0xff]  ;;  %v7426_v3 = vrot.slane %v16730_v16, 6  ;;  %7992 = vmatpush.msra.mxu3 %v10574_v15  ;;  %8090 = vmatpush.msra.mxu0 %v10590_v5  ;;  %v10572_v16 = vld [vmem:[%s18568_s4 + $0x1180] sm:$0xff] }
 0x543   : > { %v17052_v0 = vadd.f32 %v6740_v30, %v6570_v6  ;;  %v6555_v24 = vpop.f32.mrf.mxu1  ;;  %v7321_v6 = vrot.slane %v16742_v45, 5  ;;  %v7533_v30 = vrot.slane %v16742_v45, 7  ;;  %7886 = vmatpush.msra.mxu2 %v10558_v53 }
 0x544   : > { %v17054_v27 = vpop.f32.mrf.mxu0  ;;  %7993 = vmatpush.msra.mxu3 %v10573_v52  ;;  %v7434_v5 = vsel %vm685_vm2, %v7426_v3, %v7427_v54  ;;  %8091 = vmatpush.msra.mxu0 %v10589_v1  ;;  %v17132_v54 = vadd.f32 %v16928_v33, %v16951_v50  ;;  %v7325_v33 = vrot.slane %v16835_v51, 5  ;;  %v7431_v50 = vrot.slane %v16835_v51, 6 }
 0x545   : > { %v7328_v15 = vsel %vm651_vm3, %v7320_v46, %v7321_v6  ;;  %v17124_v6 = vld [vmem:[#allocation2 + $0x140] sm:$0xff] }
 0x546   : > { %10488 = vmatmul.msk.f32.gmra.mxu1 %vm387_vm1, %v7329_v63  ;;  %10504 = vmatmul.msk.f32.gmra.mxu2 %vm387_vm1, %v16458_v49  ;;  %v10557_v49 = vld [vmem:[%s18568_s4 + $0x1148] sm:$0xff]  ;;  %v6571_v63 = vadd.f32 %v6555_v24, %v16794_v41  ;;  %v10588_v41 = vld [vmem:[%s18568_s4 + $0x11c0] sm:$0xff]  ;;  %v7323_v3 = vrot.slane %v17124_v6, 5 }
 0x547   : > { %10520 = vmatmul.msk.f32.gmra.mxu3 %vm387_vm1, %v16462_v28  ;;  %10536 = vmatmul.msk.f32.gmra.mxu0 %vm387_vm1, %v17037_v34  ;;  %v10611_v28 = vld [vmem:[%s18568_s4 + $0x1238] sm:$0xff] }
 0x548   : > { %8216 = vmatpush.msrb.mxu1 %v10611_v28  ;;  %7887 = vmatpush.msra.mxu2 %v10557_v49 }
 0x549   : > { %v6661_v43 = vpop.f32.mrf.mxu2  ;;  %7994 = vmatpush.msra.mxu3 %v10572_v16  ;;  %8092 = vmatpush.msra.mxu0 %v10588_v41  ;;  %v10609_v41 = vld [vmem:[%s18568_s4 + $0x1228] sm:$0xff] }
 0x54a   : > { %v17104_v13 = vadd.f32 %v6661_v43, %v16917_v20  ;;  %v6743_v31 = vpop.f32.mrf.mxu3  ;;  %v7540_v43 = vsel %vm849_vm5, %v7532_v60, %v7533_v30  ;;  %7888 = vmatpush.msra.mxu2 %v10556_v26  ;;  %v10911_v20 = vld [vmem:[#allocation2 + $0x138] sm:$0xff]  ;;  %v10610_v26 = vld [vmem:[%s18568_s4 + $0x1230] sm:$0xff] }
 0x54b   : > { %v17109_v24 = vadd.f32 %v6743_v31, %v6571_v63  ;;  %v6558_v53 = vpop.f32.mrf.mxu1  ;;  %v7322_v46 = vrot.slane %v10911_v20, 5  ;;  %8217 = vmatpush.msrb.mxu1 %v10610_v26 }
 0x54c   : > { %v17115_v28 = vpop.f32.mrf.mxu0  ;;  %v6572_v49 = vadd.f32 %v6558_v53, %v16827_v23  ;;  %v7324_v23 = vrot.slane %v16833_v35, 5  ;;  %v7536_v53 = vrot.slane %v16833_v35, 7 }
 0x54d   : > { %v7327_v16 = vsel %vm651_vm3, %v7322_v46, %v7323_v3  ;;  %8218 = vmatpush.msrb.mxu1 %v10609_v41 }
 0x54e   : > { %10489 = vmatmul.msk.f32.gmra.mxu1 %vm387_vm1, %v7328_v15  ;;  %10505 = vmatmul.msk.f32.gmra.mxu2 %vm387_vm1, %v7434_v5  ;;  %v7326_v26 = vsel %vm651_vm3, %v7324_v23, %v7325_v33 }
 0x54f   : > { %10521 = vmatmul.msk.f32.gmra.mxu3 %vm387_vm1, %v7540_v43  ;;  %10537 = vmatmul.msk.f32.gmra.mxu0 %vm387_vm1, %v16742_v45 }
 0x551   : > { %v6664_v52 = vpop.f32.mrf.mxu2 }
 0x552   : > { %v17136_v60 = vadd.f32 %v6664_v52, %v16944_v55  ;;  %v6746_v30 = vpop.f32.mrf.mxu3  ;;  %v7430_v55 = vrot.slane %v16833_v35, 6 }
 0x553   : > { %v17138_v1 = vadd.f32 %v6746_v30, %v6572_v49  ;;  %v6561_v63 = vpop.f32.mrf.mxu1  ;;  %v17188_v49 = vadd.f32 %v17000_v32, %v17047_v9 }
 0x554   : > { %v17142_v31 = vpop.f32.mrf.mxu0  ;;  %v6573_v15 = vadd.f32 %v6561_v63, %v16862_v19  ;;  %v7182_v19 = vld [vmem:[#allocation2 + $0xb8] sm:$0xff]  ;;  %v7710_v63 = vrot.slane %v16893_v22, 1 }
 0x555   : > { %v7817_v23 = vrot.slane %v7182_v19, 2  ;;  %v8028_v41 = vrot.slane %v7182_v19, 4 }
 0x556   : > { %10490 = vmatmul.msk.f32.gmra.mxu1 %vm387_vm1, %v7327_v16  ;;  %10506 = vmatmul.msk.f32.gmra.mxu2 %vm387_vm1, %v16523_v12  ;;  %v17160_v12 = vadd.f32 %v16955_v40, %v16987_v21  ;;  %v7432_v40 = vsel %vm685_vm2, %v7430_v55, %v7431_v50  ;;  %v7711_v16 = vrot.slane %v7182_v19, 1  ;;  %v7923_v50 = vrot.slane %v7182_v19, 3 }
 0x557   : > { %10522 = vmatmul.msk.f32.gmra.mxu3 %vm387_vm1, %v16527_v17  ;;  %10538 = vmatmul.msk.f32.gmra.mxu0 %vm387_vm1, %v17124_v6  ;;  %v7537_v17 = vrot.slane %v16835_v51, 7  ;;  %v7839_v22 = vsel %vm1202_vm7, %v6871_v42, %v7817_v23  ;;  %v10607_v42 = vld [vmem:[%s18568_s4 + $0x1218] sm:$0xff]  ;;  %v18978_v23 = vld [vmem:[#allocation44_spill] sm:$0xff] }
 0x558   : > { %v7733_v32 = vsel %vm1095_vm6, %v7710_v63, %v7711_v16  ;;  %v18977_v63 = vrot.slane %v15860_v61, 3 }
 0x559   : > { %v6667_v5 = vpop.f32.mrf.mxu2  ;;  %v7538_v21 = vsel %vm849_vm5, %v7536_v53, %v7537_v17 }
 0x55a   : > { %v17166_v43 = vadd.f32 %v6667_v5, %v16977_v8  ;;  %v6749_v20 = vpop.f32.mrf.mxu3  ;;  %v10608_v8 = vld [vmem:[%s18568_s4 + $0x1220] sm:$0xff]  ;;  %v17221_v5 = vadd.f32 %v17054_v27, %v17104_v13 }
 0x55b   : > { %v17168_v46 = vadd.f32 %v6749_v20, %v6573_v15  ;;  %v6564_v3 = vpop.f32.mrf.mxu1  ;;  %8219 = vmatpush.msrb.mxu1 %v10608_v8  ;;  %v7712_v20 = vrot.slane %v16920_v59, 1 }
 0x55c   : > { %v17174_v35 = vpop.f32.mrf.mxu0  ;;  %v6574_v52 = vadd.f32 %v6564_v3, %v16899_v58  ;;  %v7945_v58 = vsel %vm1309_vm8, %v6977_v25, %v7923_v50  ;;  %v17225_v3 = vld [vmem:[#allocation2 + $0xd0] sm:$0xff] }
 0x55d   : > { %8220 = vmatpush.msrb.mxu1 %v10607_v42  ;;  %v7925_v8 = vrot.slane %v17225_v3, 3  ;;  %v8029_v27 = vrot.slane %v17225_v3, 4  ;;  %v10606_v50 = vld [vmem:[%s18568_s4 + $0x1210] sm:$0xff] }
 0x55e   : > { %10491 = vmatmul.msk.f32.gmra.mxu1 %vm387_vm1, %v7326_v26  ;;  %10507 = vmatmul.msk.f32.gmra.mxu2 %vm387_vm1, %v7432_v40  ;;  %v7713_v26 = vrot.slane %v17225_v3, 1  ;;  %v7819_v40 = vrot.slane %v17225_v3, 2 }
 0x55f   : > { %10523 = vmatmul.msk.f32.gmra.mxu3 %vm387_vm1, %v7538_v21  ;;  %10539 = vmatmul.msk.f32.gmra.mxu0 %vm387_vm1, %v16835_v51  ;;  %v7944_v16 = vsel %vm1309_vm8, %v18977_v63, %v7925_v8  ;;  %v17317_v63 = vadd.f32 %v17142_v31, %v17166_v43 }
 0x560   : > { %v7732_v59 = vsel %vm1095_vm6, %v7712_v20, %v7713_v26  ;;  %8221 = vmatpush.msrb.mxu1 %v10606_v50  ;;  %v7716_v50 = vrot.slane %v16983_v37, 1  ;;  %v10626_v37 = vld [vmem:[%s18568_s4 + $0x1270] sm:$0xff] }
 0x561   : > { %v6670_v30 = vpop.f32.mrf.mxu2 }
 0x562   : > { %v17193_v33 = vadd.f32 %v6670_v30, %v17031_v38  ;;  %v6752_v55 = vpop.f32.mrf.mxu3  ;;  %v18975_v38 = vld [vmem:[#allocation28_spill] sm:$0xff] }
 0x563   : > { %v17195_v53 = vadd.f32 %v6752_v55, %v6574_v52  ;;  %v6943_v17 = vpop.f32.mrf.mxu1  ;;  %v8043_v9 = vsel %vm618_vm4, %v18975_v38, %v8028_v41  ;;  %v8042_v55 = vsel %vm618_vm4, %v18978_v23, %v8029_v27  ;;  %v17266_v41 = vadd.f32 %v17115_v28, %v17136_v60 }
 0x564   : > { %v17197_v15 = vpop.f32.mrf.mxu0  ;;  %v6967_v48 = vadd.f32 %v6943_v17, %v16926_v4 }
 0x566   : > { %10548 = vmatmul.msk.f32.vlgmr.msra.gmra.mxu1 %vm387_vm1, %v7733_v32  ;;  %10564 = vmatmul.msk.f32.vlgmr.msra.gmra.mxu2 %vm387_vm1, %v7839_v22  ;;  %v7714_v32 = vrot.slane %v16947_v2, 1  ;;  %v17270_v22 = vld [vmem:[#allocation2 + $0xe8] sm:$0xff] }
 0x567   : > { %10580 = vmatmul.msk.f32.vlgmr.msra.gmra.mxu3 %vm387_vm1, %v7945_v58  ;;  %10596 = vmatmul.msk.f32.vlgmr.msra.gmra.mxu0 %vm387_vm1, %v8043_v9  ;;  %v7715_v58 = vrot.slane %v17270_v22, 1  ;;  %v7821_v38 = vrot.slane %v17270_v22, 2  ;;  %v8030_v28 = vrot.slane %v17270_v22, 4 }
 0x569   : > { %v7049_v25 = vpop.f32.mrf.mxu2  ;;  %v7731_v2 = vsel %vm1095_vm6, %v7714_v32, %v7715_v58 }
 0x56a   : > { %v17230_v21 = vadd.f32 %v7049_v25, %v17089_v62  ;;  %v7147_v19 = vpop.f32.mrf.mxu3  ;;  %v18976_v62 = vrot.slane %v15860_v61, 2 }
 0x56b   : > { %v17234_v13 = vadd.f32 %v7147_v19, %v6967_v48  ;;  %v6946_v4 = vpop.f32.mrf.mxu1  ;;  %v7927_v48 = vrot.slane %v17270_v22, 3  ;;  %v18980_v19 = vrot.slane %v15914_v14, 3 }
 0x56c   : > { %v17236_v52 = vpop.f32.mrf.mxu0  ;;  %v7838_v30 = vsel %vm1202_vm7, %v18976_v62, %v7819_v40  ;;  %v6968_v61 = vadd.f32 %v6946_v4, %v16953_v11  ;;  %v18981_v4 = vld [vmem:[#allocation46_spill] sm:$0xff]  ;;  %v10605_v62 = vld [vmem:[%s18568_s4 + $0x1208] sm:$0xff] }
 0x56d   : > { %v7943_v27 = vsel %vm1309_vm8, %v18980_v19, %v7927_v48  ;;  %8222 = vmatpush.msrb.mxu1 %v10605_v62  ;;  %v18982_v19 = vrot.slane %v15992_v56, 2  ;;  %v18983_v62 = vrot.slane %v15992_v56, 3  ;;  %v10640_v56 = vld [vmem:[%s18568_s4 + $0x12a0] sm:$0xff] }
 0x56e   : > { %10549 = vmatmul.msk.f32.gmra.mxu1 %vm387_vm1, %v7732_v59  ;;  %10565 = vmatmul.msk.f32.gmra.mxu2 %vm387_vm1, %v7838_v30  ;;  %v8041_v59 = vsel %vm618_vm4, %v18981_v4, %v8030_v28  ;;  %v10627_v30 = vld [vmem:[%s18568_s4 + $0x1278] sm:$0xff]  ;;  %v10625_v4 = vld [vmem:[%s18568_s4 + $0x1268] sm:$0xff] }
 0x56f   : > { %10581 = vmatmul.msk.f32.gmra.mxu3 %vm387_vm1, %v7944_v16  ;;  %10597 = vmatmul.msk.f32.gmra.mxu0 %vm387_vm1, %v8042_v55  ;;  %v10659_v16 = vld [vmem:[%s18568_s4 + $0x12f8] sm:$0xff] }
 0x570   : > { %8322 = vmatpush.msrb.mxu2 %v10627_v30  ;;  %8534 = vmatpush.msrb.mxu0 %v10659_v16 }
 0x571   : > { %v7052_v17 = vpop.f32.mrf.mxu2 }
 0x572   : > { %v17275_v9 = vadd.f32 %v7052_v17, %v17132_v54  ;;  %v7150_v42 = vpop.f32.mrf.mxu3  ;;  %v18979_v54 = vrot.slane %v15914_v14, 2  ;;  %v10643_v14 = vld [vmem:[%s18568_s4 + $0x12b8] sm:$0xff]  ;;  %8323 = vmatpush.msrb.mxu2 %v10626_v37 }
 0x573   : > { %v17279_v60 = vadd.f32 %v7150_v42, %v6968_v61  ;;  %v6949_v11 = vpop.f32.mrf.mxu1  ;;  %v17324_v61 = vld [vmem:[#allocation2 + $0x100] sm:$0xff]  ;;  %8428 = vmatpush.msrb.mxu3 %v10643_v14 }
 0x574   : > { %v17281_v25 = vpop.f32.mrf.mxu0  ;;  %v7837_v20 = vsel %vm1202_vm7, %v18979_v54, %v7821_v38  ;;  %v6969_v23 = vadd.f32 %v6949_v11, %v16989_v36  ;;  %v7717_v17 = vrot.slane %v17324_v61, 1  ;;  %v7823_v32 = vrot.slane %v17324_v61, 2  ;;  %v18984_v14 = vld [vmem:[#allocation47_spill] sm:$0xff]  ;;  %8324 = vmatpush.msrb.mxu2 %v10625_v4  ;;  %v10623_v4 = vld [vmem:[%s18568_s4 + $0x1258] sm:$0xff] }
 0x575   : > { %v7929_v42 = vrot.slane %v17324_v61, 3  ;;  %v8031_v28 = vrot.slane %v17324_v61, 4 }
 0x576   : > { %10550 = vmatmul.msk.f32.gmra.mxu1 %vm387_vm1, %v7731_v2  ;;  %10566 = vmatmul.msk.f32.gmra.mxu2 %vm387_vm1, %v7837_v20  ;;  %v10642_v2 = vld [vmem:[%s18568_s4 + $0x12b0] sm:$0xff]  ;;  %v7730_v20 = vsel %vm1095_vm6, %v7716_v50, %v7717_v17  ;;  %v10656_v50 = vld [vmem:[%s18568_s4 + $0x12e0] sm:$0xff] }
 0x577   : > { %10582 = vmatmul.msk.f32.gmra.mxu3 %vm387_vm1, %v7943_v27  ;;  %10598 = vmatmul.msk.f32.gmra.mxu0 %vm387_vm1, %v8041_v59  ;;  %v7836_v27 = vsel %vm1202_vm7, %v18982_v19, %v7823_v32  ;;  %v10641_v59 = vld [vmem:[%s18568_s4 + $0x12a8] sm:$0xff]  ;;  %v7942_v30 = vsel %vm1309_vm8, %v18983_v62, %v7929_v42  ;;  %v8040_v16 = vsel %vm618_vm4, %v18984_v14, %v8031_v28 }
 0x578   : > { %8429 = vmatpush.msrb.mxu3 %v10642_v2  ;;  %v17392_v28 = vadd.f32 %v17174_v35, %v17193_v33  ;;  %v10639_v35 = vld [vmem:[%s18568_s4 + $0x1298] sm:$0xff] }
 0x579   : > { %v7055_v55 = vpop.f32.mrf.mxu2 }
 0x57a   : > { %v17329_v31 = vadd.f32 %v7055_v55, %v17160_v12  ;;  %v7153_v43 = vpop.f32.mrf.mxu3  ;;  %v10658_v12 = vld [vmem:[%s18568_s4 + $0x12f0] sm:$0xff]  ;;  %v10624_v55 = vld [vmem:[%s18568_s4 + $0x1260] sm:$0xff]  ;;  %8430 = vmatpush.msrb.mxu3 %v10641_v59  ;;  %v10655_v59 = vld [vmem:[%s18568_s4 + $0x12d8] sm:$0xff] }
 0x57b   : > { %v17333_v36 = vadd.f32 %v7153_v43, %v6969_v23  ;;  %v6952_v11 = vpop.f32.mrf.mxu1  ;;  %8535 = vmatpush.msrb.mxu0 %v10658_v12  ;;  %v10657_v23 = vld [vmem:[%s18568_s4 + $0x12e8] sm:$0xff]  ;;  %v10604_v43 = vld [vmem:[%s18568_s4 + $0x1200] sm:$0xff]  ;;  %v7718_v12 = vrot.slane %v17037_v34, 1  ;;  %8325 = vmatpush.msrb.mxu2 %v10624_v55  ;;  %v10622_v55 = vld [vmem:[%s18568_s4 + $0x1250] sm:$0xff] }
 0x57c   : > { %v17344_v54 = vpop.f32.mrf.mxu0  ;;  %v6970_v37 = vadd.f32 %v6952_v11, %v17052_v0  ;;  %8431 = vmatpush.msrb.mxu3 %v10640_v56  ;;  %8223 = vmatpush.msrb.mxu1 %v10604_v43  ;;  %v10638_v56 = vld [vmem:[%s18568_s4 + $0x1290] sm:$0xff] }
 0x57d   : > { %8536 = vmatpush.msrb.mxu0 %v10657_v23  ;;  %8326 = vmatpush.msrb.mxu2 %v10623_v4  ;;  %v10621_v4 = vld [vmem:[%s18568_s4 + $0x1248] sm:$0xff] }
 0x57e   : > { %10551 = vmatmul.msk.f32.gmra.mxu1 %vm387_vm1, %v7730_v20  ;;  %10567 = vmatmul.msk.f32.gmra.mxu2 %vm387_vm1, %v7836_v27  ;;  %v17396_v20 = vld [vmem:[#allocation2 + $0x118] sm:$0xff] }
 0x57f   : > { %10583 = vmatmul.msk.f32.gmra.mxu3 %vm387_vm1, %v7942_v30  ;;  %10599 = vmatmul.msk.f32.gmra.mxu0 %vm387_vm1, %v8040_v16  ;;  %v7719_v19 = vrot.slane %v17396_v20, 1  ;;  %v18727_v27 = vrot.slane %v17396_v20, 2  ;;  %v18715_v34 = vrot.slane %v17396_v20, 3  ;;  %v8032_v11 = vrot.slane %v17396_v20, 4 }
 0x580   : > { %8537 = vmatpush.msrb.mxu0 %v10656_v50  ;;  %8432 = vmatpush.msrb.mxu3 %v10639_v35  ;;  %v18985_v50 = vld [vmem:[#allocation50_spill] sm:$0xff]  ;;  %v10637_v35 = vld [vmem:[%s18568_s4 + $0x1288] sm:$0xff] }
 0x581   : > { %v7058_v2 = vpop.f32.mrf.mxu2  ;;  %v7729_v16 = vsel %vm1095_vm6, %v7718_v12, %v7719_v19  ;;  %v7835_v23 = vsel %vm1202_vm7, %v6879_v7, %v18727_v27  ;;  %v7941_v7 = vsel %vm1309_vm8, %v6985_v29, %v18715_v34  ;;  %v8039_v43 = vsel %vm618_vm4, %v18985_v50, %v8032_v11  ;;  %8327 = vmatpush.msrb.mxu2 %v10622_v55 }
 0x582   : > { %v17407_v0 = vadd.f32 %v7058_v2, %v17188_v49  ;;  %v7156_v33 = vpop.f32.mrf.mxu3  ;;  %v17418_v49 = vld [vmem:[#allocation2 + $0x130] sm:$0xff]  ;;  %8538 = vmatpush.msrb.mxu0 %v10655_v59  ;;  %v17467_v11 = vadd.f32 %v17197_v15, %v17230_v21  ;;  %v7932_v59 = vrot.slane %v16742_v45, 3  ;;  %8433 = vmatpush.msrb.mxu3 %v10638_v56  ;;  %v10620_v15 = vld [vmem:[%s18568_s4 + $0x1240] sm:$0xff] }
 0x583   : > { %v17414_v62 = vadd.f32 %v7156_v33, %v6970_v37  ;;  %v6955_v30 = vpop.f32.mrf.mxu1  ;;  %v7720_v37 = vrot.slane %v16742_v45, 1  ;;  %v10654_v2 = vld [vmem:[%s18568_s4 + $0x12d0] sm:$0xff]  ;;  %v18726_v12 = vrot.slane %v17418_v49, 1  ;;  %v18725_v29 = vrot.slane %v17418_v49, 2  ;;  %v10675_v33 = vld [vmem:[%s18568_s4 + $0x1338] sm:$0xff]  ;;  %v10636_v21 = vld [vmem:[%s18568_s4 + $0x1280] sm:$0xff]  ;;  %8328 = vmatpush.msrb.mxu2 %v10621_v4 }
 0x584   : > { %v17416_v14 = vpop.f32.mrf.mxu0  ;;  %v6971_v50 = vadd.f32 %v6955_v30, %v17109_v24  ;;  %8539 = vmatpush.msrb.mxu0 %v10654_v2  ;;  %8616 = vmatpush.msra.mxu1 %v10675_v33  ;;  %v10652_v24 = vld [vmem:[%s18568_s4 + $0x12c0] sm:$0xff] }
 0x585   : > { %8434 = vmatpush.msrb.mxu3 %v10637_v35  ;;  %v7728_v34 = vsel %vm1095_vm6, %v7720_v37, %v18726_v12  ;;  %8329 = vmatpush.msrb.mxu2 %v10620_v15  ;;  %v7722_v37 = vrot.slane %v17124_v6, 1  ;;  %v10687_v12 = vld [vmem:[%s18568_s4 + $0x1358] sm:$0xff] }
 0x586   : > { %10552 = vmatmul.msk.f32.gmra.mxu1 %vm387_vm1, %v7729_v16  ;;  %10568 = vmatmul.msk.f32.gmra.mxu2 %vm387_vm1, %v7835_v23  ;;  %v18724_v16 = vrot.slane %v17418_v49, 3  ;;  %v8033_v23 = vrot.slane %v17418_v49, 4 }
 0x587   : > { %10584 = vmatmul.msk.f32.gmra.mxu3 %vm387_vm1, %v7941_v7  ;;  %10600 = vmatmul.msk.f32.gmra.mxu0 %vm387_vm1, %v8039_v43  ;;  %v10653_v7 = vld [vmem:[%s18568_s4 + $0x12c8] sm:$0xff] }
 0x588   : > { %8540 = vmatpush.msrb.mxu0 %v10653_v7  ;;  %v7940_v35 = vsel %vm1309_vm8, %v7932_v59, %v18724_v16  ;;  %v8038_v33 = vsel %vm618_vm4, %v7215_v10, %v8033_v23  ;;  %8435 = vmatpush.msrb.mxu3 %v10636_v21  ;;  %v10674_v10 = vld [vmem:[%s18568_s4 + $0x1330] sm:$0xff]  ;;  %v17522_v59 = vadd.f32 %v17236_v52, %v17275_v9  ;;  %v10705_v16 = vld [vmem:[%s18568_s4 + $0x13a8] sm:$0xff] }
 0x589   : > { %v7061_v43 = vpop.f32.mrf.mxu2  ;;  %8617 = vmatpush.msra.mxu1 %v10674_v10  ;;  %v7936_v10 = vrot.slane %v16835_v51, 3 }
 0x58a   : > { %v17483_v55 = vadd.f32 %v7061_v43, %v17221_v5  ;;  %v7159_v56 = vpop.f32.mrf.mxu3  ;;  %v7834_v5 = vsel %vm1202_vm7, %v7826_v44, %v18725_v29  ;;  %8541 = vmatpush.msrb.mxu0 %v10652_v24 }
 0x58b   : > { %v17488_v30 = vadd.f32 %v7159_v56, %v6971_v50  ;;  %v6958_v2 = vpop.f32.mrf.mxu1  ;;  %v17508_v50 = vld [vmem:[#allocation2 + $0x148] sm:$0xff] }
 0x58c   : > { %v17498_v4 = vpop.f32.mrf.mxu0  ;;  %v18723_v45 = vrot.slane %v17508_v50, 1  ;;  %v18722_v44 = vrot.slane %v17508_v50, 2  ;;  %v18717_v23 = vrot.slane %v17508_v50, 4  ;;  %v6972_v7 = vadd.f32 %v6958_v2, %v17138_v1 }
 0x58e   : > { %10553 = vmatmul.msk.f32.gmra.mxu1 %vm387_vm1, %v7728_v34  ;;  %10569 = vmatmul.msk.f32.gmra.mxu2 %vm387_vm1, %v7834_v5  ;;  %v18721_v34 = vrot.slane %v17508_v50, 3  ;;  %v7727_v52 = vsel %vm1095_vm6, %v7722_v37, %v18723_v45  ;;  %v7833_v1 = vsel %vm1202_vm7, %v6883_v47, %v18722_v44  ;;  %v8037_v2 = vsel %vm618_vm4, %v16136_v57, %v18717_v23  ;;  %v17555_v5 = vld [vmem:[#allocation2 + $0x160] sm:$0xff]  ;;  %v10673_v57 = vld [vmem:[%s18568_s4 + $0x1328] sm:$0xff] }
 0x58f   : > { %10585 = vmatmul.msk.f32.gmra.mxu3 %vm387_vm1, %v7940_v35  ;;  %10601 = vmatmul.msk.f32.gmra.mxu0 %vm387_vm1, %v8038_v33  ;;  %v7724_v47 = vrot.slane %v16835_v51, 1  ;;  %v7830_v35 = vrot.slane %v16835_v51, 2  ;;  %v18719_v33 = vrot.slane %v17555_v5, 2  ;;  %v17570_v37 = vadd.f32 %v17281_v25, %v17329_v31  ;;  %v8136_v44 = vld [vmem:[#allocation2 + $0x108] sm:$0xff] }
 0x590   : > { %8618 = vmatpush.msra.mxu1 %v10673_v57  ;;  %v10689_v45 = vld [vmem:[%s18568_s4 + $0x1368] sm:$0xff] }
 0x591   : > { %v7064_v6 = vpop.f32.mrf.mxu2  ;;  %v7832_v31 = vsel %vm1202_vm7, %v7830_v35, %v18719_v33  ;;  %v10672_v35 = vld [vmem:[%s18568_s4 + $0x1320] sm:$0xff] }
 0x592   : > { %v17528_v43 = vadd.f32 %v7064_v6, %v17266_v41  ;;  %v7162_v15 = vpop.f32.mrf.mxu3  ;;  %v18986_v41 = vrot.slane %v16115_v18, 3  ;;  %v18720_v18 = vrot.slane %v17555_v5, 1  ;;  %v18716_v6 = vrot.slane %v17555_v5, 4  ;;  %8619 = vmatpush.msra.mxu1 %v10672_v35 }
 0x593   : > { %v17530_v21 = vadd.f32 %v7162_v15, %v6972_v7  ;;  %v6961_v56 = vpop.f32.mrf.mxu1  ;;  %v18718_v7 = vrot.slane %v17555_v5, 3 }
 0x594   : > { %v17542_v9 = vpop.f32.mrf.mxu0  ;;  %v7939_v24 = vsel %vm1309_vm8, %v18986_v41, %v18721_v34  ;;  %v6973_v15 = vadd.f32 %v6961_v56, %v17168_v46  ;;  %v7726_v25 = vsel %vm1095_vm6, %v7724_v47, %v18720_v18  ;;  %v8127_v47 = vld [vmem:[#allocation2 + $0xc0] sm:$0xff]  ;;  %v8133_v34 = vld [vmem:[#allocation2 + $0xf0] sm:$0xff] }
 0x595   : > { %v7938_v46 = vsel %vm1309_vm8, %v7936_v10, %v18718_v7  ;;  %v17610_v10 = vadd.f32 %v17344_v54, %v17407_v0  ;;  %v8469_v23 = vrot.slane %v8127_v47, 7 }
 0x596   : > { %10554 = vmatmul.msk.f32.gmra.mxu1 %vm387_vm1, %v7727_v52  ;;  %10570 = vmatmul.msk.f32.gmra.mxu2 %vm387_vm1, %v7833_v1 }
 0x597   : > { %10586 = vmatmul.msk.f32.gmra.mxu3 %vm387_vm1, %v7939_v24  ;;  %10602 = vmatmul.msk.f32.gmra.mxu0 %vm387_vm1, %v8037_v2 }
 0x599   : > { %v7067_v52 = vpop.f32.mrf.mxu2 }
 0x59a   : > { %v17577_v1 = vadd.f32 %v7067_v52, %v17317_v63  ;;  %v7165_v41 = vpop.f32.mrf.mxu3  ;;  %v18987_v63 = vrot.slane %v16835_v51, 4  ;;  %v8151_v51 = vrot.slane %v8127_v47, 4 }
 0x59b   : > { %v17579_v24 = vadd.f32 %v7165_v41, %v6973_v15  ;;  %v6964_v2 = vpop.f32.mrf.mxu1  ;;  %v8257_v41 = vrot.slane %v8127_v47, 5 }
 0x59c   : > { %v17589_v57 = vpop.f32.mrf.mxu0  ;;  %v8036_v56 = vsel %vm618_vm4, %v18987_v63, %v18716_v6  ;;  %v6974_v15 = vadd.f32 %v6964_v2, %v17195_v53  ;;  %v18988_v2 = vld [vmem:[#allocation31_spill] sm:$0xff] }
 0x59d   : > { %v18989_v7 = vrot.slane %v18988_v2, 4 }
 0x59e   : > { %10555 = vmatmul.msk.f32.gmra.mxu1 %vm387_vm1, %v7726_v25  ;;  %10571 = vmatmul.msk.f32.gmra.mxu2 %vm387_vm1, %v7832_v31  ;;  %v17613_v25 = vld [vmem:[#allocation2 + $0xc8] sm:$0xff] }
 0x59f   : > { %10587 = vmatmul.msk.f32.gmra.mxu3 %vm387_vm1, %v7938_v46  ;;  %10603 = vmatmul.msk.f32.gmra.mxu0 %vm387_vm1, %v8036_v56  ;;  %v8258_v31 = vrot.slane %v17613_v25, 5  ;;  %v8363_v46 = vrot.slane %v8127_v47, 6  ;;  %v8364_v6 = vrot.slane %v17613_v25, 6  ;;  %v8470_v54 = vrot.slane %v17613_v25, 7 }
 0x5a0   : > { %v8174_v33 = vsel %vm618_vm4, %v8151_v51, %v18989_v7  ;;  %v10671_v7 = vld [vmem:[%s18568_s4 + $0x1318] sm:$0xff]  ;;  %v17644_v51 = vadd.f32 %v17416_v14, %v17483_v55 }
 0x5a1   : > { %v7070_v52 = vpop.f32.mrf.mxu2  ;;  %v8386_v47 = vsel %vm685_vm2, %v8363_v46, %v8364_v6  ;;  %8620 = vmatpush.msra.mxu1 %v10671_v7  ;;  %v17647_v46 = vld [vmem:[#allocation2 + $0xe0] sm:$0xff] }
 0x5a2   : > { %v17617_v63 = vadd.f32 %v7070_v52, %v17392_v28  ;;  %v7168_v56 = vpop.f32.mrf.mxu3  ;;  %v8280_v28 = vsel %vm651_vm3, %v8257_v41, %v8258_v31  ;;  %v8130_v52 = vld [vmem:[#allocation2 + $0xd8] sm:$0xff]  ;;  %v8472_v14 = vrot.slane %v17647_v46, 7  ;;  %v8765_v3 = vrot.slane %v17647_v46, 2 }
 0x5a3   : > { %v17621_v0 = vadd.f32 %v7168_v56, %v6974_v15  ;;  %v7384_v35 = vpop.f32.mrf.mxu1  ;;  %v8492_v15 = vsel %vm849_vm5, %v8469_v23, %v8470_v54  ;;  %v8259_v31 = vrot.slane %v8130_v52, 5  ;;  %v8260_v23 = vrot.slane %v17647_v46, 5 }
 0x5a4   : > { %v17623_v53 = vpop.f32.mrf.mxu0  ;;  %v7408_v41 = vadd.f32 %v7384_v35, %v17234_v13  ;;  %v8365_v56 = vrot.slane %v8130_v52, 6  ;;  %v18990_v13 = vld [vmem:[#allocation32_spill] sm:$0xff] }
 0x5a5   : > { %v18991_v35 = vrot.slane %v18990_v13, 4  ;;  %v8279_v18 = vsel %vm651_vm3, %v8259_v31, %v8260_v23 }
 0x5a6   : > { %10612 = vmatmul.msk.f32.vlgmr.msrb.gmra.mxu1 %vm387_vm1, %v8174_v33  ;;  %10628 = vmatmul.msk.f32.vlgmr.msrb.gmra.mxu2 %vm387_vm1, %v8280_v28  ;;  %v8153_v33 = vrot.slane %v8130_v52, 4  ;;  %v8366_v28 = vrot.slane %v17647_v46, 6 }
 0x5a7   : > { %10644 = vmatmul.msk.f32.vlgmr.msrb.gmra.mxu3 %vm387_vm1, %v8386_v47  ;;  %10660 = vmatmul.msk.f32.vlgmr.msrb.gmra.mxu0 %vm387_vm1, %v8492_v15  ;;  %v8471_v47 = vrot.slane %v8130_v52, 7 }
 0x5a8   : > { %v8173_v7 = vsel %vm618_vm4, %v8153_v33, %v18991_v35  ;;  %v10670_v33 = vld [vmem:[%s18568_s4 + $0x1310] sm:$0xff] }
 0x5a9   : > { %v7490_v6 = vpop.f32.mrf.mxu2  ;;  %v8491_v52 = vsel %vm849_vm5, %v8471_v47, %v8472_v14  ;;  %8621 = vmatpush.msra.mxu1 %v10670_v33  ;;  %v8367_v47 = vrot.slane %v8133_v34, 6 }
 0x5aa   : > { %v17651_v54 = vadd.f32 %v7490_v6, %v17467_v11  ;;  %v7596_v2 = vpop.f32.mrf.mxu3  ;;  %v8385_v11 = vsel %vm685_vm2, %v8365_v56, %v8366_v28  ;;  %v17678_v6 = vadd.f32 %v17498_v4, %v17528_v43  ;;  %v8261_v56 = vrot.slane %v8133_v34, 5 }
 0x5ab   : > { %v17655_v55 = vadd.f32 %v7596_v2, %v7408_v41  ;;  %v7387_v15 = vpop.f32.mrf.mxu1  ;;  %v17681_v2 = vld [vmem:[#allocation2 + $0xf8] sm:$0xff] }
 0x5ac   : > { %v17669_v41 = vpop.f32.mrf.mxu0  ;;  %v7409_v31 = vadd.f32 %v7387_v15, %v17279_v60  ;;  %v8262_v28 = vrot.slane %v17681_v2, 5  ;;  %v8368_v35 = vrot.slane %v17681_v2, 6  ;;  %v8474_v4 = vrot.slane %v17681_v2, 7  ;;  %v18992_v60 = vld [vmem:[#allocation33_spill] sm:$0xff] }
 0x5ad   : > { %v18993_v15 = vrot.slane %v18992_v60, 4  ;;  %v17724_v60 = vld [vmem:[#allocation2 + $0x110] sm:$0xff]  ;;  %v8661_v22 = vrot.slane %v17681_v2, 1 }
 0x5ae   : > { %10613 = vmatmul.msk.f32.gmra.mxu1 %vm387_vm1, %v8173_v7  ;;  %10629 = vmatmul.msk.f32.gmra.mxu2 %vm387_vm1, %v8279_v18  ;;  %v8155_v18 = vrot.slane %v8133_v34, 4  ;;  %v8473_v7 = vrot.slane %v8133_v34, 7  ;;  %v8278_v33 = vsel %vm651_vm3, %v8261_v56, %v8262_v28  ;;  %v17716_v56 = vadd.f32 %v17542_v9, %v17577_v1 }
 0x5af   : > { %10645 = vmatmul.msk.f32.gmra.mxu3 %vm387_vm1, %v8385_v11  ;;  %10661 = vmatmul.msk.f32.gmra.mxu0 %vm387_vm1, %v8491_v52  ;;  %v8157_v28 = vrot.slane %v8136_v44, 4  ;;  %v8769_v61 = vrot.slane %v17724_v60, 2 }
 0x5b0   : > { %v8172_v52 = vsel %vm618_vm4, %v8155_v18, %v18993_v15  ;;  %v8490_v34 = vsel %vm849_vm5, %v8473_v7, %v8474_v4  ;;  %v10669_v18 = vld [vmem:[%s18568_s4 + $0x1308] sm:$0xff]  ;;  %v8263_v4 = vrot.slane %v8136_v44, 5  ;;  %v8264_v15 = vrot.slane %v17724_v60, 5 }
 0x5b1   : > { %v7493_v23 = vpop.f32.mrf.mxu2  ;;  %8622 = vmatpush.msra.mxu1 %v10669_v18 }
 0x5b2   : > { %v17685_v14 = vadd.f32 %v7493_v23, %v17522_v59  ;;  %v7599_v13 = vpop.f32.mrf.mxu3  ;;  %v8384_v59 = vsel %vm685_vm2, %v8367_v47, %v8368_v35  ;;  %v10707_v23 = vld [vmem:[%s18568_s4 + $0x13b8] sm:$0xff] }
 0x5b3   : > { %v17689_v43 = vadd.f32 %v7599_v13, %v7409_v31  ;;  %v7390_v11 = vpop.f32.mrf.mxu1  ;;  %v10691_v31 = vld [vmem:[%s18568_s4 + $0x1378] sm:$0xff]  ;;  %8828 = vmatpush.msra.mxu3 %v10707_v23  ;;  %v10706_v23 = vld [vmem:[%s18568_s4 + $0x13b0] sm:$0xff] }
 0x5b4   : > { %8722 = vmatpush.msra.mxu2 %v10691_v31  ;;  %v10723_v47 = vld [vmem:[%s18568_s4 + $0x13f8] sm:$0xff]  ;;  %v7410_v13 = vadd.f32 %v7390_v11, %v17333_v36  ;;  %v17722_v35 = vpop.f32.mrf.mxu0  ;;  %v8476_v36 = vrot.slane %v17724_v60, 7  ;;  %v8139_v11 = vld [vmem:[#allocation2 + $0x120] sm:$0xff]  ;;  %v10690_v31 = vld [vmem:[%s18568_s4 + $0x1370] sm:$0xff] }
 0x5b5   : > { %8934 = vmatpush.msra.mxu0 %v10723_v47  ;;  %v17743_v47 = vld [vmem:[#allocation2 + $0x128] sm:$0xff]  ;;  %8829 = vmatpush.msra.mxu3 %v10706_v23 }
 0x5b6   : > { %10614 = vmatmul.msk.f32.gmra.mxu1 %vm387_vm1, %v8172_v52  ;;  %10630 = vmatmul.msk.f32.gmra.mxu2 %vm387_vm1, %v8278_v33  ;;  %v8369_v52 = vrot.slane %v8136_v44, 6  ;;  %v8370_v33 = vrot.slane %v17724_v60, 6  ;;  %v18728_v23 = vrot.slane %v17743_v47, 4 }
 0x5b7   : > { %10646 = vmatmul.msk.f32.gmra.mxu3 %vm387_vm1, %v8384_v59  ;;  %10662 = vmatmul.msk.f32.gmra.mxu0 %vm387_vm1, %v8490_v34  ;;  %v8475_v59 = vrot.slane %v8136_v44, 7  ;;  %v18994_v44 = vld [vmem:[#allocation53_spill] sm:$0xff] }
 0x5b8   : > { %8723 = vmatpush.msra.mxu2 %v10690_v31  ;;  %v8383_v31 = vsel %vm685_vm2, %v8369_v52, %v8370_v33  ;;  %v10688_v52 = vld [vmem:[%s18568_s4 + $0x1360] sm:$0xff]  ;;  %8830 = vmatpush.msra.mxu3 %v10705_v16  ;;  %v17793_v16 = vadd.f32 %v17589_v57, %v17617_v63 }
 0x5b9   : > { %v7496_v7 = vpop.f32.mrf.mxu2  ;;  %v10704_v33 = vld [vmem:[%s18568_s4 + $0x13a0] sm:$0xff] }
 0x5ba   : > { %v17728_v9 = vadd.f32 %v7496_v7, %v17570_v37  ;;  %v7602_v1 = vpop.f32.mrf.mxu3  ;;  %v10722_v37 = vld [vmem:[%s18568_s4 + $0x13f0] sm:$0xff]  ;;  %8724 = vmatpush.msra.mxu2 %v10689_v45  ;;  %8831 = vmatpush.msra.mxu3 %v10704_v33  ;;  %v17815_v33 = vld [vmem:[#allocation2 + $0x140] sm:$0xff] }
 0x5bb   : > { %v17732_v34 = vadd.f32 %v7602_v1, %v7410_v13  ;;  %v7393_v18 = vpop.f32.mrf.mxu1  ;;  %v18995_v13 = vrot.slane %v18994_v44, 4  ;;  %v8277_v1 = vsel %vm651_vm3, %v8263_v4, %v8264_v15  ;;  %8935 = vmatpush.msra.mxu0 %v10722_v37  ;;  %v8159_v4 = vrot.slane %v8139_v11, 4  ;;  %v10721_v15 = vld [vmem:[%s18568_s4 + $0x13e8] sm:$0xff] }
 0x5bc   : > { %v8265_v37 = vrot.slane %v8139_v11, 5  ;;  %v8266_v44 = vrot.slane %v17743_v47, 5  ;;  %8725 = vmatpush.msra.mxu2 %v10688_v52 }
 0x5bd   : > { %v8171_v7 = vsel %vm618_vm4, %v8157_v28, %v18995_v13  ;;  %v8489_v28 = vsel %vm849_vm5, %v8475_v59, %v8476_v36  ;;  %v10668_v59 = vld [vmem:[%s18568_s4 + $0x1300] sm:$0xff]  ;;  %v8371_v36 = vrot.slane %v8139_v11, 6  ;;  %v8372_v13 = vrot.slane %v17743_v47, 6  ;;  %8936 = vmatpush.msra.mxu0 %v10721_v15 }
 0x5be   : > { %10615 = vmatmul.msk.f32.gmra.mxu1 %vm387_vm1, %v8171_v7  ;;  %10631 = vmatmul.msk.f32.gmra.mxu2 %vm387_vm1, %v8277_v1  ;;  %v8477_v7 = vrot.slane %v8139_v11, 7  ;;  %v8478_v1 = vrot.slane %v17743_v47, 7  ;;  %v10703_v11 = vld [vmem:[%s18568_s4 + $0x1398] sm:$0xff]  ;;  %v8170_v57 = vsel %vm618_vm4, %v8159_v4, %v18728_v23  ;;  %v10702_v4 = vld [vmem:[%s18568_s4 + $0x1390] sm:$0xff] }
 0x5bf   : > { %10647 = vmatmul.msk.f32.gmra.mxu3 %vm387_vm1, %v8383_v31  ;;  %10663 = vmatmul.msk.f32.gmra.mxu0 %vm387_vm1, %v8489_v28  ;;  %v10720_v31 = vld [vmem:[%s18568_s4 + $0x13e0] sm:$0xff]  ;;  %v7411_v28 = vadd.f32 %v7393_v18, %v17414_v62  ;;  %v10719_v62 = vld [vmem:[%s18568_s4 + $0x13d8] sm:$0xff]  ;;  %v17801_v18 = vpop.f32.mrf.mxu0  ;;  %v8382_v63 = vsel %vm685_vm2, %v8371_v36, %v8372_v13  ;;  %v8268_v13 = vrot.slane %v17815_v33, 5 }
 0x5c0   : > { %8623 = vmatpush.msra.mxu1 %v10668_v59  ;;  %8937 = vmatpush.msra.mxu0 %v10720_v31  ;;  %v8488_v52 = vsel %vm849_vm5, %v8477_v7, %v8478_v1  ;;  %v10685_v7 = vld [vmem:[%s18568_s4 + $0x1348] sm:$0xff]  ;;  %v10739_v31 = vld [vmem:[%s18568_s4 + $0x1438] sm:$0xff] }
 0x5c1   : > { %v7499_v29 = vpop.f32.mrf.mxu2  ;;  %8726 = vmatpush.msra.mxu2 %v10687_v12  ;;  %8832 = vmatpush.msra.mxu3 %v10703_v11  ;;  %v18730_v12 = vrot.slane %v17815_v33, 4  ;;  %v10701_v1 = vld [vmem:[%s18568_s4 + $0x1388] sm:$0xff] }
 0x5c2   : > { %v17796_v45 = vadd.f32 %v7499_v29, %v17610_v10  ;;  %v7605_v27 = vpop.f32.mrf.mxu3  ;;  %v8276_v29 = vsel %vm651_vm3, %v8265_v37, %v8266_v44  ;;  %v8142_v10 = vld [vmem:[#allocation2 + $0x138] sm:$0xff]  ;;  %8938 = vmatpush.msra.mxu0 %v10719_v62  ;;  %v10718_v44 = vld [vmem:[%s18568_s4 + $0x13d0] sm:$0xff]  ;;  %v8374_v62 = vrot.slane %v17815_v33, 6  ;;  %9032 = vmatpush.msrb.mxu1 %v10739_v31 }
 0x5c3   : > { %v17803_v15 = vadd.f32 %v7605_v27, %v7411_v28  ;;  %v7396_v59 = vpop.f32.mrf.mxu1  ;;  %v10686_v27 = vld [vmem:[%s18568_s4 + $0x1350] sm:$0xff]  ;;  %v8161_v37 = vrot.slane %v8142_v10, 4  ;;  %v8267_v36 = vrot.slane %v8142_v10, 5  ;;  %v17843_v28 = vadd.f32 %v17623_v53, %v17651_v54  ;;  %8833 = vmatpush.msra.mxu3 %v10702_v4  ;;  %v10684_v53 = vld [vmem:[%s18568_s4 + $0x1340] sm:$0xff] }
 0x5c4   : > { %v8373_v11 = vrot.slane %v8142_v10, 6  ;;  %8727 = vmatpush.msra.mxu2 %v10686_v27  ;;  %8939 = vmatpush.msra.mxu0 %v10718_v44  ;;  %v10700_v54 = vld [vmem:[%s18568_s4 + $0x1380] sm:$0xff] }
 0x5c5   : > { %8834 = vmatpush.msra.mxu3 %v10701_v1  ;;  %v8169_v44 = vsel %vm618_vm4, %v8161_v37, %v18730_v12  ;;  %v8275_v31 = vsel %vm651_vm3, %v8267_v36, %v8268_v13  ;;  %v17875_v1 = vld [vmem:[#allocation2 + $0x158] sm:$0xff] }
 0x5c6   : > { %10616 = vmatmul.msk.f32.gmra.mxu1 %vm387_vm1, %v8170_v57  ;;  %10632 = vmatmul.msk.f32.gmra.mxu2 %vm387_vm1, %v8276_v29  ;;  %v8479_v57 = vrot.slane %v8142_v10, 7  ;;  %v8480_v29 = vrot.slane %v17815_v33, 7  ;;  %v18729_v36 = vrot.slane %v17875_v1, 4 }
 0x5c7   : > { %10648 = vmatmul.msk.f32.gmra.mxu3 %vm387_vm1, %v8382_v63  ;;  %10664 = vmatmul.msk.f32.gmra.mxu0 %vm387_vm1, %v8488_v52  ;;  %v10717_v63 = vld [vmem:[%s18568_s4 + $0x13c8] sm:$0xff]  ;;  %v7412_v52 = vadd.f32 %v7396_v59, %v17488_v30  ;;  %v10716_v30 = vld [vmem:[%s18568_s4 + $0x13c0] sm:$0xff] }
 0x5c8   : > { %8728 = vmatpush.msra.mxu2 %v10685_v7  ;;  %8940 = vmatpush.msra.mxu0 %v10717_v63  ;;  %v8487_v7 = vsel %vm849_vm5, %v8479_v57, %v8480_v29  ;;  %v17890_v57 = vadd.f32 %v17669_v41, %v17685_v14  ;;  %v8376_v63 = vrot.slane %v17875_v1, 6 }
 0x5c9   : > { %v7502_v23 = vpop.f32.mrf.mxu2  ;;  %8835 = vmatpush.msra.mxu3 %v10700_v54  ;;  %v8482_v54 = vrot.slane %v17875_v1, 7 }
 0x5ca   : > { %v17858_v10 = vadd.f32 %v7502_v23, %v17644_v51  ;;  %v7608_v27 = vpop.f32.mrf.mxu3  ;;  %v8145_v51 = vld [vmem:[#allocation2 + $0x150] sm:$0xff]  ;;  %v8381_v23 = vsel %vm685_vm2, %v8373_v11, %v8374_v62  ;;  %8729 = vmatpush.msra.mxu2 %v10684_v53  ;;  %8941 = vmatpush.msra.mxu0 %v10716_v30  ;;  %v8270_v11 = vrot.slane %v17875_v1, 5 }
 0x5cb   : > { %v17863_v59 = vadd.f32 %v7608_v27, %v7412_v52  ;;  %v7399_v4 = vpop.f32.mrf.mxu1  ;;  %v17877_v52 = vpop.f32.mrf.mxu0  ;;  %v8163_v37 = vrot.slane %v8145_v51, 4  ;;  %v8269_v13 = vrot.slane %v8145_v51, 5  ;;  %v10738_v62 = vld [vmem:[%s18568_s4 + $0x1430] sm:$0xff]  ;;  %v8375_v29 = vrot.slane %v8145_v51, 6 }
 0x5cc   : > { %v8481_v53 = vrot.slane %v8145_v51, 7  ;;  %9033 = vmatpush.msrb.mxu1 %v10738_v62  ;;  %v7413_v27 = vadd.f32 %v7399_v4, %v17530_v21  ;;  %v8148_v51 = vld [vmem:[#allocation2 + $0x168] sm:$0xff]  ;;  %v17910_v4 = vld [vmem:[#allocation2 + $0x170] sm:$0xff] }
 0x5cd   : > { %v8168_v41 = vsel %vm618_vm4, %v8163_v37, %v18729_v36  ;;  %v8274_v14 = vsel %vm651_vm3, %v8269_v13, %v8270_v11  ;;  %v8380_v21 = vsel %vm685_vm2, %v8375_v29, %v8376_v63  ;;  %v8165_v62 = vrot.slane %v8148_v51, 4  ;;  %v10737_v29 = vld [vmem:[%s18568_s4 + $0x1428] sm:$0xff] }
 0x5ce   : > { %10617 = vmatmul.msk.f32.gmra.mxu1 %vm387_vm1, %v8169_v44  ;;  %10633 = vmatmul.msk.f32.gmra.mxu2 %vm387_vm1, %v8275_v31  ;;  %v8166_v37 = vrot.slane %v17910_v4, 4  ;;  %v8271_v13 = vrot.slane %v8148_v51, 5  ;;  %v8272_v11 = vrot.slane %v17910_v4, 5  ;;  %v17925_v63 = vadd.f32 %v17722_v35, %v17728_v9 }
 0x5cf   : > { %10649 = vmatmul.msk.f32.gmra.mxu3 %vm387_vm1, %v8381_v23  ;;  %10665 = vmatmul.msk.f32.gmra.mxu0 %vm387_vm1, %v8487_v7 }
 0x5d0   : > { %9034 = vmatpush.msrb.mxu1 %v10737_v29  ;;  %v8167_v35 = vsel %vm618_vm4, %v8165_v62, %v8166_v37  ;;  %v8273_v9 = vsel %vm651_vm3, %v8271_v13, %v8272_v11  ;;  %v8657_v29 = vrot.slane %v17613_v25, 1 }
 0x5d1   : > { %v7505_v30 = vpop.f32.mrf.mxu2 }
 0x5d2   : > { %v17896_v44 = vadd.f32 %v7505_v30, %v17678_v6  ;;  %v7611_v31 = vpop.f32.mrf.mxu3  ;;  %v8486_v6 = vsel %vm849_vm5, %v8481_v53, %v8482_v54  ;;  %v8377_v53 = vrot.slane %v8148_v51, 6  ;;  %v8378_v54 = vrot.slane %v17910_v4, 6 }
 0x5d3   : > { %v17898_v23 = vadd.f32 %v7611_v31, %v7413_v27  ;;  %v7402_v7 = vpop.f32.mrf.mxu1  ;;  %v17914_v27 = vpop.f32.mrf.mxu0  ;;  %v8483_v30 = vrot.slane %v8148_v51, 7  ;;  %v8484_v31 = vrot.slane %v17910_v4, 7 }
 0x5d4   : > { %v8379_v51 = vsel %vm685_vm2, %v8377_v53, %v8378_v54 }
 0x5d6   : > { %10618 = vmatmul.msk.f32.gmra.mxu1 %vm387_vm1, %v8168_v41  ;;  %10634 = vmatmul.msk.f32.gmra.mxu2 %vm387_vm1, %v8274_v14  ;;  %v7414_v41 = vadd.f32 %v7402_v7, %v17579_v24  ;;  %v8485_v24 = vsel %vm849_vm5, %v8483_v30, %v8484_v31  ;;  %v17954_v7 = vadd.f32 %v17801_v18, %v17796_v45  ;;  %v8763_v30 = vrot.slane %v17613_v25, 2 }
 0x5d7   : > { %10650 = vmatmul.msk.f32.gmra.mxu3 %vm387_vm1, %v8380_v21  ;;  %10666 = vmatmul.msk.f32.gmra.mxu0 %vm387_vm1, %v8486_v6  ;;  %v8869_v31 = vrot.slane %v17613_v25, 3  ;;  %v8871_v18 = vrot.slane %v17647_v46, 3 }
 0x5d9   : > { %v7508_v14 = vpop.f32.mrf.mxu2  ;;  %v8892_v45 = vsel %vm1309_vm8, %v8869_v31, %v7925_v8 }
 0x5da   : > { %v17931_v21 = vadd.f32 %v7508_v14, %v17716_v56  ;;  %v7614_v6 = vpop.f32.mrf.mxu3  ;;  %v10736_v56 = vld [vmem:[%s18568_s4 + $0x1420] sm:$0xff] }
 0x5db   : > { %v17933_v36 = vadd.f32 %v7614_v6, %v7414_v41  ;;  %v7405_v12 = vpop.f32.mrf.mxu1  ;;  %9035 = vmatpush.msrb.mxu1 %v10736_v56  ;;  %v7696_v62 = vpop.f32.mrf.mxu0  ;;  %v8678_v56 = vsel %vm1095_vm6, %v8661_v22, %v7717_v17  ;;  %v10733_v17 = vld [vmem:[%s18568_s4 + $0x1408] sm:$0xff]  ;;  %v8773_v22 = vrot.slane %v17815_v33, 2 }
 0x5dc   : > { %v7415_v13 = vadd.f32 %v7405_v12, %v17621_v0  ;;  %v8680_v0 = vsel %vm1095_vm6, %v8657_v29, %v7713_v26  ;;  %v10735_v26 = vld [vmem:[%s18568_s4 + $0x1418] sm:$0xff] }
 0x5dd   : > { %9036 = vmatpush.msrb.mxu1 %v10735_v26 }
 0x5de   : > { %10619 = vmatmul.msk.f32.gmra.mxu1 %vm387_vm1, %v8167_v35  ;;  %10635 = vmatmul.msk.f32.gmra.mxu2 %vm387_vm1, %v8273_v9  ;;  %v8873_v9 = vrot.slane %v17681_v2, 3 }
 0x5df   : > { %10651 = vmatmul.msk.f32.gmra.mxu3 %vm387_vm1, %v8379_v51  ;;  %10667 = vmatmul.msk.f32.gmra.mxu0 %vm387_vm1, %v8485_v24 }
 0x5e1   : > { %v7511_v11 = vpop.f32.mrf.mxu2 }
 0x5e2   : > { %v17959_v53 = vadd.f32 %v7511_v11, %v17793_v16  ;;  %v7617_v54 = vpop.f32.mrf.mxu3  ;;  %v8786_v16 = vsel %vm1202_vm7, %v8763_v30, %v7819_v40  ;;  %v8659_v40 = vrot.slane %v17647_v46, 1  ;;  %v18997_v30 = vrot.slane %v17396_v20, 3 }
 0x5e3   : > { %v17963_v41 = vadd.f32 %v7617_v54, %v7415_v13  ;;  %v17965_v14 = vpop.f32.mrf.mxu1  ;;  %v7699_v8 = vpop.f32.mrf.mxu0 }
 0x5e4   : > { %v8679_v6 = vsel %vm1095_vm6, %v8659_v40, %v7715_v58  ;;  %v10734_v58 = vld [vmem:[%s18568_s4 + $0x1410] sm:$0xff] }
 0x5e5   : > { %9037 = vmatpush.msrb.mxu1 %v10734_v58  ;;  %v8667_v58 = vrot.slane %v17815_v33, 1 }
 0x5e6   : > { %10676 = vmatmul.msk.f32.vlgmr.msra.gmra.mxu1 %vm387_vm1, %v17613_v25  ;;  %10692 = vmatmul.msk.f32.vlgmr.msra.gmra.mxu2 %vm387_vm1, %v8680_v0  ;;  %v17989_v25 = vadd.f32 %v17877_v52, %v17858_v10  ;;  %v8785_v10 = vsel %vm1202_vm7, %v8765_v3, %v7821_v38  ;;  %v8891_v52 = vsel %vm1309_vm8, %v8871_v18, %v7927_v48  ;;  %v8767_v48 = vrot.slane %v17681_v2, 2 }
 0x5e7   : > { %10708 = vmatmul.msk.f32.vlgmr.msra.gmra.mxu3 %vm387_vm1, %v8786_v16  ;;  %10724 = vmatmul.msk.f32.vlgmr.msra.gmra.mxu0 %vm387_vm1, %v8892_v45  ;;  %v18087_v16 = vadd.f32 %v7699_v8, %v17959_v53  ;;  %v8877_v45 = vrot.slane %v17743_v47, 3  ;;  %v18999_v3 = vrot.slane %v17418_v49, 1  ;;  %v19001_v8 = vrot.slane %v17418_v49, 3 }
 0x5e8   : > { %9038 = vmatpush.msrb.mxu1 %v10733_v17 }
 0x5e9   : > { %v18011_v35 = vpop.f32.mrf.mxu2  ;;  %18998 = vst [vmem:[#allocation10_spill] sm:$0xff] %v18087_v16 }
 0x5ea   : > { %v18022_v38 = vpop.f32.mrf.mxu3 }
 0x5eb   : > { %v17994_v12 = vpop.f32.mrf.mxu1  ;;  %v18029_v24 = vpop.f32.mrf.mxu0 }
 0x5ee   : > { %10677 = vmatmul.msk.f32.gmra.mxu1 %vm387_vm1, %v17647_v46  ;;  %10693 = vmatmul.msk.f32.gmra.mxu2 %vm387_vm1, %v8679_v6  ;;  %v18020_v46 = vadd.f32 %v17914_v27, %v17896_v44  ;;  %v8784_v44 = vsel %vm1202_vm7, %v8767_v48, %v7823_v32  ;;  %v8890_v27 = vsel %vm1309_vm8, %v8873_v9, %v7929_v42  ;;  %v8663_v32 = vrot.slane %v17724_v60, 1 }
 0x5ef   : > { %10709 = vmatmul.msk.f32.gmra.mxu3 %vm387_vm1, %v8785_v10  ;;  %10725 = vmatmul.msk.f32.gmra.mxu0 %vm387_vm1, %v8891_v52  ;;  %v8875_v42 = vrot.slane %v17724_v60, 3  ;;  %v19000_v6 = vrot.slane %v17418_v49, 2  ;;  %v8888_v10 = vsel %vm1309_vm8, %v8877_v45, %v19001_v8  ;;  %v8879_v49 = vrot.slane %v17815_v33, 3 }
 0x5f0   : > { %v8677_v54 = vsel %vm1095_vm6, %v8663_v32, %v7719_v19  ;;  %v8665_v19 = vrot.slane %v17743_v47, 1  ;;  %v19004_v32 = vrot.slane %v17508_v50, 3  ;;  %v19006_v45 = vrot.slane %v17555_v5, 2 }
 0x5f1   : > { %v18054_v13 = vpop.f32.mrf.mxu2  ;;  %v8889_v31 = vsel %vm1309_vm8, %v8875_v42, %v18997_v30  ;;  %v8881_v30 = vrot.slane %v17875_v1, 3 }
 0x5f2   : > { %v18059_v11 = vpop.f32.mrf.mxu3  ;;  %v8676_v18 = vsel %vm1095_vm6, %v8665_v19, %v18999_v3  ;;  %v7915_v16 = vadd.f32 %v18054_v13, %v17890_v57  ;;  %v18369_v13 = vld [vmem:[%s18569_s5] ss:$0 sm:$0xff] }
 0x5f3   : > { %v18027_v51 = vpop.f32.mrf.mxu1  ;;  %v18078_v0 = vpop.f32.mrf.mxu0 }
 0x5f6   : > { %10678 = vmatmul.msk.f32.gmra.mxu1 %vm387_vm1, %v17681_v2  ;;  %10694 = vmatmul.msk.f32.gmra.mxu2 %vm387_vm1, %v8678_v56  ;;  %v18052_v2 = vadd.f32 %v7696_v62, %v17931_v21  ;;  %v18996_v21 = vrot.slane %v17396_v20, 2  ;;  %v8771_v20 = vrot.slane %v17743_v47, 2  ;;  %v19002_v56 = vrot.slane %v17508_v50, 1 }
 0x5f7   : > { %10710 = vmatmul.msk.f32.gmra.mxu3 %vm387_vm1, %v8784_v44  ;;  %10726 = vmatmul.msk.f32.gmra.mxu0 %vm387_vm1, %v8890_v27  ;;  %v19003_v27 = vrot.slane %v17508_v50, 2 }
 0x5f8   : > { %v8783_v62 = vsel %vm1202_vm7, %v8769_v61, %v18996_v21  ;;  %v8782_v53 = vsel %vm1202_vm7, %v8771_v20, %v19000_v6  ;;  %v8675_v44 = vsel %vm1095_vm6, %v8667_v58, %v19002_v56  ;;  %v8887_v61 = vsel %vm1309_vm8, %v8879_v49, %v19004_v32 }
 0x5f9   : > { %v18091_v26 = vpop.f32.mrf.mxu2  ;;  %v8781_v17 = vsel %vm1202_vm7, %v8773_v22, %v19003_v27  ;;  %v8669_v21 = vrot.slane %v17875_v1, 1  ;;  %v19007_v6 = vrot.slane %v17555_v5, 3  ;;  %v8777_v22 = vrot.slane %v17910_v4, 2 }
 0x5fa   : > { %v18107_v52 = vpop.f32.mrf.mxu3  ;;  %v8883_v56 = vrot.slane %v17910_v4, 3 }
 0x5fb   : > { %v18061_v29 = vpop.f32.mrf.mxu1  ;;  %v18117_v48 = vpop.f32.mrf.mxu0 }
 0x5fe   : > { %10679 = vmatmul.msk.f32.gmra.mxu1 %vm387_vm1, %v17724_v60  ;;  %10695 = vmatmul.msk.f32.gmra.mxu2 %vm387_vm1, %v8677_v54  ;;  %v10732_v60 = vld [vmem:[%s18568_s4 + $0x1400] sm:$0xff] }
 0x5ff   : > { %10711 = vmatmul.msk.f32.gmra.mxu3 %vm387_vm1, %v8783_v62  ;;  %10727 = vmatmul.msk.f32.gmra.mxu0 %vm387_vm1, %v8889_v31  ;;  %v8775_v62 = vrot.slane %v17875_v1, 2 }
 0x600   : > { %9039 = vmatpush.msrb.mxu1 %v10732_v60  ;;  %v19005_v60 = vrot.slane %v17555_v5, 1 }
 0x601   : > { %v18133_v42 = vpop.f32.mrf.mxu2  ;;  %v8780_v3 = vsel %vm1202_vm7, %v8775_v62, %v19006_v45 }
 0x602   : > { %v8005_v54 = vpop.f32.mrf.mxu3  ;;  %v8674_v20 = vsel %vm1095_vm6, %v8669_v21, %v19005_v60 }
 0x603   : > { %v18093_v40 = vpop.f32.mrf.mxu1  ;;  %v18143_v31 = vpop.f32.mrf.mxu0 }
 0x606   : > { %10680 = vmatmul.msk.f32.gmra.mxu1 %vm387_vm1, %v17743_v47  ;;  %10696 = vmatmul.msk.f32.gmra.mxu2 %vm387_vm1, %v8676_v18  ;;  %v18155_v18 = vld [vmem:[#allocation2 + $0x178] sm:$0xff] }
 0x607   : > { %10712 = vmatmul.msk.f32.gmra.mxu3 %vm387_vm1, %v8782_v53  ;;  %10728 = vmatmul.msk.f32.gmra.mxu0 %vm387_vm1, %v8888_v10  ;;  %v8886_v53 = vsel %vm1309_vm8, %v8881_v30, %v19007_v6  ;;  %v8671_v10 = vrot.slane %v17910_v4, 1  ;;  %v8672_v58 = vrot.slane %v18155_v18, 1  ;;  %v8778_v49 = vrot.slane %v18155_v18, 2 }
 0x608   : > { %v7808_v30 = vadd.f32 %v17965_v14, %v17655_v55 }
 0x609   : > { %v18164_v8 = vpop.f32.mrf.mxu2  ;;  %v8673_v32 = vsel %vm1095_vm6, %v8671_v10, %v8672_v58  ;;  %v7809_v58 = vadd.f32 %v17994_v12, %v17689_v43 }
 0x60a   : > { %v8008_v27 = vpop.f32.mrf.mxu3 }
 0x60b   : > { %v18119_v9 = vpop.f32.mrf.mxu1  ;;  %v18182_v62 = vpop.f32.mrf.mxu0 }
 0x60e   : > { %10681 = vmatmul.msk.f32.gmra.mxu1 %vm387_vm1, %v17815_v33  ;;  %10697 = vmatmul.msk.f32.gmra.mxu2 %vm387_vm1, %v8675_v44  ;;  %v8884_v44 = vrot.slane %v18155_v18, 3 }
 0x60f   : > { %10713 = vmatmul.msk.f32.gmra.mxu3 %vm387_vm1, %v8781_v17  ;;  %10729 = vmatmul.msk.f32.gmra.mxu0 %vm387_vm1, %v8887_v61  ;;  %v8779_v61 = vsel %vm1202_vm7, %v8777_v22, %v8778_v49  ;;  %v8021_v22 = vadd.f32 %v18059_v11, %v7809_v58  ;;  %v19012_v11 = vld [vmem:[#allocation56_spill] sm:$0xff]  ;;  %v19014_v58 = vld [vmem:[#allocation57_spill] sm:$0xff] }
 0x610   : > { %v8885_v21 = vsel %vm1309_vm8, %v8883_v56, %v8884_v44  ;;  %v19009_v56 = vld [vmem:[#allocation55_spill] sm:$0xff]  ;;  %v7810_v44 = vadd.f32 %v18027_v51, %v17732_v34 }
 0x611   : > { %v18191_v60 = vpop.f32.mrf.mxu2 }
 0x612   : > { %v8011_v45 = vpop.f32.mrf.mxu3 }
 0x613   : > { %v18145_v19 = vpop.f32.mrf.mxu1  ;;  %v18198_v10 = vpop.f32.mrf.mxu0 }
 0x616   : > { %10682 = vmatmul.msk.f32.gmra.mxu1 %vm387_vm1, %v17875_v1  ;;  %10698 = vmatmul.msk.f32.gmra.mxu2 %vm387_vm1, %v8674_v20  ;;  %v8020_v20 = vadd.f32 %v18022_v38, %v7808_v30 }
 0x617   : > { %10714 = vmatmul.msk.f32.gmra.mxu3 %vm387_vm1, %v8780_v3  ;;  %10730 = vmatmul.msk.f32.gmra.mxu0 %vm387_vm1, %v8886_v53  ;;  %v19008_v53 = vld [vmem:[#allocation54_spill] sm:$0xff] }
 0x619   : > { %v18203_v49 = vpop.f32.mrf.mxu2 }
 0x61a   : > { %v8014_v38 = vpop.f32.mrf.mxu3 }
 0x61b   : > { %v18174_v17 = vpop.f32.mrf.mxu1 }
 0x61e   : > { %10683 = vmatmul.msk.f32.gmra.mxu1 %vm387_vm1, %v17910_v4  ;;  %10699 = vmatmul.msk.f32.gmra.mxu2 %vm387_vm1, %v8673_v32  ;;  %v18211_v32 = vpop.f32.mrf.mxu0 }
 0x61f   : > { %10715 = vmatmul.msk.f32.gmra.mxu3 %vm387_vm1, %v8779_v61  ;;  %10731 = vmatmul.msk.f32.gmra.mxu0 %vm387_vm1, %v8885_v21  ;;  %19010 = vst [vmem:[#allocation12_spill] sm:$0xff] %v18211_v32  ;;  %v8022_v61 = vadd.f32 %v18107_v52, %v7810_v44 }
 0x621   : > { %v18216_v12 = vpop.f32.mrf.mxu2 }
 0x622   : > { %19011 = vst [vmem:[#allocation4_spill] sm:$0xff] %v18216_v12  ;;  %v8017_v30 = vpop.f32.mrf.mxu3 }
 0x623   : > { %v8225_v3 = vpop.f32.mrf.mxu1 }
 0x624   : > { %v18194_v6 = vadd.f32 %v8225_v3, %v8020_v20  ;;  %v7811_v20 = vadd.f32 %v18061_v29, %v17803_v15  ;;  %v19015_v29 = vrot.slane %v17743_v47, 4  ;;  %v19016_v47 = vrot.slane %v17508_v50, 4 }
 0x626   : > { %10740 = vmatmul.msk.f32.vlgmr.msrb.gmra.mxu1 %vm387_vm1, %v19008_v53  ;;  %v8023_v3 = vadd.f32 %v8005_v54, %v7811_v20  ;;  %v18222_v53 = vpop.f32.mrf.mxu0  ;;  %v7813_v20 = vadd.f32 %v18119_v9, %v17898_v23  ;;  %v7814_v9 = vadd.f32 %v18145_v19, %v17933_v36  ;;  %v8982_v36 = vrot.slane %v18155_v18, 4 }
 0x627   : > { %19013 = vst [vmem:[#allocation17_spill] sm:$0xff] %v18222_v53 }
 0x628   : > { %v8026_v50 = vadd.f32 %v8014_v38, %v7814_v9 }
 0x629   : > { %v18228_v52 = vpop.f32.mrf.mxu2 }
 0x62a   : > { %v18232_v44 = vpop.f32.mrf.mxu3 }
 0x62b   : > { %v8228_v55 = vpop.f32.mrf.mxu1 }
 0x62c   : > { %v18205_v14 = vadd.f32 %v8228_v55, %v8021_v22  ;;  %v10921_v22 = vld [vmem:[#allocation2 + $0x130] sm:$0xff] }
 0x62d   : > { %v8979_v55 = vrot.slane %v10921_v22, 4 }
 0x62e   : > { %10741 = vmatmul.msk.f32.gmra.mxu1 %vm387_vm1, %v19009_v56  ;;  %v7812_v56 = vadd.f32 %v18093_v40, %v17863_v59  ;;  %v8025_v59 = vadd.f32 %v8011_v45, %v7813_v20 }
 0x62f   : > { %v8986_v54 = vsel %vm618_vm4, %v19015_v29, %v8979_v55  ;;  %v9120_v55 = vld [vmem:[%s18571_s7 + $0x38] sm:$0xff] }
 0x630   : > { %9153 = vmatpush.msrb.mxu2 %v9120_v55 }
 0x632   : > { %v18247_v40 = vpop.f32.mrf.mxu3 }
 0x633   : > { %v8231_v21 = vpop.f32.mrf.mxu1 }
 0x634   : > { %v18214_v43 = vadd.f32 %v8231_v21, %v8022_v61  ;;  %v8024_v61 = vadd.f32 %v8008_v27, %v7812_v56  ;;  %v19018_v56 = vrot.slane %v17555_v5, 4  ;;  %v7815_v5 = vadd.f32 %v18174_v17, %v17963_v41 }
 0x636   : > { %10742 = vmatmul.msk.f32.gmra.mxu1 %vm387_vm1, %v19012_v11  ;;  %v18240_v11 = vpop.f32.mrf.mxu0  ;;  %v8027_v19 = vadd.f32 %v8017_v30, %v7815_v5 }
 0x63a   : > { %v18278_v20 = vpop.f32.mrf.mxu3 }
 0x63b   : > { %v8234_v34 = vpop.f32.mrf.mxu1 }
 0x63c   : > { %v18224_v51 = vadd.f32 %v8234_v34, %v8023_v3  ;;  %v18245_v3 = vpop.f32.mrf.mxu2  ;;  %v19017_v34 = vrot.slane %v17815_v33, 4 }
 0x63e   : > { %10743 = vmatmul.msk.f32.gmra.mxu1 %vm387_vm1, %v19014_v58  ;;  %v8985_v58 = vsel %vm618_vm4, %v19017_v34, %v19016_v47  ;;  %v18261_v23 = vpop.f32.mrf.mxu0  ;;  %v9118_v47 = vld [vmem:[%s18571_s7 + $0x28] sm:$0xff] }
 0x642   : > { %v18298_v41 = vpop.f32.mrf.mxu3 }
 0x643   : > { %v8237_v15 = vpop.f32.mrf.mxu1 }
 0x644   : > { %v18238_v21 = vadd.f32 %v8237_v15, %v8024_v61  ;;  %v18265_v45 = vpop.f32.mrf.mxu2  ;;  %v19019_v61 = vrot.slane %v17875_v1, 4 }
 0x646   : > { %10744 = vmatmul.msk.f32.gmra.mxu1 %vm387_vm1, %v8986_v54  ;;  %v8984_v15 = vsel %vm618_vm4, %v19019_v61, %v19018_v56  ;;  %v9119_v54 = vld [vmem:[%s18571_s7 + $0x30] sm:$0xff]  ;;  %v18284_v1 = vpop.f32.mrf.mxu0 }
 0x647   : > { %9154 = vmatpush.msrb.mxu2 %v9119_v54  ;;  %v9115_v56 = vld [vmem:[%s18571_s7 + $0x10] sm:$0xff] }
 0x649   : > { %9155 = vmatpush.msrb.mxu2 %v9118_v47 }
 0x64b   : > { %v8240_v27 = vpop.f32.mrf.mxu1  ;;  %9156 = vmatpush.msrb.mxu2 %v9117_v39 }
 0x64c   : > { %v18255_v22 = vadd.f32 %v8240_v27, %v8025_v59  ;;  %v8983_v59 = vsel %vm618_vm4, %v8166_v37, %v8982_v36  ;;  %v18295_v34 = vpop.f32.mrf.mxu2  ;;  %v18307_v37 = vpop.f32.mrf.mxu3  ;;  %v9114_v36 = vld [vmem:[%s18571_s7 + $0x8] sm:$0xff] }
 0x64e   : > { %10745 = vmatmul.msk.f32.gmra.mxu1 %vm387_vm1, %v8985_v58  ;;  %v18300_v18 = vpop.f32.mrf.mxu0  ;;  %v9116_v58 = vld [vmem:[%s18571_s7 + $0x18] sm:$0xff] }
 0x64f   : > { %9157 = vmatpush.msrb.mxu2 %v9116_v58 }
 0x651   : > { %9158 = vmatpush.msrb.mxu2 %v9115_v56  ;;  %v9113_v56 = vld [vmem:[%s18571_s7] sm:$0xff] }
 0x653   : > { %v8243_v33 = vpop.f32.mrf.mxu1  ;;  %9159 = vmatpush.msrb.mxu2 %v9114_v36 }
 0x654   : > { %v18273_v29 = vadd.f32 %v8243_v33, %v8026_v50  ;;  %v18305_v4 = vpop.f32.mrf.mxu2  ;;  %v18316_v50 = vpop.f32.mrf.mxu3 }
 0x655   : > { %9160 = vmatpush.msrb.mxu2 %v9113_v56  ;;  %v8461_v56 = vadd.f32 %v18232_v44, %v18194_v6 }
 0x656   : > { %19020 = vst [vmem:[#allocation37_spill] sm:$0xff] %v18273_v29  ;;  %10746 = vmatmul.msk.f32.gmra.mxu1 %vm387_vm1, %v8984_v15  ;;  %v18312_v55 = vpop.f32.mrf.mxu0 }
 0x65b   : > { %v8246_v38 = vpop.f32.mrf.mxu1 }
 0x65c   : > { %v18290_v27 = vadd.f32 %v8246_v38, %v8027_v19  ;;  %v18314_v9 = vpop.f32.mrf.mxu2  ;;  %v18332_v5 = vpop.f32.mrf.mxu3 }
 0x65d   : > { %19023 = vst [vmem:[#allocation23_spill] sm:$0xff] %v18332_v5 }
 0x65e   : > { %19021 = vst [vmem:[#allocation21_spill] sm:$0xff] %v18290_v27  ;;  %10747 = vmatmul.msk.f32.gmra.mxu1 %vm387_vm1, %v8983_v59  ;;  %v18323_v61 = vpop.f32.mrf.mxu0 }
 0x663   : > { %v8625_v17 = vpop.f32.mrf.mxu1 }
 0x664   : > { %v18325_v15 = vpop.f32.mrf.mxu2  ;;  %v18340_v47 = vpop.f32.mrf.mxu3 }
 0x665   : > { %19022 = vst [vmem:[#allocation22_spill] sm:$0xff] %v18325_v15 }
 0x666   : > { %v18334_v19 = vpop.f32.mrf.mxu0  ;;  %19026 = vst [vmem:[#allocation13_spill] sm:$0xff] %v18340_v47 }
 0x667   : > { %19024 = vst [vmem:[#allocation24_spill] sm:$0xff] %v18334_v19  ;;  %v7914_v19 = vadd.f32 %v18011_v35, %v17843_v28  ;;  %v8119_v28 = vadd.f32 %v18078_v0, %v7915_v16  ;;  %v8649_v35 = vadd.f32 %v8625_v17, %v8461_v56  ;;  %v8462_v0 = vadd.f32 %v18247_v40, %v18205_v14 }
 0x66b   : > { %v8628_v30 = vpop.f32.mrf.mxu1 }
 0x66c   : > { %v18338_v59 = vpop.f32.mrf.mxu2  ;;  %v8837_v53 = vpop.f32.mrf.mxu3 }
 0x66d   : > { %19025 = vst [vmem:[#allocation11_spill] sm:$0xff] %v18338_v59  ;;  %v8118_v59 = vadd.f32 %v18029_v24, %v7914_v19  ;;  %v8356_v24 = vadd.f32 %v18245_v3, %v8119_v28  ;;  %v8861_v19 = vadd.f32 %v8837_v53, %v8649_v35  ;;  %v18377_v53 = vld [vmem:[%s18570_s6] ss:$0 sm:$0xff] }
 0x66e   : > { %v18342_v39 = vpop.f32.mrf.mxu0 }
 0x66f   : > { %19027 = vst [vmem:[#allocation35_spill] sm:$0xff] %v18342_v39  ;;  %v8355_v39 = vadd.f32 %v18228_v52, %v8118_v59  ;;  %v8568_v16 = vadd.f32 %v18261_v23, %v8356_v24 }
 0x673   : > { %v18318_v33 = vpop.f32.mrf.mxu1 }
 0x674   : > { %v8731_v27 = vpop.f32.mrf.mxu2  ;;  %v8840_v29 = vpop.f32.mrf.mxu3 }
 0x676   : > { %v8943_v5 = vpop.f32.mrf.mxu0 }
 0x67b   : > { %v18327_v54 = vpop.f32.mrf.mxu1 }
 0x67c   : > { %v8734_v47 = vpop.f32.mrf.mxu2  ;;  %v8843_v6 = vpop.f32.mrf.mxu3 }
 0x67e   : > { %v8946_v15 = vpop.f32.mrf.mxu0 }
 0x683   : > { %v18336_v38 = vpop.f32.mrf.mxu1 }
 0x684   : > { %v8737_v52 = vpop.f32.mrf.mxu2 }
 0x68b   : > { %v18344_v58 = vpop.f32.mrf.mxu1 }
 0x68c   : > { %19028 = vst [vmem:[#allocation14_spill] sm:$0xff] %v18344_v58 }
 0x693   : > { %v18349_v36 = vpop.f32.mrf.mxu1 }
 0x694   : > { %19029 = vst [vmem:[#allocation15_spill] sm:$0xff] %v18349_v36  ;;  %v8567_v36 = vadd.f32 %v18240_v11, %v8355_v39  ;;  %v8756_v11 = vadd.f32 %v8734_v47, %v8568_v16 }
 0x696   : > { %v8755_v58 = vadd.f32 %v8731_v27, %v8567_v36  ;;  %v8949_v27 = vpop.f32.mrf.mxu0  ;;  %v8968_v23 = vadd.f32 %v8946_v15, %v8756_v11  ;;  %v8740_v36 = vpop.f32.mrf.mxu2 }
 0x698   : > { %v8967_v32 = vadd.f32 %v8943_v5, %v8755_v58 }
 0x69b   : > { %v18355_v12 = vpop.f32.mrf.mxu1 }
 0x69c   : > { %19030 = vst [vmem:[#allocation36_spill] sm:$0xff] %v18355_v12  ;;  %v7916_v12 = vadd.f32 %v18091_v26, %v17925_v63  ;;  %v8650_v26 = vadd.f32 %v8628_v30, %v8462_v0 }
 0x69e   : > { %v8120_v63 = vadd.f32 %v18117_v48, %v7916_v12  ;;  %v8862_v5 = vadd.f32 %v8840_v29, %v8650_v26  ;;  %v8463_v48 = vadd.f32 %v18278_v20, %v18214_v43  ;;  %v8952_v35 = vpop.f32.mrf.mxu0  ;;  %v7918_v20 = vadd.f32 %v18164_v8, %v17989_v25 }
 0x6a0   : > { %v8357_v17 = vadd.f32 %v18265_v45, %v8120_v63  ;;  %v8846_v45 = vpop.f32.mrf.mxu3  ;;  %v8651_v47 = vadd.f32 %v18318_v33, %v8463_v48 }
 0x6a2   : > { %v8569_v12 = vadd.f32 %v18284_v1, %v8357_v17  ;;  %v8863_v15 = vadd.f32 %v8843_v6, %v8651_v47 }
 0x6a3   : > { %v9041_v59 = vpop.f32.mrf.mxu1 }
 0x6a4   : > { %v9065_v57 = vadd.f32 %v9041_v59, %v8861_v19  ;;  %v8757_v56 = vadd.f32 %v8737_v52, %v8569_v12  ;;  %v8122_v59 = vadd.f32 %v18182_v62, %v7918_v20  ;;  %v8465_v62 = vadd.f32 %v18307_v37, %v18238_v21  ;;  %v19032_v12 = vld [vmem:[#allocation14_spill] sm:$0xff]  ;;  %v19036_v20 = vld [vmem:[#allocation37_spill] sm:$0xff] }
 0x6a5   : > { %v7920_v37 = vadd.f32 %v18203_v49, %v18052_v2  ;;  %v19033_v2 = vld [vmem:[#allocation22_spill] sm:$0xff] }
 0x6a6   : > { %v9073_v44 = vadd.f32 %v9065_v57, %v8967_v32  ;;  %v7917_v32 = vadd.f32 %v18133_v42, %v17954_v7  ;;  %v8969_v1 = vadd.f32 %v8949_v27, %v8757_v56  ;;  %v8359_v8 = vadd.f32 %v18305_v4, %v8122_v59 }
 0x6a7   : > { %v8653_v27 = vadd.f32 %v18336_v38, %v8465_v62  ;;  %v8466_v38 = vadd.f32 %v18316_v50, %v18255_v22  ;;  %v19034_v22 = vld [vmem:[#allocation10_spill] sm:$0xff]  ;;  %v19035_v50 = vld [vmem:[#allocation4_spill] sm:$0xff]  ;;  %v19042_v62 = vld [vmem:[#allocation21_spill] sm:$0xff] }
 0x6a8   : > { %v9085_v3 = vmul.f32 %v18369_v13, %v9073_v44  ;;  %v8121_v29 = vadd.f32 %v18143_v31, %v7917_v32  ;;  %v8464_v31 = vadd.f32 %v18298_v41, %v18224_v51  ;;  %v8849_v25 = vpop.f32.mrf.mxu3  ;;  %v8955_v51 = vpop.f32.mrf.mxu0 }
 0x6aa   : > { %v9097_v14 = vadd.f32 %v18377_v53, %v9085_v3  ;;  %v8358_v42 = vadd.f32 %v18295_v34, %v8121_v29  ;;  %v8743_v34 = vpop.f32.mrf.mxu2  ;;  %v8652_v57 = vadd.f32 %v18327_v54, %v8464_v31  ;;  %v8571_v54 = vadd.f32 %v18312_v55, %v8359_v8  ;;  %v19041_v8 = vld [vmem:[#allocation11_spill] sm:$0xff] }
 0x6ab   : > { %v9044_v40 = vpop.f32.mrf.mxu1 }
 0x6ac   : > { %v9105_v39 = vmax.f32 %v9097_v14, 0.0  ;;  %v9066_v58 = vadd.f32 %v9044_v40, %v8862_v5  ;;  %v8570_v33 = vadd.f32 %v18300_v18, %v8358_v42  ;;  %v8864_v16 = vadd.f32 %v8846_v45, %v8652_v57  ;;  %v19040_v57 = vld [vmem:[#allocation15_spill] sm:$0xff] }
 0x6ad   : > { %v7919_v18 = vadd.f32 %v18191_v60, %v18020_v46  ;;  %v8759_v17 = vadd.f32 %v8743_v34, %v8571_v54  ;;  %v8865_v60 = vadd.f32 %v8849_v25, %v8653_v27  ;;  %v19039_v34 = vld [vmem:[#allocation17_spill] sm:$0xff] }
 0x6ae   : > { %v9074_v30 = vadd.f32 %v9066_v58, %v8968_v23  ;;  %10748 = vmatmul.msk.f32.vlgmr.msrb.gmra.mxu2 %vm387_vm1, %v9105_v39  ;;  %v8758_v6 = vadd.f32 %v8740_v36, %v8570_v33  ;;  %v19043_v54 = vld [vmem:[#allocation13_spill] sm:$0xff] }
 0x6af   : > { %v8123_v4 = vadd.f32 %v18198_v10, %v7919_v18  ;;  %v8971_v55 = vadd.f32 %v8955_v51, %v8759_v17 }
 0x6b0   : > { %v9086_v7 = vmul.f32 %v18369_v13, %v9074_v30  ;;  %v8970_v63 = vadd.f32 %v8952_v35, %v8758_v6  ;;  %v8852_v32 = vpop.f32.mrf.mxu3  ;;  %v8958_v10 = vpop.f32.mrf.mxu0  ;;  %v8654_v30 = vadd.f32 %v19032_v12, %v8466_v38  ;;  %v18457_v12 = vld [vmem:[%s18573_s9] ss:$0 sm:$0xff] }
 0x6b1   : > { %v8360_v46 = vadd.f32 %v18314_v9, %v8123_v4  ;;  %v19031_v9 = vld [vmem:[#allocation12_spill] sm:$0xff]  ;;  %v19044_v4 = vld [vmem:[#allocation35_spill] sm:$0xff] }
 0x6b2   : > { %v9098_v28 = vadd.f32 %v18377_v53, %v9086_v7  ;;  %v8746_v14 = vpop.f32.mrf.mxu2  ;;  %v8124_v48 = vadd.f32 %v19031_v9, %v7920_v37  ;;  %v8866_v47 = vadd.f32 %v8852_v32, %v8654_v30 }
 0x6b3   : > { %v9047_v43 = vpop.f32.mrf.mxu1  ;;  %v8572_v58 = vadd.f32 %v18323_v61, %v8360_v46  ;;  %v7921_v61 = vadd.f32 %v19035_v50, %v19034_v22 }
 0x6b4   : > { %v9106_v24 = vmax.f32 %v9098_v28, 0.0  ;;  %v9067_v19 = vadd.f32 %v9047_v43, %v8863_v15  ;;  %v8361_v49 = vadd.f32 %v19033_v2, %v8124_v48  ;;  %v18452_v48 = vld [vmem:[%s18572_s8] ss:$0 sm:$0xff] }
 0x6b5   : > { %v8760_v45 = vadd.f32 %v8746_v14, %v8572_v58  ;;  %v8125_v59 = vadd.f32 %v19039_v34, %v7921_v61  ;;  %v19045_v14 = vld [vmem:[#allocation36_spill] sm:$0xff]  ;;  %v9226_v34 = vld [vmem:[%s18574_s10 + $0x40] sm:$0xff] }
 0x6b6   : > { %v9075_v52 = vadd.f32 %v9067_v19, %v8969_v1  ;;  %10749 = vmatmul.msk.f32.gmra.mxu2 %vm387_vm1, %v9106_v24  ;;  %v19037_v1 = vld [vmem:[#allocation23_spill] sm:$0xff]  ;;  %v19038_v19 = vld [vmem:[#allocation24_spill] sm:$0xff] }
 0x6b7   : > { %v8972_v15 = vadd.f32 %v8958_v10, %v8760_v45  ;;  %v8467_v24 = vadd.f32 %v19037_v1, %v19036_v20  ;;  %v8573_v31 = vadd.f32 %v19038_v19, %v8361_v49  ;;  %v9230_v20 = vld [vmem:[%s18574_s10 + $0x60] sm:$0xff] }
 0x6b8   : > { %v9087_v0 = vmul.f32 %v18369_v13, %v9075_v52  ;;  %v8855_v43 = vpop.f32.mrf.mxu3  ;;  %v8961_v52 = vpop.f32.mrf.mxu0 }
 0x6b9   : > { %v8655_v6 = vadd.f32 %v19040_v57, %v8467_v24  ;;  %v9231_v24 = vld [vmem:[%s18574_s10 + $0x68] sm:$0xff] }
 0x6ba   : > { %v9099_v44 = vadd.f32 %v18377_v53, %v9087_v0  ;;  %v8749_v7 = vpop.f32.mrf.mxu2 }
 0x6bb   : > { %v9050_v41 = vpop.f32.mrf.mxu1  ;;  %v8761_v0 = vadd.f32 %v8749_v7, %v8573_v31  ;;  %v9228_v31 = vld [vmem:[%s18574_s10 + $0x50] sm:$0xff] }
 0x6bc   : > { %v9107_v26 = vmax.f32 %v9099_v44, 0.0  ;;  %v9068_v11 = vadd.f32 %v9050_v41, %v8864_v16  ;;  %v8362_v16 = vadd.f32 %v19041_v8, %v8125_v59  ;;  %v8867_v44 = vadd.f32 %v8855_v43, %v8655_v6  ;;  %v9233_v43 = vld [vmem:[%s18574_s10 + $0x78] sm:$0xff]  ;;  %v9227_v59 = vld [vmem:[%s18574_s10 + $0x48] sm:$0xff]  ;;  %v9224_v6 = vld [vmem:[%s18574_s10 + $0x30] sm:$0xff] }
 0x6bd   : > { %v8973_v18 = vadd.f32 %v8961_v52, %v8761_v0  ;;  %9339 = vmatpush.msrb.mxu0 %v9233_v43  ;;  %v9225_v0 = vld [vmem:[%s18574_s10 + $0x38] sm:$0xff]  ;;  %v9223_v8 = vld [vmem:[%s18574_s10 + $0x28] sm:$0xff] }
 0x6be   : > { %v9076_v3 = vadd.f32 %v9068_v11, %v8970_v63  ;;  %10750 = vmatmul.msk.f32.gmra.mxu2 %vm387_vm1, %v9107_v26  ;;  %v8574_v27 = vadd.f32 %v19044_v4, %v8362_v16 }
 0x6bf   : > { %9340 = vmatpush.msrb.mxu0 %v9231_v24 }
 0x6c0   : > { %v9088_v5 = vmul.f32 %v18369_v13, %v9076_v3  ;;  %v8468_v3 = vadd.f32 %v19043_v54, %v19042_v62  ;;  %v8964_v32 = vpop.f32.mrf.mxu0 }
 0x6c2   : > { %v9100_v40 = vadd.f32 %v18377_v53, %v9088_v5  ;;  %v8752_v11 = vpop.f32.mrf.mxu2  ;;  %v8858_v5 = vpop.f32.mrf.mxu3  ;;  %v8656_v46 = vadd.f32 %v19045_v14, %v8468_v3 }
 0x6c3   : > { %v9053_v21 = vpop.f32.mrf.mxu1 }
 0x6c4   : > { %v9108_v23 = vmax.f32 %v9100_v40, 0.0  ;;  %v9069_v39 = vadd.f32 %v9053_v21, %v8865_v60  ;;  %v8762_v60 = vadd.f32 %v8752_v11, %v8574_v27  ;;  %v8868_v21 = vadd.f32 %v8858_v5, %v8656_v46 }
 0x6c6   : > { %v9077_v36 = vadd.f32 %v9069_v39, %v8971_v55  ;;  %10751 = vmatmul.msk.f32.gmra.mxu2 %vm387_vm1, %v9108_v23  ;;  %v8974_v23 = vadd.f32 %v8964_v32, %v8762_v60 }
 0x6c8   : > { %v9089_v29 = vmul.f32 %v18369_v13, %v9077_v36 }
 0x6ca   : > { %v9101_v56 = vadd.f32 %v18377_v53, %v9089_v29 }
 0x6cb   : > { %v9056_v42 = vpop.f32.mrf.mxu1 }
 0x6cc   : > { %v9109_v28 = vmax.f32 %v9101_v56, 0.0  ;;  %v9070_v35 = vadd.f32 %v9056_v42, %v8866_v47 }
 0x6ce   : > { %v9078_v33 = vadd.f32 %v9070_v35, %v8972_v15  ;;  %10752 = vmatmul.msk.f32.gmra.mxu2 %vm387_vm1, %v9109_v28  ;;  %v9232_v35 = vld [vmem:[%s18574_s10 + $0x70] sm:$0xff] }
 0x6cf   : > { %9298 = vmatpush.msrb.mxu3 %v9232_v35 }
 0x6d0   : > { %v9090_v25 = vmul.f32 %v18369_v13, %v9078_v33  ;;  %v9229_v33 = vld [vmem:[%s18574_s10 + $0x58] sm:$0xff] }
 0x6d1   : > { %9299 = vmatpush.msrb.mxu3 %v9230_v20  ;;  %9341 = vmatpush.msrb.mxu0 %v9229_v33 }
 0x6d2   : > { %v9102_v51 = vadd.f32 %v18377_v53, %v9090_v25  ;;  %v9222_v25 = vld [vmem:[%s18574_s10 + $0x20] sm:$0xff] }
 0x6d3   : > { %v9059_v41 = vpop.f32.mrf.mxu1  ;;  %9300 = vmatpush.msrb.mxu3 %v9228_v31  ;;  %9342 = vmatpush.msrb.mxu0 %v9227_v59 }
 0x6d4   : > { %v9110_v63 = vmax.f32 %v9102_v51, 0.0  ;;  %v9071_v26 = vadd.f32 %v9059_v41, %v8867_v44  ;;  %v9220_v51 = vld [vmem:[%s18574_s10 + $0x10] sm:$0xff]  ;;  %v9221_v41 = vld [vmem:[%s18574_s10 + $0x18] sm:$0xff] }
 0x6d5   : > { %9301 = vmatpush.msrb.mxu3 %v9226_v34  ;;  %9343 = vmatpush.msrb.mxu0 %v9225_v0 }
 0x6d6   : > { %v9079_v17 = vadd.f32 %v9071_v26, %v8973_v18  ;;  %10753 = vmatmul.msk.f32.gmra.mxu2 %vm387_vm1, %v9110_v63  ;;  %v9218_v63 = vld [vmem:[%s18574_s10] sm:$0xff]  ;;  %v9219_v26 = vld [vmem:[%s18574_s10 + $0x8] sm:$0xff] }
 0x6d7   : > { %9302 = vmatpush.msrb.mxu3 %v9224_v6  ;;  %9344 = vmatpush.msrb.mxu0 %v9223_v8 }
 0x6d8   : > { %v9091_v40 = vmul.f32 %v18369_v13, %v9079_v17 }
 0x6d9   : > { %9303 = vmatpush.msrb.mxu3 %v9222_v25  ;;  %9345 = vmatpush.msrb.mxu0 %v9221_v41 }
 0x6da   : > { %v9103_v37 = vadd.f32 %v18377_v53, %v9091_v40 }
 0x6db   : > { %v9062_v55 = vpop.f32.mrf.mxu1  ;;  %9304 = vmatpush.msrb.mxu3 %v9220_v51  ;;  %9346 = vmatpush.msrb.mxu0 %v9219_v26 }
 0x6dc   : > { %v9111_v39 = vmax.f32 %v9103_v37, 0.0  ;;  %v9072_v10 = vadd.f32 %v9062_v55, %v8868_v21 }
 0x6dd   : > { %9305 = vmatpush.msrb.mxu3 %v9218_v63 }
 0x6de   : > { %v9080_v38 = vadd.f32 %v9072_v10, %v8974_v23  ;;  %10754 = vmatmul.msk.f32.gmra.mxu2 %vm387_vm1, %v9111_v39 }
 0x6e0   : > { %v9092_v58 = vmul.f32 %v18369_v13, %v9080_v38 }
 0x6e2   : > { %v9104_v36 = vadd.f32 %v18377_v53, %v9092_v58 }
 0x6e4   : > { %v9112_v9 = vmax.f32 %v9104_v36, 0.0 }
 0x6e6   : > { %10755 = vmatmul.msk.f32.gmra.mxu2 %vm387_vm1, %v9112_v9 }
 0x731   : > { %v9162_v30 = vpop.f32.mrf.mxu2 }
 0x732   : > { %v9190_v45 = vmul.f32 %v18452_v48, %v9162_v30 }
 0x734   : > { %v9202_v13 = vadd.f32 %v18457_v12, %v9190_v45 }
 0x736   : > { %v9210_v29 = vmax.f32 %v9202_v13, 0.0 }
 0x738   : > { %9234 = vxpose.xlu1.b32.start [1/8] (short) (narrow) %v9210_v29, 64 }
 0x739   : > { %v9165_v53 = vpop.f32.mrf.mxu2 }
 0x73a   : > { %v9191_v2 = vmul.f32 %v18452_v48, %v9165_v53 }
 0x73c   : > { %v9203_v49 = vadd.f32 %v18457_v12, %v9191_v2 }
 0x73e   : > { %v9211_v47 = vmax.f32 %v9203_v49, 0.0 }
 0x740   : > { %9235 = vxpose.xlu1.b32.cont [2/8] (short) (narrow) %v9211_v47, 64 }
 0x741   : > { %v9168_v56 = vpop.f32.mrf.mxu2 }
 0x742   : > { %v9192_v7 = vmul.f32 %v18452_v48, %v9168_v56 }
 0x744   : > { %v9204_v42 = vadd.f32 %v18457_v12, %v9192_v7 }
 0x746   : > { %v9212_v22 = vmax.f32 %v9204_v42, 0.0 }
 0x748   : > { %9236 = vxpose.xlu1.b32.cont [3/8] (short) (narrow) %v9212_v22, 64 }
 0x749   : > { %v9171_v50 = vpop.f32.mrf.mxu2 }
 0x74a   : > { %v9193_v61 = vmul.f32 %v18452_v48, %v9171_v50 }
 0x74c   : > { %v9205_v15 = vadd.f32 %v18457_v12, %v9193_v61 }
 0x74e   : > { %v9213_v28 = vmax.f32 %v9205_v15, 0.0 }
 0x750   : > { %9237 = vxpose.xlu1.b32.cont [4/8] (short) (narrow) %v9213_v28, 64 }
 0x751   : > { %v9174_v1 = vpop.f32.mrf.mxu2 }
 0x752   : > { %v9194_v19 = vmul.f32 %v18452_v48, %v9174_v1 }
 0x754   : > { %v9206_v52 = vadd.f32 %v18457_v12, %v9194_v19 }
 0x756   : > { %v9214_v57 = vmax.f32 %v9206_v52, 0.0 }
 0x758   : > { %9238 = vxpose.xlu1.b32.cont [5/8] (short) (narrow) %v9214_v57, 64 }
 0x759   : > { %v9177_v16 = vpop.f32.mrf.mxu2 }
 0x75a   : > { %v9195_v44 = vmul.f32 %v18452_v48, %v9177_v16 }
 0x75c   : > { %v9207_v18 = vadd.f32 %v18457_v12, %v9195_v44 }
 0x75e   : > { %v9215_v11 = vmax.f32 %v9207_v18, 0.0 }
 0x760   : > { %9239 = vxpose.xlu1.b32.cont [6/8] (short) (narrow) %v9215_v11, 64 }
 0x761   : > { %v9180_v62 = vpop.f32.mrf.mxu2 }
 0x762   : > { %v9196_v54 = vmul.f32 %v18452_v48, %v9180_v62 }
 0x764   : > { %v9208_v3 = vadd.f32 %v18457_v12, %v9196_v54 }
 0x766   : > { %v9216_v4 = vmax.f32 %v9208_v3, 0.0 }
 0x768   : > { %9240 = vxpose.xlu1.b32.cont [7/8] (short) (narrow) %v9216_v4, 64 }
 0x769   : > { %v9183_v27 = vpop.f32.mrf.mxu2 }
 0x76a   : > { %v9197_v17 = vmul.f32 %v18452_v48, %v9183_v27 }
 0x76c   : > { %v9209_v5 = vadd.f32 %v18457_v12, %v9197_v17 }
 0x76e   : > { %v9217_v14 = vmax.f32 %v9209_v5, 0.0 }
 0x770   : > { %9241 = vxpose.xlu1.b32.end [8/8] (short) (narrow) %v9217_v14, 64 }
 0x7dc   : > { %v9250_v46 = vpop.trf.xlu1 }
 0x7dd   : > { %10756 = vmatmul.msk.f32.vlgmr.msrb.gmra.mxu3 %vm387_vm1, %v9250_v46  ;;  %10764 = vmatmul.msk.f32.vlgmr.msrb.gmra.mxu0 %vm387_vm1, %v9250_v46 }
 0x7e4   : > { %v9251_v60 = vpop.trf.xlu1 }
 0x7e5   : > { %10757 = vmatmul.msk.f32.gmra.mxu3 %vm387_vm1, %v9251_v60  ;;  %10765 = vmatmul.msk.f32.gmra.mxu0 %vm387_vm1, %v9251_v60 }
 0x7ec   : > { %v9252_v40 = vpop.trf.xlu1 }
 0x7ed   : > { %10758 = vmatmul.msk.f32.gmra.mxu3 %vm387_vm1, %v9252_v40  ;;  %10766 = vmatmul.msk.f32.gmra.mxu0 %vm387_vm1, %v9252_v40 }
 0x7f4   : > { %v9253_v32 = vpop.trf.xlu1 }
 0x7f5   : > { %10759 = vmatmul.msk.f32.gmra.mxu3 %vm387_vm1, %v9253_v32  ;;  %10767 = vmatmul.msk.f32.gmra.mxu0 %vm387_vm1, %v9253_v32 }
 0x7fc   : > { %v9254_v21 = vpop.trf.xlu1 }
 0x7fd   : > { %10760 = vmatmul.msk.f32.gmra.mxu3 %vm387_vm1, %v9254_v21  ;;  %10768 = vmatmul.msk.f32.gmra.mxu0 %vm387_vm1, %v9254_v21 }
 0x804   : > { %v9255_v37 = vpop.trf.xlu1 }
 0x805   : > { %10761 = vmatmul.msk.f32.gmra.mxu3 %vm387_vm1, %v9255_v37  ;;  %10769 = vmatmul.msk.f32.gmra.mxu0 %vm387_vm1, %v9255_v37 }
 0x80c   : > { %v9256_v55 = vpop.trf.xlu1 }
 0x80d   : > { %10762 = vmatmul.msk.f32.gmra.mxu3 %vm387_vm1, %v9256_v55  ;;  %10770 = vmatmul.msk.f32.gmra.mxu0 %vm387_vm1, %v9256_v55 }
 0x814   : > { %v9257_v23 = vpop.trf.xlu1 }
 0x815   : > { %10763 = vmatmul.msk.f32.gmra.mxu3 %vm387_vm1, %v9257_v23  ;;  %10771 = vmatmul.msk.f32.gmra.mxu0 %vm387_vm1, %v9257_v23 }
 0x85a   : > { %v9348_v39 = vpop.f32.mrf.mxu0 }
 0x85b   : > { %9373 = vst [vmem:[%s18543_s30 + $0x8] sm:$0xff] %v9348_v39 }
 0x860   : > { %v9307_v10 = vpop.f32.mrf.mxu3 }
 0x861   : > { %9372 = vst [vmem:[%s18543_s30] sm:$0xff] %v9307_v10 }
 0x862   : > { %v9351_v38 = vpop.f32.mrf.mxu0 }
 0x863   : > { %9375 = vst [vmem:[%s18543_s30 + $0x18] sm:$0xff] %v9351_v38 }
 0x868   : > { %v9310_v58 = vpop.f32.mrf.mxu3 }
 0x869   : > { %9374 = vst [vmem:[%s18543_s30 + $0x10] sm:$0xff] %v9310_v58 }
 0x86a   : > { %v9354_v36 = vpop.f32.mrf.mxu0 }
 0x86b   : > { %9377 = vst [vmem:[%s18543_s30 + $0x28] sm:$0xff] %v9354_v36 }
 0x870   : > { %v9313_v9 = vpop.f32.mrf.mxu3 }
 0x871   : > { %9376 = vst [vmem:[%s18543_s30 + $0x20] sm:$0xff] %v9313_v9 }
 0x872   : > { %v9357_v48 = vpop.f32.mrf.mxu0 }
 0x873   : > { %9379 = vst [vmem:[%s18543_s30 + $0x38] sm:$0xff] %v9357_v48 }
 0x878   : > { %v9316_v12 = vpop.f32.mrf.mxu3 }
 0x879   : > { %9378 = vst [vmem:[%s18543_s30 + $0x30] sm:$0xff] %v9316_v12 }
 0x87a   : > { %v9360_v30 = vpop.f32.mrf.mxu0 }
 0x87b   : > { %9381 = vst [vmem:[%s18543_s30 + $0x48] sm:$0xff] %v9360_v30 }
 0x880   : > { %v9319_v45 = vpop.f32.mrf.mxu3 }
 0x881   : > { %9380 = vst [vmem:[%s18543_s30 + $0x40] sm:$0xff] %v9319_v45 }
 0x882   : > { %v9363_v13 = vpop.f32.mrf.mxu0 }
 0x883   : > { %9383 = vst [vmem:[%s18543_s30 + $0x58] sm:$0xff] %v9363_v13 }
 0x888   : > { %v9322_v29 = vpop.f32.mrf.mxu3 }
 0x889   : > { %9382 = vst [vmem:[%s18543_s30 + $0x50] sm:$0xff] %v9322_v29 }
 0x88a   : > { %v9366_v53 = vpop.f32.mrf.mxu0 }
 0x88b   : > { %9385 = vst [vmem:[%s18543_s30 + $0x68] sm:$0xff] %v9366_v53 }
 0x890   : > { %v9325_v2 = vpop.f32.mrf.mxu3 }
 0x891   : > { %9384 = vst [vmem:[%s18543_s30 + $0x60] sm:$0xff] %v9325_v2 }
 0x892   : > { %v9369_v49 = vpop.f32.mrf.mxu0 }
 0x893   : > { %9387 = vst [vmem:[%s18543_s30 + $0x78] sm:$0xff] %v9369_v49 }
 0x898   : > { %v9328_v47 = vpop.f32.mrf.mxu3 }
 0x899   : > { %9386 = vst [vmem:[%s18543_s30 + $0x70] sm:$0xff] %v9328_v47 }
 0x89a PF: > { %s21_s17 = sadd.s32 1, %s10928_s17  }
 0x89b   : > { %p18_p4 = scmp.ge.s32.totalorder %s21_s17, 4  }
 0x89d   :  { %20 = sbr.rel (!%p18_p4) target bundleno = 1 (0x1), region = 183 }

</bundles_post_ra>
